<compile_context>
chip_gen: v5e
topology: v5e:2x2
jax: 0.10.0
libtpu: 0.0.40
codegen_flags: <defaults>
</compile_context>

<pallas_src>
from functools import partial

import jax
import jax.numpy as jnp
from jax.experimental import pallas as pl
from jax.experimental.pallas import tpu as pltpu


_VMEM_SPEC = pl.BlockSpec(memory_space=pltpu.MemorySpace.VMEM)


def _round_up(n, m):
    return ((n + m - 1) // m) * m


def _pick_vmem_limit():
    # Generation-aware scoped-VMEM limit: ~96 MiB on v5e/v6e (128 MiB VMEM),
    # ~48 MiB on v7x (64 MiB VMEM).  Guarded so a query failure falls back to
    # the conservative (v7x-sized) limit that the previous version used.
    try:
        cap = int(pltpu.get_tpu_info().vmem_capacity_bytes)
    except Exception:
        cap = 64 * 1024 * 1024
    return min(cap * 3 // 4, 110 * 1024 * 1024)


_VMEM_LIMIT = _pick_vmem_limit()


# ----------------------------------------------------------------------------
# Kernel 1: fused node path
#   encoder -> RBF affinity -> dense GCN -> mlp -> EGAT node-side projections
#   A is written directly in its zero-padded conv-halo layout.
# ----------------------------------------------------------------------------
def _node_kernel(x_ref, ew_ref, eb_ref, gw_ref, gb_ref, mw_ref, mb_ref,
                 wn_ref, ms_ref, md_ref,
                 a_ref, z_ref, sr_ref, sc_ref, *, n, n_pad):
    f32 = jnp.float32
    x = x_ref[...]
    # TODO(synk): encoder is user-supplied in PyTorch; modeled as Linear+ReLU.
    h0 = jnp.maximum(
        jnp.dot(x, ew_ref[...], preferred_element_type=f32) + eb_ref[...], 0.0)

    # A = exp(gamma * cdist(normalize(h0), normalize(h0))^2)
    ssq = jnp.sum(h0 * h0, axis=-1, keepdims=True)
    a = h0 * jax.lax.rsqrt(jnp.maximum(ssq, 1e-24))          # F.normalize(p=2)
    sq = jnp.sum(a * a, axis=-1, keepdims=True)
    g = jax.lax.dot_general(a, a, (((1,), (1,)), ((), ())),
                            preferred_element_type=f32)
    dist = jnp.maximum(sq + jnp.transpose(sq) - 2.0 * g, 0.0)
    n_el = dist.shape[0] * dist.shape[1]
    mean = jnp.sum(dist, axis=(0, 1), keepdims=True) / n_el
    var = jnp.sum((dist - mean) ** 2, axis=(0, 1), keepdims=True) / (n_el - 1)
    gamma = -0.5 * jax.lax.rsqrt(jnp.maximum(var, 1e-24))    # -1/(2*std)
    A = jnp.exp(gamma * dist)

    # Write A directly into its zero-padded (+2 conv halo, rows padded to
    # n_pad) layout so the pair kernel needs no XLA-side jnp.pad of A.
    # TODO(synk): for very large N the N^2 temporaries here (g, dist, A, an)
    # should be split into a stats pass + a row-tiled apply pass (v7x VMEM).
    zc = jnp.zeros((n, 2), f32)
    a_cols = jnp.concatenate([zc, A, zc], axis=1)            # (n, n+4)
    ztop = jnp.zeros((2, n + 4), f32)
    zbot = jnp.zeros((2 + n_pad - n, n + 4), f32)
    a_ref[...] = jnp.concatenate([ztop, a_cols, zbot], axis=0)

    # TODO(synk): GCN_DENSE source not provided; single sym-normalized layer.
    deg = jnp.sum(A, axis=1, keepdims=True)
    dinv = jax.lax.rsqrt(jnp.maximum(deg, 1e-12))
    an = dinv * A * jnp.transpose(dinv)
    h = jnp.dot(an, h0, preferred_element_type=f32)
    h = jnp.maximum(
        jnp.dot(h, gw_ref[...], preferred_element_type=f32) + gb_ref[...], 0.0)
    h1 = jnp.dot(h, mw_ref[...], preferred_element_type=f32) + mb_ref[...]

    # EGAT node-side projections (re-used directly by the fused pair kernel).
    z = jnp.dot(h1, wn_ref[...], preferred_element_type=f32)
    z_ref[...] = z
    sr_ref[...] = jnp.dot(z, ms_ref[...], preferred_element_type=f32)
    sc_ref[...] = jnp.dot(z, md_ref[...], preferred_element_type=f32)


# ----------------------------------------------------------------------------
# Kernel 2: fused pair-matrix + EGAT kernel, gridded over destination-row tiles
#   5x5 conv(A) -> ReLU -> fc -> (+pos) -> {A_pred, link diag, EGAT aggregate}
#   The edge-attention logits never leave VMEM.
# ----------------------------------------------------------------------------
def _pair_egat_kernel(a_ref, cw_ref, cb_ref, fw_ref, fb_ref, hw_ref, hb_ref,
                      posT_ref, z_ref, srow_ref, scolt_ref,
                      pred_ref, link_ref, gnn_ref,
                      *, tile, n, n_pad, heads, head_dim, out_ch, n_ssm,
                      l_lanes):
    f32 = jnp.float32
    i = pl.program_id(0)
    r0 = pl.multiple_of(i * tile, tile)
    d_tot = heads + n_ssm

    # -- 5x5 'same' conv on the VMEM-resident padded A.
    # TODO(synk): ConvNetSSM modeled as Conv2d(1, out_ch, 5, padding=2)+ReLU.
    # The 25-tap im2col slab is replaced by five 5-tap slabs.  The channel
    # mixing stays a batched einsum because Mosaic does not lower the
    # (C, tile, N) -> (C, tile*N) reshape needed for a flat 2-D matmul.
    cw = cw_ref[...]                                          # (out_ch, 25)
    h = None
    for dy in range(5):
        rows = a_ref[pl.ds(r0 + dy, tile), :]                 # (tile, n+4)
        slab = jnp.stack([rows[:, dx:dx + n] for dx in range(5)], axis=1)
        cw_dy = jnp.broadcast_to(cw[:, 5 * dy:5 * dy + 5], (tile, out_ch, 5))
        part = jnp.einsum("tck,tkn->tcn", cw_dy, slab,
                          preferred_element_type=f32)
        h = part if h is None else h + part
    h = jnp.maximum(h + cb_ref[...][None], 0.0)               # (tile, C, n)

    # -- fc (channel mixing); lane dim stays N (dense).
    fw = jnp.broadcast_to(fw_ref[...], (tile, out_ch, out_ch))
    h_fc = jnp.einsum("tdc,tcn->tdn", fw, h,
                      preferred_element_type=f32) + fb_ref[...][None]

    # -- combined [EGAT edge-attention (heads) | final_projection (n_ssm)] head.
    hw = jnp.broadcast_to(hw_ref[...], (tile, d_tot, out_ch))
    out = jnp.einsum("tdc,tcn->tdn", hw, h_fc,
                     preferred_element_type=f32) + hb_ref[...][None]

    # -- positional |i-j| term via a vectorised Hankel construction.
    # Row (r0 + r) needs the window pos_tab[:, n_pad-1-(r0+r) : ... + n].
    # Build every per-row window at once with log2(n_pad) lane-shift + select
    # steps (replaces the old per-row serial fori_loop).
    # TODO(synk): for very large N on v7x, pair this with a column-chunk grid
    # axis so the broadcast table stays within the per-core VMEM budget.
    table = posT_ref[...]                                     # (d_tot, l_lanes)
    pos = jnp.broadcast_to(table[None], (tile, d_tot, l_lanes))
    shift = ((n_pad - 1 - r0)
             - jax.lax.broadcasted_iota(jnp.int32, (tile, 1, 1), 0))
    for b in range((n_pad - 1).bit_length()):
        step = 1 << b
        rolled = jnp.concatenate([pos[:, :, step:], pos[:, :, :step]], axis=2)
        pos = jnp.where((shift & step) != 0, rolled, pos)
    out = out + pos[:, :, :n]

    # -- A_pred: channel-outermost stores (lane- and sublane-dense).
    for c in range(n_ssm):
        pred_ref[c] = out[:, heads + c, :]

    # -- super-diagonal link features A_conv[i, i+1, :] (pos_emb[1] part is
    #    folded into the boundary-head bias by the caller).
    col = jax.lax.broadcasted_iota(jnp.int32, (tile, 1, n), 2)
    row = jax.lax.broadcasted_iota(jnp.int32, (tile, 1, n), 0)
    dmask = (col == row + (r0 + 1)).astype(f32)
    link_ref[...] = jnp.sum(h_fc * dmask, axis=2)             # (tile, out_ch)

    # -- fused EGAT aggregation: edge-attention logits never leave VMEM.
    # TODO(synk): EGAT source not provided; per-head GAT with additive
    # edge-feature attention (leaky_relu(0.2), softmax over sources).
    logits = (out[:, :heads, :]
              + srow_ref[...][:, :, None]
              + scolt_ref[...][None, :, :])                   # (tile, heads, n)
    logits = jnp.where(logits > 0, logits, 0.2 * logits)
    m = jnp.max(logits, axis=2, keepdims=True)
    pexp = jnp.exp(logits - m)
    denom = jnp.sum(pexp, axis=2, keepdims=True)
    alpha = pexp * pl.reciprocal(denom, approx=True)          # softmax
    z = z_ref[...]
    for hh in range(heads):                                   # slice-stores
        gnn_ref[:, hh * head_dim:(hh + 1) * head_dim] = jnp.dot(
            alpha[:, hh, :], z[:, hh * head_dim:(hh + 1) * head_dim],
            preferred_element_type=f32)


# ----------------------------------------------------------------------------
# Kernel 3: fused class / boundary prediction heads.
# ----------------------------------------------------------------------------
def _head_kernel(x_ref, link_ref, wx_ref, cb_ref, wl_ref, bb_ref,
                 class_ref, bound_ref, *, n_sec):
    f32 = jnp.float32
    y = jnp.dot(x_ref[...], wx_ref[...], preferred_element_type=f32)
    class_ref[...] = y[:, :n_sec] + cb_ref[...]
    a_src = y[:, n_sec:n_sec + 1]
    a_dst = y[:, n_sec + 1:n_sec + 2]
    a_dst = jnp.concatenate([a_dst[1:, :], jnp.zeros((1, 1), f32)], axis=0)
    a_link = jnp.dot(link_ref[...], wl_ref[...], preferred_element_type=f32)
    bound_ref[...] = jax.nn.sigmoid(a_src + a_dst + a_link + bb_ref[...])


# ----------------------------------------------------------------------------
# Parameters (synthetic, deterministic) — pre-transposed / pre-fused once.
# ----------------------------------------------------------------------------
def _blockdiag_att(a):
    heads, hd = a.shape
    m = jnp.zeros((heads * hd, heads), dtype=a.dtype)
    for h in range(heads):
        m = m.at[h * hd:(h + 1) * hd, h].set(a[h])
    return m


def init_params(key, in_feat=24, hidden=32, out_ch=16, n_ssm=3, n_sec=7,
                heads=8, max_len=1500):
    std = 0.02
    ks = jax.random.split(key, 16)
    nrm = lambda k, s: jax.random.normal(k, s, dtype=jnp.float32) * std
    head_dim = hidden // heads

    enc_w = nrm(ks[0], (in_feat, hidden))
    gcn_w = nrm(ks[1], (hidden, hidden))
    mlp_w = nrm(ks[2], (hidden, hidden))
    conv_w = nrm(ks[3], (25, out_ch))                 # Conv2d(1,out_ch,5,pad=2)
    pos_emb = nrm(ks[4], (max_len, out_ch))
    fc_w = nrm(ks[5], (out_ch, out_ch))
    proj_w = nrm(ks[6], (out_ch, n_ssm))
    proj_b = jnp.zeros((n_ssm,), jnp.float32)
    egat_wn = nrm(ks[7], (hidden, heads * head_dim))
    egat_msrc = _blockdiag_att(nrm(ks[8], (heads, head_dim)))
    egat_mdst = _blockdiag_att(nrm(ks[9], (heads, head_dim)))
    egat_me = nrm(ks[10], (heads, out_ch))
    bound_w = nrm(ks[11], (hidden * 2 + out_ch, 1))
    class_w = nrm(ks[12], (hidden, n_sec))

    # Fused / transposed forms so kernels do no per-call reshapes or casts.
    w_comb = jnp.concatenate([egat_me.T, proj_w], axis=1)       # (C, heads+n_ssm)
    head_b = jnp.concatenate([jnp.zeros((heads,), jnp.float32), proj_b])
    head2_w = jnp.concatenate(
        [class_w, bound_w[:hidden], bound_w[hidden:2 * hidden]], axis=1)

    return {
        "enc_w": enc_w, "enc_b": jnp.zeros((1, hidden), jnp.float32),
        "gcn_w": gcn_w, "gcn_b": jnp.zeros((1, hidden), jnp.float32),
        "mlp_w": mlp_w, "mlp_b": jnp.zeros((1, hidden), jnp.float32),
        "conv_wt": conv_w.T, "conv_b": jnp.zeros((out_ch, 1), jnp.float32),
        "fc_wt": fc_w.T, "fc_b": jnp.zeros((out_ch, 1), jnp.float32),
        "head_wt": w_comb.T, "head_b": head_b.reshape(-1, 1), "w_comb": w_comb,
        "pos_emb": pos_emb,
        "egat_wn": egat_wn, "egat_msrc": egat_msrc, "egat_mdst": egat_mdst,
        "head2_w": head2_w, "class_b": jnp.zeros((1, n_sec), jnp.float32),
        "bound_w_link": bound_w[2 * hidden:],
        "bound_b": jnp.zeros((1, 1), jnp.float32),
        "heads": heads, "head_dim": head_dim, "out_ch": out_ch,
        "n_ssm": n_ssm, "n_sec": n_sec,
    }


# ----------------------------------------------------------------------------
# Forward pass.
# ----------------------------------------------------------------------------
def link_seg_forward(x, p):
    N = x.shape[0]
    hidden = p["enc_w"].shape[1]
    C, heads, hd = p["out_ch"], p["heads"], p["head_dim"]
    n_ssm, n_sec = p["n_ssm"], p["n_sec"]
    f32 = jnp.float32

    tile = min(128, _round_up(N, 8))
    n_pad = _round_up(N, tile)
    grid = (n_pad // tile,)
    l_lanes = _round_up(N + n_pad - 1, 128)

    def resident(arr):
        # Constant-index full-shape blocks (re-DMA is skipped on revisits).
        # TODO(synk): pl.Buffered(1) would drop the dead second buffer on v7x.
        nd = arr.ndim
        return pl.BlockSpec(arr.shape, lambda i, _nd=nd: (0,) * _nd)

    # ---- node path: one fused whole-array call ------------------------------
    a_pad, z, s_row, s_col = pl.pallas_call(
        partial(_node_kernel, n=N, n_pad=n_pad),
        in_specs=[_VMEM_SPEC] * 10,
        out_specs=(_VMEM_SPEC,) * 4,
        out_shape=(jax.ShapeDtypeStruct((n_pad + 4, N + 4), f32),
                   jax.ShapeDtypeStruct((N, hidden), f32),
                   jax.ShapeDtypeStruct((N, heads), f32),
                   jax.ShapeDtypeStruct((N, heads), f32)),
        compiler_params=pltpu.CompilerParams(vmem_limit_bytes=_VMEM_LIMIT),
    )(x, p["enc_w"], p["enc_b"], p["gcn_w"], p["gcn_b"], p["mlp_w"], p["mlp_b"],
      p["egat_wn"], p["egat_msrc"], p["egat_mdst"])

    # ---- tiny XLA-side prep (O(N * channels) only; no N^2 tensors) ----------
    L = N + n_pad - 1
    pos_comb = jnp.dot(p["pos_emb"][:N], p["w_comb"])            # (N, d_tot)
    refl_idx = jnp.clip(jnp.abs(jnp.arange(L) - (n_pad - 1)), 0, N - 1)
    pos_tab = jnp.pad(jnp.transpose(pos_comb[refl_idx]),
                      ((0, 0), (0, l_lanes - L)))                # (d_tot, l_lanes)
    s_row_pad = jnp.pad(s_row, ((0, n_pad - N), (0, 0)))         # (n_pad, heads)
    s_col_t = jnp.transpose(s_col)                               # (heads, N)

    # ---- fused pair + EGAT kernel (gridded over destination-row tiles) ------
    # TODO(synk): bf16 MXU casts were considered (review item) but kept f32 to
    # preserve the RBF/softmax numerics of the reference forward.
    pred_co, link_raw, x_gnn_pad = pl.pallas_call(
        partial(_pair_egat_kernel, tile=tile, n=N, n_pad=n_pad, heads=heads,
                head_dim=hd, out_ch=C, n_ssm=n_ssm, l_lanes=l_lanes),
        grid=grid,
        in_specs=[resident(a_pad),
                  resident(p["conv_wt"]), resident(p["conv_b"]),
                  resident(p["fc_wt"]), resident(p["fc_b"]),
                  resident(p["head_wt"]), resident(p["head_b"]),
                  resident(pos_tab),
                  resident(z),
                  pl.BlockSpec((tile, heads), lambda i: (i, 0)),
                  resident(s_col_t)],
        out_specs=(pl.BlockSpec((n_ssm, tile, N), lambda i: (0, i, 0)),
                   pl.BlockSpec((tile, C), lambda i: (i, 0)),
                   pl.BlockSpec((tile, hidden), lambda i: (i, 0))),
        out_shape=(jax.ShapeDtypeStruct((n_ssm, n_pad, N), f32),
                   jax.ShapeDtypeStruct((n_pad, C), f32),
                   jax.ShapeDtypeStruct((n_pad, hidden), f32)),
        compiler_params=pltpu.CompilerParams(
            dimension_semantics=("parallel",), vmem_limit_bytes=_VMEM_LIMIT),
    )(a_pad, p["conv_wt"], p["conv_b"], p["fc_wt"], p["fc_b"],
      p["head_wt"], p["head_b"], pos_tab, z, s_row_pad, s_col_t)

    # ---- class / boundary heads (pos_emb[1]·w_link folded into the bias) ----
    bb_eff = p["bound_b"] + jnp.dot(p["pos_emb"][1:2, :], p["bound_w_link"])
    class_pad, bound_pad = pl.pallas_call(
        partial(_head_kernel, n_sec=n_sec),
        in_specs=[_VMEM_SPEC] * 6,
        out_specs=(_VMEM_SPEC, _VMEM_SPEC),
        out_shape=(jax.ShapeDtypeStruct((n_pad, n_sec), f32),
                   jax.ShapeDtypeStruct((n_pad, 1), f32)),
        compiler_params=pltpu.CompilerParams(vmem_limit_bytes=_VMEM_LIMIT),
    )(x_gnn_pad, link_raw, p["head2_w"], p["class_b"],
      p["bound_w_link"], bb_eff)

    x_gnn_final = x_gnn_pad[:N]
    bound_pred = bound_pad[:N - 1, 0]
    class_pred = class_pad[:N]
    # Single transpose at the very end to the required (N, N, n_ssm) layout.
    A_pred = jnp.transpose(pred_co[:, :N, :], (1, 2, 0))
    return x_gnn_final, bound_pred, class_pred, A_pred


if __name__ == "__main__":
    key = jax.random.PRNGKey(0)
    kx, kp = jax.random.split(key)

    N, F_IN = 16, 24                       # N frames, F_IN input features
    x = jax.random.normal(kx, (N, F_IN), dtype=jnp.float32)
    params = init_params(kp, in_feat=F_IN)

    fwd = jax.jit(lambda xx: link_seg_forward(xx, params))
    outs = fwd(x)
    jax.block_until_ready(outs)

    x_gnn_final, bound_pred, class_pred, A_pred = outs
    assert x_gnn_final.shape == (N, 32)
    assert bound_pred.shape == (N - 1,)
    assert class_pred.shape == (N, 7)
    assert A_pred.shape == (N, N, 3)
    assert all(bool(jnp.all(jnp.isfinite(o))) for o in outs)

    print("KERNEL_OK")
</pallas_src>

<mosaic_0001>
module attributes {stable_mosaic.version = 11 : i64} {
  func.func @_node_kernel(%arg0: memref<16x24xf32, #tpu.memory_space<vmem>>, %arg1: memref<24x32xf32, #tpu.memory_space<vmem>>, %arg2: memref<1x32xf32, #tpu.memory_space<vmem>>, %arg3: memref<32x32xf32, #tpu.memory_space<vmem>>, %arg4: memref<1x32xf32, #tpu.memory_space<vmem>>, %arg5: memref<32x32xf32, #tpu.memory_space<vmem>>, %arg6: memref<1x32xf32, #tpu.memory_space<vmem>>, %arg7: memref<32x32xf32, #tpu.memory_space<vmem>>, %arg8: memref<32x8xf32, #tpu.memory_space<vmem>>, %arg9: memref<32x8xf32, #tpu.memory_space<vmem>>, %arg10: memref<20x20xf32, #tpu.memory_space<vmem>>, %arg11: memref<16x32xf32, #tpu.memory_space<vmem>>, %arg12: memref<16x8xf32, #tpu.memory_space<vmem>>, %arg13: memref<16x8xf32, #tpu.memory_space<vmem>>) attributes {dimension_semantics = [], scalar_prefetch = 0 : i64, scratch_operands = 0 : i64, tpu.core_type = #tpu.core_type<tc>} {
    %c0 = arith.constant 0 : index
    %c0_0 = arith.constant 0 : index
    %0 = vector.load %arg0[%c0, %c0_0] : memref<16x24xf32, #tpu.memory_space<vmem>>, vector<16x24xf32>
    %c0_1 = arith.constant 0 : index
    %c0_2 = arith.constant 0 : index
    %1 = vector.load %arg1[%c0_1, %c0_2] : memref<24x32xf32, #tpu.memory_space<vmem>>, vector<24x32xf32>
    %cst = arith.constant dense<0.000000e+00> : vector<16x32xf32>
    %2 = tpu.matmul %0, %1, %cst {dimension_numbers = #tpu.dot_dimension_numbers<[1], [0], [0], [1], [0, 0, 1, 1], [], []>} : vector<16x24xf32>, vector<24x32xf32>, vector<16x32xf32> -> vector<16x32xf32>
    %c0_3 = arith.constant 0 : index
    %c0_4 = arith.constant 0 : index
    %3 = vector.load %arg2[%c0_3, %c0_4] : memref<1x32xf32, #tpu.memory_space<vmem>>, vector<1x32xf32>
    %4 = vector.broadcast %3 : vector<1x32xf32> to vector<16x32xf32>
    %5 = arith.addf %2, %4 : vector<16x32xf32>
    %cst_5 = arith.constant 0.000000e+00 : f32
    %6 = vector.broadcast %cst_5 : f32 to vector<16x32xf32>
    %7 = arith.maximumf %5, %6 : vector<16x32xf32>
    %8 = arith.mulf %7, %7 : vector<16x32xf32>
    %cst_6 = arith.constant dense<0.000000e+00> : vector<16xf32>
    %9 = vector.multi_reduction <add>, %8, %cst_6 [1] : vector<16x32xf32> to vector<16xf32>
    %10 = vector.shape_cast %9 : vector<16xf32> to vector<16x1xf32>
    %cst_7 = arith.constant 1.000000e-24 : f32
    %11 = vector.broadcast %cst_7 : f32 to vector<16x1xf32>
    %12 = arith.maximumf %10, %11 : vector<16x1xf32>
    %13 = math.rsqrt %12 : vector<16x1xf32>
    %14 = vector.broadcast %13 : vector<16x1xf32> to vector<16x32xf32>
    %15 = arith.mulf %7, %14 : vector<16x32xf32>
    %16 = arith.mulf %15, %15 : vector<16x32xf32>
    %cst_8 = arith.constant dense<0.000000e+00> : vector<16xf32>
    %17 = vector.multi_reduction <add>, %16, %cst_8 [1] : vector<16x32xf32> to vector<16xf32>
    %18 = vector.shape_cast %17 : vector<16xf32> to vector<16x1xf32>
    %cst_9 = arith.constant dense<0.000000e+00> : vector<16x16xf32>
    %19 = tpu.matmul %15, %15, %cst_9 {dimension_numbers = #tpu.dot_dimension_numbers<[1], [1], [0], [0], [0, 0, 1, 0], [], []>} : vector<16x32xf32>, vector<16x32xf32>, vector<16x16xf32> -> vector<16x16xf32>
    %20 = tpu.transpose %18, [1, 0] : vector<16x1xf32> -> vector<1x16xf32>
    %21 = vector.broadcast %18 : vector<16x1xf32> to vector<16x16xf32>
    %22 = vector.broadcast %20 : vector<1x16xf32> to vector<16x16xf32>
    %23 = arith.addf %21, %22 : vector<16x16xf32>
    %cst_10 = arith.constant 2.000000e+00 : f32
    %24 = vector.broadcast %cst_10 : f32 to vector<16x16xf32>
    %25 = arith.mulf %24, %19 : vector<16x16xf32>
    %26 = arith.subf %23, %25 : vector<16x16xf32>
    %cst_11 = arith.constant 0.000000e+00 : f32
    %27 = vector.broadcast %cst_11 : f32 to vector<16x16xf32>
    %28 = arith.maximumf %26, %27 : vector<16x16xf32>
    %29 = vector.shape_cast %28 : vector<16x16xf32> to vector<1x16x16xf32>
    %cst_12 = arith.constant dense<0.000000e+00> : vector<1xf32>
    %30 = vector.multi_reduction <add>, %29, %cst_12 [1, 2] : vector<1x16x16xf32> to vector<1xf32>
    %31 = vector.shape_cast %30 : vector<1xf32> to vector<1x1x1xf32>
    %32 = vector.extract %31[0, 0, 0] : f32 from vector<1x1x1xf32>
    %33 = vector.broadcast %32 : f32 to vector<1x1xf32>
    %cst_13 = arith.constant 2.560000e+02 : f32
    %34 = vector.broadcast %cst_13 : f32 to vector<1x1xf32>
    %35 = arith.divf %33, %34 : vector<1x1xf32>
    %36 = vector.broadcast %35 : vector<1x1xf32> to vector<16x16xf32>
    %37 = arith.subf %28, %36 : vector<16x16xf32>
    %38 = arith.mulf %37, %37 : vector<16x16xf32>
    %39 = vector.shape_cast %38 : vector<16x16xf32> to vector<1x16x16xf32>
    %cst_14 = arith.constant dense<0.000000e+00> : vector<1xf32>
    %40 = vector.multi_reduction <add>, %39, %cst_14 [1, 2] : vector<1x16x16xf32> to vector<1xf32>
    %41 = vector.shape_cast %40 : vector<1xf32> to vector<1x1x1xf32>
    %42 = vector.extract %41[0, 0, 0] : f32 from vector<1x1x1xf32>
    %43 = vector.broadcast %42 : f32 to vector<1x1xf32>
    %cst_15 = arith.constant 2.550000e+02 : f32
    %44 = vector.broadcast %cst_15 : f32 to vector<1x1xf32>
    %45 = arith.divf %43, %44 : vector<1x1xf32>
    %cst_16 = arith.constant 1.000000e-24 : f32
    %46 = vector.broadcast %cst_16 : f32 to vector<1x1xf32>
    %47 = arith.maximumf %45, %46 : vector<1x1xf32>
    %48 = math.rsqrt %47 : vector<1x1xf32>
    %cst_17 = arith.constant -5.000000e-01 : f32
    %49 = vector.broadcast %cst_17 : f32 to vector<1x1xf32>
    %50 = arith.mulf %49, %48 : vector<1x1xf32>
    %51 = vector.broadcast %50 : vector<1x1xf32> to vector<16x16xf32>
    %52 = arith.mulf %51, %28 : vector<16x16xf32>
    %53 = math.exp %52 : vector<16x16xf32>
    %cst_18 = arith.constant 0.000000e+00 : f32
    %54 = vector.broadcast %cst_18 : f32 to vector<16x2xf32>
    %55 = tpu.concatenate %54, %53, %54 in 1 : vector<16x2xf32>, vector<16x16xf32>, vector<16x2xf32> -> vector<16x20xf32>
    %cst_19 = arith.constant 0.000000e+00 : f32
    %56 = vector.broadcast %cst_19 : f32 to vector<2x20xf32>
    %cst_20 = arith.constant 0.000000e+00 : f32
    %57 = vector.broadcast %cst_20 : f32 to vector<2x20xf32>
    %58 = tpu.concatenate %56, %55, %57 in 0 : vector<2x20xf32>, vector<16x20xf32>, vector<2x20xf32> -> vector<20x20xf32>
    %c0_21 = arith.constant 0 : index
    %c0_22 = arith.constant 0 : index
    %59 = vector.load %arg10[%c0_21, %c0_22] : memref<20x20xf32, #tpu.memory_space<vmem>>, vector<20x20xf32>
    tpu.vector_store %arg10[%c0_21, %c0_22], %58 {strides = array<i32>} : memref<20x20xf32, #tpu.memory_space<vmem>>, vector<20x20xf32>,
    %cst_23 = arith.constant dense<0.000000e+00> : vector<16xf32>
    %60 = vector.multi_reduction <add>, %53, %cst_23 [1] : vector<16x16xf32> to vector<16xf32>
    %61 = vector.shape_cast %60 : vector<16xf32> to vector<16x1xf32>
    %cst_24 = arith.constant 9.99999996E-13 : f32
    %62 = vector.broadcast %cst_24 : f32 to vector<16x1xf32>
    %63 = arith.maximumf %61, %62 : vector<16x1xf32>
    %64 = math.rsqrt %63 : vector<16x1xf32>
    %65 = vector.broadcast %64 : vector<16x1xf32> to vector<16x16xf32>
    %66 = arith.mulf %65, %53 : vector<16x16xf32>
    %67 = tpu.transpose %64, [1, 0] : vector<16x1xf32> -> vector<1x16xf32>
    %68 = vector.broadcast %67 : vector<1x16xf32> to vector<16x16xf32>
    %69 = arith.mulf %66, %68 : vector<16x16xf32>
    %cst_25 = arith.constant dense<0.000000e+00> : vector<16x32xf32>
    %70 = tpu.matmul %69, %7, %cst_25 {dimension_numbers = #tpu.dot_dimension_numbers<[1], [0], [0], [1], [0, 0, 1, 1], [], []>} : vector<16x16xf32>, vector<16x32xf32>, vector<16x32xf32> -> vector<16x32xf32>
    %c0_26 = arith.constant 0 : index
    %c0_27 = arith.constant 0 : index
    %71 = vector.load %arg3[%c0_26, %c0_27] : memref<32x32xf32, #tpu.memory_space<vmem>>, vector<32x32xf32>
    %cst_28 = arith.constant dense<0.000000e+00> : vector<16x32xf32>
    %72 = tpu.matmul %70, %71, %cst_28 {dimension_numbers = #tpu.dot_dimension_numbers<[1], [0], [0], [1], [0, 0, 1, 1], [], []>} : vector<16x32xf32>, vector<32x32xf32>, vector<16x32xf32> -> vector<16x32xf32>
    %c0_29 = arith.constant 0 : index
    %c0_30 = arith.constant 0 : index
    %73 = vector.load %arg4[%c0_29, %c0_30] : memref<1x32xf32, #tpu.memory_space<vmem>>, vector<1x32xf32>
    %74 = vector.broadcast %73 : vector<1x32xf32> to vector<16x32xf32>
    %75 = arith.addf %72, %74 : vector<16x32xf32>
    %cst_31 = arith.constant 0.000000e+00 : f32
    %76 = vector.broadcast %cst_31 : f32 to vector<16x32xf32>
    %77 = arith.maximumf %75, %76 : vector<16x32xf32>
    %c0_32 = arith.constant 0 : index
    %c0_33 = arith.constant 0 : index
    %78 = vector.load %arg5[%c0_32, %c0_33] : memref<32x32xf32, #tpu.memory_space<vmem>>, vector<32x32xf32>
    %cst_34 = arith.constant dense<0.000000e+00> : vector<16x32xf32>
    %79 = tpu.matmul %77, %78, %cst_34 {dimension_numbers = #tpu.dot_dimension_numbers<[1], [0], [0], [1], [0, 0, 1, 1], [], []>} : vector<16x32xf32>, vector<32x32xf32>, vector<16x32xf32> -> vector<16x32xf32>
    %c0_35 = arith.constant 0 : index
    %c0_36 = arith.constant 0 : index
    %80 = vector.load %arg6[%c0_35, %c0_36] : memref<1x32xf32, #tpu.memory_space<vmem>>, vector<1x32xf32>
    %81 = vector.broadcast %80 : vector<1x32xf32> to vector<16x32xf32>
    %82 = arith.addf %79, %81 : vector<16x32xf32>
    %c0_37 = arith.constant 0 : index
    %c0_38 = arith.constant 0 : index
    %83 = vector.load %arg7[%c0_37, %c0_38] : memref<32x32xf32, #tpu.memory_space<vmem>>, vector<32x32xf32>
    %cst_39 = arith.constant dense<0.000000e+00> : vector<16x32xf32>
    %84 = tpu.matmul %82, %83, %cst_39 {dimension_numbers = #tpu.dot_dimension_numbers<[1], [0], [0], [1], [0, 0, 1, 1], [], []>} : vector<16x32xf32>, vector<32x32xf32>, vector<16x32xf32> -> vector<16x32xf32>
    %c0_40 = arith.constant 0 : index
    %c0_41 = arith.constant 0 : index
    %85 = vector.load %arg11[%c0_40, %c0_41] : memref<16x32xf32, #tpu.memory_space<vmem>>, vector<16x32xf32>
    tpu.vector_store %arg11[%c0_40, %c0_41], %84 {strides = array<i32>} : memref<16x32xf32, #tpu.memory_space<vmem>>, vector<16x32xf32>,
    %c0_42 = arith.constant 0 : index
    %c0_43 = arith.constant 0 : index
    %86 = vector.load %arg8[%c0_42, %c0_43] : memref<32x8xf32, #tpu.memory_space<vmem>>, vector<32x8xf32>
    %cst_44 = arith.constant dense<0.000000e+00> : vector<16x8xf32>
    %87 = tpu.matmul %84, %86, %cst_44 {dimension_numbers = #tpu.dot_dimension_numbers<[1], [0], [0], [1], [0, 0, 1, 1], [], []>} : vector<16x32xf32>, vector<32x8xf32>, vector<16x8xf32> -> vector<16x8xf32>
    %c0_45 = arith.constant 0 : index
    %c0_46 = arith.constant 0 : index
    %88 = vector.load %arg12[%c0_45, %c0_46] : memref<16x8xf32, #tpu.memory_space<vmem>>, vector<16x8xf32>
    tpu.vector_store %arg12[%c0_45, %c0_46], %87 {strides = array<i32>} : memref<16x8xf32, #tpu.memory_space<vmem>>, vector<16x8xf32>,
    %c0_47 = arith.constant 0 : index
    %c0_48 = arith.constant 0 : index
    %89 = vector.load %arg9[%c0_47, %c0_48] : memref<32x8xf32, #tpu.memory_space<vmem>>, vector<32x8xf32>
    %cst_49 = arith.constant dense<0.000000e+00> : vector<16x8xf32>
    %90 = tpu.matmul %84, %89, %cst_49 {dimension_numbers = #tpu.dot_dimension_numbers<[1], [0], [0], [1], [0, 0, 1, 1], [], []>} : vector<16x32xf32>, vector<32x8xf32>, vector<16x8xf32> -> vector<16x8xf32>
    %c0_50 = arith.constant 0 : index
    %c0_51 = arith.constant 0 : index
    %91 = vector.load %arg13[%c0_50, %c0_51] : memref<16x8xf32, #tpu.memory_space<vmem>>, vector<16x8xf32>
    tpu.vector_store %arg13[%c0_50, %c0_51], %90 {strides = array<i32>} : memref<16x8xf32, #tpu.memory_space<vmem>>, vector<16x8xf32>,
    return
  }
}

module attributes {stable_mosaic.version = 11 : i64} {
  func.func @_head_kernel(%arg0: memref<16x32xf32, #tpu.memory_space<vmem>>, %arg1: memref<16x16xf32, #tpu.memory_space<vmem>>, %arg2: memref<32x9xf32, #tpu.memory_space<vmem>>, %arg3: memref<1x7xf32, #tpu.memory_space<vmem>>, %arg4: memref<16x1xf32, #tpu.memory_space<vmem>>, %arg5: memref<1x1xf32, #tpu.memory_space<vmem>>, %arg6: memref<16x7xf32, #tpu.memory_space<vmem>>, %arg7: memref<16x1xf32, #tpu.memory_space<vmem>>) attributes {dimension_semantics = [], scalar_prefetch = 0 : i64, scratch_operands = 0 : i64, tpu.core_type = #tpu.core_type<tc>} {
    %c0 = arith.constant 0 : index
    %c0_0 = arith.constant 0 : index
    %0 = vector.load %arg0[%c0, %c0_0] : memref<16x32xf32, #tpu.memory_space<vmem>>, vector<16x32xf32>
    %c0_1 = arith.constant 0 : index
    %c0_2 = arith.constant 0 : index
    %1 = vector.load %arg2[%c0_1, %c0_2] : memref<32x9xf32, #tpu.memory_space<vmem>>, vector<32x9xf32>
    %cst = arith.constant dense<0.000000e+00> : vector<16x9xf32>
    %2 = tpu.matmul %0, %1, %cst {dimension_numbers = #tpu.dot_dimension_numbers<[1], [0], [0], [1], [0, 0, 1, 1], [], []>} : vector<16x32xf32>, vector<32x9xf32>, vector<16x9xf32> -> vector<16x9xf32>
    %3 = vector.extract_strided_slice %2 {offsets = [0, 0], sizes = [16, 7], strides = [1, 1]} : vector<16x9xf32> to vector<16x7xf32>
    %c0_3 = arith.constant 0 : index
    %c0_4 = arith.constant 0 : index
    %4 = vector.load %arg3[%c0_3, %c0_4] : memref<1x7xf32, #tpu.memory_space<vmem>>, vector<1x7xf32>
    %5 = vector.broadcast %4 : vector<1x7xf32> to vector<16x7xf32>
    %6 = arith.addf %3, %5 : vector<16x7xf32>
    %c0_5 = arith.constant 0 : index
    %c0_6 = arith.constant 0 : index
    %7 = vector.load %arg6[%c0_5, %c0_6] : memref<16x7xf32, #tpu.memory_space<vmem>>, vector<16x7xf32>
    tpu.vector_store %arg6[%c0_5, %c0_6], %6 {strides = array<i32>} : memref<16x7xf32, #tpu.memory_space<vmem>>, vector<16x7xf32>,
    %8 = vector.extract_strided_slice %2 {offsets = [0, 7], sizes = [16, 1], strides = [1, 1]} : vector<16x9xf32> to vector<16x1xf32>
    %9 = vector.extract_strided_slice %2 {offsets = [0, 8], sizes = [16, 1], strides = [1, 1]} : vector<16x9xf32> to vector<16x1xf32>
    %10 = vector.extract_strided_slice %9 {offsets = [1, 0], sizes = [15, 1], strides = [1, 1]} : vector<16x1xf32> to vector<15x1xf32>
    %cst_7 = arith.constant 0.000000e+00 : f32
    %11 = vector.broadcast %cst_7 : f32 to vector<1x1xf32>
    %12 = tpu.concatenate %10, %11 in 0 : vector<15x1xf32>, vector<1x1xf32> -> vector<16x1xf32>
    %c0_8 = arith.constant 0 : index
    %c0_9 = arith.constant 0 : index
    %13 = vector.load %arg1[%c0_8, %c0_9] : memref<16x16xf32, #tpu.memory_space<vmem>>, vector<16x16xf32>
    %c0_10 = arith.constant 0 : index
    %c0_11 = arith.constant 0 : index
    %14 = vector.load %arg4[%c0_10, %c0_11] : memref<16x1xf32, #tpu.memory_space<vmem>>, vector<16x1xf32>
    %cst_12 = arith.constant dense<0.000000e+00> : vector<16x1xf32>
    %15 = tpu.matmul %13, %14, %cst_12 {dimension_numbers = #tpu.dot_dimension_numbers<[1], [0], [0], [1], [0, 0, 1, 1], [], []>} : vector<16x16xf32>, vector<16x1xf32>, vector<16x1xf32> -> vector<16x1xf32>
    %16 = arith.addf %8, %12 : vector<16x1xf32>
    %17 = arith.addf %16, %15 : vector<16x1xf32>
    %c0_13 = arith.constant 0 : index
    %c0_14 = arith.constant 0 : index
    %18 = vector.load %arg5[%c0_13, %c0_14] : memref<1x1xf32, #tpu.memory_space<vmem>>, vector<1x1xf32>
    %19 = vector.broadcast %18 : vector<1x1xf32> to vector<16x1xf32>
    %20 = arith.addf %17, %19 : vector<16x1xf32>
    %21 = arith.negf %20 : vector<16x1xf32>
    %22 = math.exp %21 : vector<16x1xf32>
    %cst_15 = arith.constant 1.000000e+00 : f32
    %23 = vector.broadcast %cst_15 : f32 to vector<16x1xf32>
    %24 = arith.addf %23, %22 : vector<16x1xf32>
    %25 = arith.divf %23, %24 : vector<16x1xf32>
    %c0_16 = arith.constant 0 : index
    %c0_17 = arith.constant 0 : index
    %26 = vector.load %arg7[%c0_16, %c0_17] : memref<16x1xf32, #tpu.memory_space<vmem>>, vector<16x1xf32>
    tpu.vector_store %arg7[%c0_16, %c0_17], %25 {strides = array<i32>} : memref<16x1xf32, #tpu.memory_space<vmem>>, vector<16x1xf32>,
    return
  }
}

module attributes {stable_mosaic.version = 11 : i64} {
  func.func @_pair_egat_kernel(%arg0: i32, %arg1: memref<20x20xf32, #tpu.memory_space<vmem>>, %arg2: memref<16x25xf32, #tpu.memory_space<vmem>>, %arg3: memref<16x1xf32, #tpu.memory_space<vmem>>, %arg4: memref<16x16xf32, #tpu.memory_space<vmem>>, %arg5: memref<16x1xf32, #tpu.memory_space<vmem>>, %arg6: memref<11x16xf32, #tpu.memory_space<vmem>>, %arg7: memref<11x1xf32, #tpu.memory_space<vmem>>, %arg8: memref<11x128xf32, #tpu.memory_space<vmem>>, %arg9: memref<16x32xf32, #tpu.memory_space<vmem>>, %arg10: memref<16x8xf32, #tpu.memory_space<vmem>>, %arg11: memref<8x16xf32, #tpu.memory_space<vmem>>, %arg12: memref<3x16x16xf32, #tpu.memory_space<vmem>>, %arg13: memref<16x16xf32, #tpu.memory_space<vmem>>, %arg14: memref<16x32xf32, #tpu.memory_space<vmem>>) attributes {dimension_semantics = [#tpu.dimension_semantics<parallel>], iteration_bounds = array<i64: 1>, scalar_prefetch = 0 : i64, scratch_operands = 0 : i64, tpu.core_type = #tpu.core_type<tc>, window_params = [{pipeline_mode = #tpu.pipeline_mode<synchronous>, transform_indices = @transform_0, window_bounds = array<i64: 20, 20>}, {pipeline_mode = #tpu.pipeline_mode<synchronous>, transform_indices = @transform_1, window_bounds = array<i64: 16, 25>}, {pipeline_mode = #tpu.pipeline_mode<synchronous>, transform_indices = @transform_2, window_bounds = array<i64: 16, 1>}, {pipeline_mode = #tpu.pipeline_mode<synchronous>, transform_indices = @transform_3, window_bounds = array<i64: 16, 16>}, {pipeline_mode = #tpu.pipeline_mode<synchronous>, transform_indices = @transform_4, window_bounds = array<i64: 16, 1>}, {pipeline_mode = #tpu.pipeline_mode<synchronous>, transform_indices = @transform_5, window_bounds = array<i64: 11, 16>}, {pipeline_mode = #tpu.pipeline_mode<synchronous>, transform_indices = @transform_6, window_bounds = array<i64: 11, 1>}, {pipeline_mode = #tpu.pipeline_mode<synchronous>, transform_indices = @transform_7, window_bounds = array<i64: 11, 128>}, {pipeline_mode = #tpu.pipeline_mode<synchronous>, transform_indices = @transform_8, window_bounds = array<i64: 16, 32>}, {transform_indices = @transform_9, window_bounds = array<i64: 16, 8>}, {pipeline_mode = #tpu.pipeline_mode<synchronous>, transform_indices = @transform_10, window_bounds = array<i64: 8, 16>}, {transform_indices = @transform_11, window_bounds = array<i64: 3, 16, 16>}, {transform_indices = @transform_12, window_bounds = array<i64: 16, 16>}, {transform_indices = @transform_13, window_bounds = array<i64: 16, 32>}]} {
    %c16_i32 = arith.constant 16 : i32
    %0 = arith.muli %arg0, %c16_i32 : i32
    %1 = tpu.assume_multiple %0, 16 : i32
    %c0 = arith.constant 0 : index
    %c0_0 = arith.constant 0 : index
    %2 = vector.load %arg2[%c0, %c0_0] : memref<16x25xf32, #tpu.memory_space<vmem>>, vector<16x25xf32>
    %c0_i32 = arith.constant 0 : i32
    %3 = arith.addi %1, %c0_i32 : i32
    %4 = arith.index_cast %3 : i32 to index
    %c0_1 = arith.constant 0 : index
    %5 = vector.load %arg1[%4, %c0_1] : memref<20x20xf32, #tpu.memory_space<vmem>>, vector<16x20xf32>
    %6 = vector.extract_strided_slice %5 {offsets = [0, 0], sizes = [16, 16], strides = [1, 1]} : vector<16x20xf32> to vector<16x16xf32>
    %7 = vector.extract_strided_slice %5 {offsets = [0, 1], sizes = [16, 16], strides = [1, 1]} : vector<16x20xf32> to vector<16x16xf32>
    %8 = vector.extract_strided_slice %5 {offsets = [0, 2], sizes = [16, 16], strides = [1, 1]} : vector<16x20xf32> to vector<16x16xf32>
    %9 = vector.extract_strided_slice %5 {offsets = [0, 3], sizes = [16, 16], strides = [1, 1]} : vector<16x20xf32> to vector<16x16xf32>
    %10 = vector.extract_strided_slice %5 {offsets = [0, 4], sizes = [16, 16], strides = [1, 1]} : vector<16x20xf32> to vector<16x16xf32>
    %11 = vector.shape_cast %6 : vector<16x16xf32> to vector<16x1x16xf32>
    %12 = vector.shape_cast %7 : vector<16x16xf32> to vector<16x1x16xf32>
    %13 = vector.shape_cast %8 : vector<16x16xf32> to vector<16x1x16xf32>
    %14 = vector.shape_cast %9 : vector<16x16xf32> to vector<16x1x16xf32>
    %15 = vector.shape_cast %10 : vector<16x16xf32> to vector<16x1x16xf32>
    %16 = tpu.concatenate %11, %12, %13, %14, %15 in 1 : vector<16x1x16xf32>, vector<16x1x16xf32>, vector<16x1x16xf32>, vector<16x1x16xf32>, vector<16x1x16xf32> -> vector<16x5x16xf32>
    %17 = vector.extract_strided_slice %2 {offsets = [0, 0], sizes = [16, 5], strides = [1, 1]} : vector<16x25xf32> to vector<16x5xf32>
    %18 = vector.shape_cast %17 : vector<16x5xf32> to vector<1x16x5xf32>
    %19 = vector.broadcast %18 : vector<1x16x5xf32> to vector<16x16x5xf32>
    "tpu.trace_start"() <{level = 10 : i32, message = "tck,tkn->tcn"}> : () -> ()
    %cst = arith.constant dense<0.000000e+00> : vector<16x16x16xf32>
    %20 = tpu.matmul %19, %16, %cst {dimension_numbers = #tpu.dot_dimension_numbers<[2], [1], [1], [2], [0, 0, 0, 1, 1, 2], [0], [0]>} : vector<16x16x5xf32>, vector<16x5x16xf32>, vector<16x16x16xf32> -> vector<16x16x16xf32>
    "tpu.trace_stop"() : () -> ()
    %c1_i32 = arith.constant 1 : i32
    %21 = arith.addi %1, %c1_i32 : i32
    %22 = arith.index_cast %21 : i32 to index
    %c0_2 = arith.constant 0 : index
    %23 = vector.load %arg1[%22, %c0_2] : memref<20x20xf32, #tpu.memory_space<vmem>>, vector<16x20xf32>
    %24 = vector.extract_strided_slice %23 {offsets = [0, 0], sizes = [16, 16], strides = [1, 1]} : vector<16x20xf32> to vector<16x16xf32>
    %25 = vector.extract_strided_slice %23 {offsets = [0, 1], sizes = [16, 16], strides = [1, 1]} : vector<16x20xf32> to vector<16x16xf32>
    %26 = vector.extract_strided_slice %23 {offsets = [0, 2], sizes = [16, 16], strides = [1, 1]} : vector<16x20xf32> to vector<16x16xf32>
    %27 = vector.extract_strided_slice %23 {offsets = [0, 3], sizes = [16, 16], strides = [1, 1]} : vector<16x20xf32> to vector<16x16xf32>
    %28 = vector.extract_strided_slice %23 {offsets = [0, 4], sizes = [16, 16], strides = [1, 1]} : vector<16x20xf32> to vector<16x16xf32>
    %29 = vector.shape_cast %24 : vector<16x16xf32> to vector<16x1x16xf32>
    %30 = vector.shape_cast %25 : vector<16x16xf32> to vector<16x1x16xf32>
    %31 = vector.shape_cast %26 : vector<16x16xf32> to vector<16x1x16xf32>
    %32 = vector.shape_cast %27 : vector<16x16xf32> to vector<16x1x16xf32>
    %33 = vector.shape_cast %28 : vector<16x16xf32> to vector<16x1x16xf32>
    %34 = tpu.concatenate %29, %30, %31, %32, %33 in 1 : vector<16x1x16xf32>, vector<16x1x16xf32>, vector<16x1x16xf32>, vector<16x1x16xf32>, vector<16x1x16xf32> -> vector<16x5x16xf32>
    %35 = vector.extract_strided_slice %2 {offsets = [0, 5], sizes = [16, 5], strides = [1, 1]} : vector<16x25xf32> to vector<16x5xf32>
    %36 = vector.shape_cast %35 : vector<16x5xf32> to vector<1x16x5xf32>
    %37 = vector.broadcast %36 : vector<1x16x5xf32> to vector<16x16x5xf32>
    "tpu.trace_start"() <{level = 10 : i32, message = "tck,tkn->tcn"}> : () -> ()
    %cst_3 = arith.constant dense<0.000000e+00> : vector<16x16x16xf32>
    %38 = tpu.matmul %37, %34, %cst_3 {dimension_numbers = #tpu.dot_dimension_numbers<[2], [1], [1], [2], [0, 0, 0, 1, 1, 2], [0], [0]>} : vector<16x16x5xf32>, vector<16x5x16xf32>, vector<16x16x16xf32> -> vector<16x16x16xf32>
    "tpu.trace_stop"() : () -> ()
    %39 = arith.addf %20, %38 : vector<16x16x16xf32>
    %c2_i32 = arith.constant 2 : i32
    %40 = arith.addi %1, %c2_i32 : i32
    %41 = arith.index_cast %40 : i32 to index
    %c0_4 = arith.constant 0 : index
    %42 = vector.load %arg1[%41, %c0_4] : memref<20x20xf32, #tpu.memory_space<vmem>>, vector<16x20xf32>
    %43 = vector.extract_strided_slice %42 {offsets = [0, 0], sizes = [16, 16], strides = [1, 1]} : vector<16x20xf32> to vector<16x16xf32>
    %44 = vector.extract_strided_slice %42 {offsets = [0, 1], sizes = [16, 16], strides = [1, 1]} : vector<16x20xf32> to vector<16x16xf32>
    %45 = vector.extract_strided_slice %42 {offsets = [0, 2], sizes = [16, 16], strides = [1, 1]} : vector<16x20xf32> to vector<16x16xf32>
    %46 = vector.extract_strided_slice %42 {offsets = [0, 3], sizes = [16, 16], strides = [1, 1]} : vector<16x20xf32> to vector<16x16xf32>
    %47 = vector.extract_strided_slice %42 {offsets = [0, 4], sizes = [16, 16], strides = [1, 1]} : vector<16x20xf32> to vector<16x16xf32>
    %48 = vector.shape_cast %43 : vector<16x16xf32> to vector<16x1x16xf32>
    %49 = vector.shape_cast %44 : vector<16x16xf32> to vector<16x1x16xf32>
    %50 = vector.shape_cast %45 : vector<16x16xf32> to vector<16x1x16xf32>
    %51 = vector.shape_cast %46 : vector<16x16xf32> to vector<16x1x16xf32>
    %52 = vector.shape_cast %47 : vector<16x16xf32> to vector<16x1x16xf32>
    %53 = tpu.concatenate %48, %49, %50, %51, %52 in 1 : vector<16x1x16xf32>, vector<16x1x16xf32>, vector<16x1x16xf32>, vector<16x1x16xf32>, vector<16x1x16xf32> -> vector<16x5x16xf32>
    %54 = vector.extract_strided_slice %2 {offsets = [0, 10], sizes = [16, 5], strides = [1, 1]} : vector<16x25xf32> to vector<16x5xf32>
    %55 = vector.shape_cast %54 : vector<16x5xf32> to vector<1x16x5xf32>
    %56 = vector.broadcast %55 : vector<1x16x5xf32> to vector<16x16x5xf32>
    "tpu.trace_start"() <{level = 10 : i32, message = "tck,tkn->tcn"}> : () -> ()
    %cst_5 = arith.constant dense<0.000000e+00> : vector<16x16x16xf32>
    %57 = tpu.matmul %56, %53, %cst_5 {dimension_numbers = #tpu.dot_dimension_numbers<[2], [1], [1], [2], [0, 0, 0, 1, 1, 2], [0], [0]>} : vector<16x16x5xf32>, vector<16x5x16xf32>, vector<16x16x16xf32> -> vector<16x16x16xf32>
    "tpu.trace_stop"() : () -> ()
    %58 = arith.addf %39, %57 : vector<16x16x16xf32>
    %c3_i32 = arith.constant 3 : i32
    %59 = arith.addi %1, %c3_i32 : i32
    %60 = arith.index_cast %59 : i32 to index
    %c0_6 = arith.constant 0 : index
    %61 = vector.load %arg1[%60, %c0_6] : memref<20x20xf32, #tpu.memory_space<vmem>>, vector<16x20xf32>
    %62 = vector.extract_strided_slice %61 {offsets = [0, 0], sizes = [16, 16], strides = [1, 1]} : vector<16x20xf32> to vector<16x16xf32>
    %63 = vector.extract_strided_slice %61 {offsets = [0, 1], sizes = [16, 16], strides = [1, 1]} : vector<16x20xf32> to vector<16x16xf32>
    %64 = vector.extract_strided_slice %61 {offsets = [0, 2], sizes = [16, 16], strides = [1, 1]} : vector<16x20xf32> to vector<16x16xf32>
    %65 = vector.extract_strided_slice %61 {offsets = [0, 3], sizes = [16, 16], strides = [1, 1]} : vector<16x20xf32> to vector<16x16xf32>
    %66 = vector.extract_strided_slice %61 {offsets = [0, 4], sizes = [16, 16], strides = [1, 1]} : vector<16x20xf32> to vector<16x16xf32>
    %67 = vector.shape_cast %62 : vector<16x16xf32> to vector<16x1x16xf32>
    %68 = vector.shape_cast %63 : vector<16x16xf32> to vector<16x1x16xf32>
    %69 = vector.shape_cast %64 : vector<16x16xf32> to vector<16x1x16xf32>
    %70 = vector.shape_cast %65 : vector<16x16xf32> to vector<16x1x16xf32>
    %71 = vector.shape_cast %66 : vector<16x16xf32> to vector<16x1x16xf32>
    %72 = tpu.concatenate %67, %68, %69, %70, %71 in 1 : vector<16x1x16xf32>, vector<16x1x16xf32>, vector<16x1x16xf32>, vector<16x1x16xf32>, vector<16x1x16xf32> -> vector<16x5x16xf32>
    %73 = vector.extract_strided_slice %2 {offsets = [0, 15], sizes = [16, 5], strides = [1, 1]} : vector<16x25xf32> to vector<16x5xf32>
    %74 = vector.shape_cast %73 : vector<16x5xf32> to vector<1x16x5xf32>
    %75 = vector.broadcast %74 : vector<1x16x5xf32> to vector<16x16x5xf32>
    "tpu.trace_start"() <{level = 10 : i32, message = "tck,tkn->tcn"}> : () -> ()
    %cst_7 = arith.constant dense<0.000000e+00> : vector<16x16x16xf32>
    %76 = tpu.matmul %75, %72, %cst_7 {dimension_numbers = #tpu.dot_dimension_numbers<[2], [1], [1], [2], [0, 0, 0, 1, 1, 2], [0], [0]>} : vector<16x16x5xf32>, vector<16x5x16xf32>, vector<16x16x16xf32> -> vector<16x16x16xf32>
    "tpu.trace_stop"() : () -> ()
    %77 = arith.addf %58, %76 : vector<16x16x16xf32>
    %c4_i32 = arith.constant 4 : i32
    %78 = arith.addi %1, %c4_i32 : i32
    %79 = arith.index_cast %78 : i32 to index
    %c0_8 = arith.constant 0 : index
    %80 = vector.load %arg1[%79, %c0_8] : memref<20x20xf32, #tpu.memory_space<vmem>>, vector<16x20xf32>
    %81 = vector.extract_strided_slice %80 {offsets = [0, 0], sizes = [16, 16], strides = [1, 1]} : vector<16x20xf32> to vector<16x16xf32>
    %82 = vector.extract_strided_slice %80 {offsets = [0, 1], sizes = [16, 16], strides = [1, 1]} : vector<16x20xf32> to vector<16x16xf32>
    %83 = vector.extract_strided_slice %80 {offsets = [0, 2], sizes = [16, 16], strides = [1, 1]} : vector<16x20xf32> to vector<16x16xf32>
    %84 = vector.extract_strided_slice %80 {offsets = [0, 3], sizes = [16, 16], strides = [1, 1]} : vector<16x20xf32> to vector<16x16xf32>
    %85 = vector.extract_strided_slice %80 {offsets = [0, 4], sizes = [16, 16], strides = [1, 1]} : vector<16x20xf32> to vector<16x16xf32>
    %86 = vector.shape_cast %81 : vector<16x16xf32> to vector<16x1x16xf32>
    %87 = vector.shape_cast %82 : vector<16x16xf32> to vector<16x1x16xf32>
    %88 = vector.shape_cast %83 : vector<16x16xf32> to vector<16x1x16xf32>
    %89 = vector.shape_cast %84 : vector<16x16xf32> to vector<16x1x16xf32>
    %90 = vector.shape_cast %85 : vector<16x16xf32> to vector<16x1x16xf32>
    %91 = tpu.concatenate %86, %87, %88, %89, %90 in 1 : vector<16x1x16xf32>, vector<16x1x16xf32>, vector<16x1x16xf32>, vector<16x1x16xf32>, vector<16x1x16xf32> -> vector<16x5x16xf32>
    %92 = vector.extract_strided_slice %2 {offsets = [0, 20], sizes = [16, 5], strides = [1, 1]} : vector<16x25xf32> to vector<16x5xf32>
    %93 = vector.shape_cast %92 : vector<16x5xf32> to vector<1x16x5xf32>
    %94 = vector.broadcast %93 : vector<1x16x5xf32> to vector<16x16x5xf32>
    "tpu.trace_start"() <{level = 10 : i32, message = "tck,tkn->tcn"}> : () -> ()
    %cst_9 = arith.constant dense<0.000000e+00> : vector<16x16x16xf32>
    %95 = tpu.matmul %94, %91, %cst_9 {dimension_numbers = #tpu.dot_dimension_numbers<[2], [1], [1], [2], [0, 0, 0, 1, 1, 2], [0], [0]>} : vector<16x16x5xf32>, vector<16x5x16xf32>, vector<16x16x16xf32> -> vector<16x16x16xf32>
    "tpu.trace_stop"() : () -> ()
    %96 = arith.addf %77, %95 : vector<16x16x16xf32>
    %c0_10 = arith.constant 0 : index
    %c0_11 = arith.constant 0 : index
    %97 = vector.load %arg3[%c0_10, %c0_11] : memref<16x1xf32, #tpu.memory_space<vmem>>, vector<16x1xf32>
    %98 = vector.shape_cast %97 : vector<16x1xf32> to vector<1x16x1xf32>
    %99 = vector.broadcast %98 : vector<1x16x1xf32> to vector<16x16x16xf32>
    %100 = arith.addf %96, %99 : vector<16x16x16xf32>
    %cst_12 = arith.constant 0.000000e+00 : f32
    %101 = vector.broadcast %cst_12 : f32 to vector<16x16x16xf32>
    %102 = arith.maximumf %100, %101 : vector<16x16x16xf32>
    %c0_13 = arith.constant 0 : index
    %c0_14 = arith.constant 0 : index
    %103 = vector.load %arg4[%c0_13, %c0_14] : memref<16x16xf32, #tpu.memory_space<vmem>>, vector<16x16xf32>
    %104 = vector.shape_cast %103 : vector<16x16xf32> to vector<1x16x16xf32>
    %105 = vector.broadcast %104 : vector<1x16x16xf32> to vector<16x16x16xf32>
    "tpu.trace_start"() <{level = 10 : i32, message = "tdc,tcn->tdn"}> : () -> ()
    %cst_15 = arith.constant dense<0.000000e+00> : vector<16x16x16xf32>
    %106 = tpu.matmul %105, %102, %cst_15 {dimension_numbers = #tpu.dot_dimension_numbers<[2], [1], [1], [2], [0, 0, 0, 1, 1, 2], [0], [0]>} : vector<16x16x16xf32>, vector<16x16x16xf32>, vector<16x16x16xf32> -> vector<16x16x16xf32>
    "tpu.trace_stop"() : () -> ()
    %c0_16 = arith.constant 0 : index
    %c0_17 = arith.constant 0 : index
    %107 = vector.load %arg5[%c0_16, %c0_17] : memref<16x1xf32, #tpu.memory_space<vmem>>, vector<16x1xf32>
    %108 = vector.shape_cast %107 : vector<16x1xf32> to vector<1x16x1xf32>
    %109 = vector.broadcast %108 : vector<1x16x1xf32> to vector<16x16x16xf32>
    %110 = arith.addf %106, %109 : vector<16x16x16xf32>
    %c0_18 = arith.constant 0 : index
    %c0_19 = arith.constant 0 : index
    %111 = vector.load %arg6[%c0_18, %c0_19] : memref<11x16xf32, #tpu.memory_space<vmem>>, vector<11x16xf32>
    %112 = vector.shape_cast %111 : vector<11x16xf32> to vector<1x11x16xf32>
    %113 = vector.broadcast %112 : vector<1x11x16xf32> to vector<16x11x16xf32>
    "tpu.trace_start"() <{level = 10 : i32, message = "tdc,tcn->tdn"}> : () -> ()
    %cst_20 = arith.constant dense<0.000000e+00> : vector<16x11x16xf32>
    %114 = tpu.matmul %113, %110, %cst_20 {dimension_numbers = #tpu.dot_dimension_numbers<[2], [1], [1], [2], [0, 0, 0, 1, 1, 2], [0], [0]>} : vector<16x11x16xf32>, vector<16x16x16xf32>, vector<16x11x16xf32> -> vector<16x11x16xf32>
    "tpu.trace_stop"() : () -> ()
    %c0_21 = arith.constant 0 : index
    %c0_22 = arith.constant 0 : index
    %115 = vector.load %arg7[%c0_21, %c0_22] : memref<11x1xf32, #tpu.memory_space<vmem>>, vector<11x1xf32>
    %116 = vector.shape_cast %115 : vector<11x1xf32> to vector<1x11x1xf32>
    %117 = vector.broadcast %116 : vector<1x11x1xf32> to vector<16x11x16xf32>
    %118 = arith.addf %114, %117 : vector<16x11x16xf32>
    %c0_23 = arith.constant 0 : index
    %c0_24 = arith.constant 0 : index
    %119 = vector.load %arg8[%c0_23, %c0_24] : memref<11x128xf32, #tpu.memory_space<vmem>>, vector<11x128xf32>
    %120 = vector.shape_cast %119 : vector<11x128xf32> to vector<1x11x128xf32>
    %121 = vector.shape_cast %120 : vector<1x11x128xf32> to vector<1x11x128xf32>
    %122 = vector.broadcast %121 : vector<1x11x128xf32> to vector<16x11x128xf32>
    %c15_i32 = arith.constant 15 : i32
    %123 = arith.subi %c15_i32, %1 : i32
    %124 = tpu.iota {dimensions = array<i32: 0>} : vector<16x1x1xi32>
    %125 = vector.broadcast %123 : i32 to vector<16x1x1xi32>
    %126 = arith.subi %125, %124 : vector<16x1x1xi32>
    %127 = vector.extract_strided_slice %122 {offsets = [0, 0, 1], sizes = [16, 11, 127], strides = [1, 1, 1]} : vector<16x11x128xf32> to vector<16x11x127xf32>
    %128 = vector.extract_strided_slice %122 {offsets = [0, 0, 0], sizes = [16, 11, 1], strides = [1, 1, 1]} : vector<16x11x128xf32> to vector<16x11x1xf32>
    %129 = tpu.concatenate %127, %128 in 2 : vector<16x11x127xf32>, vector<16x11x1xf32> -> vector<16x11x128xf32>
    %c1_i32_25 = arith.constant 1 : i32
    %130 = vector.broadcast %c1_i32_25 : i32 to vector<16x1x1xi32>
    %131 = arith.andi %126, %130 : vector<16x1x1xi32>
    %c0_i32_26 = arith.constant 0 : i32
    %132 = vector.broadcast %c0_i32_26 : i32 to vector<16x1x1xi32>
    %133 = arith.cmpi ne, %131, %132 : vector<16x1x1xi32>
    %134 = vector.shape_cast %133 : vector<16x1x1xi1> to vector<16x1x1xi1>
    %135 = vector.broadcast %134 : vector<16x1x1xi1> to vector<16x11x128xi1>
    %136 = arith.select %135, %129, %122 : vector<16x11x128xi1>, vector<16x11x128xf32>
    %137 = vector.extract_strided_slice %136 {offsets = [0, 0, 2], sizes = [16, 11, 126], strides = [1, 1, 1]} : vector<16x11x128xf32> to vector<16x11x126xf32>
    %138 = vector.extract_strided_slice %136 {offsets = [0, 0, 0], sizes = [16, 11, 2], strides = [1, 1, 1]} : vector<16x11x128xf32> to vector<16x11x2xf32>
    %139 = tpu.concatenate %137, %138 in 2 : vector<16x11x126xf32>, vector<16x11x2xf32> -> vector<16x11x128xf32>
    %c2_i32_27 = arith.constant 2 : i32
    %140 = vector.broadcast %c2_i32_27 : i32 to vector<16x1x1xi32>
    %141 = arith.andi %126, %140 : vector<16x1x1xi32>
    %c0_i32_28 = arith.constant 0 : i32
    %142 = vector.broadcast %c0_i32_28 : i32 to vector<16x1x1xi32>
    %143 = arith.cmpi ne, %141, %142 : vector<16x1x1xi32>
    %144 = vector.shape_cast %143 : vector<16x1x1xi1> to vector<16x1x1xi1>
    %145 = vector.broadcast %144 : vector<16x1x1xi1> to vector<16x11x128xi1>
    %146 = arith.select %145, %139, %136 : vector<16x11x128xi1>, vector<16x11x128xf32>
    %147 = vector.extract_strided_slice %146 {offsets = [0, 0, 4], sizes = [16, 11, 124], strides = [1, 1, 1]} : vector<16x11x128xf32> to vector<16x11x124xf32>
    %148 = vector.extract_strided_slice %146 {offsets = [0, 0, 0], sizes = [16, 11, 4], strides = [1, 1, 1]} : vector<16x11x128xf32> to vector<16x11x4xf32>
    %149 = tpu.concatenate %147, %148 in 2 : vector<16x11x124xf32>, vector<16x11x4xf32> -> vector<16x11x128xf32>
    %c4_i32_29 = arith.constant 4 : i32
    %150 = vector.broadcast %c4_i32_29 : i32 to vector<16x1x1xi32>
    %151 = arith.andi %126, %150 : vector<16x1x1xi32>
    %c0_i32_30 = arith.constant 0 : i32
    %152 = vector.broadcast %c0_i32_30 : i32 to vector<16x1x1xi32>
    %153 = arith.cmpi ne, %151, %152 : vector<16x1x1xi32>
    %154 = vector.shape_cast %153 : vector<16x1x1xi1> to vector<16x1x1xi1>
    %155 = vector.broadcast %154 : vector<16x1x1xi1> to vector<16x11x128xi1>
    %156 = arith.select %155, %149, %146 : vector<16x11x128xi1>, vector<16x11x128xf32>
    %157 = vector.extract_strided_slice %156 {offsets = [0, 0, 8], sizes = [16, 11, 120], strides = [1, 1, 1]} : vector<16x11x128xf32> to vector<16x11x120xf32>
    %158 = vector.extract_strided_slice %156 {offsets = [0, 0, 0], sizes = [16, 11, 8], strides = [1, 1, 1]} : vector<16x11x128xf32> to vector<16x11x8xf32>
    %159 = tpu.concatenate %157, %158 in 2 : vector<16x11x120xf32>, vector<16x11x8xf32> -> vector<16x11x128xf32>
    %c8_i32 = arith.constant 8 : i32
    %160 = vector.broadcast %c8_i32 : i32 to vector<16x1x1xi32>
    %161 = arith.andi %126, %160 : vector<16x1x1xi32>
    %c0_i32_31 = arith.constant 0 : i32
    %162 = vector.broadcast %c0_i32_31 : i32 to vector<16x1x1xi32>
    %163 = arith.cmpi ne, %161, %162 : vector<16x1x1xi32>
    %164 = vector.shape_cast %163 : vector<16x1x1xi1> to vector<16x1x1xi1>
    %165 = vector.broadcast %164 : vector<16x1x1xi1> to vector<16x11x128xi1>
    %166 = arith.select %165, %159, %156 : vector<16x11x128xi1>, vector<16x11x128xf32>
    %167 = vector.extract_strided_slice %166 {offsets = [0, 0, 0], sizes = [16, 11, 16], strides = [1, 1, 1]} : vector<16x11x128xf32> to vector<16x11x16xf32>
    %168 = arith.addf %118, %167 : vector<16x11x16xf32>
    %169 = vector.extract_strided_slice %168 {offsets = [0, 8, 0], sizes = [16, 1, 16], strides = [1, 1, 1]} : vector<16x11x16xf32> to vector<16x1x16xf32>
    %170 = vector.shape_cast %169 : vector<16x1x16xf32> to vector<16x16xf32>
    %c0_32 = arith.constant 0 : index
    %c0_33 = arith.constant 0 : index
    %c0_34 = arith.constant 0 : index
    %171 = vector.load %arg12[%c0_32, %c0_33, %c0_34] : memref<3x16x16xf32, #tpu.memory_space<vmem>>, vector<1x16x16xf32>
    %172 = vector.shape_cast %171 : vector<1x16x16xf32> to vector<16x16xf32>
    %173 = vector.shape_cast %170 : vector<16x16xf32> to vector<1x16x16xf32>
    tpu.vector_store %arg12[%c0_32, %c0_33, %c0_34], %173 {strides = array<i32>} : memref<3x16x16xf32, #tpu.memory_space<vmem>>, vector<1x16x16xf32>,
    %174 = vector.extract_strided_slice %168 {offsets = [0, 9, 0], sizes = [16, 1, 16], strides = [1, 1, 1]} : vector<16x11x16xf32> to vector<16x1x16xf32>
    %175 = vector.shape_cast %174 : vector<16x1x16xf32> to vector<16x16xf32>
    %c1 = arith.constant 1 : index
    %c0_35 = arith.constant 0 : index
    %c0_36 = arith.constant 0 : index
    %176 = vector.load %arg12[%c1, %c0_35, %c0_36] : memref<3x16x16xf32, #tpu.memory_space<vmem>>, vector<1x16x16xf32>
    %177 = vector.shape_cast %176 : vector<1x16x16xf32> to vector<16x16xf32>
    %178 = vector.shape_cast %175 : vector<16x16xf32> to vector<1x16x16xf32>
    tpu.vector_store %arg12[%c1, %c0_35, %c0_36], %178 {strides = array<i32>} : memref<3x16x16xf32, #tpu.memory_space<vmem>>, vector<1x16x16xf32>,
    %179 = vector.extract_strided_slice %168 {offsets = [0, 10, 0], sizes = [16, 1, 16], strides = [1, 1, 1]} : vector<16x11x16xf32> to vector<16x1x16xf32>
    %180 = vector.shape_cast %179 : vector<16x1x16xf32> to vector<16x16xf32>
    %c2 = arith.constant 2 : index
    %c0_37 = arith.constant 0 : index
    %c0_38 = arith.constant 0 : index
    %181 = vector.load %arg12[%c2, %c0_37, %c0_38] : memref<3x16x16xf32, #tpu.memory_space<vmem>>, vector<1x16x16xf32>
    %182 = vector.shape_cast %181 : vector<1x16x16xf32> to vector<16x16xf32>
    %183 = vector.shape_cast %180 : vector<16x16xf32> to vector<1x16x16xf32>
    tpu.vector_store %arg12[%c2, %c0_37, %c0_38], %183 {strides = array<i32>} : memref<3x16x16xf32, #tpu.memory_space<vmem>>, vector<1x16x16xf32>,
    %184 = tpu.iota {dimensions = array<i32: 2>} : vector<16x1x16xi32>
    %185 = tpu.iota {dimensions = array<i32: 0>} : vector<16x1x16xi32>
    %c1_i32_39 = arith.constant 1 : i32
    %186 = arith.addi %1, %c1_i32_39 : i32
    %187 = vector.broadcast %186 : i32 to vector<16x1x16xi32>
    %188 = arith.addi %185, %187 : vector<16x1x16xi32>
    %189 = arith.cmpi eq, %184, %188 : vector<16x1x16xi32>
    %190 = arith.extui %189 : vector<16x1x16xi1> to vector<16x1x16xi32>
    %191 = arith.sitofp %190 : vector<16x1x16xi32> to vector<16x1x16xf32>
    %192 = vector.broadcast %191 : vector<16x1x16xf32> to vector<16x16x16xf32>
    %193 = arith.mulf %110, %192 : vector<16x16x16xf32>
    %cst_40 = arith.constant dense<0.000000e+00> : vector<16x16xf32>
    %194 = vector.multi_reduction <add>, %193, %cst_40 [2] : vector<16x16x16xf32> to vector<16x16xf32>
    %c0_41 = arith.constant 0 : index
    %c0_42 = arith.constant 0 : index
    %195 = vector.load %arg13[%c0_41, %c0_42] : memref<16x16xf32, #tpu.memory_space<vmem>>, vector<16x16xf32>
    tpu.vector_store %arg13[%c0_41, %c0_42], %194 {strides = array<i32>} : memref<16x16xf32, #tpu.memory_space<vmem>>, vector<16x16xf32>,
    %196 = vector.extract_strided_slice %168 {offsets = [0, 0, 0], sizes = [16, 8, 16], strides = [1, 1, 1]} : vector<16x11x16xf32> to vector<16x8x16xf32>
    %c0_43 = arith.constant 0 : index
    %c0_44 = arith.constant 0 : index
    %197 = vector.load %arg10[%c0_43, %c0_44] : memref<16x8xf32, #tpu.memory_space<vmem>>, vector<16x8xf32>
    %198 = vector.shape_cast %197 : vector<16x8xf32> to vector<16x8x1xf32>
    %199 = vector.broadcast %198 : vector<16x8x1xf32> to vector<16x8x16xf32>
    %200 = arith.addf %196, %199 : vector<16x8x16xf32>
    %c0_45 = arith.constant 0 : index
    %c0_46 = arith.constant 0 : index
    %201 = vector.load %arg11[%c0_45, %c0_46] : memref<8x16xf32, #tpu.memory_space<vmem>>, vector<8x16xf32>
    %202 = vector.shape_cast %201 : vector<8x16xf32> to vector<1x8x16xf32>
    %203 = vector.broadcast %202 : vector<1x8x16xf32> to vector<16x8x16xf32>
    %204 = arith.addf %200, %203 : vector<16x8x16xf32>
    %cst_47 = arith.constant 0.000000e+00 : f32
    %205 = vector.broadcast %cst_47 : f32 to vector<16x8x16xf32>
    %206 = arith.cmpf ogt, %204, %205 : vector<16x8x16xf32>
    %cst_48 = arith.constant 2.000000e-01 : f32
    %207 = vector.broadcast %cst_48 : f32 to vector<16x8x16xf32>
    %208 = arith.mulf %207, %204 : vector<16x8x16xf32>
    %209 = arith.select %206, %204, %208 : vector<16x8x16xi1>, vector<16x8x16xf32>
    %cst_49 = arith.constant dense<0xFF800000> : vector<16x8xf32>
    %210 = vector.multi_reduction <maximumf>, %209, %cst_49 [2] : vector<16x8x16xf32> to vector<16x8xf32>
    %211 = vector.shape_cast %210 : vector<16x8xf32> to vector<16x8x1xf32>
    %212 = vector.broadcast %211 : vector<16x8x1xf32> to vector<16x8x16xf32>
    %213 = arith.subf %209, %212 : vector<16x8x16xf32>
    %214 = math.exp %213 : vector<16x8x16xf32>
    %cst_50 = arith.constant dense<0.000000e+00> : vector<16x8xf32>
    %215 = vector.multi_reduction <add>, %214, %cst_50 [2] : vector<16x8x16xf32> to vector<16x8xf32>
    %216 = vector.shape_cast %215 : vector<16x8xf32> to vector<16x8x1xf32>
    %217 = tpu.reciprocal %216 {approx = true} : vector<16x8x1xf32> -> vector<16x8x1xf32>
    %218 = vector.broadcast %217 : vector<16x8x1xf32> to vector<16x8x16xf32>
    %219 = arith.mulf %214, %218 : vector<16x8x16xf32>
    %c0_51 = arith.constant 0 : index
    %c0_52 = arith.constant 0 : index
    %220 = vector.load %arg9[%c0_51, %c0_52] : memref<16x32xf32, #tpu.memory_space<vmem>>, vector<16x32xf32>
    %221 = vector.extract_strided_slice %219 {offsets = [0, 0, 0], sizes = [16, 1, 16], strides = [1, 1, 1]} : vector<16x8x16xf32> to vector<16x1x16xf32>
    %222 = vector.shape_cast %221 : vector<16x1x16xf32> to vector<16x16xf32>
    %223 = vector.extract_strided_slice %220 {offsets = [0, 0], sizes = [16, 4], strides = [1, 1]} : vector<16x32xf32> to vector<16x4xf32>
    %cst_53 = arith.constant dense<0.000000e+00> : vector<16x4xf32>
    %224 = tpu.matmul %222, %223, %cst_53 {dimension_numbers = #tpu.dot_dimension_numbers<[1], [0], [0], [1], [0, 0, 1, 1], [], []>} : vector<16x16xf32>, vector<16x4xf32>, vector<16x4xf32> -> vector<16x4xf32>
    %c0_54 = arith.constant 0 : index
    %c0_55 = arith.constant 0 : index
    %225 = vector.load %arg14[%c0_54, %c0_55] : memref<16x32xf32, #tpu.memory_space<vmem>>, vector<16x4xf32>
    tpu.vector_store %arg14[%c0_54, %c0_55], %224 {strides = array<i32>} : memref<16x32xf32, #tpu.memory_space<vmem>>, vector<16x4xf32>,
    %226 = vector.extract_strided_slice %219 {offsets = [0, 1, 0], sizes = [16, 1, 16], strides = [1, 1, 1]} : vector<16x8x16xf32> to vector<16x1x16xf32>
    %227 = vector.shape_cast %226 : vector<16x1x16xf32> to vector<16x16xf32>
    %228 = vector.extract_strided_slice %220 {offsets = [0, 4], sizes = [16, 4], strides = [1, 1]} : vector<16x32xf32> to vector<16x4xf32>
    %cst_56 = arith.constant dense<0.000000e+00> : vector<16x4xf32>
    %229 = tpu.matmul %227, %228, %cst_56 {dimension_numbers = #tpu.dot_dimension_numbers<[1], [0], [0], [1], [0, 0, 1, 1], [], []>} : vector<16x16xf32>, vector<16x4xf32>, vector<16x4xf32> -> vector<16x4xf32>
    %c0_57 = arith.constant 0 : index
    %c4 = arith.constant 4 : index
    %230 = vector.load %arg14[%c0_57, %c4] : memref<16x32xf32, #tpu.memory_space<vmem>>, vector<16x4xf32>
    tpu.vector_store %arg14[%c0_57, %c4], %229 {strides = array<i32>} : memref<16x32xf32, #tpu.memory_space<vmem>>, vector<16x4xf32>,
    %231 = vector.extract_strided_slice %219 {offsets = [0, 2, 0], sizes = [16, 1, 16], strides = [1, 1, 1]} : vector<16x8x16xf32> to vector<16x1x16xf32>
    %232 = vector.shape_cast %231 : vector<16x1x16xf32> to vector<16x16xf32>
    %233 = vector.extract_strided_slice %220 {offsets = [0, 8], sizes = [16, 4], strides = [1, 1]} : vector<16x32xf32> to vector<16x4xf32>
    %cst_58 = arith.constant dense<0.000000e+00> : vector<16x4xf32>
    %234 = tpu.matmul %232, %233, %cst_58 {dimension_numbers = #tpu.dot_dimension_numbers<[1], [0], [0], [1], [0, 0, 1, 1], [], []>} : vector<16x16xf32>, vector<16x4xf32>, vector<16x4xf32> -> vector<16x4xf32>
    %c0_59 = arith.constant 0 : index
    %c8 = arith.constant 8 : index
    %235 = vector.load %arg14[%c0_59, %c8] : memref<16x32xf32, #tpu.memory_space<vmem>>, vector<16x4xf32>
    tpu.vector_store %arg14[%c0_59, %c8], %234 {strides = array<i32>} : memref<16x32xf32, #tpu.memory_space<vmem>>, vector<16x4xf32>,
    %236 = vector.extract_strided_slice %219 {offsets = [0, 3, 0], sizes = [16, 1, 16], strides = [1, 1, 1]} : vector<16x8x16xf32> to vector<16x1x16xf32>
    %237 = vector.shape_cast %236 : vector<16x1x16xf32> to vector<16x16xf32>
    %238 = vector.extract_strided_slice %220 {offsets = [0, 12], sizes = [16, 4], strides = [1, 1]} : vector<16x32xf32> to vector<16x4xf32>
    %cst_60 = arith.constant dense<0.000000e+00> : vector<16x4xf32>
    %239 = tpu.matmul %237, %238, %cst_60 {dimension_numbers = #tpu.dot_dimension_numbers<[1], [0], [0], [1], [0, 0, 1, 1], [], []>} : vector<16x16xf32>, vector<16x4xf32>, vector<16x4xf32> -> vector<16x4xf32>
    %c0_61 = arith.constant 0 : index
    %c12 = arith.constant 12 : index
    %240 = vector.load %arg14[%c0_61, %c12] : memref<16x32xf32, #tpu.memory_space<vmem>>, vector<16x4xf32>
    tpu.vector_store %arg14[%c0_61, %c12], %239 {strides = array<i32>} : memref<16x32xf32, #tpu.memory_space<vmem>>, vector<16x4xf32>,
    %241 = vector.extract_strided_slice %219 {offsets = [0, 4, 0], sizes = [16, 1, 16], strides = [1, 1, 1]} : vector<16x8x16xf32> to vector<16x1x16xf32>
    %242 = vector.shape_cast %241 : vector<16x1x16xf32> to vector<16x16xf32>
    %243 = vector.extract_strided_slice %220 {offsets = [0, 16], sizes = [16, 4], strides = [1, 1]} : vector<16x32xf32> to vector<16x4xf32>
    %cst_62 = arith.constant dense<0.000000e+00> : vector<16x4xf32>
    %244 = tpu.matmul %242, %243, %cst_62 {dimension_numbers = #tpu.dot_dimension_numbers<[1], [0], [0], [1], [0, 0, 1, 1], [], []>} : vector<16x16xf32>, vector<16x4xf32>, vector<16x4xf32> -> vector<16x4xf32>
    %c0_63 = arith.constant 0 : index
    %c16 = arith.constant 16 : index
    %245 = vector.load %arg14[%c0_63, %c16] : memref<16x32xf32, #tpu.memory_space<vmem>>, vector<16x4xf32>
    tpu.vector_store %arg14[%c0_63, %c16], %244 {strides = array<i32>} : memref<16x32xf32, #tpu.memory_space<vmem>>, vector<16x4xf32>,
    %246 = vector.extract_strided_slice %219 {offsets = [0, 5, 0], sizes = [16, 1, 16], strides = [1, 1, 1]} : vector<16x8x16xf32> to vector<16x1x16xf32>
    %247 = vector.shape_cast %246 : vector<16x1x16xf32> to vector<16x16xf32>
    %248 = vector.extract_strided_slice %220 {offsets = [0, 20], sizes = [16, 4], strides = [1, 1]} : vector<16x32xf32> to vector<16x4xf32>
    %cst_64 = arith.constant dense<0.000000e+00> : vector<16x4xf32>
    %249 = tpu.matmul %247, %248, %cst_64 {dimension_numbers = #tpu.dot_dimension_numbers<[1], [0], [0], [1], [0, 0, 1, 1], [], []>} : vector<16x16xf32>, vector<16x4xf32>, vector<16x4xf32> -> vector<16x4xf32>
    %c0_65 = arith.constant 0 : index
    %c20 = arith.constant 20 : index
    %250 = vector.load %arg14[%c0_65, %c20] : memref<16x32xf32, #tpu.memory_space<vmem>>, vector<16x4xf32>
    tpu.vector_store %arg14[%c0_65, %c20], %249 {strides = array<i32>} : memref<16x32xf32, #tpu.memory_space<vmem>>, vector<16x4xf32>,
    %251 = vector.extract_strided_slice %219 {offsets = [0, 6, 0], sizes = [16, 1, 16], strides = [1, 1, 1]} : vector<16x8x16xf32> to vector<16x1x16xf32>
    %252 = vector.shape_cast %251 : vector<16x1x16xf32> to vector<16x16xf32>
    %253 = vector.extract_strided_slice %220 {offsets = [0, 24], sizes = [16, 4], strides = [1, 1]} : vector<16x32xf32> to vector<16x4xf32>
    %cst_66 = arith.constant dense<0.000000e+00> : vector<16x4xf32>
    %254 = tpu.matmul %252, %253, %cst_66 {dimension_numbers = #tpu.dot_dimension_numbers<[1], [0], [0], [1], [0, 0, 1, 1], [], []>} : vector<16x16xf32>, vector<16x4xf32>, vector<16x4xf32> -> vector<16x4xf32>
    %c0_67 = arith.constant 0 : index
    %c24 = arith.constant 24 : index
    %255 = vector.load %arg14[%c0_67, %c24] : memref<16x32xf32, #tpu.memory_space<vmem>>, vector<16x4xf32>
    tpu.vector_store %arg14[%c0_67, %c24], %254 {strides = array<i32>} : memref<16x32xf32, #tpu.memory_space<vmem>>, vector<16x4xf32>,
    %256 = vector.extract_strided_slice %219 {offsets = [0, 7, 0], sizes = [16, 1, 16], strides = [1, 1, 1]} : vector<16x8x16xf32> to vector<16x1x16xf32>
    %257 = vector.shape_cast %256 : vector<16x1x16xf32> to vector<16x16xf32>
    %258 = vector.extract_strided_slice %220 {offsets = [0, 28], sizes = [16, 4], strides = [1, 1]} : vector<16x32xf32> to vector<16x4xf32>
    %cst_68 = arith.constant dense<0.000000e+00> : vector<16x4xf32>
    %259 = tpu.matmul %257, %258, %cst_68 {dimension_numbers = #tpu.dot_dimension_numbers<[1], [0], [0], [1], [0, 0, 1, 1], [], []>} : vector<16x16xf32>, vector<16x4xf32>, vector<16x4xf32> -> vector<16x4xf32>
    %c0_69 = arith.constant 0 : index
    %c28 = arith.constant 28 : index
    %260 = vector.load %arg14[%c0_69, %c28] : memref<16x32xf32, #tpu.memory_space<vmem>>, vector<16x4xf32>
    tpu.vector_store %arg14[%c0_69, %c28], %259 {strides = array<i32>} : memref<16x32xf32, #tpu.memory_space<vmem>>, vector<16x4xf32>,
    return
  }
  func.func @transform_0(%arg0: i32) -> (i32, i32) {
    %c0_i32 = arith.constant 0 : i32
    %c0_i32_0 = arith.constant 0 : i32
    %c0_i32_1 = arith.constant 0 : i32
    return %c0_i32, %c0_i32_0 : i32, i32
  }
  func.func @transform_1(%arg0: i32) -> (i32, i32) {
    %c0_i32 = arith.constant 0 : i32
    %c0_i32_0 = arith.constant 0 : i32
    %c0_i32_1 = arith.constant 0 : i32
    return %c0_i32, %c0_i32_0 : i32, i32
  }
  func.func @transform_2(%arg0: i32) -> (i32, i32) {
    %c0_i32 = arith.constant 0 : i32
    %c0_i32_0 = arith.constant 0 : i32
    %c0_i32_1 = arith.constant 0 : i32
    return %c0_i32, %c0_i32_0 : i32, i32
  }
  func.func @transform_3(%arg0: i32) -> (i32, i32) {
    %c0_i32 = arith.constant 0 : i32
    %c0_i32_0 = arith.constant 0 : i32
    %c0_i32_1 = arith.constant 0 : i32
    return %c0_i32, %c0_i32_0 : i32, i32
  }
  func.func @transform_4(%arg0: i32) -> (i32, i32) {
    %c0_i32 = arith.constant 0 : i32
    %c0_i32_0 = arith.constant 0 : i32
    %c0_i32_1 = arith.constant 0 : i32
    return %c0_i32, %c0_i32_0 : i32, i32
  }
  func.func @transform_5(%arg0: i32) -> (i32, i32) {
    %c0_i32 = arith.constant 0 : i32
    %c0_i32_0 = arith.constant 0 : i32
    %c0_i32_1 = arith.constant 0 : i32
    return %c0_i32, %c0_i32_0 : i32, i32
  }
  func.func @transform_6(%arg0: i32) -> (i32, i32) {
    %c0_i32 = arith.constant 0 : i32
    %c0_i32_0 = arith.constant 0 : i32
    %c0_i32_1 = arith.constant 0 : i32
    return %c0_i32, %c0_i32_0 : i32, i32
  }
  func.func @transform_7(%arg0: i32) -> (i32, i32) {
    %c0_i32 = arith.constant 0 : i32
    %c0_i32_0 = arith.constant 0 : i32
    %c0_i32_1 = arith.constant 0 : i32
    return %c0_i32, %c0_i32_0 : i32, i32
  }
  func.func @transform_8(%arg0: i32) -> (i32, i32) {
    %c0_i32 = arith.constant 0 : i32
    %c0_i32_0 = arith.constant 0 : i32
    %c0_i32_1 = arith.constant 0 : i32
    return %c0_i32, %c0_i32_0 : i32, i32
  }
  func.func @transform_9(%arg0: i32) -> (i32, i32) {
    %c0_i32 = arith.constant 0 : i32
    %c0_i32_0 = arith.constant 0 : i32
    return %arg0, %c0_i32 : i32, i32
  }
  func.func @transform_10(%arg0: i32) -> (i32, i32) {
    %c0_i32 = arith.constant 0 : i32
    %c0_i32_0 = arith.constant 0 : i32
    %c0_i32_1 = arith.constant 0 : i32
    return %c0_i32, %c0_i32_0 : i32, i32
  }
  func.func @transform_11(%arg0: i32) -> (i32, i32, i32) {
    %c0_i32 = arith.constant 0 : i32
    %c0_i32_0 = arith.constant 0 : i32
    %c0_i32_1 = arith.constant 0 : i32
    return %c0_i32, %arg0, %c0_i32_0 : i32, i32, i32
  }
  func.func @transform_12(%arg0: i32) -> (i32, i32) {
    %c0_i32 = arith.constant 0 : i32
    %c0_i32_0 = arith.constant 0 : i32
    return %arg0, %c0_i32 : i32, i32
  }
  func.func @transform_13(%arg0: i32) -> (i32, i32) {
    %c0_i32 = arith.constant 0 : i32
    %c0_i32_0 = arith.constant 0 : i32
    return %arg0, %c0_i32 : i32, i32
  }
}

</mosaic_0001>

<bundles_post_ra>
// kernel: _lambda_.5
= control target key start
LH: loop header
LB: loop body
LE: loop exit
PB: predicated region body
PF: predicated region fallthrough
CT: control target
= control target key end

     0   :  { %vm33_vm0 = vcmask 261120   ;;  %vm84_vm1 = vcmask 130048   ;;  %vm69_vm2 = vcmask 56320   ;;  %vm74_vm3 = vcmask 1046528   ;;  %s314_s2 = inlined_call_operand.vmem [shape: f32[32,9], index: 2, kind: input, shape index: {}]   ;;  %s315_s4 = inlined_call_operand.vmem [shape: f32[16,1], index: 4, kind: input, shape index: {}]   ;;  %s316_s0 = inlined_call_operand.vmem [shape: f32[16,32], index: 0, kind: input, shape index: {}]   ;;  %s317_s3 = inlined_call_operand.vmem [shape: f32[1,7], index: 3, kind: input, shape index: {}]   ;;  %s318_s1 = inlined_call_operand.vmem [shape: f32[16,16], index: 1, kind: input, shape index: {}]   ;;  %s319_s5 = inlined_call_operand.<no memory space> [shape: f32[1,1], index: 5, kind: input, shape index: {}]   ;;  %s320_s6 = inlined_call_operand.vmem [shape: f32[16,7], index: 6, kind: output, shape index: {0}]   ;;  %s321_s7 = inlined_call_operand.vmem [shape: f32[16,1], index: 7, kind: output, shape index: {1}]  }
   0x1   :  { %v32_v0 = vld [vmem:[%s314_s2 + $0x18] sm:$0xff]  ;;  %v31_v1 = vld [vmem:[%s314_s2 + $0x10] sm:$0xff]  ;;  %v30_v2 = vld [vmem:[%s314_s2 + $0x8] sm:$0xff]  ;;  %v13_v10 = vstv %s319_s5  ;;  %vm187_vm12 = vcmask 7168  }
   0x2   :  { %204 = vmatpush.msra.mxu2 %v32_v0  ;;  %52 = vmatpush.msra.mxu0 %v32_v0  ;;  %v83_v3 = vld [vmem:[%s315_s4 + $0x8] sm:$0xff]  ;;  %v82_v4 = vld [vmem:[%s315_s4] sm:$0xff]  ;;  %14 = vst [vmem:[#allocation2] sm:$0x1] %v13_v10 }
   0x3   :  { %v29_v5 = vld [vmem:[%s314_s2] sm:$0xff]  ;;  %105 = vmatpush.msra.mxu1 %v83_v3  ;;  %208 = vmatpush.msra.mxu3 %v83_v3  ;;  %v28_v6 = vld [vmem:[%s316_s0 + $0x8] sm:$0xff] }
   0x4   :  { %205 = vmatpush.msra.mxu2 %v31_v1  ;;  %53 = vmatpush.msra.mxu0 %v31_v1  ;;  %v27_v7 = vld [vmem:[%s316_s0] sm:$0xff]  ;;  %v81_v9 = vld [vmem:[%s318_s1 + $0x8] sm:$0xff]  ;;  %s223_s0 = smov 7  }
   0x5   :  { %106 = vmatpush.msra.mxu1 %v82_v4  ;;  %v80_v8 = vld [vmem:[%s318_s1] sm:$0xff]  ;;  %209 = vmatpush.msra.mxu3 %v82_v4 }
   0x6   :  { %206 = vmatpush.msra.mxu2 %v30_v2  ;;  %54 = vmatpush.msra.mxu0 %v30_v2  ;;  %v213_v12 = vld [vmem:[%s317_s3] ss:$0 sm:$0xff]  ;;  %s224_s3 = smov 127  }
   0x7   :  { %200 = vmatmul.msk.f32.vlgmr.msra.gmra.mxu1 %vm84_vm1, %v80_v8  ;;  %201 = vmatmul.msk.f32.vlgmr.msra.gmra.mxu3 %vm84_vm1, %v81_v9 }
   0x8   :  { %207 = vmatpush.msra.mxu2 %v29_v5  ;;  %55 = vmatpush.msra.mxu0 %v29_v5 }
   0x9   :  { %199 = vmatmul.msk.f32.vlgmr.msra.gmra.mxu2 %vm33_vm0, %v28_v6  ;;  %198 = vmatmul.msk.f32.vlgmr.msra.gmra.mxu0 %vm33_vm0, %v27_v7  ;;  %v214_v11 = vld [vmem:[#allocation2] ss:$0 sm:$0xff] }
   0xa   :  { %136 = vrot.lane.b32.xlu2 %v214_v11, %s223_s0 }
  0x64   :  { %v137_v26 = vpop.permute.xlu2 %136 }
  0x84   :  { %v108_v15 = vpop.f32.mrf.mxu1 }
  0x85   :  { %125 = vrot.lane.b32.xlu1 %v108_v15, %s223_s0 }
  0x86   :  { %v57_v13 = vpop.f32.mrf.mxu0 }
  0x87   :  { %v67_v14 = vadd.f32 %v213_v12, %v57_v13  ;;  %v75_v16 = vrot.slane %v57_v13, 1 }
  0x89   :  { %70 = vst.msk [vmem:[%s320_s6] sm:$0xff] %vm69_vm2, %v67_v14 }
  0x8a   :  { %v111_v20 = vpop.f32.mrf.mxu3 }
  0x8c   :  { %v60_v17 = vpop.f32.mrf.mxu2 }
  0x8d   :  { %v68_v18 = vadd.f32 %v213_v12, %v60_v17  ;;  %v76_v19 = vrot.slane %v60_v17, 1  ;;  %127 = vrot.lane.b32.xlu1 %v111_v20, %s223_s0 }
  0x8f   :  { %71 = vst.msk [vmem:[%s320_s6 + $0x8] sm:$0xff] %vm69_vm2, %v68_v18  ;;  %v77_v21 = vsel %vm74_vm3, %v75_v16, %v76_v19  ;;  %v79_v22 = vsel %vm74_vm3, %v76_v19, 0.0  ;;  %s225_s6 = smov 121  }
  0x90   :  { %115 = vrot.lane.b32.xlu0 %v77_v21, %s224_s3 }
  0x98   :  { %117 = vrot.lane.b32.xlu0 %v79_v22, %s224_s3 }
  0xf7   :  { %v126_v23 = vpop.permute.xlu1 %125 }
  0xff   :  { %v128_v31 = vpop.permute.xlu1 %127 }
 0x102   :  { %v116_v24 = vpop.permute.xlu0 %115 }
 0x103   :  { %v121_v25 = vadd.f32 %v116_v24, %v57_v13 }
 0x105   :  { %v131_v27 = vadd.f32 %v126_v23, %v121_v25 }
 0x107   :  { %v139_v28 = vadd.f32 %v137_v26, %v131_v27 }
 0x109   :  { %v202_v29 = vmul.f32 -1.442695, %v139_v28 }
 0x10a   :  { %v118_v30 = vpop.permute.xlu0 %117 }
 0x10b   :  { %215 = vpow2.f32 %v202_v29  ;;  %v122_v32 = vadd.f32 %v118_v30, %v60_v17 }
 0x10d   :  { %v132_v33 = vadd.f32 %v128_v31, %v122_v32 }
 0x10f   :  { %v140_v34 = vadd.f32 %v137_v26, %v132_v33 }
 0x111   :  { %v216_v35 = vpop.eup %215  ;;  %v203_v36 = vmul.f32 -1.442695, %v140_v34 }
 0x112   :  { %v147_v37 = vadd.f32 1.0, %v216_v35 }
 0x113   :  { %217 = vpow2.f32 %v203_v36 }
 0x114   :  { %219 = vrcp.f32 %v147_v37  ;;  %v160_v43 = vand.u32 2147483648, %v147_v37  ;;  %v158_v45 = vand.u32 2147483647, %v147_v37  ;;  %vm154_vm5 = vweird.f32 %v147_v37 }
 0x116   :  { %v161_v48 = vor.u32 1.1754944e-38, %v160_v43  ;;  %vm159_vm7 = vcmp.eq.f32.partialorder %v158_v45, 8.507059e+37 }
 0x119   :  { %v218_v38 = vpop.eup %217 }
 0x11a   :  { %v220_v39 = vpop.eup %219  ;;  %v148_v40 = vadd.f32 1.0, %v218_v38 }
 0x11b   :  { %v150_v41 = vmul.f32 %v220_v39, %v147_v37  ;;  %vm155_vm4 = vweird.f32 %v220_v39 }
 0x11c   :  { %221 = vrcp.f32 %v148_v40  ;;  %vm156_vm6 = vmor %vm154_vm5, %vm155_vm4  ;;  %v175_v53 = vand.u32 2147483648, %v148_v40  ;;  %v173_v55 = vand.u32 2147483647, %v148_v40  ;;  %vm169_vm9 = vweird.f32 %v148_v40 }
 0x11d   :  { %v151_v42 = vsub.f32 1.0, %v150_v41 }
 0x11e   :  { %v176_v57 = vor.u32 1.1754944e-38, %v175_v53  ;;  %vm174_vm11 = vcmp.eq.f32.partialorder %v173_v55, 8.507059e+37 }
 0x11f   :  { %v152_v44 = vmul.f32 %v220_v39, %v151_v42 }
 0x121   :  { %v153_v46 = vadd.f32 %v220_v39, %v152_v44 }
 0x122   :  { %v222_v47 = vpop.eup %221 }
 0x123   :  { %v157_v49 = vsel %vm156_vm6, %v220_v39, %v153_v46  ;;  %v165_v50 = vmul.f32 %v222_v47, %v148_v40  ;;  %vm170_vm8 = vweird.f32 %v222_v47 }
 0x124   :  { %v162_v51 = vsel %vm159_vm7, %v161_v48, %v157_v49  ;;  %vm171_vm10 = vmor %vm169_vm9, %vm170_vm8 }
 0x125   :  { %181 = vrot.lane.b32.xlu2 %v162_v51, %s225_s6  ;;  %v166_v52 = vsub.f32 1.0, %v165_v50 }
 0x127   :  { %v167_v54 = vmul.f32 %v222_v47, %v166_v52 }
 0x129   :  { %v168_v56 = vadd.f32 %v222_v47, %v167_v54 }
 0x12b   :  { %v172_v58 = vsel %vm171_vm10, %v222_v47, %v168_v56 }
 0x12c   :  { %v177_v59 = vsel %vm174_vm11, %v176_v57, %v172_v58 }
 0x12d   :  { %183 = vrot.lane.b32.xlu0 %v177_v59, %s225_s6 }
 0x17f   :  { %v182_v60 = vpop.permute.xlu2 %181 }
 0x180   :  { %188 = vst.msk [vmem:[%s321_s7] sm:$0xff] %vm187_vm12, %v182_v60 }
 0x19f   :  { %v184_v61 = vpop.permute.xlu0 %183 }
 0x1a0   :  { %189 = vst.msk [vmem:[%s321_s7 + $0x8] sm:$0xff] %vm187_vm12, %v184_v61 }

// kernel: _lambda_.3
= control target key start
LH: loop header
LB: loop body
LE: loop exit
PB: predicated region body
PF: predicated region fallthrough
CT: control target
= control target key end

     0   :  { %19 = vsyncpa [#allocation3], 0  ;;  %s1134_s0 = inlined_call_operand.hbm [shape: f32[16,24], index: 0, kind: input, shape index: {}]   ;;  %s1135_s1 = inlined_call_operand.hbm [shape: f32[24,32], index: 1, kind: input, shape index: {}]   ;;  %s1136_s2 = inlined_call_operand.vmem [shape: f32[1,32], index: 2, kind: input, shape index: {}, may-alias: {2,4,6}]   ;;  %s1137_s3 = inlined_call_operand.hbm [shape: f32[32,32], index: 3, kind: input, shape index: {}]   ;;  %s1138_s4 = inlined_call_operand.vmem [shape: f32[1,32], index: 4, kind: input, shape index: {}, may-alias: {2,4,6}]   ;;  %s1139_s5 = inlined_call_operand.hbm [shape: f32[32,32], index: 5, kind: input, shape index: {}]   ;;  %s1140_s6 = inlined_call_operand.vmem [shape: f32[1,32], index: 6, kind: input, shape index: {}, may-alias: {2,4,6}]   ;;  %s1141_s7 = inlined_call_operand.hbm [shape: f32[32,32], index: 7, kind: input, shape index: {}]   ;;  %s1142_s8 = inlined_call_operand.hbm [shape: f32[32,8], index: 8, kind: input, shape index: {}]   ;;  %s1143_s9 = inlined_call_operand.hbm [shape: f32[32,8], index: 9, kind: input, shape index: {}]   ;;  %s1144_s10 = inlined_call_operand.vmem [shape: f32[20,20], index: 10, kind: output, shape index: {0}]   ;;  %s1145_s11 = inlined_call_operand.vmem [shape: f32[16,32], index: 11, kind: output, shape index: {1}]   ;;  %s1146_s12 = inlined_call_operand.vmem [shape: f32[16,8], index: 12, kind: output, shape index: {2}]   ;;  %s1147_s13 = inlined_call_operand.vmem [shape: f32[16,8], index: 13, kind: output, shape index: {3}]  }
   0x1   :  { %20 = vsyncpa [#allocation5], 0 }
   0x2   :  { %21 = vsyncpa [#allocation8], 0 }
   0x3   :  { %22 = vsyncpa [#allocation11], 0  ;;  %s40_s27 = sshll.u32 %s1135_s1, 4  ;;  %s917_s28 = smov [#allocation4]   ;;  %s41_s27 = int_to_ptr.hbm [resolvable:$true] %s40_s27 }
   0x4   :  { %s42_s29 = sshll.u32 %s917_s28, 4  ;;  %s70_s15 = sshll.u32 %s1139_s5, 4  ;;  %s43_s29 = int_to_ptr.vmem [resolvable:$true] %s42_s29  ;;  %s71_s15 = int_to_ptr.hbm [resolvable:$true] %s70_s15 }
   0x5   :  { %s918_s16 = smov 128   ;;  %s919_s17 = smov 8  }
   0x6   :  { %48 = dma.hbm_to_vmem [thread:$0]  %s41_s27, 384, %s43_s29, [#allocation5], %s918_s16, %s918_s16, %s919_s17  }
   0x7   :  { %s920_s18 = smov [#allocation7]   ;;  %s98_s1 = sshll.u32 %s1142_s8, 4  ;;  %s99_s1 = int_to_ptr.hbm [resolvable:$true] %s98_s1 }
   0x8   :  { %s72_s19 = sshll.u32 %s920_s18, 4  ;;  %s27_s23 = sshll.u32 %s1134_s0, 4  ;;  %s73_s19 = int_to_ptr.vmem [resolvable:$true] %s72_s19  ;;  %s28_s23 = int_to_ptr.hbm [resolvable:$true] %s27_s23 }
   0x9   :  { %78 = dma.hbm_to_vmem [thread:$0]  %s71_s15, 512, %s73_s19, [#allocation8], %s918_s16, %s918_s16, %s919_s17  }
   0xa   :  { %s921_s24 = smov [#allocation10]   ;;  %s922_s26 = smov [#allocation2]  }
   0xb   :  { %s100_s25 = sshll.u32 %s921_s24, 4  ;;  %s29_s8 = sshll.u32 %s922_s26, 4  ;;  %s101_s25 = int_to_ptr.vmem [resolvable:$true] %s100_s25  ;;  %s30_s8 = int_to_ptr.vmem [resolvable:$true] %s29_s8 }
   0xc   :  { %106 = dma.hbm_to_vmem [thread:$0]  %s99_s1, 512, %s101_s25, [#allocation11], %s918_s16, %s918_s16, %s919_s17  }
   0xd   :  { %s55_s29 = sshll.u32 %s1137_s3, 4  ;;  %s85_s14 = sshll.u32 %s1141_s7, 4  ;;  %s56_s29 = int_to_ptr.hbm [resolvable:$true] %s55_s29  ;;  %s86_s14 = int_to_ptr.hbm [resolvable:$true] %s85_s14 }
   0xe   :  { %35 = dma.hbm_to_vmem [thread:$0]  %s28_s23, 256, %s30_s8, [#allocation3], %s918_s16, %s918_s16, %s919_s17  }
   0xf   :  { %s923_s15 = smov [#allocation6]   ;;  %s924_s19 = smov [#allocation9]  }
  0x10   :  { %s57_s18 = sshll.u32 %s923_s15, 4  ;;  %s87_s3 = sshll.u32 %s924_s19, 4  ;;  %s58_s18 = int_to_ptr.vmem [resolvable:$true] %s57_s18  ;;  %s88_s3 = int_to_ptr.vmem [resolvable:$true] %s87_s3 }
  0x11   :  { %63 = dma.hbm_to_vmem [thread:$0]  %s56_s29, 512, %s58_s18, [#allocation5], %s918_s16, %s918_s16, %s919_s17  }
  0x12   :  { %s111_s1 = sshll.u32 %s1143_s9, 4  ;;  %s925_s7 = smov [#allocation12]   ;;  %s112_s1 = int_to_ptr.hbm [resolvable:$true] %s111_s1 }
  0x13   :  { %93 = dma.hbm_to_vmem [thread:$0]  %s86_s14, 512, %s88_s3, [#allocation8], %s918_s16, %s918_s16, %s919_s17  }
  0x14   :  { %s113_s5 = sshll.u32 %s925_s7, 4  ;;  %s114_s5 = int_to_ptr.vmem [resolvable:$true] %s113_s5 }
  0x15   :  { %119 = dma.hbm_to_vmem [thread:$0]  %s112_s1, 512, %s114_s5, [#allocation11], %s918_s16, %s918_s16, %s919_s17  }
  0x16   :  { %909 = dma.done.wait [#allocation3], 256  }
  0x17   :  { %910 = vsyncadd [#allocation3], 4294967040 }
  0x18   :  { %911 = dma.done.wait [#allocation5], 896  }
  0x19   :  { %912 = vsyncadd [#allocation5], 4294966400 }
  0x1a   :  { %913 = dma.done.wait [#allocation8], 1024  }
  0x1b   :  { %914 = vsyncadd [#allocation8], 4294966272 }
  0x1c   :  { %915 = dma.done.wait [#allocation11], 1024  }
  0x1d   :  { %916 = vsyncadd [#allocation11], 4294966272  ;;  %v152_v0 = vld [vmem:[#allocation4 + $0x10] sm:$0xff]  ;;  %v151_v1 = vld [vmem:[#allocation4 + $0x8] sm:$0xff]  ;;  %vm157_vm0 = vcmask 195584   ;;  %vm191_vm1 = vcmask 261120  }
  0x1e   :  { %177 = vmatpush.msra.mxu0 %v152_v0  ;;  %v150_v2 = vld [vmem:[#allocation4] sm:$0xff]  ;;  %v148_v3 = vld [vmem:[#allocation2] sm:$0xff]  ;;  %v149_v4 = vld [vmem:[#allocation2 + $0x8] sm:$0xff]  ;;  %vm300_vm8 = vcmask 130048   ;;  %v926_v0 = vmov 256.0   ;;  %s928_s22 = smov 2  }
  0x1f   :  { %v720_v6 = vld [vmem:[%s1136_s2] ss:$0 sm:$0xff]  ;;  %vm373_vm15 = vcmask 15360  }
  0x20   :  { %178 = vmatpush.msra.mxu0 %v151_v1 }
  0x22   :  { %179 = vmatpush.msra.mxu0 %v150_v2 }
  0x23   :  { %685 = vmatmul.msk.f32.vlgmr.msra.gmra.mxu0 %vm157_vm0, %v148_v3 }
  0x2b   :  { %686 = vmatmul.msk.f32.gmra.mxu0 %vm157_vm0, %v149_v4 }
  0xa0   :  { %v181_v5 = vpop.f32.mrf.mxu0 }
  0xa1   :  { %v182_v8 = vadd.f32 %v720_v6, %v181_v5 }
  0xa3   :  { %v187_v11 = vmax.f32 %v182_v8, 0.0 }
  0xa5   :  { %v189_v14 = vmul.f32 %v187_v11, %v187_v11 }
  0xa7   :  { %v192_v15 = vsel %vm191_vm1, %v189_v14, 0.0 }
  0xa8   :  { %v184_v7 = vpop.f32.mrf.mxu0 }
  0xa9   :  { %v185_v9 = vadd.f32 %v720_v6, %v184_v7 }
  0xab   :  { %v188_v10 = vmax.f32 %v185_v9, 0.0 }
  0xad   :  { %480 = vmatpush.msra.mxu2 %v188_v10  ;;  %v190_v12 = vmul.f32 %v188_v10, %v188_v10 }
  0xaf   :  { %481 = vmatpush.msra.mxu2 %v187_v11  ;;  %v195_v13 = vsel %vm191_vm1, %v190_v12, 0.0 }
  0xb0   :  { %196 = vadd.xlane.f32.xlu0 %v195_v13 }
  0xb8   :  { %193 = vadd.xlane.f32.xlu0 %v192_v15 }
 0x123   :  { %v197_v16 = vpop.xlane.xlu0 %196 }
 0x124   :  { %v199_v17 = vmax.f32 %v197_v16, 1e-24 }
 0x126   :  { %723 = vrsqrt.f32 %v199_v17  ;;  %vm216_vm3 = vweird.f32 %v199_v17 }
 0x12b   :  { %v194_v18 = vpop.xlane.xlu0 %193 }
 0x12c   :  { %v724_v19 = vpop.eup %723  ;;  %v198_v20 = vmax.f32 %v194_v18, 1e-24 }
 0x12d   :  { %v211_v21 = vmul.f32 %v724_v19, %v199_v17  ;;  %vm217_vm2 = vweird.f32 %v724_v19 }
 0x12e   :  { %725 = vrsqrt.f32 %v198_v20  ;;  %vm218_vm4 = vmor %vm216_vm3, %vm217_vm2  ;;  %vm206_vm6 = vweird.f32 %v198_v20  ;;  %vm376_vm2 = vcmask 146432  }
 0x12f   :  { %v212_v22 = vmul.f32 %v724_v19, %v211_v21  ;;  %727 = vrcp.f32 %v926_v0 }
 0x131   :  { %v213_v23 = vmul.f32 0.5, %v212_v22 }
 0x133   :  { %v214_v24 = vsub.f32 1.5, %v213_v23  ;;  %v927_v23 = vmov 255.0  }
 0x134   :  { %v726_v25 = vpop.eup %725  ;;  %729 = vrcp.f32 %v927_v23  ;;  %v489_v23 = vld [vmem:[#allocation6] sm:$0xff] }
 0x135   :  { %v201_v26 = vmul.f32 %v726_v25, %v198_v20  ;;  %v215_v27 = vmul.f32 %v724_v19, %v214_v24  ;;  %vm207_vm5 = vweird.f32 %v726_v25  ;;  %v728_v1 = vpop.eup %727 }
 0x136   :  { %vm208_vm7 = vmor %vm206_vm6, %vm207_vm5  ;;  %v315_v2 = vmul.f32 256.0, %v728_v1  ;;  %vm319_vm9 = vweird.f32 %v728_v1  ;;  %vm390_vm5 = vcmask 162816  }
 0x137   :  { %v202_v28 = vmul.f32 %v726_v25, %v201_v26  ;;  %v219_v29 = vsel %vm218_vm4, %v724_v19, %v215_v27  ;;  %vm381_vm4 = vcmask 1041408  }
 0x138   :  { %v221_v30 = vmul.f32 %v219_v29, %v188_v10  ;;  %v316_v3 = vsub.f32 1.0, %v315_v2 }
 0x139   :  { %v203_v31 = vmul.f32 0.5, %v202_v28 }
 0x13a   :  { %687 = vmatpush.xpose.msk.msra.mxu1 %vm191_vm1, %v221_v30  ;;  %v223_v38 = vmul.f32 %v221_v30, %v221_v30  ;;  %v317_v4 = vmul.f32 %v728_v1, %v316_v3  ;;  %v730_v24 = vpop.eup %729 }
 0x13b   :  { %v204_v32 = vsub.f32 1.5, %v203_v31  ;;  %vm344_vm10 = vweird.f32 %v730_v24 }
 0x13c   :  { %v227_v39 = vsel %vm191_vm1, %v223_v38, 0.0  ;;  %v318_v5 = vadd.f32 %v728_v1, %v317_v4 }
 0x13d   :  { %v205_v33 = vmul.f32 %v726_v25, %v204_v32 }
 0x13e   :  { %v320_v6 = vsel %vm319_vm9, %v728_v1, %v318_v5 }
 0x13f   :  { %v209_v34 = vsel %vm208_vm7, %v726_v25, %v205_v33  ;;  %v340_v25 = vmul.f32 255.0, %v730_v24 }
 0x140   :  { %v220_v35 = vmul.f32 %v209_v34, %v187_v11 }
 0x141   :  { %v341_v26 = vsub.f32 1.0, %v340_v25  ;;  %v530_v25 = vld [vmem:[#allocation7 + $0x10] sm:$0xff] }
 0x142   :  { %688 = vmatpush.xpose.msk.msra.mxu1 %vm191_vm1, %v220_v35  ;;  %v222_v36 = vmul.f32 %v220_v35, %v220_v35 }
 0x143   :  { %v342_v27 = vmul.f32 %v730_v24, %v341_v26  ;;  %v529_v26 = vld [vmem:[#allocation7 + $0x8] sm:$0xff] }
 0x144   :  { %v224_v37 = vsel %vm191_vm1, %v222_v36, 0.0 }
 0x145   :  { %689 = vmatmul.msk.f32.vlgmr.msra.gmra.mxu1 %vm191_vm1, %v220_v35  ;;  %225 = vadd.xlane.f32.xlu1 %v224_v37  ;;  %v343_v28 = vadd.f32 %v730_v24, %v342_v27 }
 0x147   :  { %v345_v29 = vsel %vm344_vm10, %v730_v24, %v343_v28  ;;  %vm393_vm10 = vcmask 158720   ;;  %v531_v24 = vld [vmem:[#allocation7 + $0x18] sm:$0xff] }
 0x148   :  { %554 = vmatpush.msrb.mxu2 %v531_v24 }
 0x14a   :  { %555 = vmatpush.msrb.mxu2 %v530_v25 }
 0x14c   :  { %556 = vmatpush.msrb.mxu2 %v529_v26 }
 0x14d   :  { %690 = vmatmul.msk.f32.gmra.mxu1 %vm191_vm1, %v221_v30  ;;  %228 = vadd.xlane.f32.xlu1 %v227_v39 }
 0x1b8   :  { %v226_v40 = vpop.xlane.xlu1 %225 }
 0x1b9   :  { %259 = vxpose.xlu2.b32.start [1/2] (short) (narrow) %v226_v40, 8 }
 0x1c0   :  { %v229_v41 = vpop.xlane.xlu1 %228 }
 0x1c1   :  { %260 = vxpose.xlu2.b32.end [2/2] (short) (narrow) %v229_v41, 8 }
 0x1c2   :  { %v253_v42 = vpop.f32.mrf.mxu1 }
 0x1c3   :  { %v294_v46 = vmul.f32 2.0, %v253_v42 }
 0x1ca   :  { %v256_v43 = vpop.f32.mrf.mxu1 }
 0x1cb   :  { %v295_v47 = vmul.f32 2.0, %v256_v43 }
 0x252   :  { %v275_v44 = vpop.trf.xlu2 }
 0x253   :  { %v291_v45 = vperm.slane %v275_v44, 0 }
 0x255   :  { %v292_v48 = vadd.f32 %v291_v45, %v226_v40  ;;  %v293_v49 = vadd.f32 %v291_v45, %v229_v41 }
 0x257   :  { %v296_v50 = vsub.f32 %v292_v48, %v294_v46  ;;  %v297_v51 = vsub.f32 %v293_v49, %v295_v47 }
 0x259   :  { %v1052_v52 = vmax.f32 %v296_v50, 0.0  ;;  %v1054_v53 = vmax.f32 %v297_v51, 0.0 }
 0x25b   :  { %v301_v54 = vsel %vm300_vm8, %v1052_v52, 0.0  ;;  %v302_v55 = vsel %vm300_vm8, %v1054_v53, 0.0 }
 0x25c   :  { %v303_v56 = vadd.f32 %v302_v55, %v301_v54 }
 0x25e   :  { %304 = vadd.xlane.f32.xlu0 %v303_v56 }
 0x2d1   :  { %v305_v57 = vpop.xlane.xlu0 %304 }
 0x2d2   :  { %v306_v58 = vrot.slane %v305_v57, 4 }
 0x2d4   :  { %v307_v59 = vadd.f32 %v306_v58, %v305_v57 }
 0x2d6   :  { %v308_v60 = vrot.slane %v307_v59, 2 }
 0x2d8   :  { %v309_v61 = vadd.f32 %v308_v60, %v307_v59 }
 0x2da   :  { %v310_v62 = vrot.slane %v309_v61, 1 }
 0x2dc   :  { %v311_v63 = vadd.f32 %v310_v62, %v309_v61 }
 0x2de   :  { %703 = vpush %v311_v63 }
 0x30f   :  { %s704_s2 = spop %703 }
 0x310   :  { %v313_v7 = vstv %s704_s2 }
 0x311   :  { %v321_v8 = vmul.f32 %v320_v6, %v313_v7 }
 0x313   :  { %v322_v9 = vsub.f32 %v1052_v52, %v321_v8  ;;  %v323_v10 = vsub.f32 %v1054_v53, %v321_v8 }
 0x315   :  { %v324_v11 = vmul.f32 %v322_v9, %v322_v9  ;;  %v325_v12 = vmul.f32 %v323_v10, %v323_v10 }
 0x317   :  { %v326_v13 = vsel %vm300_vm8, %v324_v11, 0.0  ;;  %v327_v14 = vsel %vm300_vm8, %v325_v12, 0.0 }
 0x318   :  { %v328_v15 = vadd.f32 %v327_v14, %v326_v13  ;;  %v492_v14 = vld [vmem:[#allocation6 + $0x18] sm:$0xff] }
 0x319   :  { %515 = vmatpush.msra.mxu3 %v492_v14 }
 0x31a   :  { %329 = vadd.xlane.f32.xlu1 %v328_v15  ;;  %v491_v15 = vld [vmem:[#allocation6 + $0x10] sm:$0xff] }
 0x31b   :  { %516 = vmatpush.msra.mxu3 %v491_v15 }
 0x38d   :  { %v330_v16 = vpop.xlane.xlu1 %329 }
 0x38e   :  { %v331_v17 = vrot.slane %v330_v16, 4 }
 0x390   :  { %v332_v18 = vadd.f32 %v331_v17, %v330_v16  ;;  %v490_v16 = vld [vmem:[#allocation6 + $0x8] sm:$0xff] }
 0x391   :  { %517 = vmatpush.msra.mxu3 %v490_v16 }
 0x392   :  { %v333_v19 = vrot.slane %v332_v18, 2 }
 0x393   :  { %518 = vmatpush.msra.mxu3 %v489_v23 }
 0x394   :  { %v334_v20 = vadd.f32 %v333_v19, %v332_v18 }
 0x396   :  { %v335_v21 = vrot.slane %v334_v20, 1 }
 0x398   :  { %v336_v22 = vadd.f32 %v335_v21, %v334_v20 }
 0x39a   :  { %705 = vpush %v336_v22 }
 0x3cb   :  { %s706_s17 = spop %705 }
 0x3cc   :  { %v338_v30 = vstv %s706_s17 }
 0x3cd   :  { %v346_v31 = vmul.f32 %v345_v29, %v338_v30  ;;  %v528_v29 = vld [vmem:[#allocation7] sm:$0xff]  ;;  %v568_v30 = vld [vmem:[#allocation9 + $0x18] sm:$0xff] }
 0x3ce   :  { %557 = vmatpush.msrb.mxu2 %v528_v29  ;;  %587 = vmatpush.msrb.mxu0 %v568_v30 }
 0x3cf   :  { %v347_v32 = vmax.f32 %v346_v31, 1e-24  ;;  %v567_v31 = vld [vmem:[#allocation9 + $0x10] sm:$0xff] }
 0x3d0   :  { %588 = vmatpush.msrb.mxu0 %v567_v31 }
 0x3d1   :  { %731 = vrsqrt.f32 %v347_v32  ;;  %vm354_vm12 = vweird.f32 %v347_v32 }
 0x3d7   :  { %v732_v33 = vpop.eup %731 }
 0x3d8   :  { %v349_v34 = vmul.f32 %v732_v33, %v347_v32  ;;  %vm355_vm11 = vweird.f32 %v732_v33  ;;  %v566_v32 = vld [vmem:[#allocation9 + $0x8] sm:$0xff] }
 0x3d9   :  { %vm356_vm13 = vmor %vm354_vm12, %vm355_vm11  ;;  %589 = vmatpush.msrb.mxu0 %v566_v32 }
 0x3da   :  { %v350_v35 = vmul.f32 %v732_v33, %v349_v34  ;;  %v721_v34 = vld [vmem:[%s1138_s4] ss:$0 sm:$0xff] }
 0x3dc   :  { %v351_v36 = vmul.f32 0.5, %v350_v35 }
 0x3de   :  { %v352_v37 = vsub.f32 1.5, %v351_v36 }
 0x3e0   :  { %v353_v38 = vmul.f32 %v732_v33, %v352_v37 }
 0x3e2   :  { %v357_v39 = vsel %vm356_vm13, %v732_v33, %v353_v38  ;;  %v565_v33 = vld [vmem:[#allocation9] sm:$0xff] }
 0x3e3   :  { %v358_v40 = vmul.f32 -0.5, %v357_v39  ;;  %590 = vmatpush.msrb.mxu0 %v565_v33 }
 0x3e5   :  { %v359_v41 = vmul.f32 %v358_v40, %v1052_v52  ;;  %v360_v42 = vmul.f32 %v358_v40, %v1054_v53 }
 0x3e7   :  { %v361_v43 = vmul.f32 1.442695, %v359_v41  ;;  %v363_v44 = vmul.f32 1.442695, %v360_v42  ;;  %v639_v41 = vld [vmem:[#allocation12 + $0x18] sm:$0xff]  ;;  %v638_v42 = vld [vmem:[#allocation12 + $0x10] sm:$0xff] }
 0x3e8   :  { %652 = vmatpush.msrb.mxu3 %v639_v41 }
 0x3e9   :  { %733 = vpow2.f32 %v361_v43  ;;  %v603_v43 = vld [vmem:[#allocation10 + $0x18] sm:$0xff] }
 0x3ea   :  { %735 = vpow2.f32 %v363_v44  ;;  %622 = vmatpush.msrb.mxu1 %v603_v43  ;;  %v602_v44 = vld [vmem:[#allocation10 + $0x10] sm:$0xff]  ;;  %653 = vmatpush.msrb.mxu3 %v638_v42 }
 0x3ec   :  { %623 = vmatpush.msrb.mxu1 %v602_v44 }
 0x3ef   :  { %v1066_v45 = vpop.eup %733 }
 0x3f0   :  { %v1068_v46 = vpop.eup %735  ;;  %v395_v47 = vsel %vm300_vm8, %v1066_v45, 0.0 }
 0x3f1   :  { %v398_v48 = vsel %vm300_vm8, %v1068_v46, 0.0  ;;  %396 = vadd.xlane.f32.xlu2 %v395_v47  ;;  %v636_v47 = vld [vmem:[#allocation12] sm:$0xff] }
 0x3f2   :  { %399 = vadd.xlane.f32.xlu0 %v398_v48  ;;  %v722_v48 = vld [vmem:[%s1140_s6] ss:$0 sm:$0xff] }
 0x406   :  { %367 = vrot.lane.b32.xlu0 %v1066_v45, %s928_s22 }
 0x40e   :  { %369 = vrot.lane.b32.xlu0 %v1068_v46, %s928_s22 }
 0x464   :  { %v397_v49 = vpop.xlane.xlu2 %396 }
 0x465   :  { %v400_v50 = vpop.xlane.xlu0 %399  ;;  %v401_v51 = vmax.f32 %v397_v49, 1e-12 }
 0x466   :  { %v402_v52 = vmax.f32 %v400_v50, 1e-12 }
 0x467   :  { %737 = vrsqrt.f32 %v401_v51  ;;  %vm409_vm0 = vweird.f32 %v401_v51 }
 0x468   :  { %739 = vrsqrt.f32 %v402_v52  ;;  %vm419_vm7 = vweird.f32 %v402_v52 }
 0x46d   :  { %v738_v53 = vpop.eup %737 }
 0x46e   :  { %v740_v54 = vpop.eup %739  ;;  %v404_v55 = vmul.f32 %v738_v53, %v401_v51  ;;  %vm410_vm14 = vweird.f32 %v738_v53 }
 0x46f   :  { %v414_v56 = vmul.f32 %v740_v54, %v402_v52  ;;  %vm411_vm3 = vmor %vm409_vm0, %vm410_vm14  ;;  %vm420_vm6 = vweird.f32 %v740_v54 }
 0x470   :  { %v405_v57 = vmul.f32 %v738_v53, %v404_v55  ;;  %vm421_vm9 = vmor %vm419_vm7, %vm420_vm6 }
 0x471   :  { %v415_v58 = vmul.f32 %v740_v54, %v414_v56 }
 0x472   :  { %v406_v59 = vmul.f32 0.5, %v405_v57 }
 0x473   :  { %v416_v60 = vmul.f32 0.5, %v415_v58 }
 0x474   :  { %v407_v61 = vsub.f32 1.5, %v406_v59 }
 0x475   :  { %v417_v63 = vsub.f32 1.5, %v416_v60 }
 0x476   :  { %v408_v62 = vmul.f32 %v738_v53, %v407_v61 }
 0x477   :  { %v418_v5 = vmul.f32 %v740_v54, %v417_v63 }
 0x478   :  { %v368_v0 = vpop.permute.xlu0 %367  ;;  %v412_v1 = vsel %vm411_vm3, %v738_v53, %v408_v62  ;;  %v600_v53 = vld [vmem:[#allocation10] sm:$0xff] }
 0x479   :  { %v374_v2 = vsel %vm373_vm15, 0.0, %v368_v0  ;;  %425 = vxpose.xlu1.b32.start [1/2] (short) (narrow) %v412_v1, 8  ;;  %v422_v8 = vsel %vm421_vm9, %v740_v54, %v418_v5  ;;  %v423_v18 = vmul.f32 %v1066_v45, %v412_v1  ;;  %v637_v45 = vld [vmem:[#allocation12 + $0x8] sm:$0xff] }
 0x47a   :  { %v377_v3 = vsel %vm376_vm2, %v374_v2, 0.0  ;;  %v424_v21 = vmul.f32 %v1068_v46, %v422_v8  ;;  %v601_v46 = vld [vmem:[#allocation10 + $0x8] sm:$0xff]  ;;  %654 = vmatpush.msrb.mxu3 %v637_v45 }
 0x47b   :  { %v382_v4 = vrot.slane %v377_v3, 6  ;;  %624 = vmatpush.msrb.mxu1 %v601_v46 }
 0x47c   :  { %655 = vmatpush.msrb.mxu3 %v636_v47 }
 0x47d   :  { %v388_v6 = vsel %vm381_vm4, 0.0, %v382_v4  ;;  %625 = vmatpush.msrb.mxu1 %v600_v53 }
 0x47e   :  { %391 = vst.msk [vmem:[%s1144_s10] sm:$0xff] %vm390_vm5, %v388_v6 }
 0x480   :  { %v370_v7 = vpop.permute.xlu0 %369 }
 0x481   :  { %v375_v9 = vsel %vm373_vm15, 0.0, %v370_v7  ;;  %426 = vxpose.xlu1.b32.end [2/2] (short) (narrow) %v422_v8, 8 }
 0x482   :  { %v378_v10 = vsel %vm376_vm2, %v375_v9, 0.0 }
 0x483   :  { %v383_v11 = vrot.slane %v378_v10, 6 }
 0x485   :  { %v384_v12 = vsel %vm381_vm4, %v382_v4, %v383_v11  ;;  %v389_v13 = vsel %vm381_vm4, %v383_v11, 0.0 }
 0x486   :  { %392 = vst.msk [vmem:[%s1144_s10 + $0x8] sm:$0xff] %vm390_vm5, %v384_v12 }
 0x487   :  { %394 = vst.msk [vmem:[%s1144_s10 + $0x10] sm:$0xf] %vm393_vm10, %v389_v13 }
 0x51d   :  { %v441_v17 = vpop.trf.xlu1 }
 0x51e   :  { %v457_v19 = vperm.slane %v441_v17, 0 }
 0x520   :  { %v458_v20 = vmul.f32 %v457_v19, %v423_v18  ;;  %v459_v22 = vmul.f32 %v457_v19, %v424_v21 }
 0x522   :  { %691 = vmatmul.msk.f32.vlgmr.msra.gmra.mxu2 %vm300_vm8, %v458_v20 }
 0x52a   :  { %692 = vmatmul.msk.f32.gmra.mxu2 %vm300_vm8, %v459_v22  ;;  %vm633_vm8 = vcmask 64512  }
 0x5a5   :  { %v483_v27 = vpop.f32.mrf.mxu2 }
 0x5a6   :  { %693 = vmatmul.msk.f32.vlgmr.msra.gmra.mxu3 %vm191_vm1, %v483_v27 }
 0x5ad   :  { %v486_v28 = vpop.f32.mrf.mxu2 }
 0x5ae   :  { %694 = vmatmul.msk.f32.gmra.mxu3 %vm191_vm1, %v486_v28 }
 0x629   :  { %v520_v35 = vpop.f32.mrf.mxu3 }
 0x62a   :  { %v521_v36 = vadd.f32 %v721_v34, %v520_v35 }
 0x62c   :  { %v526_v37 = vmax.f32 %v521_v36, 0.0 }
 0x62e   :  { %695 = vmatmul.msk.f32.vlgmr.msrb.gmra.mxu2 %vm191_vm1, %v526_v37 }
 0x631   :  { %v523_v38 = vpop.f32.mrf.mxu3 }
 0x632   :  { %v524_v39 = vadd.f32 %v721_v34, %v523_v38 }
 0x634   :  { %v527_v40 = vmax.f32 %v524_v39, 0.0 }
 0x636   :  { %696 = vmatmul.msk.f32.gmra.mxu2 %vm191_vm1, %v527_v40 }
 0x6b1   :  { %v559_v49 = vpop.f32.mrf.mxu2 }
 0x6b2   :  { %v560_v50 = vadd.f32 %v722_v48, %v559_v49 }
 0x6b4   :  { %697 = vmatmul.msk.f32.vlgmr.msrb.gmra.mxu0 %vm191_vm1, %v560_v50 }
 0x6b9   :  { %v562_v51 = vpop.f32.mrf.mxu2 }
 0x6ba   :  { %v563_v52 = vadd.f32 %v722_v48, %v562_v51 }
 0x6bc   :  { %698 = vmatmul.msk.f32.gmra.mxu0 %vm191_vm1, %v563_v52 }
 0x731   :  { %v592_v54 = vpop.f32.mrf.mxu0 }
 0x732   :  { %598 = vst.msk [vmem:[%s1145_s11] sm:$0xff] %vm191_vm1, %v592_v54  ;;  %699 = vmatmul.msk.f32.vlgmr.msrb.gmra.mxu1 %vm191_vm1, %v592_v54  ;;  %701 = vmatmul.msk.f32.vlgmr.msrb.gmra.mxu3 %vm191_vm1, %v592_v54 }
 0x739   :  { %v595_v55 = vpop.f32.mrf.mxu0 }
 0x73a   :  { %599 = vst.msk [vmem:[%s1145_s11 + $0x8] sm:$0xff] %vm191_vm1, %v595_v55  ;;  %700 = vmatmul.msk.f32.gmra.mxu1 %vm191_vm1, %v595_v55  ;;  %702 = vmatmul.msk.f32.gmra.mxu3 %vm191_vm1, %v595_v55 }
 0x7af   :  { %v627_v56 = vpop.f32.mrf.mxu1 }
 0x7b0   :  { %634 = vst.msk [vmem:[%s1146_s12] sm:$0xff] %vm633_vm8, %v627_v56 }
 0x7b5   :  { %v657_v57 = vpop.f32.mrf.mxu3 }
 0x7b6   :  { %663 = vst.msk [vmem:[%s1147_s13] sm:$0xff] %vm633_vm8, %v657_v57 }
 0x7b7   :  { %v630_v58 = vpop.f32.mrf.mxu1 }
 0x7b8   :  { %635 = vst.msk [vmem:[%s1146_s12 + $0x8] sm:$0xff] %vm633_vm8, %v630_v58 }
 0x7bd   :  { %v660_v59 = vpop.f32.mrf.mxu3 }
 0x7be   :  { %664 = vst.msk [vmem:[%s1147_s13 + $0x8] sm:$0xff] %vm633_vm8, %v660_v59 }
 0x7bf   :  { %681 = vsyncpa [#allocation3], 1 }
 0x7c0   :  { %682 = vsyncpa [#allocation5], 1 }
 0x7c1   :  { %683 = vsyncpa [#allocation8], 1 }
 0x7c2   :  { %684 = vsyncpa [#allocation11], 1 }

// kernel: _lambda_.4
= control target key start
LH: loop header
LB: loop body
LE: loop exit
PB: predicated region body
PF: predicated region fallthrough
CT: control target
= control target key end

     0   :  { %s11862_s0 = inlined_call_operand.vmem [shape: f32[20,20], index: 0, kind: input, shape index: {}]   ;;  %s11863_s1 = inlined_call_operand.vmem [shape: f32[16,25], index: 1, kind: input, shape index: {}]   ;;  %s11864_s2 = inlined_call_operand.vmem [shape: f32[16,1], index: 2, kind: input, shape index: {}, may-alias: {2,4}]   ;;  %s11865_s3 = inlined_call_operand.vmem [shape: f32[16,16], index: 3, kind: input, shape index: {}]   ;;  %s11866_s4 = inlined_call_operand.vmem [shape: f32[16,1], index: 4, kind: input, shape index: {}, may-alias: {2,4}]   ;;  %s11867_s5 = inlined_call_operand.vmem [shape: f32[11,16], index: 5, kind: input, shape index: {}]   ;;  %s11868_s6 = inlined_call_operand.vmem [shape: f32[11,1], index: 6, kind: input, shape index: {}]   ;;  %s11869_s7 = inlined_call_operand.vmem [shape: f32[11,128], index: 7, kind: input, shape index: {}]   ;;  %s11870_s8 = inlined_call_operand.vmem [shape: f32[16,32], index: 8, kind: input, shape index: {}]   ;;  %s11871_s9 = inlined_call_operand.vmem [shape: f32[16,8], index: 9, kind: input, shape index: {}]   ;;  %s11872_s10 = inlined_call_operand.vmem [shape: f32[8,16], index: 10, kind: input, shape index: {}]   ;;  %s11873_s11 = inlined_call_operand.hbm [shape: f32[3,16,16], index: 11, kind: output, shape index: {0}]   ;;  %s11874_s12 = inlined_call_operand.vmem [shape: f32[16,16], index: 12, kind: output, shape index: {1}]   ;;  %s11875_s13 = inlined_call_operand.vmem [shape: f32[16,32], index: 13, kind: output, shape index: {2}]  }
   0x1   :  { %v7454_v0 = vld [vmem:[%s11862_s0] sm:$0xff] }
   0x2   :  { %11984 = vst [vmem:[#allocation5_spill] sm:$0xff] %v7454_v0 }
   0x3   :  { %19 = vsyncpa [#allocation3], 0  ;;  %v7457_v1 = vperm.slane %v7454_v0, 0  ;;  %v11885_v2 = vrot.slane %v7454_v0, 4  ;;  %v11888_v3 = vrot.slane %v7454_v0, 2  ;;  %s7357_s27 = smov 127  }
   0x4   :  { %v11887_v6 = vrot.slane %v7454_v0, 1  ;;  %v11884_v7 = vrot.slane %v7454_v0, 5  ;;  %v11889_v8 = vrot.slane %v7454_v0, 3  ;;  %v11883_v12 = vrot.slane %v7454_v0, 6  ;;  %v7501_v14 = vld [vmem:[%s11862_s0 + $0x8] sm:$0xff]  ;;  %s7358_s30 = smov 126  }
   0x5   :  { %94 = vrot.lane.b32.xlu0 %v7457_v1, %s7357_s27  ;;  %v7465_v4 = vperm.slane %v11885_v2, 0  ;;  %v7469_v5 = vperm.slane %v11888_v3, 0  ;;  %v11886_v13 = vrot.slane %v7454_v0, 7  ;;  %11985 = vst [vmem:[#allocation6_spill] sm:$0xff] %v7501_v14  ;;  %v7508_v16 = vperm.slane %v7501_v14, 0  ;;  %s7359_s14 = smov 125  }
   0x6   :  { %v7480_v9 = vperm.slane %v11887_v6, 0  ;;  %v7484_v10 = vperm.slane %v11884_v7, 0  ;;  %v7488_v11 = vperm.slane %v11889_v8, 0  ;;  %v7505_v15 = vperm.slane %v11883_v12, 0  ;;  %s7360_s15 = smov 124   ;;  %v7702_v53 = vld [vmem:[%s11862_s0 + $0x1] sm:$0xff] }
   0x7   :  { %102 = vrot.lane.b32.xlu2 %v7465_v4, %s7357_s27  ;;  %98 = vrot.lane.b32.xlu1 %v7469_v5, %s7357_s27  ;;  %v7512_v17 = vperm.slane %v11886_v13, 0  ;;  %v11880_v18 = vrot.slane %v7501_v14, 1  ;;  %v11881_v19 = vrot.slane %v7501_v14, 3  ;;  %v11882_v20 = vrot.slane %v7501_v14, 2  ;;  %s7361_s24 = smov 123   ;;  %s7362_s22 = smov 118  }
   0x8   :  { %v11878_v24 = vrot.slane %v7501_v14, 4  ;;  %v11877_v25 = vrot.slane %v7501_v14, 6  ;;  %v11879_v26 = vrot.slane %v7501_v14, 5  ;;  %v11876_v30 = vrot.slane %v7501_v14, 7  ;;  %s7363_s16 = smov 113   ;;  %s7364_s20 = smov 108  }
   0x9   :  { %v7525_v21 = vperm.slane %v11880_v18, 0  ;;  %v7529_v22 = vperm.slane %v11881_v19, 0  ;;  %v7533_v23 = vperm.slane %v11882_v20, 0  ;;  %v11901_v55 = vrot.slane %v7702_v53, 1  ;;  %s7375_s25 = smov 20   ;;  %s7376_s26 = smov 16  }
   0xa   :  { %v7546_v27 = vperm.slane %v11878_v24, 0  ;;  %v7550_v28 = vperm.slane %v11877_v25, 0  ;;  %v7554_v29 = vperm.slane %v11879_v26, 0  ;;  %v7565_v31 = vperm.slane %v11876_v30, 0  ;;  %s7377_s28 = smov 24   ;;  %s6826_s17 = sshll.u32 %s11873_s11, 4  ;;  %s6827_s17 = int_to_ptr.hbm [resolvable:$true] %s6826_s17 }
   0xb   :  { %v7718_v58 = vperm.slane %v7702_v53, 0  ;;  %v7722_v59 = vperm.slane %v11901_v55, 0  ;;  %v11899_v60 = vrot.slane %v7702_v53, 2  ;;  %v11898_v62 = vrot.slane %v7702_v53, 3 }
   0xc   :  { %v11900_v63 = vrot.slane %v7702_v53, 4  ;;  %vm286_vm0 = vcmask 1040384   ;;  %vm303_vm1 = vcmask 1041408   ;;  %v12062_v0 = vrot.slane %v7702_v53, 1 }
   0xd   :  { %96 = vrot.lane.b32.xlu0 %v7480_v9, %s7357_s27  ;;  %vm320_vm2 = vcmask 1042432   ;;  %vm671_vm3 = vcmask 1044480   ;;  %vm337_vm4 = vcmask 1043456   ;;  %vm666_vm5 = vcmask 39936  }
   0xe   :  { %vm3884_vm6 = vcmask 130048   ;;  %vm5497_vm14 = vcmask 1043459   ;;  %vm5500_vm15 = vcmask 1044484  }
   0xf   :  { %104 = vrot.lane.b32.xlu2 %v7484_v10, %s7357_s27  ;;  %100 = vrot.lane.b32.xlu1 %v7488_v11, %s7357_s27 }
  0x15   :  { %106 = vrot.lane.b32.xlu0 %v7505_v15, %s7357_s27 }
  0x17   :  { %110 = vrot.lane.b32.xlu2 %v7508_v16, %s7357_s27  ;;  %108 = vrot.lane.b32.xlu1 %v7512_v17, %s7357_s27 }
  0x1d   :  { %112 = vrot.lane.b32.xlu0 %v7525_v21, %s7357_s27 }
  0x1f   :  { %116 = vrot.lane.b32.xlu2 %v7529_v22, %s7357_s27  ;;  %114 = vrot.lane.b32.xlu1 %v7533_v23, %s7357_s27 }
  0x25   :  { %118 = vrot.lane.b32.xlu0 %v7546_v27, %s7357_s27 }
  0x27   :  { %122 = vrot.lane.b32.xlu2 %v7550_v28, %s7357_s27  ;;  %120 = vrot.lane.b32.xlu1 %v7554_v29, %s7357_s27 }
  0x2d   :  { %124 = vrot.lane.b32.xlu0 %v7565_v31, %s7357_s27 }
  0x2f   :  { %142 = vrot.lane.b32.xlu1 %v7457_v1, %s7358_s30  ;;  %144 = vrot.lane.b32.xlu2 %v7480_v9, %s7358_s30 }
  0x35   :  { %146 = vrot.lane.b32.xlu0 %v7469_v5, %s7358_s30 }
  0x37   :  { %148 = vrot.lane.b32.xlu1 %v7488_v11, %s7358_s30  ;;  %150 = vrot.lane.b32.xlu2 %v7465_v4, %s7358_s30 }
  0x3d   :  { %152 = vrot.lane.b32.xlu0 %v7484_v10, %s7358_s30 }
  0x3f   :  { %154 = vrot.lane.b32.xlu1 %v7505_v15, %s7358_s30  ;;  %156 = vrot.lane.b32.xlu2 %v7512_v17, %s7358_s30 }
  0x45   :  { %158 = vrot.lane.b32.xlu0 %v7508_v16, %s7358_s30 }
  0x47   :  { %160 = vrot.lane.b32.xlu1 %v7525_v21, %s7358_s30  ;;  %162 = vrot.lane.b32.xlu2 %v7533_v23, %s7358_s30 }
  0x4d   :  { %164 = vrot.lane.b32.xlu0 %v7529_v22, %s7358_s30 }
  0x4f   :  { %166 = vrot.lane.b32.xlu1 %v7546_v27, %s7358_s30  ;;  %168 = vrot.lane.b32.xlu2 %v7554_v29, %s7358_s30 }
  0x55   :  { %170 = vrot.lane.b32.xlu0 %v7550_v28, %s7358_s30 }
  0x57   :  { %172 = vrot.lane.b32.xlu1 %v7565_v31, %s7358_s30  ;;  %190 = vrot.lane.b32.xlu2 %v7457_v1, %s7359_s14 }
  0x5d   :  { %192 = vrot.lane.b32.xlu0 %v7480_v9, %s7359_s14 }
  0x5f   :  { %194 = vrot.lane.b32.xlu1 %v7469_v5, %s7359_s14  ;;  %196 = vrot.lane.b32.xlu2 %v7488_v11, %s7359_s14 }
  0x61   :  { %v7609_v32 = vpop.permute.xlu2 %102 }
  0x62   :  { %11986 = vst [vmem:[#allocation7_spill] sm:$0xff] %v7609_v32 }
  0x65   :  { %198 = vrot.lane.b32.xlu0 %v7465_v4, %s7359_s14 }
  0x67   :  { %200 = vrot.lane.b32.xlu1 %v7484_v10, %s7359_s14  ;;  %202 = vrot.lane.b32.xlu2 %v7505_v15, %s7359_s14 }
  0x69   :  { %v7617_v33 = vpop.permute.xlu2 %104 }
  0x6a   :  { %11987 = vst [vmem:[#allocation8_spill] sm:$0xff] %v7617_v33 }
  0x6d   :  { %204 = vrot.lane.b32.xlu0 %v7512_v17, %s7359_s14 }
  0x6f   :  { %206 = vrot.lane.b32.xlu1 %v7508_v16, %s7359_s14  ;;  %208 = vrot.lane.b32.xlu2 %v7525_v21, %s7359_s14 }
  0x71   :  { %v7625_v34 = vpop.permute.xlu2 %110 }
  0x72   :  { %11988 = vst [vmem:[#allocation9_spill] sm:$0xff] %v7625_v34 }
  0x75   :  { %210 = vrot.lane.b32.xlu0 %v7533_v23, %s7359_s14 }
  0x77   :  { %v7629_v35 = vpop.permute.xlu0 %94  ;;  %212 = vrot.lane.b32.xlu1 %v7529_v22, %s7359_s14  ;;  %214 = vrot.lane.b32.xlu2 %v7546_v27, %s7359_s14 }
  0x78   :  { %11989 = vst [vmem:[#allocation10_spill] sm:$0xff] %v7629_v35 }
  0x79   :  { %v7635_v36 = vpop.permute.xlu2 %116  ;;  %v7637_v37 = vpop.permute.xlu1 %98 }
  0x7a   :  { %11990 = vst [vmem:[#allocation11_spill] sm:$0xff] %v7635_v36 }
  0x7b   :  { %11991 = vst [vmem:[#allocation12_spill] sm:$0xff] %v7637_v37 }
  0x7d   :  { %216 = vrot.lane.b32.xlu0 %v7554_v29, %s7359_s14 }
  0x7f   :  { %218 = vrot.lane.b32.xlu1 %v7550_v28, %s7359_s14  ;;  %220 = vrot.lane.b32.xlu2 %v7565_v31, %s7359_s14  ;;  %v7645_v38 = vpop.permute.xlu0 %96 }
  0x80   :  { %11992 = vst [vmem:[#allocation13_spill] sm:$0xff] %v7645_v38 }
  0x81   :  { %v7647_v39 = vpop.permute.xlu2 %122  ;;  %v7649_v40 = vpop.permute.xlu1 %100 }
  0x82   :  { %11993 = vst [vmem:[#allocation14_spill] sm:$0xff] %v7647_v39 }
  0x83   :  { %11994 = vst [vmem:[#allocation15_spill] sm:$0xff] %v7649_v40 }
  0x85   :  { %238 = vrot.lane.b32.xlu0 %v7457_v1, %s7360_s15 }
  0x87   :  { %240 = vrot.lane.b32.xlu1 %v7480_v9, %s7360_s15  ;;  %242 = vrot.lane.b32.xlu2 %v7469_v5, %s7360_s15  ;;  %v7657_v41 = vpop.permute.xlu0 %106  ;;  %v7741_v5 = vperm.slane %v11899_v60, 0  ;;  %v7745_v9 = vperm.slane %v11898_v62, 0 }
  0x88   :  { %11995 = vst [vmem:[#allocation16_spill] sm:$0xff] %v7657_v41 }
  0x89   :  { %v7659_v42 = vpop.permute.xlu1 %108  ;;  %v7661_v43 = vpop.permute.xlu2 %144 }
  0x8a   :  { %11996 = vst [vmem:[#allocation17_spill] sm:$0xff] %v7659_v42  ;;  %v8139_v42 = vld [vmem:[%s11862_s0 + $0xa] sm:$0xff] }
  0x8b   :  { %11997 = vst [vmem:[#allocation18_spill] sm:$0xff] %v7661_v43  ;;  %v11926_v38 = vrot.slane %v8139_v42, 6 }
  0x8c   :  { %12058 = vst [vmem:[#allocation79_spill] sm:$0xff] %v8139_v42 }
  0x8d   :  { %244 = vrot.lane.b32.xlu0 %v7488_v11, %s7360_s15  ;;  %v11895_v11 = vrot.slane %v7702_v53, 5 }
  0x8f   :  { %246 = vrot.lane.b32.xlu1 %v7465_v4, %s7360_s15  ;;  %248 = vrot.lane.b32.xlu2 %v7484_v10, %s7360_s15  ;;  %v7669_v44 = vpop.permute.xlu0 %112  ;;  %v7749_v10 = vperm.slane %v11900_v63, 0 }
  0x90   :  { %11998 = vst [vmem:[#allocation19_spill] sm:$0xff] %v7669_v44 }
  0x91   :  { %v7671_v45 = vpop.permute.xlu1 %114  ;;  %v7673_v46 = vpop.permute.xlu2 %150 }
  0x92   :  { %11999 = vst [vmem:[#allocation20_spill] sm:$0xff] %v7671_v45  ;;  %v8052_v45 = vld [vmem:[%s11863_s1] sm:$0xff] }
  0x93   :  { %12000 = vst [vmem:[#allocation21_spill] sm:$0xff] %v7673_v46 }
  0x94   :  { %12054 = vst [vmem:[#allocation75_spill] sm:$0xff] %v8052_v45 }
  0x95   :  { %250 = vrot.lane.b32.xlu0 %v7505_v15, %s7360_s15 }
  0x97   :  { %252 = vrot.lane.b32.xlu1 %v7512_v17, %s7360_s15  ;;  %254 = vrot.lane.b32.xlu2 %v7508_v16, %s7360_s15  ;;  %v7681_v47 = vpop.permute.xlu0 %118  ;;  %v11892_v16 = vrot.slane %v7702_v53, 6  ;;  %v11896_v17 = vrot.slane %v7702_v53, 7 }
  0x98   :  { %12001 = vst [vmem:[#allocation22_spill] sm:$0xff] %v7681_v47 }
  0x99   :  { %v7683_v48 = vpop.permute.xlu1 %120  ;;  %v7685_v49 = vpop.permute.xlu2 %156 }
  0x9a   :  { %12002 = vst [vmem:[#allocation23_spill] sm:$0xff] %v7683_v48 }
  0x9b   :  { %12003 = vst [vmem:[#allocation24_spill] sm:$0xff] %v7685_v49 }
  0x9d   :  { %256 = vrot.lane.b32.xlu0 %v7525_v21, %s7360_s15 }
  0x9f   :  { %258 = vrot.lane.b32.xlu1 %v7533_v23, %s7360_s15  ;;  %260 = vrot.lane.b32.xlu2 %v7529_v22, %s7360_s15  ;;  %v7693_v50 = vpop.permute.xlu0 %124  ;;  %v7768_v23 = vperm.slane %v11895_v11, 0 }
  0xa0   :  { %12004 = vst [vmem:[#allocation25_spill] sm:$0xff] %v7693_v50 }
  0xa1   :  { %v7695_v51 = vpop.permute.xlu1 %142  ;;  %v7697_v52 = vpop.permute.xlu2 %162 }
  0xa2   :  { %12005 = vst [vmem:[#allocation26_spill] sm:$0xff] %v7695_v51 }
  0xa3   :  { %12006 = vst [vmem:[#allocation27_spill] sm:$0xff] %v7697_v52 }
  0xa5   :  { %262 = vrot.lane.b32.xlu0 %v7546_v27, %s7360_s15  ;;  %v7772_v27 = vperm.slane %v11892_v16, 0 }
  0xa7   :  { %264 = vrot.lane.b32.xlu1 %v7554_v29, %s7360_s15  ;;  %266 = vrot.lane.b32.xlu2 %v7550_v28, %s7360_s15  ;;  %v7710_v54 = vpop.permute.xlu0 %146  ;;  %v7776_v28 = vperm.slane %v11896_v17, 0  ;;  %v7781_v29 = vld [vmem:[%s11862_s0 + $0x9] sm:$0xff] }
  0xa8   :  { %12007 = vst [vmem:[#allocation28_spill] sm:$0xff] %v7710_v54  ;;  %v11890_v30 = vrot.slane %v7781_v29, 1  ;;  %v11891_v25 = vrot.slane %v7781_v29, 2  ;;  %v7798_v18 = vperm.slane %v7781_v29, 0  ;;  %v11893_v12 = vrot.slane %v7781_v29, 3 }
  0xa9   :  { %v7713_v56 = vpop.permute.xlu1 %148  ;;  %v7715_v57 = vpop.permute.xlu2 %168  ;;  %v11894_v2 = vrot.slane %v7781_v29, 4  ;;  %v11897_v13 = vrot.slane %v7781_v29, 5  ;;  %v11902_v16 = vrot.slane %v7781_v29, 6 }
  0xaa   :  { %12008 = vst [vmem:[#allocation29_spill] sm:$0xff] %v7713_v56  ;;  %v7802_v19 = vperm.slane %v11890_v30, 0  ;;  %v7806_v20 = vperm.slane %v11891_v25, 0  ;;  %v7825_v8 = vperm.slane %v11893_v12, 0 }
  0xab   :  { %12009 = vst [vmem:[#allocation30_spill] sm:$0xff] %v7715_v57  ;;  %v7829_v30 = vperm.slane %v11894_v2, 0  ;;  %v7833_v25 = vperm.slane %v11897_v13, 0  ;;  %v11903_v2 = vrot.slane %v7781_v29, 7  ;;  %v7851_v13 = vperm.slane %v11902_v16, 0 }
  0xad   :  { %268 = vrot.lane.b32.xlu0 %v7565_v31, %s7360_s15  ;;  %v7855_v62 = vperm.slane %v11903_v2, 0 }
  0xaf   :  { %404 = vrot.lane.b32.xlu1 %v7718_v58, %s7357_s27  ;;  %406 = vrot.lane.b32.xlu2 %v7722_v59, %s7357_s27  ;;  %v7731_v61 = vpop.permute.xlu0 %152 }
  0xb0   :  { %12010 = vst [vmem:[#allocation31_spill] sm:$0xff] %v7731_v61 }
  0xb1   :  { %v7735_v1 = vpop.permute.xlu1 %154  ;;  %v7737_v4 = vpop.permute.xlu2 %190 }
  0xb2   :  { %12011 = vst [vmem:[#allocation32_spill] sm:$0xff] %v7735_v1 }
  0xb3   :  { %12012 = vst [vmem:[#allocation33_spill] sm:$0xff] %v7737_v4 }
  0xb5   :  { %408 = vrot.lane.b32.xlu0 %v7741_v5, %s7357_s27 }
  0xb7   :  { %410 = vrot.lane.b32.xlu1 %v7745_v9, %s7357_s27  ;;  %412 = vrot.lane.b32.xlu2 %v7749_v10, %s7357_s27  ;;  %v7758_v15 = vpop.permute.xlu0 %158 }
  0xb8   :  { %12013 = vst [vmem:[#allocation34_spill] sm:$0xff] %v7758_v15 }
  0xb9   :  { %v7762_v21 = vpop.permute.xlu1 %160  ;;  %v7764_v22 = vpop.permute.xlu2 %196 }
  0xba   :  { %12014 = vst [vmem:[#allocation35_spill] sm:$0xff] %v7762_v21 }
  0xbb   :  { %12015 = vst [vmem:[#allocation36_spill] sm:$0xff] %v7764_v22  ;;  %v11921_v22 = vrot.slane %v8139_v42, 4 }
  0xbd   :  { %414 = vrot.lane.b32.xlu0 %v7768_v23, %s7357_s27  ;;  %v8183_v51 = vperm.slane %v11921_v22, 0  ;;  %v11927_v22 = vrot.slane %v8139_v42, 7 }
  0xbf   :  { %416 = vrot.lane.b32.xlu1 %v7772_v27, %s7357_s27  ;;  %418 = vrot.lane.b32.xlu2 %v7776_v28, %s7357_s27  ;;  %v7789_v31 = vpop.permute.xlu0 %164  ;;  %v8207_v37 = vperm.slane %v11927_v22, 0 }
  0xc0   :  { %12016 = vst [vmem:[#allocation37_spill] sm:$0xff] %v7789_v31 }
  0xc1   :  { %v7793_v24 = vpop.permute.xlu1 %166  ;;  %v7795_v26 = vpop.permute.xlu2 %202 }
  0xc2   :  { %12017 = vst [vmem:[#allocation38_spill] sm:$0xff] %v7793_v24 }
  0xc3   :  { %12018 = vst [vmem:[#allocation39_spill] sm:$0xff] %v7795_v26 }
  0xc5   :  { %420 = vrot.lane.b32.xlu0 %v7798_v18, %s7357_s27 }
  0xc7   :  { %422 = vrot.lane.b32.xlu1 %v7802_v19, %s7357_s27  ;;  %424 = vrot.lane.b32.xlu2 %v7806_v20, %s7357_s27  ;;  %v7815_v7 = vpop.permute.xlu0 %170 }
  0xc8   :  { %12019 = vst [vmem:[#allocation40_spill] sm:$0xff] %v7815_v7 }
  0xc9   :  { %v7819_v6 = vpop.permute.xlu1 %172  ;;  %v7821_v3 = vpop.permute.xlu2 %208 }
  0xca   :  { %12020 = vst [vmem:[#allocation41_spill] sm:$0xff] %v7819_v6 }
  0xcb   :  { %12021 = vst [vmem:[#allocation42_spill] sm:$0xff] %v7821_v3 }
  0xcd   :  { %426 = vrot.lane.b32.xlu0 %v7825_v8, %s7357_s27 }
  0xcf   :  { %428 = vrot.lane.b32.xlu1 %v7829_v30, %s7357_s27  ;;  %430 = vrot.lane.b32.xlu2 %v7833_v25, %s7357_s27  ;;  %v7842_v12 = vpop.permute.xlu0 %192 }
  0xd0   :  { %12022 = vst [vmem:[#allocation43_spill] sm:$0xff] %v7842_v12 }
  0xd1   :  { %v7845_v11 = vpop.permute.xlu1 %194  ;;  %v7847_v17 = vpop.permute.xlu2 %214 }
  0xd2   :  { %12023 = vst [vmem:[#allocation44_spill] sm:$0xff] %v7845_v11  ;;  %v11922_v11 = vrot.slane %v8139_v42, 3 }
  0xd3   :  { %12024 = vst [vmem:[#allocation45_spill] sm:$0xff] %v7847_v17 }
  0xd5   :  { %432 = vrot.lane.b32.xlu0 %v7851_v13, %s7357_s27 }
  0xd7   :  { %434 = vrot.lane.b32.xlu1 %v7855_v62, %s7357_s27  ;;  %452 = vrot.lane.b32.xlu2 %v7718_v58, %s7358_s30  ;;  %v7863_v60 = vpop.permute.xlu0 %198 }
  0xd8   :  { %12025 = vst [vmem:[#allocation46_spill] sm:$0xff] %v7863_v60 }
  0xd9   :  { %v7865_v63 = vpop.permute.xlu1 %200  ;;  %v7867_v55 = vpop.permute.xlu2 %220 }
  0xda   :  { %12026 = vst [vmem:[#allocation47_spill] sm:$0xff] %v7865_v63 }
  0xdb   :  { %12027 = vst [vmem:[#allocation48_spill] sm:$0xff] %v7867_v55 }
  0xdd   :  { %454 = vrot.lane.b32.xlu0 %v7722_v59, %s7358_s30 }
  0xdf   :  { %456 = vrot.lane.b32.xlu1 %v7741_v5, %s7358_s30  ;;  %458 = vrot.lane.b32.xlu2 %v7745_v9, %s7358_s30  ;;  %v7875_v16 = vpop.permute.xlu0 %204 }
  0xe0   :  { %12028 = vst [vmem:[#allocation49_spill] sm:$0xff] %v7875_v16 }
  0xe1   :  { %v7877_v2 = vpop.permute.xlu1 %206  ;;  %v7879_v17 = vpop.permute.xlu2 %242 }
  0xe2   :  { %12029 = vst [vmem:[#allocation50_spill] sm:$0xff] %v7877_v2 }
  0xe3   :  { %12030 = vst [vmem:[#allocation51_spill] sm:$0xff] %v7879_v17  ;;  %v8156_v17 = vperm.slane %v8139_v42, 0 }
  0xe5   :  { %460 = vrot.lane.b32.xlu0 %v7749_v10, %s7358_s30 }
  0xe7   :  { %462 = vrot.lane.b32.xlu1 %v7768_v23, %s7358_s30  ;;  %464 = vrot.lane.b32.xlu2 %v7772_v27, %s7358_s30  ;;  %v7887_v55 = vpop.permute.xlu0 %210 }
  0xe8   :  { %12031 = vst [vmem:[#allocation52_spill] sm:$0xff] %v7887_v55 }
  0xe9   :  { %v7889_v6 = vpop.permute.xlu1 %212  ;;  %v7891_v7 = vpop.permute.xlu2 %248 }
  0xea   :  { %12032 = vst [vmem:[#allocation53_spill] sm:$0xff] %v7889_v6 }
  0xeb   :  { %12033 = vst [vmem:[#allocation54_spill] sm:$0xff] %v7891_v7 }
  0xed   :  { %466 = vrot.lane.b32.xlu0 %v7776_v28, %s7358_s30 }
  0xef   :  { %468 = vrot.lane.b32.xlu1 %v7798_v18, %s7358_s30  ;;  %470 = vrot.lane.b32.xlu2 %v7802_v19, %s7358_s30  ;;  %v7899_v24 = vpop.permute.xlu0 %216 }
  0xf0   :  { %12034 = vst [vmem:[#allocation55_spill] sm:$0xff] %v7899_v24 }
  0xf1   :  { %v7901_v57 = vpop.permute.xlu1 %218  ;;  %v7903_v50 = vpop.permute.xlu2 %254 }
  0xf2   :  { %12035 = vst [vmem:[#allocation56_spill] sm:$0xff] %v7901_v57 }
  0xf3   :  { %12036 = vst [vmem:[#allocation57_spill] sm:$0xff] %v7903_v50 }
  0xf5   :  { %472 = vrot.lane.b32.xlu0 %v7806_v20, %s7358_s30 }
  0xf7   :  { %474 = vrot.lane.b32.xlu1 %v7825_v8, %s7358_s30  ;;  %476 = vrot.lane.b32.xlu2 %v7829_v30, %s7358_s30  ;;  %v7911_v39 = vpop.permute.xlu0 %238 }
  0xf8   :  { %12037 = vst [vmem:[#allocation58_spill] sm:$0xff] %v7911_v39 }
  0xf9   :  { %v7913_v47 = vpop.permute.xlu1 %240  ;;  %v7915_v48 = vpop.permute.xlu2 %260 }
  0xfa   :  { %12038 = vst [vmem:[#allocation59_spill] sm:$0xff] %v7913_v47 }
  0xfb   :  { %12039 = vst [vmem:[#allocation60_spill] sm:$0xff] %v7915_v48 }
  0xfd   :  { %478 = vrot.lane.b32.xlu0 %v7833_v25, %s7358_s30 }
  0xff   :  { %480 = vrot.lane.b32.xlu1 %v7851_v13, %s7358_s30  ;;  %482 = vrot.lane.b32.xlu2 %v7855_v62, %s7358_s30  ;;  %v7923_v57 = vpop.permute.xlu0 %244 }
 0x100   :  { %12040 = vst [vmem:[#allocation61_spill] sm:$0xff] %v7923_v57 }
 0x101   :  { %v7925_v24 = vpop.permute.xlu1 %246  ;;  %v7927_v50 = vpop.permute.xlu2 %266 }
 0x102   :  { %12041 = vst [vmem:[#allocation62_spill] sm:$0xff] %v7925_v24  ;;  %v8074_v24 = vld [vmem:[%s11863_s1 + $0x8] sm:$0xff] }
 0x103   :  { %12042 = vst [vmem:[#allocation63_spill] sm:$0xff] %v7927_v50 }
 0x104   :  { %12057 = vst [vmem:[#allocation78_spill] sm:$0xff] %v8074_v24 }
 0x105   :  { %500 = vrot.lane.b32.xlu0 %v7718_v58, %s7359_s14 }
 0x107   :  { %502 = vrot.lane.b32.xlu1 %v7722_v59, %s7359_s14  ;;  %504 = vrot.lane.b32.xlu2 %v7741_v5, %s7359_s14  ;;  %v7935_v48 = vpop.permute.xlu0 %250 }
 0x108   :  { %12043 = vst [vmem:[#allocation64_spill] sm:$0xff] %v7935_v48 }
 0x109   :  { %v7937_v6 = vpop.permute.xlu1 %252  ;;  %v7939_v55 = vpop.permute.xlu2 %406 }
 0x10a   :  { %12044 = vst [vmem:[#allocation65_spill] sm:$0xff] %v7937_v6  ;;  %v597_v40 = vsel %vm286_vm0, %v12062_v0, %v7939_v55 }
 0x10d   :  { %506 = vrot.lane.b32.xlu0 %v7745_v9, %s7359_s14 }
 0x10f   :  { %508 = vrot.lane.b32.xlu1 %v7749_v10, %s7359_s14  ;;  %510 = vrot.lane.b32.xlu2 %v7768_v23, %s7359_s14  ;;  %v7947_v50 = vpop.permute.xlu0 %256 }
 0x110   :  { %12045 = vst [vmem:[#allocation66_spill] sm:$0xff] %v7947_v50 }
 0x111   :  { %v7949_v2 = vpop.permute.xlu1 %258  ;;  %v7951_v3 = vpop.permute.xlu2 %412 }
 0x112   :  { %12046 = vst [vmem:[#allocation67_spill] sm:$0xff] %v7949_v2 }
 0x115   :  { %512 = vrot.lane.b32.xlu0 %v7772_v27, %s7359_s14 }
 0x117   :  { %514 = vrot.lane.b32.xlu1 %v7776_v28, %s7359_s14  ;;  %516 = vrot.lane.b32.xlu2 %v7798_v18, %s7359_s14  ;;  %v7959_v31 = vpop.permute.xlu0 %262 }
 0x118   :  { %12047 = vst [vmem:[#allocation68_spill] sm:$0xff] %v7959_v31 }
 0x119   :  { %v7961_v21 = vpop.permute.xlu1 %264  ;;  %v7963_v15 = vpop.permute.xlu2 %418 }
 0x11a   :  { %12048 = vst [vmem:[#allocation69_spill] sm:$0xff] %v7961_v21 }
 0x11d   :  { %518 = vrot.lane.b32.xlu0 %v7802_v19, %s7359_s14 }
 0x11f   :  { %520 = vrot.lane.b32.xlu1 %v7806_v20, %s7359_s14  ;;  %522 = vrot.lane.b32.xlu2 %v7825_v8, %s7359_s14  ;;  %v7971_v2 = vpop.permute.xlu0 %268 }
 0x120   :  { %12049 = vst [vmem:[#allocation70_spill] sm:$0xff] %v7971_v2 }
 0x121   :  { %v7973_v50 = vpop.permute.xlu1 %404  ;;  %v7975_v52 = vpop.permute.xlu2 %424 }
 0x125   :  { %524 = vrot.lane.b32.xlu0 %v7829_v30, %s7359_s14 }
 0x127   :  { %526 = vrot.lane.b32.xlu1 %v7833_v25, %s7359_s14  ;;  %528 = vrot.lane.b32.xlu2 %v7851_v13, %s7359_s14  ;;  %v7983_v21 = vpop.permute.xlu0 %408 }
 0x129   :  { %v7985_v31 = vpop.permute.xlu1 %410  ;;  %v7987_v44 = vpop.permute.xlu2 %430 }
 0x12a   :  { %12050 = vst [vmem:[#allocation71_spill] sm:$0xff] %v7987_v44 }
 0x12d   :  { %530 = vrot.lane.b32.xlu0 %v7855_v62, %s7359_s14 }
 0x12f   :  { %548 = vrot.lane.b32.xlu1 %v7718_v58, %s7360_s15  ;;  %550 = vrot.lane.b32.xlu2 %v7722_v59, %s7360_s15  ;;  %v7995_v2 = vpop.permute.xlu0 %414 }
 0x131   :  { %v7997_v36 = vpop.permute.xlu1 %416  ;;  %v7999_v34 = vpop.permute.xlu2 %452 }
 0x135   :  { %552 = vrot.lane.b32.xlu0 %v7741_v5, %s7360_s15 }
 0x137   :  { %554 = vrot.lane.b32.xlu1 %v7745_v9, %s7360_s15  ;;  %556 = vrot.lane.b32.xlu2 %v7749_v10, %s7360_s15  ;;  %v8007_v14 = vpop.permute.xlu0 %420 }
 0x139   :  { %v8009_v58 = vpop.permute.xlu1 %422  ;;  %v8011_v59 = vpop.permute.xlu2 %458 }
 0x13d   :  { %558 = vrot.lane.b32.xlu0 %v7768_v23, %s7360_s15 }
 0x13f   :  { %560 = vrot.lane.b32.xlu1 %v7772_v27, %s7360_s15  ;;  %562 = vrot.lane.b32.xlu2 %v7776_v28, %s7360_s15  ;;  %v8019_v5 = vpop.permute.xlu0 %426 }
 0x141   :  { %v8021_v9 = vpop.permute.xlu1 %428  ;;  %v8023_v10 = vpop.permute.xlu2 %464 }
 0x145   :  { %564 = vrot.lane.b32.xlu0 %v7798_v18, %s7360_s15 }
 0x147   :  { %566 = vrot.lane.b32.xlu1 %v7802_v19, %s7360_s15  ;;  %568 = vrot.lane.b32.xlu2 %v7806_v20, %s7360_s15  ;;  %v8031_v23 = vpop.permute.xlu0 %432 }
 0x148   :  { %12051 = vst [vmem:[#allocation72_spill] sm:$0xff] %v8031_v23 }
 0x149   :  { %v8033_v27 = vpop.permute.xlu1 %434  ;;  %v8035_v28 = vpop.permute.xlu2 %470 }
 0x14a   :  { %12052 = vst [vmem:[#allocation73_spill] sm:$0xff] %v8033_v27 }
 0x14d   :  { %570 = vrot.lane.b32.xlu0 %v7825_v8, %s7360_s15  ;;  %v8057_v8 = vld [vmem:[%s11862_s0 + $0x2] sm:$0xff] }
 0x14e   :  { %12055 = vst [vmem:[#allocation76_spill] sm:$0xff] %v8057_v8  ;;  %v11911_v16 = vrot.slane %v8057_v8, 3  ;;  %v11913_v63 = vrot.slane %v8057_v8, 4  ;;  %v11914_v61 = vrot.slane %v8057_v8, 5 }
 0x14f   :  { %572 = vrot.lane.b32.xlu1 %v7829_v30, %s7360_s15  ;;  %574 = vrot.lane.b32.xlu2 %v7833_v25, %s7360_s15  ;;  %v8043_v18 = vpop.permute.xlu0 %454  ;;  %v11908_v30 = vrot.slane %v8057_v8, 1 }
 0x150   :  { %v8103_v26 = vperm.slane %v11911_v16, 0  ;;  %v8107_v1 = vperm.slane %v11913_v63, 0  ;;  %v11915_v16 = vrot.slane %v8057_v8, 6  ;;  %v8126_v41 = vperm.slane %v11914_v61, 0 }
 0x151   :  { %v8045_v19 = vpop.permute.xlu1 %456  ;;  %v8047_v20 = vpop.permute.xlu2 %476 }
 0x152   :  { %12053 = vst [vmem:[#allocation74_spill] sm:$0xff] %v8047_v20  ;;  %v8130_v33 = vperm.slane %v11915_v16, 0  ;;  %v11919_v16 = vrot.slane %v8139_v42, 1 }
 0x154   :  { %v8160_v47 = vperm.slane %v11919_v16, 0  ;;  %v11923_v16 = vrot.slane %v8139_v42, 5 }
 0x155   :  { %576 = vrot.lane.b32.xlu0 %v7851_v13, %s7360_s15  ;;  %v8077_v13 = vperm.slane %v8057_v8, 0 }
 0x156   :  { %v8187_v43 = vperm.slane %v11923_v16, 0  ;;  %v8203_v16 = vperm.slane %v11926_v38, 0  ;;  %v613_v38 = vsel %vm303_vm1, %v597_v40, %v8043_v18 }
 0x157   :  { %578 = vrot.lane.b32.xlu1 %v7855_v62, %s7360_s15  ;;  %v8063_v25 = vpop.permute.xlu0 %460  ;;  %662 = vrot.lane.b32.xlu2 %v8052_v45, %s7361_s24  ;;  %v8081_v62 = vperm.slane %v11908_v30, 0  ;;  %v11912_v45 = vrot.slane %v8057_v8, 2 }
 0x159   :  { %v8067_v6 = vpop.permute.xlu1 %462  ;;  %v8069_v48 = vpop.permute.xlu2 %482 }
 0x15a   :  { %12056 = vst [vmem:[#allocation77_spill] sm:$0xff] %v8069_v48 }
 0x15d   :  { %664 = vrot.lane.b32.xlu0 %v8074_v24, %s7361_s24  ;;  %v8099_v24 = vperm.slane %v11912_v45, 0  ;;  %v11916_v45 = vrot.slane %v8057_v8, 7 }
 0x15f   :  { %1558 = vrot.lane.b32.xlu1 %v8077_v13, %s7357_s27  ;;  %v8087_v7 = vpop.permute.xlu0 %466  ;;  %1560 = vrot.lane.b32.xlu2 %v8081_v62, %s7357_s27  ;;  %v8134_v32 = vperm.slane %v11916_v45, 0  ;;  %v11920_v45 = vrot.slane %v8139_v42, 2 }
 0x161   :  { %v8093_v60 = vpop.permute.xlu1 %468  ;;  %v8095_v30 = vpop.permute.xlu2 %504  ;;  %v8164_v39 = vperm.slane %v11920_v45, 0  ;;  %v8179_v45 = vperm.slane %v11922_v11, 0 }
 0x165   :  { %1562 = vrot.lane.b32.xlu0 %v8099_v24, %s7357_s27 }
 0x167   :  { %1564 = vrot.lane.b32.xlu1 %v8103_v26, %s7357_s27  ;;  %v8114_v49 = vpop.permute.xlu0 %472  ;;  %1566 = vrot.lane.b32.xlu2 %v8107_v1, %s7357_s27 }
 0x169   :  { %v8120_v46 = vpop.permute.xlu1 %474  ;;  %v8122_v63 = vpop.permute.xlu2 %510 }
 0x16d   :  { %1568 = vrot.lane.b32.xlu0 %v8126_v41, %s7357_s27 }
 0x16f   :  { %1570 = vrot.lane.b32.xlu1 %v8130_v33, %s7357_s27  ;;  %v8145_v61 = vpop.permute.xlu0 %478  ;;  %1572 = vrot.lane.b32.xlu2 %v8134_v32, %s7357_s27 }
 0x170   :  { %12059 = vst [vmem:[#allocation80_spill] sm:$0xff] %v8145_v61 }
 0x171   :  { %v8151_v8 = vpop.permute.xlu1 %480  ;;  %v8153_v57 = vpop.permute.xlu2 %516 }
 0x172   :  { %12060 = vst [vmem:[#allocation81_spill] sm:$0xff] %v8151_v8 }
 0x175   :  { %1574 = vrot.lane.b32.xlu0 %v8156_v17, %s7357_s27 }
 0x177   :  { %1576 = vrot.lane.b32.xlu1 %v8160_v47, %s7357_s27  ;;  %v501_v12 = vpop.permute.xlu0 %500  ;;  %1578 = vrot.lane.b32.xlu2 %v8164_v39, %s7357_s27 }
 0x179   :  { %v503_v4 = vpop.permute.xlu1 %502  ;;  %v8175_v54 = vpop.permute.xlu2 %522 }
 0x17a   :  { %v629_v22 = vsel %vm320_vm2, %v613_v38, %v503_v4 }
 0x17d   :  { %1580 = vrot.lane.b32.xlu0 %v8179_v45, %s7357_s27 }
 0x17f   :  { %1582 = vrot.lane.b32.xlu1 %v8183_v51, %s7357_s27  ;;  %v8194_v35 = vpop.permute.xlu0 %506  ;;  %1584 = vrot.lane.b32.xlu2 %v8187_v43, %s7357_s27 }
 0x181   :  { %v509_v11 = vpop.permute.xlu1 %508  ;;  %v8199_v56 = vpop.permute.xlu2 %528 }
 0x182   :  { %12061 = vst [vmem:[#allocation82_spill] sm:$0xff] %v8199_v56 }
 0x185   :  { %1586 = vrot.lane.b32.xlu0 %v8203_v16, %s7357_s27 }
 0x187   :  { %1588 = vrot.lane.b32.xlu1 %v8207_v37, %s7357_s27  ;;  %v8217_v56 = vpop.permute.xlu0 %512  ;;  %1606 = vrot.lane.b32.xlu2 %v8077_v13, %s7358_s30 }
 0x189   :  { %v515_v42 = vpop.permute.xlu1 %514  ;;  %v551_v8 = vpop.permute.xlu2 %550 }
 0x18a   :  { %v645_v0 = vsel %vm337_vm4, %v629_v22, %v551_v8  ;;  %v596_v8 = vsel %vm286_vm0, %v7702_v53, %v7973_v50 }
 0x18b   :  { %6855 = vmatpush.msk.msra.mxu1 %vm671_vm3, %v645_v0  ;;  %v612_v61 = vsel %vm303_vm1, %v596_v8, %v7999_v34 }
 0x18c   :  { %v628_v48 = vsel %vm320_vm2, %v612_v61, %v501_v12  ;;  %v12068_v12 = vrot.slane %v7702_v53, 3 }
 0x18d   :  { %1608 = vrot.lane.b32.xlu0 %v8081_v62, %s7358_s30 }
 0x18e   :  { %v599_v61 = vsel %vm286_vm0, %v12068_v12, %v7985_v31 }
 0x18f   :  { %1610 = vrot.lane.b32.xlu1 %v8099_v24, %s7358_s30  ;;  %v8230_v55 = vpop.permute.xlu0 %518  ;;  %1612 = vrot.lane.b32.xlu2 %v8103_v26, %s7358_s30 }
 0x191   :  { %v8234_v40 = vpop.permute.xlu1 %520  ;;  %v557_v38 = vpop.permute.xlu2 %556 }
 0x195   :  { %1614 = vrot.lane.b32.xlu0 %v8107_v1, %s7358_s30 }
 0x197   :  { %1616 = vrot.lane.b32.xlu1 %v8126_v41, %s7358_s30  ;;  %v8240_v4 = vpop.permute.xlu0 %524  ;;  %1618 = vrot.lane.b32.xlu2 %v8130_v33, %s7358_s30 }
 0x198   :  { %12063 = vst [vmem:[#allocation83_spill] sm:$0xff] %v8240_v4  ;;  %v12066_v4 = vrot.slane %v7702_v53, 4 }
 0x199   :  { %v8244_v22 = vpop.permute.xlu1 %526  ;;  %v563_v18 = vpop.permute.xlu2 %562 }
 0x19a   :  { %12064 = vst [vmem:[#allocation84_spill] sm:$0xff] %v8244_v22  ;;  %v600_v22 = vsel %vm286_vm0, %v12066_v4, %v7951_v3  ;;  %v12067_v3 = vrot.slane %v7702_v53, 2 }
 0x19b   :  { %v616_v50 = vsel %vm303_vm1, %v600_v22, %v8063_v25  ;;  %v12071_v22 = vrot.slane %v7702_v53, 6 }
 0x19c   :  { %v598_v34 = vsel %vm286_vm0, %v12067_v3, %v7983_v21  ;;  %v12069_v21 = vrot.slane %v7702_v53, 7 }
 0x19d   :  { %1620 = vrot.lane.b32.xlu0 %v8134_v32, %s7358_s30  ;;  %v602_v8 = vsel %vm286_vm0, %v12071_v22, %v7997_v36  ;;  %v12077_v22 = vrot.slane %v7781_v29, 7 }
 0x19e   :  { %v603_v31 = vsel %vm286_vm0, %v12069_v21, %v7963_v15  ;;  %v12074_v21 = vrot.slane %v7781_v29, 3 }
 0x19f   :  { %1622 = vrot.lane.b32.xlu1 %v8156_v17, %s7358_s30  ;;  %v8253_v0 = vpop.permute.xlu0 %530  ;;  %1624 = vrot.lane.b32.xlu2 %v8160_v47, %s7358_s30 }
 0x1a0   :  { %12065 = vst [vmem:[#allocation85_spill] sm:$0xff] %v8253_v0  ;;  %v632_v0 = vsel %vm320_vm2, %v616_v50, %v509_v11 }
 0x1a1   :  { %v549_v20 = vpop.permute.xlu1 %548  ;;  %v569_v23 = vpop.permute.xlu2 %568  ;;  %v648_v27 = vsel %vm337_vm4, %v632_v0, %v557_v38 }
 0x1a2   :  { %v644_v44 = vsel %vm337_vm4, %v628_v48, %v549_v20  ;;  %v619_v20 = vsel %vm303_vm1, %v603_v31, %v8087_v7  ;;  %v12070_v7 = vrot.slane %v7702_v53, 5  ;;  %v618_v53 = vsel %vm303_vm1, %v602_v8, %v8023_v10 }
 0x1a3   :  { %6852 = vmatpush.msk.msra.mxu0 %vm671_vm3, %v644_v44  ;;  %v614_v44 = vsel %vm303_vm1, %v598_v34, %v8045_v19  ;;  %v635_v4 = vsel %vm320_vm2, %v619_v20, %v515_v42  ;;  %v634_v50 = vsel %vm320_vm2, %v618_v53, %v8217_v56  ;;  %v604_v56 = vsel %vm286_vm0, %v7781_v29, %v8007_v14 }
 0x1a4   :  { %v630_v48 = vsel %vm320_vm2, %v614_v44, %v8095_v30  ;;  %v12073_v10 = vrot.slane %v7781_v29, 1  ;;  %v607_v31 = vsel %vm286_vm0, %v12074_v21, %v8019_v5 }
 0x1a5   :  { %6864 = vmatpush.msk.msrb.mxu0 %vm671_vm3, %v648_v27  ;;  %1626 = vrot.lane.b32.xlu0 %v8164_v39, %s7358_s30  ;;  %v615_v27 = vsel %vm303_vm1, %v599_v61, %v8011_v59  ;;  %v651_v59 = vsel %vm337_vm4, %v635_v4, %v563_v18 }
 0x1a6   :  { %v631_v25 = vsel %vm320_vm2, %v615_v27, %v8194_v35  ;;  %v601_v35 = vsel %vm286_vm0, %v12070_v7, %v7995_v2  ;;  %v12072_v2 = vrot.slane %v7781_v29, 2 }
 0x1a7   :  { %1628 = vrot.lane.b32.xlu1 %v8179_v45, %s7358_s30  ;;  %v553_v11 = vpop.permute.xlu0 %552  ;;  %1630 = vrot.lane.b32.xlu2 %v8183_v51, %s7358_s30  ;;  %v617_v42 = vsel %vm303_vm1, %v601_v35, %v8067_v6  ;;  %v12076_v35 = vld [vmem:[#allocation73_spill] sm:$0xff] }
 0x1a8   :  { %v646_v19 = vsel %vm337_vm4, %v630_v48, %v553_v11  ;;  %v633_v18 = vsel %vm320_vm2, %v617_v42, %v8122_v63  ;;  %v606_v36 = vsel %vm286_vm0, %v12072_v2, %v7975_v52  ;;  %v611_v8 = vsel %vm286_vm0, %v12077_v22, %v12076_v35  ;;  %v12078_v42 = vld [vmem:[#allocation71_spill] sm:$0xff]  ;;  %v12080_v2 = vld [vmem:[#allocation72_spill] sm:$0xff] }
 0x1a9   :  { %v555_v30 = vpop.permute.xlu1 %554  ;;  %v8300_v38 = vpop.permute.xlu2 %574  ;;  %6858 = vmatpush.msk.msra.mxu2 %vm671_vm3, %v646_v19  ;;  %v622_v63 = vsel %vm303_vm1, %v606_v36, %v8114_v49  ;;  %v12081_v36 = vrot.slane %v7781_v29, 6  ;;  %v7323_v22 = vld [vmem:[%s11862_s0] sm:$0xff] }
 0x1aa   :  { %v647_v15 = vsel %vm337_vm4, %v631_v25, %v555_v30  ;;  %v638_v12 = vsel %vm320_vm2, %v622_v63, %v8234_v40  ;;  %v605_v40 = vsel %vm286_vm0, %v12073_v10, %v8009_v58  ;;  %v12083_v63 = vld [vmem:[#allocation77_spill] sm:$0xff] }
 0x1ab   :  { %6861 = vmatpush.msk.msra.mxu3 %vm671_vm3, %v647_v15  ;;  %v654_v49 = vsel %vm337_vm4, %v638_v12, %v569_v23  ;;  %v620_v23 = vsel %vm303_vm1, %v604_v56, %v8093_v60  ;;  %v621_v14 = vsel %vm303_vm1, %v605_v40, %v8035_v28  ;;  %v623_v28 = vsel %vm303_vm1, %v607_v31, %v8120_v46  ;;  %v12087_v40 = vld [vmem:[#allocation83_spill] sm:$0xff] }
 0x1ac   :  { %v636_v61 = vsel %vm320_vm2, %v620_v23, %v8153_v57  ;;  %v637_v48 = vsel %vm320_vm2, %v621_v14, %v8230_v55  ;;  %v639_v55 = vsel %vm320_vm2, %v623_v28, %v8175_v54  ;;  %v610_v53 = vsel %vm286_vm0, %v12081_v36, %v12080_v2  ;;  %v12089_v14 = vld [vmem:[#allocation85_spill] sm:$0xff]  ;;  %v12099_v36 = vld [vmem:[#allocation18_spill] sm:$0xff] }
 0x1ad   :  { %6873 = vmatpush.msk.msrb.mxu3 %vm671_vm3, %v651_v59  ;;  %1632 = vrot.lane.b32.xlu0 %v8187_v43, %s7358_s30  ;;  %v12075_v59 = vrot.slane %v7781_v29, 4 }
 0x1af   :  { %1634 = vrot.lane.b32.xlu1 %v8203_v16, %s7358_s30  ;;  %v559_v0 = vpop.permute.xlu0 %558  ;;  %1636 = vrot.lane.b32.xlu2 %v8207_v37, %s7358_s30  ;;  %v608_v7 = vsel %vm286_vm0, %v12075_v59, %v8021_v9 }
 0x1b0   :  { %v649_v6 = vsel %vm337_vm4, %v633_v18, %v559_v0  ;;  %v12079_v18 = vrot.slane %v7781_v29, 5  ;;  %v12086_v29 = vld [vmem:[#allocation82_spill] sm:$0xff] }
 0x1b1   :  { %v561_v3 = vpop.permute.xlu1 %560  ;;  %6867 = vmatpush.msk.msrb.mxu1 %vm671_vm3, %v649_v6  ;;  %v8338_v34 = vpop.permute.xlu2 %662  ;;  %v12082_v6 = vld [vmem:[#allocation74_spill] sm:$0xff] }
 0x1b2   :  { %v650_v52 = vsel %vm337_vm4, %v634_v50, %v561_v3  ;;  %6859 = vmatmul.msk.f32.vlgmr.msra.gmra.mxu2 %vm666_vm5, %v8338_v34  ;;  %6853 = vmatmul.msk.f32.vlgmr.msra.gmra.mxu0 %vm666_vm5, %v8338_v34  ;;  %v609_v0 = vsel %vm286_vm0, %v12079_v18, %v12078_v42  ;;  %v624_v9 = vsel %vm303_vm1, %v608_v7, %v12082_v6  ;;  %v12084_v3 = vld [vmem:[#allocation80_spill] sm:$0xff]  ;;  %v12095_v7 = vld [vmem:[#allocation29_spill] sm:$0xff]  ;;  %v12100_v6 = vld [vmem:[#allocation26_spill] sm:$0xff] }
 0x1b3   :  { %6870 = vmatpush.msk.msrb.mxu2 %vm671_vm3, %v650_v52  ;;  %6856 = vmatmul.msk.f32.vlgmr.msra.gmra.mxu1 %vm666_vm5, %v8338_v34  ;;  %v627_v50 = vsel %vm303_vm1, %v611_v8, %v12083_v63  ;;  %v625_v12 = vsel %vm303_vm1, %v609_v0, %v12084_v3  ;;  %v12085_v52 = vld [vmem:[#allocation81_spill] sm:$0xff]  ;;  %v640_v23 = vsel %vm320_vm2, %v624_v9, %v12087_v40  ;;  %v12096_v8 = vld [vmem:[#allocation10_spill] sm:$0xff]  ;;  %v12101_v63 = vld [vmem:[#allocation28_spill] sm:$0xff] }
 0x1b4   :  { %6862 = vmatmul.msk.f32.vlgmr.msra.gmra.mxu3 %vm666_vm5, %v8338_v34  ;;  %v287_v42 = vsel %vm286_vm0, %v7323_v22, %v12096_v8  ;;  %v12097_v18 = vld [vmem:[#allocation13_spill] sm:$0xff]  ;;  %v12116_v8 = vld [vmem:[#allocation16_spill] sm:$0xff] }
 0x1b5   :  { %6882 = vmatpush.msk.msra.mxu2 %vm671_vm3, %v654_v49  ;;  %1654 = vrot.lane.b32.xlu0 %v8077_v13, %s7359_s14  ;;  %v626_v49 = vsel %vm303_vm1, %v610_v53, %v12085_v52  ;;  %v304_v9 = vsel %vm303_vm1, %v287_v42, %v12100_v6  ;;  %v12102_v3 = vld [vmem:[#allocation33_spill] sm:$0xff]  ;;  %v12103_v52 = vld [vmem:[#allocation36_spill] sm:$0xff]  ;;  %v12120_v6 = vld [vmem:[#allocation31_spill] sm:$0xff] }
 0x1b6   :  { %v642_v10 = vsel %vm320_vm2, %v626_v49, %v12086_v29  ;;  %v12104_v29 = vld [vmem:[#allocation43_spill] sm:$0xff] }
 0x1b7   :  { %1656 = vrot.lane.b32.xlu1 %v8081_v62, %s7359_s14  ;;  %v565_v44 = vpop.permute.xlu0 %564  ;;  %1658 = vrot.lane.b32.xlu2 %v8099_v24, %s7359_s14 }
 0x1b8   :  { %v652_v58 = vsel %vm337_vm4, %v636_v61, %v565_v44  ;;  %v12088_v61 = vld [vmem:[#allocation84_spill] sm:$0xff] }
 0x1b9   :  { %v567_v11 = vpop.permute.xlu1 %566  ;;  %6876 = vmatpush.msk.msra.mxu0 %vm671_vm3, %v652_v58  ;;  %v8377_v60 = vpop.permute.xlu2 %1560  ;;  %v641_v44 = vsel %vm320_vm2, %v625_v12, %v12088_v61  ;;  %v643_v58 = vsel %vm320_vm2, %v627_v50, %v12089_v14  ;;  %v321_v12 = vsel %vm320_vm2, %v304_v9, %v12102_v3  ;;  %v12107_v61 = vld [vmem:[#allocation59_spill] sm:$0xff] }
 0x1ba   :  { %v653_v57 = vsel %vm337_vm4, %v637_v48, %v567_v11  ;;  %v657_v48 = vsel %vm337_vm4, %v641_v44, %v8300_v38 }
 0x1bb   :  { %6879 = vmatpush.msk.msra.mxu1 %vm671_vm3, %v653_v57 }
 0x1bd   :  { %1660 = vrot.lane.b32.xlu0 %v8103_v26, %s7359_s14 }
 0x1bf   :  { %1662 = vrot.lane.b32.xlu1 %v8107_v1, %s7359_s14  ;;  %v571_v27 = vpop.permute.xlu0 %570  ;;  %1664 = vrot.lane.b32.xlu2 %v8126_v41, %s7359_s14 }
 0x1c0   :  { %v655_v19 = vsel %vm337_vm4, %v639_v55, %v571_v27  ;;  %v12090_v27 = vld [vmem:[#allocation15_spill] sm:$0xff] }
 0x1c1   :  { %v573_v20 = vpop.permute.xlu1 %572  ;;  %6885 = vmatpush.msk.msra.mxu3 %vm671_vm3, %v655_v19  ;;  %v8397_v5 = vpop.permute.xlu2 %1566  ;;  %v12091_v19 = vld [vmem:[#allocation5_spill] sm:$0xff] }
 0x1c2   :  { %v656_v11 = vsel %vm337_vm4, %v640_v23, %v573_v20  ;;  %v12092_v20 = vrot.slane %v12091_v19, 3  ;;  %v12098_v0 = vrot.slane %v12091_v19, 1  ;;  %v12106_v23 = vld [vmem:[#allocation58_spill] sm:$0xff]  ;;  %v12117_v42 = vrot.slane %v12091_v19, 6 }
 0x1c4   :  { %v288_v2 = vsel %vm286_vm0, %v12098_v0, %v12097_v18  ;;  %v293_v18 = vsel %vm286_vm0, %v12117_v42, %v12116_v8  ;;  %v12118_v0 = vld [vmem:[#allocation21_spill] sm:$0xff] }
 0x1c5   :  { %1666 = vrot.lane.b32.xlu0 %v8130_v33, %s7359_s14  ;;  %v305_v53 = vsel %vm303_vm1, %v288_v2, %v12099_v36  ;;  %v12119_v36 = vld [vmem:[#allocation24_spill] sm:$0xff] }
 0x1c7   :  { %1668 = vrot.lane.b32.xlu1 %v8134_v32, %s7359_s14  ;;  %v577_v46 = vpop.permute.xlu0 %576  ;;  %1670 = vrot.lane.b32.xlu2 %v8156_v17, %s7359_s14 }
 0x1c8   :  { %v658_v31 = vsel %vm337_vm4, %v642_v10, %v577_v46  ;;  %v12093_v46 = vld [vmem:[#allocation12_spill] sm:$0xff]  ;;  %v322_v10 = vsel %vm320_vm2, %v305_v53, %v12104_v29 }
 0x1c9   :  { %v579_v54 = vpop.permute.xlu1 %578  ;;  %v8405_v25 = vpop.permute.xlu2 %1572  ;;  %v339_v44 = vsel %vm337_vm4, %v322_v10, %v12107_v61 }
 0x1ca   :  { %v659_v28 = vsel %vm337_vm4, %v643_v58, %v579_v54  ;;  %v12094_v54 = vrot.slane %v12091_v19, 2 }
 0x1cc   :  { %v289_v59 = vsel %vm286_vm0, %v12094_v54, %v12093_v46  ;;  %v12112_v46 = vld [vmem:[#allocation7_spill] sm:$0xff]  ;;  %v12113_v54 = vrot.slane %v12091_v19, 4 }
 0x1cd   :  { %1672 = vrot.lane.b32.xlu0 %v8160_v47, %s7359_s14 }
 0x1cf   :  { %1674 = vrot.lane.b32.xlu1 %v8164_v39, %s7359_s14  ;;  %v8411_v30 = vpop.permute.xlu0 %664  ;;  %1676 = vrot.lane.b32.xlu2 %v8179_v45, %s7359_s14 }
 0x1d0   :  { %6854 = vmatmul.msk.f32.gmra.mxu0 %vm666_vm5, %v8411_v30  ;;  %6857 = vmatmul.msk.f32.gmra.mxu1 %vm666_vm5, %v8411_v30 }
 0x1d1   :  { %6860 = vmatmul.msk.f32.gmra.mxu2 %vm666_vm5, %v8411_v30  ;;  %6863 = vmatmul.msk.f32.gmra.mxu3 %vm666_vm5, %v8411_v30  ;;  %v8423_v4 = vpop.permute.xlu1 %1558  ;;  %v8425_v15 = vpop.permute.xlu2 %1578 }
 0x1d5   :  { %1678 = vrot.lane.b32.xlu0 %v8183_v51, %s7359_s14 }
 0x1d7   :  { %1680 = vrot.lane.b32.xlu1 %v8187_v43, %s7359_s14  ;;  %v8455_v56 = vpop.permute.xlu0 %1562  ;;  %1682 = vrot.lane.b32.xlu2 %v8203_v16, %s7359_s14 }
 0x1d8   :  { %6865 = vmatmul.msk.f32.vlgmr.msrb.gmra.mxu0 %vm666_vm5, %v8338_v34  ;;  %6868 = vmatmul.msk.f32.vlgmr.msrb.gmra.mxu1 %vm666_vm5, %v8338_v34 }
 0x1d9   :  { %6871 = vmatmul.msk.f32.vlgmr.msrb.gmra.mxu2 %vm666_vm5, %v8338_v34  ;;  %6874 = vmatmul.msk.f32.vlgmr.msrb.gmra.mxu3 %vm666_vm5, %v8338_v34  ;;  %v8478_v57 = vpop.permute.xlu1 %1564  ;;  %v8480_v21 = vpop.permute.xlu2 %1584 }
 0x1da   :  { %6888 = vmatpush.msk.msrb.mxu0 %vm671_vm3, %v656_v11  ;;  %6891 = vmatpush.msk.msrb.mxu1 %vm671_vm3, %v657_v48  ;;  %v12108_v48 = vld [vmem:[#allocation51_spill] sm:$0xff] }
 0x1db   :  { %6894 = vmatpush.msk.msrb.mxu2 %vm671_vm3, %v658_v31  ;;  %6897 = vmatpush.msk.msrb.mxu3 %vm671_vm3, %v659_v28  ;;  %v12109_v31 = vld [vmem:[#allocation61_spill] sm:$0xff] }
 0x1dd   :  { %1684 = vrot.lane.b32.xlu0 %v8207_v37, %s7359_s14 }
 0x1df   :  { %1702 = vrot.lane.b32.xlu1 %v8077_v13, %s7360_s15  ;;  %v8492_v38 = vpop.permute.xlu0 %1568  ;;  %1704 = vrot.lane.b32.xlu2 %v8081_v62, %s7360_s15  ;;  %v290_v62 = vsel %vm286_vm0, %v12092_v20, %v12090_v27  ;;  %v12110_v20 = vld [vmem:[#allocation17_spill] sm:$0xff] }
 0x1e0   :  { %6866 = vmatmul.msk.f32.gmra.mxu0 %vm666_vm5, %v8411_v30  ;;  %6869 = vmatmul.msk.f32.gmra.mxu1 %vm666_vm5, %v8411_v30  ;;  %v307_v35 = vsel %vm303_vm1, %v290_v62, %v12095_v7  ;;  %v12111_v62 = vrot.slane %v12091_v19, 7  ;;  %v12114_v7 = vld [vmem:[#allocation8_spill] sm:$0xff] }
 0x1e1   :  { %6872 = vmatmul.msk.f32.gmra.mxu2 %vm666_vm5, %v8411_v30  ;;  %6875 = vmatmul.msk.f32.gmra.mxu3 %vm666_vm5, %v8411_v30  ;;  %v8504_v55 = vpop.permute.xlu1 %1570  ;;  %v8506_v13 = vpop.permute.xlu2 %1606  ;;  %v324_v49 = vsel %vm320_vm2, %v307_v35, %v12103_v52  ;;  %v12115_v35 = vrot.slane %v12091_v19, 5  ;;  %v12122_v19 = vld [vmem:[#allocation39_spill] sm:$0xff] }
 0x1e2   :  { %v341_v28 = vsel %vm337_vm4, %v324_v49, %v12109_v31  ;;  %v12124_v49 = vld [vmem:[#allocation47_spill] sm:$0xff] }
 0x1e3   :  { %v292_v22 = vsel %vm286_vm0, %v12115_v35, %v12114_v7 }
 0x1e4   :  { %v309_v9 = vsel %vm303_vm1, %v292_v22, %v12120_v6  ;;  %v12137_v22 = vld [vmem:[#allocation19_spill] sm:$0xff]  ;;  %v12142_v6 = vld [vmem:[#allocation37_spill] sm:$0xff] }
 0x1e5   :  { %1706 = vrot.lane.b32.xlu0 %v8099_v24, %s7360_s15  ;;  %v306_v24 = vsel %vm303_vm1, %v289_v59, %v12101_v63  ;;  %v291_v59 = vsel %vm286_vm0, %v12113_v54, %v12112_v46  ;;  %v326_v29 = vsel %vm320_vm2, %v309_v9, %v12124_v49  ;;  %v12134_v46 = vld [vmem:[#allocation9_spill] sm:$0xff] }
 0x1e6   :  { %v308_v2 = vsel %vm303_vm1, %v291_v59, %v12118_v0  ;;  %v12135_v59 = vld [vmem:[#allocation11_spill] sm:$0xff]  ;;  %v12140_v0 = vld [vmem:[#allocation34_spill] sm:$0xff] }
 0x1e7   :  { %1708 = vrot.lane.b32.xlu1 %v8103_v26, %s7360_s15  ;;  %v8537_v50 = vpop.permute.xlu0 %1574  ;;  %1710 = vrot.lane.b32.xlu2 %v8107_v1, %s7360_s15  ;;  %v12105_v26 = vld [vmem:[#allocation44_spill] sm:$0xff]  ;;  %v338_v1 = vsel %vm337_vm4, %v321_v12, %v12106_v23  ;;  %v12123_v12 = vld [vmem:[#allocation46_spill] sm:$0xff] }
 0x1e8   :  { %6877 = vmatmul.msk.f32.vlgmr.msra.gmra.mxu0 %vm666_vm5, %v8338_v34  ;;  %6880 = vmatmul.msk.f32.vlgmr.msra.gmra.mxu1 %vm666_vm5, %v8338_v34  ;;  %v323_v40 = vsel %vm320_vm2, %v306_v24, %v12105_v26  ;;  %v325_v52 = vsel %vm320_vm2, %v308_v2, %v12123_v12  ;;  %v12126_v26 = vld [vmem:[#allocation54_spill] sm:$0xff] }
 0x1e9   :  { %6883 = vmatmul.msk.f32.vlgmr.msra.gmra.mxu2 %vm666_vm5, %v8338_v34  ;;  %6886 = vmatmul.msk.f32.vlgmr.msra.gmra.mxu3 %vm666_vm5, %v8338_v34  ;;  %v8561_v14 = vpop.permute.xlu1 %1576  ;;  %v8563_v58 = vpop.permute.xlu2 %1612  ;;  %v340_v11 = vsel %vm337_vm4, %v323_v40, %v12108_v48  ;;  %v12127_v40 = vld [vmem:[#allocation62_spill] sm:$0xff] }
 0x1ea   :  { %6900 = vmatpush.msk.msra.mxu0 %vm671_vm3, %v338_v1  ;;  %6903 = vmatpush.msk.msra.mxu1 %vm671_vm3, %v339_v44  ;;  %v342_v23 = vsel %vm337_vm4, %v325_v52, %v12127_v40  ;;  %v12128_v44 = vld [vmem:[#allocation64_spill] sm:$0xff]  ;;  %v12145_v52 = vld [vmem:[#allocation50_spill] sm:$0xff] }
 0x1eb   :  { %6906 = vmatpush.msk.msra.mxu2 %vm671_vm3, %v340_v11  ;;  %6909 = vmatpush.msk.msra.mxu3 %vm671_vm3, %v341_v28  ;;  %v12129_v11 = vld [vmem:[#allocation65_spill] sm:$0xff]  ;;  %v12130_v28 = vld [vmem:[#allocation20_spill] sm:$0xff]  ;;  %v12149_v40 = vld [vmem:[#allocation66_spill] sm:$0xff] }
 0x1ed   :  { %1712 = vrot.lane.b32.xlu0 %v8126_v41, %s7360_s15 }
 0x1ef   :  { %1714 = vrot.lane.b32.xlu1 %v8130_v33, %s7360_s15  ;;  %v8577_v27 = vpop.permute.xlu0 %1580  ;;  %1716 = vrot.lane.b32.xlu2 %v8134_v32, %s7360_s15  ;;  %v294_v32 = vsel %vm286_vm0, %v12111_v62, %v12110_v20  ;;  %v12131_v20 = vld [vmem:[#allocation6_spill] sm:$0xff] }
 0x1f0   :  { %6878 = vmatmul.msk.f32.gmra.mxu0 %vm666_vm5, %v8411_v30  ;;  %6881 = vmatmul.msk.f32.gmra.mxu1 %vm666_vm5, %v8411_v30  ;;  %v311_v53 = vsel %vm303_vm1, %v294_v32, %v12119_v36  ;;  %v12132_v62 = vrot.slane %v12131_v20, 2  ;;  %v8684_v32 = vld [vmem:[%s11862_s0 + $0x3] sm:$0xff]  ;;  %v12136_v7 = vrot.slane %v12131_v20, 3  ;;  %v12138_v8 = vrot.slane %v12131_v20, 1 }
 0x1f1   :  { %6884 = vmatmul.msk.f32.gmra.mxu2 %vm666_vm5, %v8411_v30  ;;  %6887 = vmatmul.msk.f32.gmra.mxu3 %vm666_vm5, %v8411_v30  ;;  %v8589_v41 = vpop.permute.xlu1 %1582  ;;  %v8591_v33 = vpop.permute.xlu2 %1618  ;;  %12133 = vst [vmem:[#allocation73_spill] sm:$0xff] %v8684_v32  ;;  %v12141_v36 = vld [vmem:[#allocation35_spill] sm:$0xff] }
 0x1f2   :  { %v298_v35 = vsel %vm286_vm0, %v12136_v7, %v12135_v59  ;;  %v296_v42 = vsel %vm286_vm0, %v12138_v8, %v12137_v22  ;;  %v11941_v7 = vrot.slane %v8684_v32, 3 }
 0x1f3   :  { %v315_v9 = vsel %vm303_vm1, %v298_v35, %v12142_v6  ;;  %v11932_v35 = vrot.slane %v8684_v32, 4  ;;  %v12157_v6 = vrot.slane %v12131_v20, 4 }
 0x1f5   :  { %1718 = vrot.lane.b32.xlu0 %v8156_v17, %s7360_s15  ;;  %v12121_v17 = vld [vmem:[#allocation32_spill] sm:$0xff] }
 0x1f6   :  { %v310_v63 = vsel %vm303_vm1, %v293_v18, %v12121_v17  ;;  %v12139_v18 = vld [vmem:[#allocation27_spill] sm:$0xff] }
 0x1f7   :  { %1720 = vrot.lane.b32.xlu1 %v8160_v47, %s7360_s15  ;;  %v8621_v24 = vpop.permute.xlu0 %1586  ;;  %1722 = vrot.lane.b32.xlu2 %v8164_v39, %s7360_s15  ;;  %v327_v3 = vsel %vm320_vm2, %v310_v63, %v12122_v19  ;;  %v12125_v47 = vld [vmem:[#allocation49_spill] sm:$0xff]  ;;  %v343_v39 = vsel %vm337_vm4, %v326_v29, %v12126_v26  ;;  %v12143_v63 = vld [vmem:[#allocation75_spill] sm:$0xff]  ;;  %v11935_v19 = vrot.slane %v8684_v32, 1  ;;  %v12146_v29 = vld [vmem:[#allocation52_spill] sm:$0xff] }
 0x1f8   :  { %6889 = vmatmul.msk.f32.vlgmr.msrb.gmra.mxu0 %vm666_vm5, %v8338_v34  ;;  %6892 = vmatmul.msk.f32.vlgmr.msrb.gmra.mxu1 %vm666_vm5, %v8338_v34  ;;  %v328_v10 = vsel %vm320_vm2, %v311_v53, %v12125_v47  ;;  %v344_v48 = vsel %vm337_vm4, %v327_v3, %v12128_v44  ;;  %v313_v53 = vsel %vm303_vm1, %v296_v42, %v12141_v36  ;;  %v12144_v3 = vld [vmem:[#allocation42_spill] sm:$0xff]  ;;  %v12148_v26 = vld [vmem:[#allocation57_spill] sm:$0xff]  ;;  %v8790_v36 = vperm.slane %v11932_v35, 0 }
 0x1f9   :  { %6895 = vmatmul.msk.f32.vlgmr.msrb.gmra.mxu2 %vm666_vm5, %v8338_v34  ;;  %6898 = vmatmul.msk.f32.vlgmr.msrb.gmra.mxu3 %vm666_vm5, %v8338_v34  ;;  %v8645_v1 = vpop.permute.xlu1 %1588  ;;  %v8647_v61 = vpop.permute.xlu2 %1624  ;;  %v345_v31 = vsel %vm337_vm4, %v328_v10, %v12129_v11  ;;  %v330_v12 = vsel %vm320_vm2, %v313_v53, %v12144_v3  ;;  %v12150_v11 = vld [vmem:[#allocation60_spill] sm:$0xff]  ;;  %v12156_v53 = vld [vmem:[#allocation22_spill] sm:$0xff]  ;;  %v11933_v3 = vrot.slane %v8684_v32, 5 }
 0x1fa   :  { %6912 = vmatpush.msk.msrb.mxu0 %vm671_vm3, %v342_v23  ;;  %6915 = vmatpush.msk.msrb.mxu1 %vm671_vm3, %v343_v39  ;;  %v347_v23 = vsel %vm337_vm4, %v330_v12, %v12149_v40  ;;  %12155 = vst [vmem:[#allocation71_spill] sm:$0xff] %v8790_v36  ;;  %v12158_v12 = vld [vmem:[#allocation14_spill] sm:$0xff] }
 0x1fb   :  { %6918 = vmatpush.msk.msrb.mxu2 %vm671_vm3, %v344_v48  ;;  %6921 = vmatpush.msk.msrb.mxu3 %vm671_vm3, %v345_v31 }
 0x1fd   :  { %1724 = vrot.lane.b32.xlu0 %v8179_v45, %s7360_s15 }
 0x1ff   :  { %1726 = vrot.lane.b32.xlu1 %v8183_v51, %s7360_s15  ;;  %v8661_v34 = vpop.permute.xlu0 %1608  ;;  %1728 = vrot.lane.b32.xlu2 %v8187_v43, %s7360_s15  ;;  %v297_v43 = vsel %vm286_vm0, %v12132_v62, %v12130_v28  ;;  %v12151_v28 = vld [vmem:[#allocation67_spill] sm:$0xff] }
 0x200   :  { %6890 = vmatmul.msk.f32.gmra.mxu0 %vm666_vm5, %v8411_v30  ;;  %6893 = vmatmul.msk.f32.gmra.mxu1 %vm666_vm5, %v8411_v30 }
 0x201   :  { %6896 = vmatmul.msk.f32.gmra.mxu2 %vm666_vm5, %v8411_v30  ;;  %6899 = vmatmul.msk.f32.gmra.mxu3 %vm666_vm5, %v8411_v30  ;;  %v8673_v45 = vpop.permute.xlu1 %1610  ;;  %v8675_v51 = vpop.permute.xlu2 %1630  ;;  %v7324_v30 = vld [vmem:[%s11862_s0 + $0x8] sm:$0xff] }
 0x202   :  { %v295_v54 = vsel %vm286_vm0, %v7324_v30, %v12134_v46  ;;  %v8752_v30 = vperm.slane %v11935_v19, 0  ;;  %v12152_v46 = vld [vmem:[#allocation78_spill] sm:$0xff] }
 0x203   :  { %v312_v2 = vsel %vm303_vm1, %v295_v54, %v12140_v0  ;;  %v11939_v54 = vrot.slane %v8684_v32, 2 }
 0x204   :  { %v329_v49 = vsel %vm320_vm2, %v312_v2, %v12145_v52  ;;  %v8786_v2 = vperm.slane %v11941_v7, 0  ;;  %v12159_v52 = vrot.slane %v12131_v20, 6  ;;  %v12181_v7 = vld [vmem:[#allocation76_spill] sm:$0xff] }
 0x205   :  { %1730 = vrot.lane.b32.xlu0 %v8203_v16, %s7360_s15  ;;  %v314_v16 = vsel %vm303_vm1, %v297_v43, %v12139_v18  ;;  %v346_v39 = vsel %vm337_vm4, %v329_v49, %v12148_v26  ;;  %v8748_v43 = vperm.slane %v8684_v32, 0  ;;  %v8778_v42 = vperm.slane %v11939_v54, 0  ;;  %v12153_v18 = vld [vmem:[#allocation23_spill] sm:$0xff] }
 0x206   :  { %v331_v47 = vsel %vm320_vm2, %v314_v16, %v12146_v29  ;;  %v12154_v16 = vrot.slane %v12131_v20, 5  ;;  %v301_v49 = vsel %vm286_vm0, %v12159_v52, %v12158_v12  ;;  %v12160_v29 = vld [vmem:[#allocation25_spill] sm:$0xff]  ;;  %v12169_v52 = vld [vmem:[#allocation56_spill] sm:$0xff] }
 0x207   :  { %1732 = vrot.lane.b32.xlu1 %v8207_v37, %s7360_s15  ;;  %v8711_v17 = vpop.permute.xlu0 %1614  ;;  %1814 = vrot.lane.b32.xlu2 %v12143_v63, %s7362_s22  ;;  %v12147_v37 = vld [vmem:[#allocation53_spill] sm:$0xff]  ;;  %v348_v62 = vsel %vm337_vm4, %v331_v47, %v12151_v28  ;;  %v12161_v47 = vrot.slane %v12131_v20, 7  ;;  %v11940_v20 = vrot.slane %v8684_v32, 6 }
 0x208   :  { %6901 = vmatmul.msk.f32.vlgmr.msra.gmra.mxu0 %vm666_vm5, %v12143_v63  ;;  %6904 = vmatmul.msk.f32.vlgmr.msra.gmra.mxu1 %vm666_vm5, %v12143_v63  ;;  %v332_v10 = vsel %vm320_vm2, %v315_v9, %v12147_v37  ;;  %v300_v0 = vsel %vm286_vm0, %v12154_v16, %v12153_v18  ;;  %v299_v9 = vsel %vm286_vm0, %v12157_v6, %v12156_v53  ;;  %v11934_v18 = vrot.slane %v8684_v32, 7  ;;  %v12166_v16 = vld [vmem:[#allocation45_spill] sm:$0xff]  ;;  %v12167_v53 = vld [vmem:[#allocation48_spill] sm:$0xff] }
 0x209   :  { %6907 = vmatmul.msk.f32.vlgmr.msra.gmra.mxu2 %vm666_vm5, %v12143_v63  ;;  %6910 = vmatmul.msk.f32.vlgmr.msra.gmra.mxu3 %vm666_vm5, %v12143_v63  ;;  %v8735_v44 = vpop.permute.xlu1 %1616  ;;  %v8737_v48 = vpop.permute.xlu2 %1636  ;;  %v349_v31 = vsel %vm337_vm4, %v332_v10, %v12150_v11  ;;  %v302_v37 = vsel %vm286_vm0, %v12161_v47, %v12160_v29  ;;  %v12162_v10 = vld [vmem:[#allocation30_spill] sm:$0xff]  ;;  %v12170_v29 = vld [vmem:[#allocation68_spill] sm:$0xff]  ;;  %v12182_v32 = vrot.slane %v12181_v7, 1 }
 0x20a   :  { %6924 = vmatpush.msk.msra.mxu0 %vm671_vm3, %v346_v39  ;;  %6927 = vmatpush.msk.msra.mxu1 %vm671_vm3, %v347_v23  ;;  %v317_v26 = vsel %vm303_vm1, %v300_v0, %v12162_v10  ;;  %v12163_v39 = vld [vmem:[#allocation38_spill] sm:$0xff]  ;;  %v12164_v23 = vld [vmem:[#allocation40_spill] sm:$0xff] }
 0x20b   :  { %6930 = vmatpush.msk.msra.mxu2 %vm671_vm3, %v348_v62  ;;  %6933 = vmatpush.msk.msra.mxu3 %vm671_vm3, %v349_v31  ;;  %v316_v40 = vsel %vm303_vm1, %v299_v9, %v12163_v39  ;;  %v318_v11 = vsel %vm303_vm1, %v301_v49, %v12164_v23  ;;  %v12165_v31 = vld [vmem:[#allocation41_spill] sm:$0xff]  ;;  %v12168_v9 = vld [vmem:[#allocation55_spill] sm:$0xff] }
 0x20c   :  { %v319_v28 = vsel %vm303_vm1, %v302_v37, %v12165_v31  ;;  %v333_v0 = vsel %vm320_vm2, %v316_v40, %v12166_v16  ;;  %v334_v12 = vsel %vm320_vm2, %v317_v26, %v12168_v9  ;;  %v335_v49 = vsel %vm320_vm2, %v318_v11, %v12169_v52  ;;  %v12171_v37 = vld [vmem:[#allocation69_spill] sm:$0xff]  ;;  %v12173_v23 = vld [vmem:[#allocation63_spill] sm:$0xff]  ;;  %v12174_v31 = vld [vmem:[#allocation70_spill] sm:$0xff] }
 0x20d   :  { %1816 = vrot.lane.b32.xlu0 %v12152_v46, %s7362_s22  ;;  %v336_v6 = vsel %vm320_vm2, %v319_v28, %v12167_v53  ;;  %v350_v47 = vsel %vm337_vm4, %v333_v0, %v12170_v29  ;;  %v351_v10 = vsel %vm337_vm4, %v334_v12, %v12171_v37  ;;  %v8849_v40 = vperm.slane %v11933_v3, 0  ;;  %v8870_v53 = vld [vmem:[%s11862_s0 + $0xb] sm:$0xff]  ;;  %s7371_s22 = smov 100  }
 0x20e   :  { %v352_v11 = vsel %vm337_vm4, %v335_v49, %v12173_v23  ;;  %v353_v28 = vsel %vm337_vm4, %v336_v6, %v12174_v31  ;;  %v8861_v16 = vperm.slane %v11940_v20, 0  ;;  %v8865_v0 = vperm.slane %v11934_v18, 0  ;;  %12175 = vst [vmem:[#allocation74_spill] sm:$0xff] %v8870_v53 }
 0x20f   :  { %2320 = vrot.lane.b32.xlu1 %v8748_v43, %s7357_s27  ;;  %v8758_v59 = vpop.permute.xlu0 %1620  ;;  %2322 = vrot.lane.b32.xlu2 %v8752_v30, %s7357_s27  ;;  %12172 = vst [vmem:[#allocation72_spill] sm:$0xff] %v8849_v40  ;;  %v11930_v9 = vrot.slane %v8870_v53, 1  ;;  %v11931_v12 = vrot.slane %v8870_v53, 2  ;;  %v8895_v29 = vperm.slane %v8870_v53, 0  ;;  %v11937_v31 = vrot.slane %v8870_v53, 5 }
 0x210   :  { %6902 = vmatmul.msk.f32.gmra.mxu0 %vm666_vm5, %v12152_v46  ;;  %6905 = vmatmul.msk.f32.gmra.mxu1 %vm666_vm5, %v12152_v46  ;;  %v11944_v18 = vrot.slane %v8870_v53, 6 }
 0x211   :  { %6908 = vmatmul.msk.f32.gmra.mxu2 %vm666_vm5, %v12152_v46  ;;  %6911 = vmatmul.msk.f32.gmra.mxu3 %vm666_vm5, %v12152_v46  ;;  %v8772_v22 = vpop.permute.xlu1 %1622  ;;  %v8774_v8 = vpop.permute.xlu2 %1658  ;;  %12178 = vst [vmem:[#allocation81_spill] sm:$0xff] %v8895_v29  ;;  %v8903_v37 = vperm.slane %v11931_v12, 0  ;;  %v8936_v3 = vperm.slane %v11937_v31, 0 }
 0x212   :  { %v8960_v54 = vperm.slane %v11944_v18, 0 }
 0x215   :  { %2324 = vrot.lane.b32.xlu0 %v8778_v42, %s7357_s27 }
 0x217   :  { %2326 = vrot.lane.b32.xlu1 %v8786_v2, %s7357_s27  ;;  %v8817_v62 = vpop.permute.xlu0 %1626  ;;  %2328 = vrot.lane.b32.xlu2 %v8790_v36, %s7357_s27 }
 0x218   :  { %6913 = vmatmul.msk.f32.vlgmr.msrb.gmra.mxu0 %vm666_vm5, %v12143_v63  ;;  %6916 = vmatmul.msk.f32.vlgmr.msrb.gmra.mxu1 %vm666_vm5, %v12143_v63 }
 0x219   :  { %6919 = vmatmul.msk.f32.vlgmr.msrb.gmra.mxu2 %vm666_vm5, %v12143_v63  ;;  %6922 = vmatmul.msk.f32.vlgmr.msrb.gmra.mxu3 %vm666_vm5, %v12143_v63  ;;  %v8843_v26 = vpop.permute.xlu1 %1628  ;;  %v8845_v39 = vpop.permute.xlu2 %1664 }
 0x21a   :  { %6936 = vmatpush.msk.msrb.mxu0 %vm671_vm3, %v350_v47  ;;  %6939 = vmatpush.msk.msrb.mxu1 %vm671_vm3, %v351_v10  ;;  %v8899_v47 = vperm.slane %v11930_v9, 0  ;;  %v11938_v10 = vrot.slane %v8870_v53, 3 }
 0x21b   :  { %6942 = vmatpush.msk.msrb.mxu2 %vm671_vm3, %v352_v11  ;;  %6945 = vmatpush.msk.msrb.mxu3 %vm671_vm3, %v353_v28  ;;  %v11936_v11 = vrot.slane %v8870_v53, 4 }
 0x21c   :  { %12179 = vst [vmem:[#allocation82_spill] sm:$0xff] %v8899_v47  ;;  %v8928_v12 = vperm.slane %v11938_v10, 0 }
 0x21d   :  { %2330 = vrot.lane.b32.xlu0 %v8849_v40, %s7357_s27  ;;  %v8932_v35 = vperm.slane %v11936_v11, 0  ;;  %v11945_v11 = vrot.slane %v8870_v53, 7 }
 0x21f   :  { %2332 = vrot.lane.b32.xlu1 %v8861_v16, %s7357_s27  ;;  %v8876_v6 = vpop.permute.xlu0 %1632  ;;  %2334 = vrot.lane.b32.xlu2 %v8865_v0, %s7357_s27  ;;  %v8964_v20 = vperm.slane %v11945_v11, 0 }
 0x220   :  { %12176 = vst [vmem:[#allocation77_spill] sm:$0xff] %v8876_v6  ;;  %6914 = vmatmul.msk.f32.gmra.mxu0 %vm666_vm5, %v12152_v46  ;;  %6917 = vmatmul.msk.f32.gmra.mxu1 %vm666_vm5, %v12152_v46 }
 0x221   :  { %6920 = vmatmul.msk.f32.gmra.mxu2 %vm666_vm5, %v12152_v46  ;;  %6923 = vmatmul.msk.f32.gmra.mxu3 %vm666_vm5, %v12152_v46  ;;  %v8890_v52 = vpop.permute.xlu1 %1634  ;;  %v8892_v49 = vpop.permute.xlu2 %1670 }
 0x222   :  { %12177 = vst [vmem:[#allocation80_spill] sm:$0xff] %v8890_v52  ;;  %v1751_v52 = vsel %vm286_vm0, %v12182_v32, %v8377_v60 }
 0x223   :  { %v1767_v18 = vsel %vm303_vm1, %v1751_v52, %v8661_v34 }
 0x225   :  { %2336 = vrot.lane.b32.xlu0 %v8895_v29, %s7357_s27 }
 0x227   :  { %2338 = vrot.lane.b32.xlu1 %v8899_v47, %s7357_s27  ;;  %v8910_v23 = vpop.permute.xlu0 %1654  ;;  %2340 = vrot.lane.b32.xlu2 %v8903_v37, %s7357_s27 }
 0x228   :  { %6925 = vmatmul.msk.f32.vlgmr.msra.gmra.mxu0 %vm666_vm5, %v12143_v63  ;;  %6928 = vmatmul.msk.f32.vlgmr.msra.gmra.mxu1 %vm666_vm5, %v12143_v63 }
 0x229   :  { %6931 = vmatmul.msk.f32.vlgmr.msra.gmra.mxu2 %vm666_vm5, %v12143_v63  ;;  %6934 = vmatmul.msk.f32.vlgmr.msra.gmra.mxu3 %vm666_vm5, %v12143_v63  ;;  %v1657_v28 = vpop.permute.xlu1 %1656  ;;  %v8924_v9 = vpop.permute.xlu2 %1676 }
 0x22a   :  { %v1783_v11 = vsel %vm320_vm2, %v1767_v18, %v1657_v28 }
 0x22d   :  { %2342 = vrot.lane.b32.xlu0 %v8928_v12, %s7357_s27 }
 0x22f   :  { %2344 = vrot.lane.b32.xlu1 %v8932_v35, %s7357_s27  ;;  %v8943_v19 = vpop.permute.xlu0 %1660  ;;  %2346 = vrot.lane.b32.xlu2 %v8936_v3, %s7357_s27 }
 0x230   :  { %6926 = vmatmul.msk.f32.gmra.mxu0 %vm666_vm5, %v12152_v46  ;;  %6929 = vmatmul.msk.f32.gmra.mxu1 %vm666_vm5, %v12152_v46 }
 0x231   :  { %6932 = vmatmul.msk.f32.gmra.mxu2 %vm666_vm5, %v12152_v46  ;;  %6935 = vmatmul.msk.f32.gmra.mxu3 %vm666_vm5, %v12152_v46  ;;  %v1663_v31 = vpop.permute.xlu1 %1662  ;;  %v8956_v10 = vpop.permute.xlu2 %1682 }
 0x232   :  { %12180 = vst [vmem:[#allocation83_spill] sm:$0xff] %v8956_v10 }
 0x235   :  { %2348 = vrot.lane.b32.xlu0 %v8960_v54, %s7357_s27 }
 0x237   :  { %2350 = vrot.lane.b32.xlu1 %v8964_v20, %s7357_s27  ;;  %v8974_v10 = vpop.permute.xlu0 %1666  ;;  %2368 = vrot.lane.b32.xlu2 %v8748_v43, %s7358_s30 }
 0x238   :  { %6937 = vmatmul.msk.f32.vlgmr.msrb.gmra.mxu0 %vm666_vm5, %v12143_v63  ;;  %6940 = vmatmul.msk.f32.vlgmr.msrb.gmra.mxu1 %vm666_vm5, %v12143_v63 }
 0x239   :  { %6943 = vmatmul.msk.f32.vlgmr.msrb.gmra.mxu2 %vm666_vm5, %v12143_v63  ;;  %6946 = vmatmul.msk.f32.vlgmr.msrb.gmra.mxu3 %vm666_vm5, %v12143_v63  ;;  %v1669_v60 = vpop.permute.xlu1 %1668  ;;  %v1705_v32 = vpop.permute.xlu2 %1704 }
 0x23a   :  { %v1799_v53 = vsel %vm337_vm4, %v1783_v11, %v1705_v32  ;;  %v12186_v32 = vrot.slane %v12181_v7, 4 }
 0x23b   :  { %6953 = vmatpush.msk.msra.mxu1 %vm671_vm3, %v1799_v53 }
 0x23d   :  { %2370 = vrot.lane.b32.xlu0 %v8752_v30, %s7358_s30 }
 0x23f   :  { %2372 = vrot.lane.b32.xlu1 %v8778_v42, %s7358_s30  ;;  %v8995_v34 = vpop.permute.xlu0 %1672  ;;  %2374 = vrot.lane.b32.xlu2 %v8786_v2, %s7358_s30 }
 0x240   :  { %6938 = vmatmul.msk.f32.gmra.mxu0 %vm666_vm5, %v12152_v46  ;;  %6941 = vmatmul.msk.f32.gmra.mxu1 %vm666_vm5, %v12152_v46 }
 0x241   :  { %6944 = vmatmul.msk.f32.gmra.mxu2 %vm666_vm5, %v12152_v46  ;;  %6947 = vmatmul.msk.f32.gmra.mxu3 %vm666_vm5, %v12152_v46  ;;  %v9007_v63 = vpop.permute.xlu1 %1674  ;;  %v1711_v18 = vpop.permute.xlu2 %1710  ;;  %v1750_v46 = vsel %vm286_vm0, %v12181_v7, %v8423_v4 }
 0x245   :  { %2376 = vrot.lane.b32.xlu0 %v8790_v36, %s7358_s30 }
 0x247   :  { %2378 = vrot.lane.b32.xlu1 %v8849_v40, %s7358_s30  ;;  %v9013_v53 = vpop.permute.xlu0 %1678  ;;  %2380 = vrot.lane.b32.xlu2 %v8861_v16, %s7358_s30  ;;  %v1754_v40 = vsel %vm286_vm0, %v12186_v32, %v8397_v5  ;;  %v12187_v5 = vrot.slane %v12181_v7, 2 }
 0x248   :  { %12183 = vst [vmem:[#allocation84_spill] sm:$0xff] %v9013_v53  ;;  %v1770_v4 = vsel %vm303_vm1, %v1754_v40, %v8711_v17  ;;  %v12188_v17 = vrot.slane %v12181_v7, 3 }
 0x249   :  { %v9017_v52 = vpop.permute.xlu1 %1680  ;;  %v1717_v11 = vpop.permute.xlu2 %1716 }
 0x24a   :  { %12184 = vst [vmem:[#allocation85_spill] sm:$0xff] %v9017_v52  ;;  %v1766_v52 = vsel %vm303_vm1, %v1750_v46, %v8506_v13  ;;  %v1752_v13 = vsel %vm286_vm0, %v12187_v5, %v8455_v56  ;;  %v1753_v40 = vsel %vm286_vm0, %v12188_v17, %v8478_v57  ;;  %v12189_v56 = vrot.slane %v12181_v7, 7 }
 0x24b   :  { %v1782_v53 = vsel %vm320_vm2, %v1766_v52, %v8910_v23  ;;  %v1769_v23 = vsel %vm303_vm1, %v1753_v40, %v8563_v58  ;;  %v12190_v58 = vrot.slane %v12181_v7, 5 }
 0x24c   :  { %v1757_v57 = vsel %vm286_vm0, %v12189_v56, %v8405_v25 }
 0x24d   :  { %2382 = vrot.lane.b32.xlu0 %v8865_v0, %s7358_s30 }
 0x24f   :  { %2384 = vrot.lane.b32.xlu1 %v8895_v29, %s7358_s30  ;;  %v9026_v28 = vpop.permute.xlu0 %1684  ;;  %2386 = vrot.lane.b32.xlu2 %v8899_v47, %s7358_s30 }
 0x250   :  { %12185 = vst [vmem:[#allocation15_spill] sm:$0xff] %v9026_v28  ;;  %v1786_v28 = vsel %vm320_vm2, %v1770_v4, %v1663_v31  ;;  %v1785_v31 = vsel %vm320_vm2, %v1769_v23, %v8943_v19  ;;  %v1755_v19 = vsel %vm286_vm0, %v12190_v58, %v8492_v38 }
 0x251   :  { %v1703_v29 = vpop.permute.xlu1 %1702  ;;  %v1723_v36 = vpop.permute.xlu2 %1722  ;;  %v1802_v6 = vsel %vm337_vm4, %v1786_v28, %v1711_v18 }
 0x252   :  { %v1798_v47 = vsel %vm337_vm4, %v1782_v53, %v1703_v29  ;;  %v1768_v29 = vsel %vm303_vm1, %v1752_v13, %v8673_v45 }
 0x253   :  { %6950 = vmatpush.msk.msra.mxu0 %vm671_vm3, %v1798_v47  ;;  %v1784_v47 = vsel %vm320_vm2, %v1768_v29, %v8774_v8  ;;  %v1773_v8 = vsel %vm303_vm1, %v1757_v57, %v8758_v59  ;;  %v12191_v59 = vrot.slane %v12181_v7, 6  ;;  %v12192_v7 = vld [vmem:[#allocation79_spill] sm:$0xff] }
 0x254   :  { %v1789_v52 = vsel %vm320_vm2, %v1773_v8, %v1669_v60  ;;  %v1771_v60 = vsel %vm303_vm1, %v1755_v19, %v8735_v44  ;;  %v12193_v4 = vrot.slane %v12192_v7, 2  ;;  %v12195_v23 = vrot.slane %v12192_v7, 3 }
 0x255   :  { %6962 = vmatpush.msk.msrb.mxu0 %vm671_vm3, %v1802_v6  ;;  %2388 = vrot.lane.b32.xlu0 %v8903_v37, %s7358_s30  ;;  %v1805_v46 = vsel %vm337_vm4, %v1789_v52, %v1717_v11  ;;  %v1756_v28 = vsel %vm286_vm0, %v12191_v59, %v8504_v55  ;;  %v1787_v11 = vsel %vm320_vm2, %v1771_v60, %v8845_v39  ;;  %v12196_v58 = vrot.slane %v12192_v7, 4 }
 0x256   :  { %v1772_v38 = vsel %vm303_vm1, %v1756_v28, %v8591_v33  ;;  %v1760_v44 = vsel %vm286_vm0, %v12193_v4, %v8425_v15  ;;  %v12197_v19 = vrot.slane %v12192_v7, 7  ;;  %v12198_v28 = vrot.slane %v12192_v7, 5 }
 0x257   :  { %2390 = vrot.lane.b32.xlu1 %v8928_v12, %s7358_s30  ;;  %v1707_v6 = vpop.permute.xlu0 %1706  ;;  %2392 = vrot.lane.b32.xlu2 %v8932_v35, %s7358_s30  ;;  %v1788_v39 = vsel %vm320_vm2, %v1772_v38, %v8974_v10  ;;  %v1776_v17 = vsel %vm303_vm1, %v1760_v44, %v8817_v62  ;;  %v7325_v62 = vld [vmem:[%s11862_s0 + $0xa] sm:$0xff] }
 0x258   :  { %v1800_v45 = vsel %vm337_vm4, %v1784_v47, %v1707_v6  ;;  %v1792_v15 = vsel %vm320_vm2, %v1776_v17, %v9007_v63  ;;  %v1758_v40 = vsel %vm286_vm0, %v7325_v62, %v8537_v50  ;;  %v12194_v63 = vrot.slane %v12192_v7, 1  ;;  %v12204_v44 = vld [vmem:[#allocation84_spill] sm:$0xff] }
 0x259   :  { %v1709_v18 = vpop.permute.xlu1 %1708  ;;  %6956 = vmatpush.msk.msra.mxu2 %vm671_vm3, %v1800_v45  ;;  %v9075_v53 = vpop.permute.xlu2 %1728  ;;  %v1808_v10 = vsel %vm337_vm4, %v1792_v15, %v1723_v36  ;;  %v1774_v36 = vsel %vm303_vm1, %v1758_v40, %v8772_v22  ;;  %v1761_v45 = vsel %vm286_vm0, %v12195_v23, %v8577_v27  ;;  %v1765_v59 = vsel %vm286_vm0, %v12197_v19, %v8645_v1  ;;  %v12200_v1 = vld [vmem:[#allocation77_spill] sm:$0xff] }
 0x25a   :  { %v1801_v25 = vsel %vm337_vm4, %v1785_v31, %v1709_v18  ;;  %v1759_v29 = vsel %vm286_vm0, %v12194_v63, %v8561_v14  ;;  %v1790_v47 = vsel %vm320_vm2, %v1774_v36, %v8892_v49  ;;  %v1763_v60 = vsel %vm286_vm0, %v12198_v28, %v8480_v21 }
 0x25b   :  { %6959 = vmatpush.msk.msra.mxu3 %vm671_vm3, %v1801_v25  ;;  %v1775_v14 = vsel %vm303_vm1, %v1759_v29, %v8647_v61  ;;  %v1777_v61 = vsel %vm303_vm1, %v1761_v45, %v8843_v26  ;;  %v9178_v26 = vld [vmem:[%s11863_s1] sm:$0xff]  ;;  %v1781_v38 = vsel %vm303_vm1, %v1765_v59, %v8737_v48  ;;  %v12209_v45 = vld [vmem:[#allocation82_spill] sm:$0xff] }
 0x25c   :  { %v1791_v56 = vsel %vm320_vm2, %v1775_v14, %v8995_v34  ;;  %v1793_v34 = vsel %vm320_vm2, %v1777_v61, %v8924_v9 }
 0x25d   :  { %6971 = vmatpush.msk.msrb.mxu3 %vm671_vm3, %v1805_v46  ;;  %2394 = vrot.lane.b32.xlu0 %v8936_v3, %s7358_s30 }
 0x25f   :  { %2396 = vrot.lane.b32.xlu1 %v8960_v54, %s7358_s30  ;;  %v1713_v32 = vpop.permute.xlu0 %1712  ;;  %2398 = vrot.lane.b32.xlu2 %v8964_v20, %s7358_s30 }
 0x260   :  { %v1803_v55 = vsel %vm337_vm4, %v1787_v11, %v1713_v32  ;;  %v12199_v11 = vrot.slane %v12192_v7, 6  ;;  %v12202_v7 = vld [vmem:[#allocation71_spill] sm:$0xff] }
 0x261   :  { %v1715_v5 = vpop.permute.xlu1 %1714  ;;  %6965 = vmatpush.msk.msrb.mxu1 %vm671_vm3, %v1803_v55  ;;  %v9110_v13 = vpop.permute.xlu2 %1814  ;;  %v1779_v55 = vsel %vm303_vm1, %v1763_v60, %v12200_v1 }
 0x262   :  { %v1804_v33 = vsel %vm337_vm4, %v1788_v39, %v1715_v5  ;;  %6951 = vmatmul.msk.f32.vlgmr.msra.gmra.mxu0 %vm666_vm5, %v9110_v13  ;;  %6954 = vmatmul.msk.f32.vlgmr.msra.gmra.mxu1 %vm666_vm5, %v9110_v13  ;;  %v1764_v32 = vsel %vm286_vm0, %v12199_v11, %v8621_v24  ;;  %v12203_v24 = vld [vmem:[#allocation83_spill] sm:$0xff]  ;;  %v12205_v39 = vld [vmem:[#allocation85_spill] sm:$0xff] }
 0x263   :  { %6957 = vmatmul.msk.f32.vlgmr.msra.gmra.mxu2 %vm666_vm5, %v9110_v13  ;;  %6960 = vmatmul.msk.f32.vlgmr.msra.gmra.mxu3 %vm666_vm5, %v9110_v13  ;;  %v1795_v5 = vsel %vm320_vm2, %v1779_v55, %v12205_v39 }
 0x264   :  { %6968 = vmatpush.msk.msrb.mxu2 %vm671_vm3, %v1804_v33  ;;  %v1811_v33 = vsel %vm337_vm4, %v1795_v5, %v9075_v53  ;;  %v12207_v53 = vld [vmem:[#allocation72_spill] sm:$0xff] }
 0x265   :  { %2416 = vrot.lane.b32.xlu0 %v8748_v43, %s7359_s14 }
 0x266   :  { %6980 = vmatpush.msk.msra.mxu2 %vm671_vm3, %v1808_v10 }
 0x267   :  { %2418 = vrot.lane.b32.xlu1 %v8752_v30, %s7359_s14  ;;  %v1719_v50 = vpop.permute.xlu0 %1718  ;;  %2420 = vrot.lane.b32.xlu2 %v8778_v42, %s7359_s14 }
 0x268   :  { %v1806_v6 = vsel %vm337_vm4, %v1790_v47, %v1719_v50 }
 0x269   :  { %v1721_v57 = vpop.permute.xlu1 %1720  ;;  %6974 = vmatpush.msk.msra.mxu0 %vm671_vm3, %v1806_v6  ;;  %v9153_v22 = vpop.permute.xlu2 %2322 }
 0x26a   :  { %v1807_v49 = vsel %vm337_vm4, %v1791_v56, %v1721_v57  ;;  %v9314_v6 = vpop.f32.mrf.mxu2  ;;  %v9316_v56 = vpop.f32.mrf.mxu3  ;;  %v12208_v57 = vld [vmem:[#allocation81_spill] sm:$0xff] }
 0x26b   :  { %6977 = vmatpush.msk.msra.mxu1 %vm671_vm3, %v1807_v49 }
 0x26d   :  { %2422 = vrot.lane.b32.xlu0 %v8786_v2, %s7359_s14 }
 0x26f   :  { %2468 = vrot.lane.b32.xlu1 %v8778_v42, %s7360_s15  ;;  %v1725_v8 = vpop.permute.xlu0 %1724  ;;  %2470 = vrot.lane.b32.xlu2 %v8786_v2, %s7360_s15  ;;  %v9184_v42 = vld [vmem:[%s11863_s1 + $0x8] sm:$0xff] }
 0x270   :  { %v1809_v31 = vsel %vm337_vm4, %v1793_v34, %v1725_v8 }
 0x271   :  { %v1727_v18 = vpop.permute.xlu1 %1726  ;;  %6983 = vmatpush.msk.msra.mxu3 %vm671_vm3, %v1809_v31  ;;  %v9173_v27 = vpop.permute.xlu2 %2328 }
 0x272   :  { %v9344_v34 = vpop.f32.mrf.mxu2  ;;  %v9346_v8 = vpop.f32.mrf.mxu3 }
 0x275   :  { %2576 = vrot.lane.b32.xlu0 %v9178_v26, %s7363_s16 }
 0x277   :  { %2578 = vrot.lane.b32.xlu1 %v9184_v42, %s7363_s16  ;;  %v1731_v2 = vpop.permute.xlu0 %1730  ;;  %2428 = vrot.lane.b32.xlu2 %v8861_v16, %s7359_s14 }
 0x279   :  { %v1733_v9 = vpop.permute.xlu1 %1732  ;;  %v9189_v52 = vpop.permute.xlu2 %2334 }
 0x27a   :  { %v9391_v59 = vpop.f32.mrf.mxu2  ;;  %v9393_v28 = vpop.f32.mrf.mxu3 }
 0x27b   :  { %12210 = vst [vmem:[#allocation5_spill] sm:$0xff] %v9391_v59 }
 0x27d   :  { %2430 = vrot.lane.b32.xlu0 %v8865_v0, %s7359_s14 }
 0x27f   :  { %2464 = vrot.lane.b32.xlu1 %v8748_v43, %s7360_s15  ;;  %v9195_v25 = vpop.permute.xlu0 %1816  ;;  %2476 = vrot.lane.b32.xlu2 %v8861_v16, %s7360_s15  ;;  %v1762_v16 = vsel %vm286_vm0, %v12196_v58, %v8589_v41 }
 0x280   :  { %6952 = vmatmul.msk.f32.gmra.mxu0 %vm666_vm5, %v9195_v25  ;;  %6955 = vmatmul.msk.f32.gmra.mxu1 %vm666_vm5, %v9195_v25  ;;  %v1778_v41 = vsel %vm303_vm1, %v1762_v16, %v8675_v51 }
 0x281   :  { %6958 = vmatmul.msk.f32.gmra.mxu2 %vm666_vm5, %v9195_v25  ;;  %6961 = vmatmul.msk.f32.gmra.mxu3 %vm666_vm5, %v9195_v25  ;;  %v9207_v46 = vpop.permute.xlu1 %2320  ;;  %v9209_v43 = vpop.permute.xlu2 %2340  ;;  %v1794_v48 = vsel %vm320_vm2, %v1778_v41, %v12204_v44 }
 0x282   :  { %v1810_v15 = vsel %vm337_vm4, %v1794_v48, %v1727_v18  ;;  %v9410_v1 = vpop.f32.mrf.mxu2  ;;  %v9412_v55 = vpop.f32.mrf.mxu3 }
 0x283   :  { %12211 = vst [vmem:[#allocation12_spill] sm:$0xff] %v9410_v1 }
 0x285   :  { %2466 = vrot.lane.b32.xlu0 %v8752_v30, %s7360_s15  ;;  %v12201_v30 = vld [vmem:[#allocation80_spill] sm:$0xff] }
 0x286   :  { %v1780_v4 = vsel %vm303_vm1, %v1764_v32, %v12201_v30 }
 0x287   :  { %2478 = vrot.lane.b32.xlu1 %v8865_v0, %s7360_s15  ;;  %v9239_v21 = vpop.permute.xlu0 %2324  ;;  %2424 = vrot.lane.b32.xlu2 %v12202_v7, %s7359_s14  ;;  %v1796_v51 = vsel %vm320_vm2, %v1780_v4, %v12203_v24  ;;  %v12206_v0 = vld [vmem:[#allocation15_spill] sm:$0xff] }
 0x288   :  { %6963 = vmatmul.msk.f32.vlgmr.msrb.gmra.mxu0 %vm666_vm5, %v9110_v13  ;;  %6966 = vmatmul.msk.f32.vlgmr.msrb.gmra.mxu1 %vm666_vm5, %v9110_v13  ;;  %v1797_v17 = vsel %vm320_vm2, %v1781_v38, %v12206_v0  ;;  %v1812_v40 = vsel %vm337_vm4, %v1796_v51, %v1731_v2  ;;  %v9363_v2 = vld [vmem:[%s11862_s0 + $0x4] sm:$0xff]  ;;  %v9408_v38 = vpop.f32.mrf.mxu1 }
 0x289   :  { %6969 = vmatmul.msk.f32.vlgmr.msrb.gmra.mxu2 %vm666_vm5, %v9110_v13  ;;  %6972 = vmatmul.msk.f32.vlgmr.msrb.gmra.mxu3 %vm666_vm5, %v9110_v13  ;;  %v9262_v10 = vpop.permute.xlu1 %2326  ;;  %v9264_v62 = vpop.permute.xlu2 %2346  ;;  %v1813_v63 = vsel %vm337_vm4, %v1797_v17, %v1733_v9  ;;  %v11956_v58 = vrot.slane %v9363_v2, 2  ;;  %v11957_v16 = vrot.slane %v9363_v2, 3 }
 0x28a   :  { %6986 = vmatpush.msk.msrb.mxu0 %vm671_vm3, %v1810_v15  ;;  %6989 = vmatpush.msk.msrb.mxu1 %vm671_vm3, %v1811_v33  ;;  %v9365_v9 = vpop.f32.mrf.mxu0  ;;  %v9428_v44 = vpop.f32.mrf.mxu2 }
 0x28b   :  { %6992 = vmatpush.msk.msrb.mxu2 %vm671_vm3, %v1812_v40  ;;  %6995 = vmatpush.msk.msrb.mxu3 %vm671_vm3, %v1813_v63  ;;  %v3069_v60 = vperm.slane %v11957_v16, 0  ;;  %12213 = vst [vmem:[#allocation10_spill] sm:$0xff] %v9428_v44  ;;  %v9430_v48 = vpop.f32.mrf.mxu3 }
 0x28c   :  { %12214 = vst [vmem:[#allocation13_spill] sm:$0xff] %v9430_v48 }
 0x28d   :  { %2436 = vrot.lane.b32.xlu0 %v8903_v37, %s7359_s14 }
 0x28f   :  { %2426 = vrot.lane.b32.xlu1 %v12207_v53, %s7359_s14  ;;  %v9276_v29 = vpop.permute.xlu0 %2330  ;;  %2438 = vrot.lane.b32.xlu2 %v8928_v12, %s7359_s14 }
 0x290   :  { %6964 = vmatmul.msk.f32.gmra.mxu0 %vm666_vm5, %v9195_v25  ;;  %6967 = vmatmul.msk.f32.gmra.mxu1 %vm666_vm5, %v9195_v25  ;;  %v9424_v51 = vpop.f32.mrf.mxu1 }
 0x291   :  { %6970 = vmatmul.msk.f32.gmra.mxu2 %vm666_vm5, %v9195_v25  ;;  %6973 = vmatmul.msk.f32.gmra.mxu3 %vm666_vm5, %v9195_v25  ;;  %v9288_v36 = vpop.permute.xlu1 %2332  ;;  %v9290_v47 = vpop.permute.xlu2 %2368 }
 0x292   :  { %v9398_v11 = vpop.f32.mrf.mxu0 }
 0x293   :  { %v9451_v40 = vpop.f32.mrf.mxu3 }
 0x294   :  { %12218 = vst [vmem:[#allocation33_spill] sm:$0xff] %v9451_v40 }
 0x295   :  { %2472 = vrot.lane.b32.xlu0 %v12202_v7, %s7360_s15 }
 0x297   :  { %2484 = vrot.lane.b32.xlu1 %v8903_v37, %s7360_s15  ;;  %v9296_v50 = vpop.permute.xlu0 %2336  ;;  %2474 = vrot.lane.b32.xlu2 %v12207_v53, %s7360_s15 }
 0x298   :  { %6975 = vmatmul.msk.f32.vlgmr.msra.gmra.mxu0 %vm666_vm5, %v9110_v13  ;;  %6978 = vmatmul.msk.f32.vlgmr.msra.gmra.mxu1 %vm666_vm5, %v9110_v13  ;;  %v9442_v33 = vpop.f32.mrf.mxu1 }
 0x299   :  { %6981 = vmatmul.msk.f32.vlgmr.msra.gmra.mxu2 %vm666_vm5, %v9110_v13  ;;  %6984 = vmatmul.msk.f32.vlgmr.msra.gmra.mxu3 %vm666_vm5, %v9110_v13  ;;  %v9308_v14 = vpop.permute.xlu1 %2338  ;;  %v9310_v37 = vpop.permute.xlu2 %2374  ;;  %12216 = vst [vmem:[#allocation26_spill] sm:$0xff] %v9442_v33 }
 0x29a   :  { %v9420_v4 = vpop.f32.mrf.mxu0 }
 0x29b   :  { %12212 = vst [vmem:[#allocation29_spill] sm:$0xff] %v9420_v4 }
 0x29d   :  { %2486 = vrot.lane.b32.xlu0 %v8928_v12, %s7360_s15 }
 0x29f   :  { %2432 = vrot.lane.b32.xlu1 %v12208_v57, %s7359_s14  ;;  %v9320_v49 = vpop.permute.xlu0 %2342  ;;  %2444 = vrot.lane.b32.xlu2 %v8960_v54, %s7359_s14 }
 0x2a0   :  { %6976 = vmatmul.msk.f32.gmra.mxu0 %vm666_vm5, %v9195_v25  ;;  %6979 = vmatmul.msk.f32.gmra.mxu1 %vm666_vm5, %v9195_v25  ;;  %v9469_v16 = vpop.f32.mrf.mxu1 }
 0x2a1   :  { %6982 = vmatmul.msk.f32.gmra.mxu2 %vm666_vm5, %v9195_v25  ;;  %6985 = vmatmul.msk.f32.gmra.mxu3 %vm666_vm5, %v9195_v25  ;;  %v9332_v12 = vpop.permute.xlu1 %2344  ;;  %v9334_v23 = vpop.permute.xlu2 %2380  ;;  %12220 = vst [vmem:[#allocation43_spill] sm:$0xff] %v9469_v16 }
 0x2a2   :  { %v9439_v17 = vpop.f32.mrf.mxu0 }
 0x2a3   :  { %12215 = vst [vmem:[#allocation18_spill] sm:$0xff] %v9439_v17  ;;  %v12223_v17 = vld [vmem:[#allocation73_spill] sm:$0xff] }
 0x2a4   :  { %v12224_v4 = vrot.slane %v12223_v17, 3 }
 0x2a5   :  { %2434 = vrot.lane.b32.xlu0 %v12209_v45, %s7359_s14 }
 0x2a6   :  { %v2515_v16 = vsel %vm286_vm0, %v12224_v4, %v9262_v10 }
 0x2a7   :  { %2446 = vrot.lane.b32.xlu1 %v8964_v20, %s7359_s14  ;;  %v9340_v61 = vpop.permute.xlu0 %2348  ;;  %2480 = vrot.lane.b32.xlu2 %v12208_v57, %s7360_s15  ;;  %v9456_v57 = vperm.slane %v9363_v2, 0  ;;  %v2531_v33 = vsel %vm303_vm1, %v2515_v16, %v9310_v37 }
 0x2a8   :  { %6987 = vmatmul.msk.f32.vlgmr.msrb.gmra.mxu0 %vm666_vm5, %v9110_v13  ;;  %6990 = vmatmul.msk.f32.vlgmr.msrb.gmra.mxu1 %vm666_vm5, %v9110_v13 }
 0x2a9   :  { %6993 = vmatmul.msk.f32.vlgmr.msrb.gmra.mxu2 %vm666_vm5, %v9110_v13  ;;  %6996 = vmatmul.msk.f32.vlgmr.msrb.gmra.mxu3 %vm666_vm5, %v9110_v13  ;;  %v9356_v31 = vpop.permute.xlu1 %2350  ;;  %v9358_v18 = vpop.permute.xlu2 %2386 }
 0x2ad   :  { %2492 = vrot.lane.b32.xlu0 %v8960_v54, %s7360_s15 }
 0x2af   :  { %2482 = vrot.lane.b32.xlu1 %v12209_v45, %s7360_s15  ;;  %v9372_v13 = vpop.permute.xlu0 %2370  ;;  %2494 = vrot.lane.b32.xlu2 %v8964_v20, %s7360_s15  ;;  %v3068_v20 = vperm.slane %v11956_v58, 0  ;;  %v9458_v45 = vpop.f32.mrf.mxu0  ;;  %v11960_v58 = vrot.slane %v9363_v2, 7 }
 0x2b0   :  { %6988 = vmatmul.msk.f32.gmra.mxu0 %vm666_vm5, %v9195_v25  ;;  %6991 = vmatmul.msk.f32.gmra.mxu1 %vm666_vm5, %v9195_v25  ;;  %12219 = vst [vmem:[#allocation36_spill] sm:$0xff] %v9458_v45 }
 0x2b1   :  { %6994 = vmatmul.msk.f32.gmra.mxu2 %vm666_vm5, %v9195_v25  ;;  %6997 = vmatmul.msk.f32.gmra.mxu3 %vm666_vm5, %v9195_v25  ;;  %v9385_v54 = vpop.permute.xlu1 %2372  ;;  %v9387_v19 = vpop.permute.xlu2 %2392  ;;  %v9487_v44 = vperm.slane %v11960_v58, 0 }
 0x2b5   :  { %3086 = vrot.lane.b32.xlu0 %v3068_v20, %s7357_s27 }
 0x2b7   :  { %3088 = vrot.lane.b32.xlu1 %v3069_v60, %s7357_s27  ;;  %v9401_v25 = vpop.permute.xlu0 %2376  ;;  %3134 = vrot.lane.b32.xlu2 %v3068_v20, %s7358_s30 }
 0x2b9   :  { %v9404_v32 = vpop.permute.xlu1 %2378  ;;  %v9406_v41 = vpop.permute.xlu2 %2398 }
 0x2bd   :  { %2440 = vrot.lane.b32.xlu0 %v8932_v35, %s7359_s14 }
 0x2bf   :  { %3136 = vrot.lane.b32.xlu1 %v3069_v60, %s7358_s30  ;;  %v9417_v30 = vpop.permute.xlu0 %2382  ;;  %3182 = vrot.lane.b32.xlu2 %v3068_v20, %s7359_s14 }
 0x2c1   :  { %v9422_v7 = vpop.permute.xlu1 %2384  ;;  %v2421_v24 = vpop.permute.xlu2 %2420 }
 0x2c5   :  { %2442 = vrot.lane.b32.xlu0 %v8936_v3, %s7359_s14 }
 0x2c7   :  { %2488 = vrot.lane.b32.xlu1 %v8932_v35, %s7360_s15  ;;  %v9434_v39 = vpop.permute.xlu0 %2388  ;;  %3184 = vrot.lane.b32.xlu2 %v3069_v60, %s7359_s14  ;;  %v9449_v35 = vpop.f32.mrf.mxu2 }
 0x2c8   :  { %12217 = vst [vmem:[#allocation28_spill] sm:$0xff] %v9449_v35 }
 0x2c9   :  { %v9437_v5 = vpop.permute.xlu1 %2390  ;;  %v2471_v0 = vpop.permute.xlu2 %2470 }
 0x2cd   :  { %3230 = vrot.lane.b32.xlu0 %v3068_v20, %s7360_s15 }
 0x2cf   :  { %2490 = vrot.lane.b32.xlu1 %v8936_v3, %s7360_s15  ;;  %v9446_v15 = vpop.permute.xlu0 %2394  ;;  %3232 = vrot.lane.b32.xlu2 %v3069_v60, %s7360_s15  ;;  %v11958_v3 = vrot.slane %v9363_v2, 6  ;;  %v11959_v60 = vrot.slane %v9363_v2, 1  ;;  %v9477_v48 = vpop.f32.mrf.mxu2 }
 0x2d0   :  { %12221 = vst [vmem:[#allocation44_spill] sm:$0xff] %v9477_v48  ;;  %v12227_v48 = vrot.slane %v12223_v17, 2 }
 0x2d1   :  { %v9453_v63 = vpop.permute.xlu1 %2396  ;;  %v2429_v53 = vpop.permute.xlu2 %2428  ;;  %v9483_v35 = vperm.slane %v11959_v60, 0 }
 0x2d2   :  { %v2514_v58 = vsel %vm286_vm0, %v12227_v48, %v9239_v21 }
 0x2d3   :  { %v2530_v4 = vsel %vm303_vm1, %v2514_v58, %v9385_v54 }
 0x2d4   :  { %v2546_v21 = vsel %vm320_vm2, %v2530_v4, %v2421_v24 }
 0x2d5   :  { %3338 = vrot.lane.b32.xlu0 %v9178_v26, %s7364_s20  ;;  %v9475_v26 = vperm.slane %v11958_v3, 0  ;;  %v9495_v3 = vpop.f32.mrf.mxu0 }
 0x2d6   :  { %12225 = vst [vmem:[#allocation59_spill] sm:$0xff] %v9495_v3  ;;  %v9520_v3 = vpop.f32.mrf.mxu1 }
 0x2d7   :  { %3340 = vrot.lane.b32.xlu1 %v9184_v42, %s7364_s20  ;;  %v2417_v20 = vpop.permute.xlu0 %2416  ;;  %3082 = vrot.lane.b32.xlu2 %v9456_v57, %s7357_s27  ;;  %v9479_v42 = vpop.f32.mrf.mxu3  ;;  %12228 = vst [vmem:[#allocation51_spill] sm:$0xff] %v9520_v3 }
 0x2d8   :  { %12222 = vst [vmem:[#allocation58_spill] sm:$0xff] %v9479_v42  ;;  %v12226_v42 = vrot.slane %v12223_v17, 6 }
 0x2d9   :  { %v9471_v45 = vpop.permute.xlu1 %2418  ;;  %v2477_v40 = vpop.permute.xlu2 %2476 }
 0x2da   :  { %v2518_v60 = vsel %vm286_vm0, %v12226_v42, %v9288_v36 }
 0x2db   :  { %v2534_v42 = vsel %vm303_vm1, %v2518_v60, %v9334_v23  ;;  %v9527_v23 = vpop.f32.mrf.mxu2 }
 0x2dc   :  { %v2550_v1 = vsel %vm320_vm2, %v2534_v42, %v2429_v53  ;;  %12229 = vst [vmem:[#allocation61_spill] sm:$0xff] %v9527_v23 }
 0x2dd   :  { %3094 = vrot.lane.b32.xlu0 %v9475_v26, %s7357_s27  ;;  %v2566_v58 = vsel %vm337_vm4, %v2550_v1, %v2477_v40  ;;  %v9540_v1 = vpop.f32.mrf.mxu0  ;;  %v2512_v40 = vsel %vm286_vm0, %v12223_v17, %v9207_v46 }
 0x2de   :  { %12231 = vst [vmem:[#allocation7_spill] sm:$0xff] %v9540_v1  ;;  %v2528_v4 = vsel %vm303_vm1, %v2512_v40, %v9290_v47  ;;  %v12234_v47 = vrot.slane %v12223_v17, 1  ;;  %v12236_v40 = vrot.slane %v12223_v17, 7 }
 0x2df   :  { %3084 = vrot.lane.b32.xlu1 %v9483_v35, %s7357_s27  ;;  %v2423_v10 = vpop.permute.xlu0 %2422  ;;  %3096 = vrot.lane.b32.xlu2 %v9487_v44, %s7357_s27  ;;  %v9529_v54 = vpop.f32.mrf.mxu3  ;;  %v2544_v46 = vsel %vm320_vm2, %v2528_v4, %v2417_v20 }
 0x2e0   :  { %v2547_v36 = vsel %vm320_vm2, %v2531_v33, %v2423_v10  ;;  %12230 = vst [vmem:[#allocation17_spill] sm:$0xff] %v9529_v54  ;;  %v9550_v33 = vpop.f32.mrf.mxu1  ;;  %v2519_v4 = vsel %vm286_vm0, %v12236_v40, %v9189_v52 }
 0x2e1   :  { %v2563_v48 = vsel %vm337_vm4, %v2547_v36, %v2471_v0  ;;  %v2469_v37 = vpop.permute.xlu1 %2468  ;;  %v9518_v16 = vpop.permute.xlu2 %2424  ;;  %12232 = vst [vmem:[#allocation8_spill] sm:$0xff] %v9550_v33 }
 0x2e2   :  { %v2562_v59 = vsel %vm337_vm4, %v2546_v21, %v2469_v37  ;;  %7009 = vmatpush.msk.msra.mxu3 %vm671_vm3, %v2563_v48  ;;  %v2513_v37 = vsel %vm286_vm0, %v12234_v47, %v9153_v22 }
 0x2e3   :  { %7006 = vmatpush.msk.msra.mxu2 %vm671_vm3, %v2562_v59  ;;  %v9557_v53 = vpop.f32.mrf.mxu2 }
 0x2e5   :  { %7018 = vmatpush.msk.msrb.mxu2 %vm671_vm3, %v2566_v58  ;;  %3130 = vrot.lane.b32.xlu0 %v9456_v57, %s7358_s30  ;;  %v9572_v21 = vpop.f32.mrf.mxu0  ;;  %v2529_v58 = vsel %vm303_vm1, %v2513_v37, %v9372_v13  ;;  %v2535_v13 = vsel %vm303_vm1, %v2519_v4, %v9417_v30 }
 0x2e6   :  { %12233 = vst [vmem:[#allocation16_spill] sm:$0xff] %v9572_v21 }
 0x2e7   :  { %3142 = vrot.lane.b32.xlu1 %v9475_v26, %s7358_s30  ;;  %v9536_v24 = vpop.permute.xlu0 %2576  ;;  %3132 = vrot.lane.b32.xlu2 %v9483_v35, %s7358_s30  ;;  %v9559_v60 = vpop.f32.mrf.mxu3 }
 0x2e8   :  { %7007 = vmatmul.msk.f32.vlgmr.msra.gmra.mxu2 %vm666_vm5, %v9536_v24  ;;  %7010 = vmatmul.msk.f32.vlgmr.msra.gmra.mxu3 %vm666_vm5, %v9536_v24  ;;  %v9584_v20 = vpop.f32.mrf.mxu1 }
 0x2e9   :  { %v9546_v59 = vpop.permute.xlu1 %2578  ;;  %v9548_v0 = vpop.permute.xlu2 %2438  ;;  %12235 = vst [vmem:[#allocation21_spill] sm:$0xff] %v9584_v20 }
 0x2ed   :  { %3144 = vrot.lane.b32.xlu0 %v9487_v44, %s7358_s30  ;;  %v9615_v30 = vpop.f32.mrf.mxu0 }
 0x2ef   :  { %3178 = vrot.lane.b32.xlu1 %v9456_v57, %s7359_s14  ;;  %v2431_v10 = vpop.permute.xlu0 %2430  ;;  %3190 = vrot.lane.b32.xlu2 %v9475_v26, %s7359_s14 }
 0x2f0   :  { %7008 = vmatmul.msk.f32.gmra.mxu2 %vm666_vm5, %v9546_v59  ;;  %7011 = vmatmul.msk.f32.gmra.mxu3 %vm666_vm5, %v9546_v59  ;;  %v2551_v52 = vsel %vm320_vm2, %v2535_v13, %v2431_v10  ;;  %v9624_v10 = vld [vmem:[%s11862_s0 + $0xc] sm:$0xff]  ;;  %v12238_v13 = vrot.slane %v12223_v17, 5 }
 0x2f1   :  { %v2465_v36 = vpop.permute.xlu1 %2464  ;;  %v2475_v42 = vpop.permute.xlu2 %2474  ;;  %v11961_v4 = vrot.slane %v9624_v10, 2 }
 0x2f2   :  { %v2560_v48 = vsel %vm337_vm4, %v2544_v46, %v2465_v36  ;;  %v2545_v46 = vsel %vm320_vm2, %v2529_v58, %v9471_v45  ;;  %v9598_v36 = vpop.f32.mrf.mxu2  ;;  %v11962_v58 = vrot.slane %v9363_v2, 4 }
 0x2f3   :  { %7000 = vmatpush.msk.msra.mxu0 %vm671_vm3, %v2560_v48  ;;  %v9600_v48 = vpop.f32.mrf.mxu3 }
 0x2f4   :  { %7001 = vmatmul.msk.f32.vlgmr.msra.gmra.mxu0 %vm666_vm5, %v9536_v24 }
 0x2f5   :  { %3180 = vrot.lane.b32.xlu0 %v9483_v35, %s7359_s14 }
 0x2f7   :  { %3192 = vrot.lane.b32.xlu1 %v9487_v44, %s7359_s14  ;;  %v2467_v22 = vpop.permute.xlu0 %2466  ;;  %3226 = vrot.lane.b32.xlu2 %v9456_v57, %s7360_s15 }
 0x2f8   :  { %v2561_v47 = vsel %vm337_vm4, %v2545_v46, %v2467_v22  ;;  %7019 = vmatmul.msk.f32.vlgmr.msrb.gmra.mxu2 %vm666_vm5, %v9536_v24  ;;  %v9635_v22 = vpop.f32.mrf.mxu1 }
 0x2f9   :  { %v2479_v45 = vpop.permute.xlu1 %2478  ;;  %7003 = vmatpush.msk.msra.mxu1 %vm671_vm3, %v2561_v47  ;;  %v9609_v37 = vpop.permute.xlu2 %2444  ;;  %12237 = vst [vmem:[#allocation24_spill] sm:$0xff] %v9635_v22 }
 0x2fa   :  { %v2567_v57 = vsel %vm337_vm4, %v2551_v52, %v2479_v45  ;;  %7004 = vmatmul.msk.f32.vlgmr.msra.gmra.mxu1 %vm666_vm5, %v9536_v24  ;;  %v9649_v45 = vpop.f32.mrf.mxu2 }
 0x2fb   :  { %7021 = vmatpush.msk.msrb.mxu3 %vm671_vm3, %v2567_v57  ;;  %v9651_v57 = vpop.f32.mrf.mxu3 }
 0x2fc   :  { %7002 = vmatmul.msk.f32.gmra.mxu0 %vm666_vm5, %v9546_v59  ;;  %7022 = vmatmul.msk.f32.vlgmr.msrb.gmra.mxu3 %vm666_vm5, %v9536_v24 }
 0x2fd   :  { %3238 = vrot.lane.b32.xlu0 %v9475_v26, %s7360_s15  ;;  %v2517_v26 = vsel %vm286_vm0, %v12238_v13, %v9276_v29  ;;  %v12239_v13 = vrot.slane %v9363_v2, 5 }
 0x2ff   :  { %3228 = vrot.lane.b32.xlu1 %v9483_v35, %s7360_s15  ;;  %v2437_v40 = vpop.permute.xlu0 %2436  ;;  %3240 = vrot.lane.b32.xlu2 %v9487_v44, %s7360_s15  ;;  %v2533_v35 = vsel %vm303_vm1, %v2517_v26, %v9404_v32  ;;  %v9647_v44 = vperm.slane %v11962_v58, 0  ;;  %v9659_v32 = vperm.slane %v11961_v4, 0  ;;  %v9663_v26 = vperm.slane %v12239_v13, 0 }
 0x300   :  { %7020 = vmatmul.msk.f32.gmra.mxu2 %vm666_vm5, %v9546_v59 }
 0x301   :  { %v2427_v47 = vpop.permute.xlu1 %2426  ;;  %v2481_v52 = vpop.permute.xlu2 %2480 }
 0x302   :  { %v2549_v46 = vsel %vm320_vm2, %v2533_v35, %v2427_v47  ;;  %7005 = vmatmul.msk.f32.gmra.mxu1 %vm666_vm5, %v9546_v59  ;;  %v12240_v35 = vrot.slane %v12223_v17, 4 }
 0x303   :  { %v2565_v29 = vsel %vm337_vm4, %v2549_v46, %v2475_v42  ;;  %v9675_v46 = vpop.f32.mrf.mxu0 }
 0x304   :  { %7015 = vmatpush.msk.msrb.mxu1 %vm671_vm3, %v2565_v29  ;;  %7023 = vmatmul.msk.f32.gmra.mxu3 %vm666_vm5, %v9546_v59  ;;  %v2516_v47 = vsel %vm286_vm0, %v12240_v35, %v9173_v27  ;;  %v12241_v29 = vld [vmem:[#allocation74_spill] sm:$0xff] }
 0x305   :  { %3090 = vrot.lane.b32.xlu0 %v9647_v44, %s7357_s27  ;;  %v2532_v13 = vsel %vm303_vm1, %v2516_v47, %v9401_v25  ;;  %v12242_v4 = vrot.slane %v12241_v29, 2 }
 0x306   :  { %v2548_v17 = vsel %vm320_vm2, %v2532_v13, %v9518_v16  ;;  %v12243_v16 = vrot.slane %v9624_v10, 3  ;;  %v9698_v13 = vpop.f32.mrf.mxu1 }
 0x307   :  { %v2522_v58 = vsel %vm286_vm0, %v12242_v4, %v9209_v43  ;;  %3102 = vrot.lane.b32.xlu1 %v9659_v32, %s7357_s27  ;;  %v2473_v27 = vpop.permute.xlu0 %2472  ;;  %3092 = vrot.lane.b32.xlu2 %v9663_v26, %s7357_s27 }
 0x308   :  { %v2538_v35 = vsel %vm303_vm1, %v2522_v58, %v9434_v39  ;;  %v2564_v25 = vsel %vm337_vm4, %v2548_v17, %v2473_v27  ;;  %v9696_v4 = vperm.slane %v12243_v16, 0  ;;  %v9706_v39 = vpop.f32.mrf.mxu2  ;;  %v9708_v58 = vpop.f32.mrf.mxu3 }
 0x309   :  { %v2554_v47 = vsel %vm320_vm2, %v2538_v35, %v2437_v40  ;;  %v2485_v42 = vpop.permute.xlu1 %2484  ;;  %7012 = vmatpush.msk.msrb.mxu0 %vm671_vm3, %v2564_v25  ;;  %v2495_v43 = vpop.permute.xlu2 %2494  ;;  %12244 = vst [vmem:[#allocation31_spill] sm:$0xff] %v9706_v39  ;;  %v12245_v40 = vrot.slane %v12241_v29, 3 }
 0x30a   :  { %v2570_v22 = vsel %vm337_vm4, %v2554_v47, %v2485_v42  ;;  %7013 = vmatmul.msk.f32.vlgmr.msrb.gmra.mxu0 %vm666_vm5, %v9536_v24  ;;  %7016 = vmatmul.msk.f32.vlgmr.msrb.gmra.mxu1 %vm666_vm5, %v9536_v24 }
 0x30b   :  { %7030 = vmatpush.msk.msra.mxu2 %vm671_vm3, %v2570_v22  ;;  %v2523_v42 = vsel %vm286_vm0, %v12245_v40, %v9320_v49  ;;  %v9726_v35 = vpop.f32.mrf.mxu0  ;;  %v2520_v49 = vsel %vm286_vm0, %v12241_v29, %v9296_v50 }
 0x30c   :  { %7031 = vmatmul.msk.f32.vlgmr.msra.gmra.mxu2 %vm666_vm5, %v9536_v24  ;;  %v2539_v17 = vsel %vm303_vm1, %v2523_v42, %v9437_v5  ;;  %12246 = vst [vmem:[#allocation32_spill] sm:$0xff] %v9726_v35  ;;  %v2536_v5 = vsel %vm303_vm1, %v2520_v49, %v9422_v7  ;;  %v12247_v7 = vrot.slane %v12241_v29, 7 }
 0x30d   :  { %3104 = vrot.lane.b32.xlu0 %v9696_v4, %s7357_s27  ;;  %v2555_v22 = vsel %vm320_vm2, %v2539_v17, %v9548_v0 }
 0x30e   :  { %v9745_v40 = vpop.f32.mrf.mxu1  ;;  %v2527_v42 = vsel %vm286_vm0, %v12247_v7, %v9356_v31 }
 0x30f   :  { %3138 = vrot.lane.b32.xlu1 %v9647_v44, %s7358_s30  ;;  %v2487_v27 = vpop.permute.xlu0 %2486  ;;  %3150 = vrot.lane.b32.xlu2 %v9659_v32, %s7358_s30 }
 0x310   :  { %v2571_v25 = vsel %vm337_vm4, %v2555_v22, %v2487_v27  ;;  %v9756_v17 = vpop.f32.mrf.mxu2  ;;  %v2543_v27 = vsel %vm303_vm1, %v2527_v42, %v9406_v41  ;;  %v12251_v41 = vrot.slane %v12241_v29, 1 }
 0x311   :  { %v2433_v47 = vpop.permute.xlu1 %2432  ;;  %7033 = vmatpush.msk.msra.mxu3 %vm671_vm3, %v2571_v25  ;;  %v9735_v0 = vpop.permute.xlu2 %3134  ;;  %12248 = vst [vmem:[#allocation39_spill] sm:$0xff] %v9756_v17 }
 0x312   :  { %v2552_v16 = vsel %vm320_vm2, %v2536_v5, %v2433_v47  ;;  %7014 = vmatmul.msk.f32.gmra.mxu0 %vm666_vm5, %v9546_v59  ;;  %7017 = vmatmul.msk.f32.gmra.mxu1 %vm666_vm5, %v9546_v59 }
 0x313   :  { %v2568_v50 = vsel %vm337_vm4, %v2552_v16, %v2481_v52  ;;  %7034 = vmatmul.msk.f32.vlgmr.msra.gmra.mxu3 %vm666_vm5, %v9536_v24  ;;  %v9758_v52 = vpop.f32.mrf.mxu3  ;;  %v9768_v5 = vpop.f32.mrf.mxu0  ;;  %v2521_v16 = vsel %vm286_vm0, %v12251_v41, %v9308_v14 }
 0x314   :  { %7024 = vmatpush.msk.msra.mxu0 %vm671_vm3, %v2568_v50  ;;  %7032 = vmatmul.msk.f32.gmra.mxu2 %vm666_vm5, %v9546_v59  ;;  %12249 = vst [vmem:[#allocation46_spill] sm:$0xff] %v9758_v52  ;;  %v12252_v50 = vrot.slane %v12241_v29, 6 }
 0x315   :  { %3140 = vrot.lane.b32.xlu0 %v9663_v26, %s7358_s30  ;;  %12250 = vst [vmem:[#allocation47_spill] sm:$0xff] %v9768_v5 }
 0x316   :  { %v2526_v7 = vsel %vm286_vm0, %v12252_v50, %v9340_v61  ;;  %v9787_v42 = vpop.f32.mrf.mxu1  ;;  %v2537_v61 = vsel %vm303_vm1, %v2521_v16, %v9358_v18  ;;  %v11963_v16 = vrot.slane %v9624_v10, 6 }
 0x317   :  { %3152 = vrot.lane.b32.xlu1 %v9696_v4, %s7358_s30  ;;  %v2435_v22 = vpop.permute.xlu0 %2434  ;;  %3186 = vrot.lane.b32.xlu2 %v9647_v44, %s7359_s14  ;;  %12253 = vst [vmem:[#allocation49_spill] sm:$0xff] %v9787_v42 }
 0x319   :  { %v2447_v49 = vpop.permute.xlu1 %2446  ;;  %v9766_v25 = vpop.permute.xlu2 %3182 }
 0x31a   :  { %v2559_v31 = vsel %vm320_vm2, %v2543_v27, %v2447_v49  ;;  %7025 = vmatmul.msk.f32.vlgmr.msra.gmra.mxu0 %vm666_vm5, %v9536_v24  ;;  %v9799_v49 = vpop.f32.mrf.mxu2 }
 0x31b   :  { %v2575_v47 = vsel %vm337_vm4, %v2559_v31, %v2495_v43  ;;  %7035 = vmatmul.msk.f32.gmra.mxu3 %vm666_vm5, %v9546_v59  ;;  %v2542_v43 = vsel %vm303_vm1, %v2526_v7, %v9453_v63  ;;  %12254 = vst [vmem:[#allocation54_spill] sm:$0xff] %v9799_v49  ;;  %v9801_v31 = vpop.f32.mrf.mxu3  ;;  %v2553_v63 = vsel %vm320_vm2, %v2537_v61, %v2435_v22  ;;  %v9814_v18 = vpop.f32.mrf.mxu0 }
 0x31c   :  { %7045 = vmatpush.msk.msrb.mxu3 %vm671_vm3, %v2575_v47  ;;  %v2558_v27 = vsel %vm320_vm2, %v2542_v43, %v9609_v37  ;;  %12255 = vst [vmem:[#allocation62_spill] sm:$0xff] %v9801_v31 }
 0x31d   :  { %3198 = vrot.lane.b32.xlu0 %v9659_v32, %s7359_s14  ;;  %12256 = vst [vmem:[#allocation64_spill] sm:$0xff] %v9814_v18 }
 0x31e   :  { %v9825_v7 = vpop.f32.mrf.mxu1 }
 0x31f   :  { %3188 = vrot.lane.b32.xlu1 %v9663_v26, %s7359_s14  ;;  %v2493_v14 = vpop.permute.xlu0 %2492  ;;  %3200 = vrot.lane.b32.xlu2 %v9696_v4, %s7359_s14  ;;  %12257 = vst [vmem:[#allocation65_spill] sm:$0xff] %v9825_v7 }
 0x320   :  { %v2574_v47 = vsel %vm337_vm4, %v2558_v27, %v2493_v14 }
 0x321   :  { %v2483_v41 = vpop.permute.xlu1 %2482  ;;  %7042 = vmatpush.msk.msrb.mxu2 %vm671_vm3, %v2574_v47  ;;  %v3185_v37 = vpop.permute.xlu2 %3184 }
 0x322   :  { %v2569_v50 = vsel %vm337_vm4, %v2553_v63, %v2483_v41  ;;  %7026 = vmatmul.msk.f32.gmra.mxu0 %vm666_vm5, %v9546_v59  ;;  %7043 = vmatmul.msk.f32.vlgmr.msrb.gmra.mxu2 %vm666_vm5, %v9536_v24  ;;  %v9827_v14 = vpop.f32.mrf.mxu2  ;;  %v12261_v63 = vrot.slane %v9363_v2, 3 }
 0x323   :  { %7046 = vmatmul.msk.f32.vlgmr.msrb.gmra.mxu3 %vm666_vm5, %v9536_v24  ;;  %7027 = vmatpush.msk.msra.mxu1 %vm671_vm3, %v2569_v50  ;;  %12258 = vst [vmem:[#allocation20_spill] sm:$0xff] %v9827_v14  ;;  %v9829_v61 = vpop.f32.mrf.mxu3  ;;  %v9847_v47 = vpop.f32.mrf.mxu0 }
 0x324   :  { %7028 = vmatmul.msk.f32.vlgmr.msra.gmra.mxu1 %vm666_vm5, %v9536_v24  ;;  %12259 = vst [vmem:[#allocation6_spill] sm:$0xff] %v9829_v61 }
 0x325   :  { %3234 = vrot.lane.b32.xlu0 %v9647_v44, %s7360_s15  ;;  %v9836_v44 = vperm.slane %v9624_v10, 0  ;;  %12260 = vst [vmem:[#allocation9_spill] sm:$0xff] %v9847_v47 }
 0x326   :  { %v9864_v54 = vpop.f32.mrf.mxu1 }
 0x327   :  { %3246 = vrot.lane.b32.xlu1 %v9659_v32, %s7360_s15  ;;  %v3087_v22 = vpop.permute.xlu0 %3086  ;;  %3236 = vrot.lane.b32.xlu2 %v9663_v26, %s7360_s15  ;;  %v9840_v32 = vperm.slane %v11963_v16, 0  ;;  %v11964_v26 = vrot.slane %v9624_v10, 1  ;;  %v11965_v16 = vrot.slane %v9624_v10, 7  ;;  %12262 = vst [vmem:[#allocation11_spill] sm:$0xff] %v9864_v54 }
 0x329   :  { %v3089_v43 = vpop.permute.xlu1 %3088  ;;  %v3233_v27 = vpop.permute.xlu2 %3232 }
 0x32a   :  { %7044 = vmatmul.msk.f32.gmra.mxu2 %vm666_vm5, %v9546_v59  ;;  %v3277_v41 = vsel %vm286_vm0, %v12261_v63, %v3089_v43  ;;  %v9869_v63 = vperm.slane %v11965_v16, 0  ;;  %v9871_v61 = vpop.f32.mrf.mxu2 }
 0x32b   :  { %7047 = vmatmul.msk.f32.gmra.mxu3 %vm666_vm5, %v9546_v59  ;;  %12263 = vst [vmem:[#allocation19_spill] sm:$0xff] %v9871_v61  ;;  %v9873_v33 = vpop.f32.mrf.mxu3 }
 0x32c   :  { %7029 = vmatmul.msk.f32.gmra.mxu1 %vm666_vm5, %v9546_v59  ;;  %12264 = vst [vmem:[#allocation27_spill] sm:$0xff] %v9873_v33 }
 0x32d   :  { %3248 = vrot.lane.b32.xlu0 %v9696_v4, %s7360_s15  ;;  %v9861_v4 = vperm.slane %v11964_v26, 0  ;;  %v12265_v26 = vrot.slane %v12241_v29, 4 }
 0x32f   :  { %3098 = vrot.lane.b32.xlu1 %v9836_v44, %s7357_s27  ;;  %v2441_v50 = vpop.permute.xlu0 %2440  ;;  %3110 = vrot.lane.b32.xlu2 %v9840_v32, %s7357_s27  ;;  %v2524_v47 = vsel %vm286_vm0, %v12265_v26, %v9332_v12 }
 0x331   :  { %v3137_v20 = vpop.permute.xlu1 %3136  ;;  %v9857_v21 = vpop.permute.xlu2 %3082 }
 0x332   :  { %v3293_v1 = vsel %vm303_vm1, %v3277_v41, %v3137_v20  ;;  %v2540_v20 = vsel %vm303_vm1, %v2524_v47, %v9387_v19  ;;  %v9899_v16 = vpop.f32.mrf.mxu2  ;;  %v12269_v47 = vrot.slane %v12241_v29, 5 }
 0x333   :  { %v3309_v43 = vsel %vm320_vm2, %v3293_v1, %v3185_v37  ;;  %v9889_v37 = vpop.f32.mrf.mxu0  ;;  %v2556_v26 = vsel %vm320_vm2, %v2540_v20, %v2441_v50  ;;  %v9901_v33 = vpop.f32.mrf.mxu3 }
 0x334   :  { %v3325_v3 = vsel %vm337_vm4, %v3309_v43, %v3233_v27  ;;  %12266 = vst [vmem:[#allocation34_spill] sm:$0xff] %v9889_v37  ;;  %v12267_v27 = vrot.slane %v9363_v2, 2  ;;  %v2525_v50 = vsel %vm286_vm0, %v12269_v47, %v9264_v62 }
 0x335   :  { %3100 = vrot.lane.b32.xlu0 %v9861_v4, %s7357_s27  ;;  %7059 = vmatpush.msk.msra.mxu3 %vm671_vm3, %v3325_v3 }
 0x336   :  { %v3276_v12 = vsel %vm286_vm0, %v12267_v27, %v3087_v22  ;;  %v9909_v22 = vpop.f32.mrf.mxu1  ;;  %v2541_v27 = vsel %vm303_vm1, %v2525_v50, %v9446_v15 }
 0x337   :  { %3112 = vrot.lane.b32.xlu1 %v9869_v63, %s7357_s27  ;;  %v2443_v1 = vpop.permute.xlu0 %2442  ;;  %3146 = vrot.lane.b32.xlu2 %v9836_v44, %s7358_s30  ;;  %v3292_v19 = vsel %vm303_vm1, %v3276_v12, %v9735_v0  ;;  %12268 = vst [vmem:[#allocation35_spill] sm:$0xff] %v9909_v22 }
 0x338   :  { %v3308_v0 = vsel %vm320_vm2, %v3292_v19, %v9766_v25 }
 0x339   :  { %v2489_v41 = vpop.permute.xlu1 %2488  ;;  %v9895_v3 = vpop.permute.xlu2 %3096 }
 0x33a   :  { %v2572_v43 = vsel %vm337_vm4, %v2556_v26, %v2489_v41  ;;  %v2557_v26 = vsel %vm320_vm2, %v2541_v27, %v2443_v1  ;;  %v9932_v25 = vpop.f32.mrf.mxu2 }
 0x33b   :  { %7036 = vmatpush.msk.msrb.mxu0 %vm671_vm3, %v2572_v43  ;;  %v9929_v43 = vpop.f32.mrf.mxu0  ;;  %v9934_v19 = vpop.f32.mrf.mxu3 }
 0x33c   :  { %7037 = vmatmul.msk.f32.vlgmr.msrb.gmra.mxu0 %vm666_vm5, %v9536_v24  ;;  %12270 = vst [vmem:[#allocation37_spill] sm:$0xff] %v9929_v43 }
 0x33d   :  { %3158 = vrot.lane.b32.xlu0 %v9840_v32, %s7358_s30 }
 0x33e   :  { %v9948_v1 = vpop.f32.mrf.mxu1 }
 0x33f   :  { %3148 = vrot.lane.b32.xlu1 %v9861_v4, %s7358_s30  ;;  %v3231_v20 = vpop.permute.xlu0 %3230  ;;  %3160 = vrot.lane.b32.xlu2 %v9869_v63, %s7358_s30  ;;  %12271 = vst [vmem:[#allocation75_spill] sm:$0xff] %v9948_v1  ;;  %v11967_v1 = vrot.slane %v9624_v10, 5 }
 0x340   :  { %v3324_v12 = vsel %vm337_vm4, %v3308_v0, %v3231_v20 }
 0x341   :  { %v2491_v29 = vpop.permute.xlu1 %2490  ;;  %7056 = vmatpush.msk.msra.mxu2 %vm671_vm3, %v3324_v12  ;;  %v9926_v62 = vpop.permute.xlu2 %3132  ;;  %v11966_v12 = vrot.slane %v9624_v10, 4 }
 0x342   :  { %v2573_v41 = vsel %vm337_vm4, %v2557_v26, %v2491_v29  ;;  %v9964_v20 = vpop.f32.mrf.mxu2  ;;  %v7365_v29 = vmov 0  }
 0x343   :  { %7039 = vmatpush.msk.msrb.mxu1 %vm671_vm3, %v2573_v41  ;;  %v9958_v50 = vpop.f32.mrf.mxu0  ;;  %12272 = vst [vmem:[#allocation42_spill] sm:$0xff] %v9964_v20  ;;  %v9966_v0 = vpop.f32.mrf.mxu3  ;;  %7219 = vset.pattern.permute.xlu2 %v7365_v29 }
 0x344   :  { %7038 = vmatmul.msk.f32.gmra.mxu0 %vm666_vm5, %v9546_v59  ;;  %7040 = vmatmul.msk.f32.vlgmr.msrb.gmra.mxu1 %vm666_vm5, %v9536_v24 }
 0x345   :  { %3194 = vrot.lane.b32.xlu0 %v9836_v44, %s7359_s14  ;;  %7218 = vset.pattern.permute.xlu1 %v7365_v29 }
 0x346   :  { %v9977_v41 = vpop.f32.mrf.mxu1  ;;  %7220 = vset.pattern.permute.xlu0 %v7365_v29 }
 0x347   :  { %3206 = vrot.lane.b32.xlu1 %v9840_v32, %s7359_s14  ;;  %v9944_v15 = vpop.permute.xlu0 %3338  ;;  %3196 = vrot.lane.b32.xlu2 %v9861_v4, %s7359_s14  ;;  %12273 = vst [vmem:[#allocation50_spill] sm:$0xff] %v9977_v41 }
 0x348   :  { %7057 = vmatmul.msk.f32.vlgmr.msra.gmra.mxu2 %vm666_vm5, %v9944_v15  ;;  %7060 = vmatmul.msk.f32.vlgmr.msra.gmra.mxu3 %vm666_vm5, %v9944_v15 }
 0x349   :  { %v9954_v24 = vpop.permute.xlu1 %3340  ;;  %v9956_v47 = vpop.permute.xlu2 %3190 }
 0x34a   :  { %v9989_v37 = vpop.f32.mrf.mxu2 }
 0x34b   :  { %12274 = vst [vmem:[#allocation52_spill] sm:$0xff] %v9989_v37  ;;  %v9991_v41 = vpop.f32.mrf.mxu3 }
 0x34c   :  { %7041 = vmatmul.msk.f32.gmra.mxu1 %vm666_vm5, %v9546_v59  ;;  %12275 = vst [vmem:[#allocation53_spill] sm:$0xff] %v9991_v41 }
 0x34d   :  { %3208 = vrot.lane.b32.xlu0 %v9869_v63, %s7359_s14 }
 0x34e   :  { %v9995_v54 = vpop.f32.mrf.mxu1 }
 0x34f   :  { %3242 = vrot.lane.b32.xlu1 %v9836_v44, %s7360_s15  ;;  %v3095_v27 = vpop.permute.xlu0 %3094  ;;  %3254 = vrot.lane.b32.xlu2 %v9840_v32, %s7360_s15  ;;  %v3078_v44 = vperm.slane %v11966_v12, 0  ;;  %v9981_v32 = vpop.f32.mrf.mxu0  ;;  %v3079_v12 = vperm.slane %v11967_v1, 0 }
 0x350   :  { %7058 = vmatmul.msk.f32.gmra.mxu2 %vm666_vm5, %v9954_v24  ;;  %7061 = vmatmul.msk.f32.gmra.mxu3 %vm666_vm5, %v9954_v24 }
 0x351   :  { %v3085_v59 = vpop.permute.xlu1 %3084  ;;  %v3227_v26 = vpop.permute.xlu2 %3226 }
 0x352   :  { %v10010_v31 = vpop.f32.mrf.mxu2 }
 0x353   :  { %12278 = vst [vmem:[#allocation60_spill] sm:$0xff] %v10010_v31  ;;  %v10013_v49 = vpop.f32.mrf.mxu3 }
 0x354   :  { %12279 = vst [vmem:[#allocation67_spill] sm:$0xff] %v10013_v49  ;;  %v12282_v49 = vrot.slane %v9363_v2, 6 }
 0x355   :  { %3244 = vrot.lane.b32.xlu0 %v9861_v4, %s7360_s15 }
 0x356   :  { %v10008_v1 = vpop.f32.mrf.mxu1  ;;  %v3280_v17 = vsel %vm286_vm0, %v12282_v49, %v3095_v27  ;;  %v3794_v49 = vld [vmem:[%s11864_s2] sm:$0xff] }
 0x357   :  { %3256 = vrot.lane.b32.xlu1 %v9869_v63, %s7360_s15  ;;  %v3131_v43 = vpop.permute.xlu0 %3130  ;;  %3106 = vrot.lane.b32.xlu2 %v3078_v44, %s7357_s27  ;;  %v9998_v4 = vpop.f32.mrf.mxu0  ;;  %v3274_v63 = vsel %vm286_vm0, %v9363_v2, %v9857_v21  ;;  %12277 = vst [vmem:[#allocation66_spill] sm:$0xff] %v10008_v1 }
 0x358   :  { %12276 = vst [vmem:[#allocation57_spill] sm:$0xff] %v9998_v4  ;;  %v3290_v23 = vsel %vm303_vm1, %v3274_v63, %v3131_v43  ;;  %v12280_v43 = vrot.slane %v9363_v2, 7 }
 0x359   :  { %v3143_v29 = vpop.permute.xlu1 %3142  ;;  %v3241_v22 = vpop.permute.xlu2 %3240 }
 0x35a   :  { %v3281_v63 = vsel %vm286_vm0, %v12280_v43, %v9895_v3  ;;  %v12283_v3 = vrot.slane %v9363_v2, 1 }
 0x35b   :  { %v10051_v27 = vpop.f32.mrf.mxu3 }
 0x35c   :  { %v3275_v43 = vsel %vm286_vm0, %v12283_v3, %v3085_v59  ;;  %12286 = vst [vmem:[#allocation14_spill] sm:$0xff] %v10051_v27 }
 0x35d   :  { %3108 = vrot.lane.b32.xlu0 %v3079_v12, %s7357_s27 }
 0x35f   :  { %3154 = vrot.lane.b32.xlu1 %v3078_v44, %s7358_s30  ;;  %v3145_v61 = vpop.permute.xlu0 %3144  ;;  %3156 = vrot.lane.b32.xlu2 %v3079_v12, %s7358_s30 }
 0x361   :  { %v3179_v18 = vpop.permute.xlu1 %3178  ;;  %v10006_v14 = vpop.permute.xlu2 %3092 }
 0x362   :  { %v3306_v52 = vsel %vm320_vm2, %v3290_v23, %v3179_v18  ;;  %v10026_v23 = vpop.f32.mrf.mxu0 }
 0x363   :  { %v3322_v21 = vsel %vm337_vm4, %v3306_v52, %v3227_v26  ;;  %12281 = vst [vmem:[#allocation78_spill] sm:$0xff] %v10026_v23  ;;  %v3297_v52 = vsel %vm303_vm1, %v3281_v63, %v3145_v61  ;;  %v10041_v23 = vpop.f32.mrf.mxu2  ;;  %v3296_v61 = vsel %vm303_vm1, %v3280_v17, %v3143_v29  ;;  %v3795_v63 = vld [vmem:[%s11864_s2 + $0x8] sm:$0xff]  ;;  %v3291_v17 = vsel %vm303_vm1, %v3275_v43, %v9926_v62  ;;  %v10085_v43 = vpop.f32.mrf.mxu3  ;;  %s7373_s2 = smov 8  }
 0x364   :  { %7050 = vmatpush.msk.msra.mxu0 %vm671_vm3, %v3322_v21  ;;  %12285 = vst [vmem:[#allocation22_spill] sm:$0xff] %v10041_v23  ;;  %v3312_v59 = vsel %vm320_vm2, %v3296_v61, %v9956_v47  ;;  %v3872_v47 = vld [vmem:[%s11866_s4] sm:$0xff] }
 0x365   :  { %3202 = vrot.lane.b32.xlu0 %v3078_v44, %s7359_s14  ;;  %7051 = vmatmul.msk.f32.vlgmr.msra.gmra.mxu0 %vm666_vm5, %v9944_v15  ;;  %12290 = vst [vmem:[#allocation40_spill] sm:$0xff] %v10085_v43 }
 0x367   :  { %3204 = vrot.lane.b32.xlu1 %v3079_v12, %s7359_s14  ;;  %v3181_v31 = vpop.permute.xlu0 %3180  ;;  %3250 = vrot.lane.b32.xlu2 %v3078_v44, %s7360_s15  ;;  %v10039_v44 = vpop.f32.mrf.mxu1  ;;  %s7367_s14 = smov 120  }
 0x368   :  { %12284 = vst [vmem:[#allocation23_spill] sm:$0xff] %v10039_v44 }
 0x369   :  { %v3193_v18 = vpop.permute.xlu1 %3192  ;;  %v10029_v26 = vpop.permute.xlu2 %3150 }
 0x36a   :  { %v3313_v21 = vsel %vm320_vm2, %v3297_v52, %v3193_v18  ;;  %v10065_v52 = vpop.f32.mrf.mxu0 }
 0x36b   :  { %v3329_v4 = vsel %vm337_vm4, %v3313_v21, %v3241_v22  ;;  %12287 = vst [vmem:[#allocation25_spill] sm:$0xff] %v10065_v52  ;;  %v10081_v3 = vpop.f32.mrf.mxu2 }
 0x36c   :  { %7071 = vmatpush.msk.msrb.mxu3 %vm671_vm3, %v3329_v4  ;;  %v3307_v4 = vsel %vm320_vm2, %v3291_v17, %v3181_v31  ;;  %v4261_v31 = vld [vmem:[%s11868_s6] sm:$0xff]  ;;  %12289 = vst [vmem:[#allocation38_spill] sm:$0xff] %v10081_v3  ;;  %v10092_v17 = vld [vmem:[%s11869_s7 + $0x8] sm:$0x7] }
 0x36d   :  { %3252 = vrot.lane.b32.xlu0 %v3079_v12, %s7360_s15  ;;  %7052 = vmatmul.msk.f32.gmra.mxu0 %vm666_vm5, %v9954_v24 }
 0x36e   :  { %7072 = vmatmul.msk.f32.vlgmr.msrb.gmra.mxu3 %vm666_vm5, %v9944_v15 }
 0x36f   :  { %3803 = vperm.xlu1 %7218, %v3795_v63   ;;  %v3239_v22 = vpop.permute.xlu0 %3238  ;;  %3798 = vperm.xlu2 %7219, %v3794_v49   ;;  %v10079_v21 = vpop.f32.mrf.mxu1 }
 0x370   :  { %v3328_v29 = vsel %vm337_vm4, %v3312_v59, %v3239_v22  ;;  %12288 = vst [vmem:[#allocation30_spill] sm:$0xff] %v10079_v21  ;;  %v10101_v59 = vld [vmem:[%s11869_s7] sm:$0xff] }
 0x371   :  { %v3229_v12 = vpop.permute.xlu1 %3228  ;;  %7068 = vmatpush.msk.msrb.mxu2 %vm671_vm3, %v3328_v29  ;;  %v3187_v18 = vpop.permute.xlu2 %3186 }
 0x372   :  { %v3323_v62 = vsel %vm337_vm4, %v3307_v4, %v3229_v12  ;;  %7069 = vmatmul.msk.f32.vlgmr.msrb.gmra.mxu2 %vm666_vm5, %v9944_v15  ;;  %v10094_v22 = vpop.f32.mrf.mxu0 }
 0x373   :  { %7053 = vmatpush.msk.msra.mxu1 %vm671_vm3, %v3323_v62  ;;  %12291 = vst [vmem:[#allocation41_spill] sm:$0xff] %v10094_v22  ;;  %v10109_v12 = vpop.f32.mrf.mxu2  ;;  %v10111_v62 = vpop.f32.mrf.mxu3 }
 0x374   :  { %7054 = vmatmul.msk.f32.vlgmr.msra.gmra.mxu1 %vm666_vm5, %v9944_v15  ;;  %12293 = vst [vmem:[#allocation48_spill] sm:$0xff] %v10109_v12 }
 0x375   :  { %3876 = vperm.xlu0 %7220, %v3872_v47   ;;  %12294 = vst [vmem:[#allocation55_spill] sm:$0xff] %v10111_v62  ;;  %v12297_v62 = vrot.slane %v9363_v2, 5 }
 0x376   :  { %7073 = vmatmul.msk.f32.gmra.mxu3 %vm666_vm5, %v9954_v24 }
 0x377   :  { %v3091_v61 = vpop.permute.xlu0 %3090  ;;  %4265 = vperm.xlu2 %7219, %v4261_v31   ;;  %v10107_v4 = vpop.f32.mrf.mxu1  ;;  %v3279_v12 = vsel %vm286_vm0, %v12297_v62, %v10006_v14  ;;  %v12300_v14 = vrot.slane %v9624_v10, 2 }
 0x378   :  { %12292 = vst [vmem:[#allocation45_spill] sm:$0xff] %v10107_v4 }
 0x379   :  { %v3103_v63 = vpop.permute.xlu1 %3102  ;;  %v3201_v49 = vpop.permute.xlu2 %3200 }
 0x37a   :  { %7070 = vmatmul.msk.f32.gmra.mxu2 %vm666_vm5, %v9954_v24  ;;  %v10115_v43 = vpop.f32.mrf.mxu0  ;;  %v3284_v62 = vsel %vm286_vm0, %v12300_v14, %v3103_v63 }
 0x37b   :  { %12295 = vst [vmem:[#allocation56_spill] sm:$0xff] %v10115_v43  ;;  %v10117_v52 = vpop.f32.mrf.mxu2  ;;  %v10119_v3 = vpop.f32.mrf.mxu3 }
 0x37c   :  { %7055 = vmatmul.msk.f32.gmra.mxu1 %vm666_vm5, %v9954_v24 }
 0x37d   :  { %4670 = vrot.lane.b32.xlu0 %v10092_v17, %s7357_s27 }
 0x37f   :  { %v3105_v29 = vpop.permute.xlu0 %3104  ;;  %4668 = vrot.lane.b32.xlu2 %v10101_v59, %s7357_s27  ;;  %v10123_v4 = vpop.f32.mrf.mxu1  ;;  %s7380_s27 = smov 28  }
 0x380   :  { %12296 = vst [vmem:[#allocation68_spill] sm:$0xff] %v10123_v4  ;;  %v12299_v4 = vrot.slane %v9363_v2, 4  ;;  %v3300_v2 = vsel %vm303_vm1, %v3284_v62, %v10029_v26  ;;  %v12302_v26 = vrot.slane %v9624_v10, 3 }
 0x381   :  { %v3139_v47 = vpop.permute.xlu1 %3138  ;;  %v3237_v31 = vpop.permute.xlu2 %3236 }
 0x382   :  { %v10129_v35 = vpop.f32.mrf.mxu0  ;;  %v3278_v20 = vsel %vm286_vm0, %v12299_v4, %v3091_v61 }
 0x383   :  { %12298 = vst [vmem:[#allocation69_spill] sm:$0xff] %v10129_v35  ;;  %v10132_v44 = vpop.f32.mrf.mxu2  ;;  %v10137_v37 = vpop.f32.mrf.mxu3 }
 0x385   :  { %4806 = vrot.lane.b32.xlu0 %v10101_v59, %s7358_s30 }
 0x387   :  { %v3141_v22 = vpop.permute.xlu0 %3140 }
 0x388   :  { %v3295_v43 = vsel %vm303_vm1, %v3279_v12, %v3141_v22  ;;  %v3294_v22 = vsel %vm303_vm1, %v3278_v20, %v3139_v47  ;;  %v10148_v12 = vpop.f32.mrf.mxu1 }
 0x389   :  { %v3153_v27 = vpop.permute.xlu1 %3152  ;;  %v10121_v23 = vpop.permute.xlu2 %3110  ;;  %12301 = vst [vmem:[#allocation63_spill] sm:$0xff] %v10148_v12 }
 0x38a   :  { %v10155_v61 = vpop.f32.mrf.mxu0 }
 0x38b   :  { %v10168_v47 = vpop.f32.mrf.mxu3 }
 0x38f   :  { %v3199_v5 = vpop.permute.xlu0 %3198 }
 0x390   :  { %v10178_v14 = vpop.f32.mrf.mxu1 }
 0x391   :  { %v3189_v21 = vpop.permute.xlu1 %3188  ;;  %v10135_v42 = vpop.permute.xlu2 %3146  ;;  %12304 = vst [vmem:[#allocation76_spill] sm:$0xff] %v10178_v14 }
 0x392   :  { %v3311_v7 = vsel %vm320_vm2, %v3295_v43, %v3189_v21  ;;  %v3310_v43 = vsel %vm320_vm2, %v3294_v22, %v3187_v18  ;;  %v3285_v18 = vsel %vm286_vm0, %v12302_v26, %v3105_v29 }
 0x393   :  { %v3327_v35 = vsel %vm337_vm4, %v3311_v7, %v3237_v31  ;;  %v3316_v7 = vsel %vm320_vm2, %v3300_v2, %v3199_v5  ;;  %v10171_v31 = vpop.f32.mrf.mxu2  ;;  %v3301_v5 = vsel %vm303_vm1, %v3285_v18, %v3153_v27  ;;  %v10191_v27 = vpop.f32.mrf.mxu3  ;;  %v3873_v18 = vld [vmem:[%s11866_s4 + $0x8] sm:$0xff]  ;;  %s7369_s4 = smov 104  }
 0x394   :  { %7065 = vmatpush.msk.msrb.mxu1 %vm671_vm3, %v3327_v35  ;;  %12303 = vst [vmem:[#allocation70_spill] sm:$0xff] %v10171_v31  ;;  %v3317_v22 = vsel %vm320_vm2, %v3301_v5, %v3201_v49  ;;  %3881 = vperm.xlu1 %7218, %v3873_v18   ;;  %v12313_v31 = vrot.slane %v9624_v10, 6 }
 0x395   :  { %7066 = vmatmul.msk.f32.vlgmr.msrb.gmra.mxu1 %vm666_vm5, %v9944_v15  ;;  %12305 = vst [vmem:[#allocation79_spill] sm:$0xff] %v10191_v27 }
 0x396   :  { %v3288_v18 = vsel %vm286_vm0, %v12313_v31, %v10121_v23 }
 0x397   :  { %v3235_v21 = vpop.permute.xlu0 %3234 }
 0x398   :  { %v3326_v63 = vsel %vm337_vm4, %v3310_v43, %v3235_v21  ;;  %v10183_v21 = vpop.f32.mrf.mxu0 }
 0x399   :  { %v3247_v20 = vpop.permute.xlu1 %3246  ;;  %7062 = vmatpush.msk.msrb.mxu0 %vm671_vm3, %v3326_v63  ;;  %v10161_v4 = vpop.permute.xlu2 %3160 }
 0x39a   :  { %v3332_v35 = vsel %vm337_vm4, %v3316_v7, %v3247_v20  ;;  %7063 = vmatmul.msk.f32.vlgmr.msrb.gmra.mxu0 %vm666_vm5, %v9944_v15  ;;  %v10195_v63 = vpop.f32.mrf.mxu1 }
 0x39b   :  { %7080 = vmatpush.msk.msra.mxu2 %vm671_vm3, %v3332_v35  ;;  %v10193_v49 = vpop.f32.mrf.mxu2  ;;  %12307 = vst [vmem:[#allocation80_spill] sm:$0xff] %v10195_v63  ;;  %v10204_v5 = vpop.f32.mrf.mxu3 }
 0x39c   :  { %7081 = vmatmul.msk.f32.vlgmr.msra.gmra.mxu2 %vm666_vm5, %v9944_v15  ;;  %12306 = vst [vmem:[#allocation77_spill] sm:$0xff] %v10193_v49 }
 0x39d   :  { %7067 = vmatmul.msk.f32.gmra.mxu1 %vm666_vm5, %v9954_v24  ;;  %12309 = vst [vmem:[#allocation83_spill] sm:$0xff] %v10204_v5 }
 0x39f   :  { %v3249_v62 = vpop.permute.xlu0 %3248 }
 0x3a0   :  { %v3333_v29 = vsel %vm337_vm4, %v3317_v22, %v3249_v62  ;;  %v10197_v35 = vpop.f32.mrf.mxu0 }
 0x3a1   :  { %v3099_v2 = vpop.permute.xlu1 %3098  ;;  %7083 = vmatpush.msk.msra.mxu3 %vm671_vm3, %v3333_v29  ;;  %v3197_v43 = vpop.permute.xlu2 %3196  ;;  %12308 = vst [vmem:[#allocation71_spill] sm:$0xff] %v10197_v35  ;;  %v4262_v35 = vld [vmem:[%s11868_s6 + $0x8] sm:$0x7]  ;;  %s7370_s6 = smov 112  }
 0x3a2   :  { %7064 = vmatmul.msk.f32.gmra.mxu0 %vm666_vm5, %v9954_v24  ;;  %7084 = vmatmul.msk.f32.vlgmr.msra.gmra.mxu3 %vm666_vm5, %v9944_v15  ;;  %v10208_v29 = vpop.f32.mrf.mxu1 }
 0x3a3   :  { %v10206_v62 = vpop.f32.mrf.mxu2  ;;  %12311 = vst [vmem:[#allocation85_spill] sm:$0xff] %v10208_v29  ;;  %4270 = vperm.xlu1 %7218, %v4262_v35   ;;  %v10219_v5 = vpop.f32.mrf.mxu3  ;;  %v3282_v35 = vsel %vm286_vm0, %v9624_v10, %v3099_v2 }
 0x3a4   :  { %7082 = vmatmul.msk.f32.gmra.mxu2 %vm666_vm5, %v9954_v24  ;;  %12310 = vst [vmem:[#allocation84_spill] sm:$0xff] %v10206_v62  ;;  %v3298_v31 = vsel %vm303_vm1, %v3282_v35, %v10135_v42 }
 0x3a5   :  { %12314 = vst [vmem:[#allocation72_spill] sm:$0xff] %v10219_v5 }
 0x3a7   :  { %v3101_v7 = vpop.permute.xlu0 %3100 }
 0x3a8   :  { %v10213_v49 = vpop.f32.mrf.mxu0 }
 0x3a9   :  { %v3113_v20 = vpop.permute.xlu1 %3112  ;;  %v3255_v26 = vpop.permute.xlu2 %3254  ;;  %12312 = vst [vmem:[#allocation15_spill] sm:$0xff] %v10213_v49 }
 0x3aa   :  { %7085 = vmatmul.msk.f32.gmra.mxu3 %vm666_vm5, %v9954_v24  ;;  %v10227_v1 = vpop.f32.mrf.mxu1 }
 0x3ab   :  { %v10221_v27 = vpop.f32.mrf.mxu2 }
 0x3ac   :  { %12315 = vst [vmem:[#allocation81_spill] sm:$0xff] %v10221_v27 }
 0x3af   :  { %v3159_v22 = vpop.permute.xlu0 %3158 }
 0x3b0   :  { %v3304_v29 = vsel %vm303_vm1, %v3288_v18, %v3159_v22  ;;  %v10235_v23 = vpop.f32.mrf.mxu0 }
 0x3b1   :  { %v3149_v14 = vpop.permute.xlu1 %3148  ;;  %v3107_v12 = vpop.permute.xlu2 %3106  ;;  %12316 = vst [vmem:[#allocation82_spill] sm:$0xff] %v10235_v23  ;;  %v12319_v23 = vrot.slane %v9624_v10, 7 }
 0x3b3   :  { %v10239_v22 = vpop.f32.mrf.mxu2  ;;  %v3289_v27 = vsel %vm286_vm0, %v12319_v23, %v3113_v20 }
 0x3b4   :  { %v3305_v35 = vsel %vm303_vm1, %v3289_v27, %v10161_v4 }
 0x3b7   :  { %v3195_v62 = vpop.permute.xlu0 %3194 }
 0x3b8   :  { %v3314_v18 = vsel %vm320_vm2, %v3298_v31, %v3195_v62  ;;  %v10255_v62 = vpop.f32.mrf.mxu1 }
 0x3b9   :  { %v3207_v39 = vpop.permute.xlu1 %3206  ;;  %v10225_v41 = vpop.permute.xlu2 %3156 }
 0x3ba   :  { %v3320_v63 = vsel %vm320_vm2, %v3304_v29, %v3207_v39  ;;  %v10241_v29 = vpop.f32.mrf.mxu3 }
 0x3bb   :  { %v3336_v49 = vsel %vm337_vm4, %v3320_v63, %v3255_v26  ;;  %12317 = vst [vmem:[#allocation73_spill] sm:$0xff] %v10241_v29  ;;  %v10272_v4 = vpop.f32.mrf.mxu2 }
 0x3bc   :  { %7092 = vmatpush.msk.msrb.mxu2 %vm671_vm3, %v3336_v49  ;;  %v12318_v49 = vrot.slane %v9624_v10, 1 }
 0x3bd   :  { %7093 = vmatmul.msk.f32.vlgmr.msrb.gmra.mxu2 %vm666_vm5, %v9944_v15 }
 0x3be   :  { %v3283_v5 = vsel %vm286_vm0, %v12318_v49, %v3101_v7 }
 0x3bf   :  { %v3209_v39 = vpop.permute.xlu0 %3208  ;;  %v3299_v42 = vsel %vm303_vm1, %v3283_v5, %v3149_v14 }
 0x3c0   :  { %v3315_v31 = vsel %vm320_vm2, %v3299_v42, %v3197_v43  ;;  %v3321_v14 = vsel %vm320_vm2, %v3305_v35, %v3209_v39  ;;  %v10281_v43 = vpop.f32.mrf.mxu1  ;;  %v12323_v42 = vrot.slane %v9624_v10, 4 }
 0x3c1   :  { %v3243_v2 = vpop.permute.xlu1 %3242  ;;  %v3251_v26 = vpop.permute.xlu2 %3250  ;;  %12321 = vst [vmem:[#allocation86_spill] sm:$0xff] %v10281_v43 }
 0x3c2   :  { %v3330_v63 = vsel %vm337_vm4, %v3314_v18, %v3243_v2  ;;  %v10262_v18 = vpop.f32.mrf.mxu0  ;;  %v10274_v27 = vpop.f32.mrf.mxu3  ;;  %v3286_v35 = vsel %vm286_vm0, %v12323_v42, %v3107_v12  ;;  %v1191_v12 = vadd.f32 %v9559_v60, %v9316_v56 }
 0x3c3   :  { %7074 = vmatpush.msk.msra.mxu0 %vm671_vm3, %v3330_v63  ;;  %12320 = vst [vmem:[#allocation74_spill] sm:$0xff] %v10274_v27 }
 0x3c4   :  { %7075 = vmatmul.msk.f32.vlgmr.msra.gmra.mxu0 %vm666_vm5, %v9944_v15 }
 0x3c5   :  { %7094 = vmatmul.msk.f32.gmra.mxu2 %vm666_vm5, %v9954_v24 }
 0x3c7   :  { %v3245_v7 = vpop.permute.xlu0 %3244 }
 0x3c8   :  { %v3331_v20 = vsel %vm337_vm4, %v3315_v31, %v3245_v7 }
 0x3c9   :  { %v3257_v5 = vpop.permute.xlu1 %3256  ;;  %7077 = vmatpush.msk.msra.mxu1 %vm671_vm3, %v3331_v20  ;;  %v10268_v2 = vpop.permute.xlu2 %3798 }
 0x3ca   :  { %v3337_v23 = vsel %vm337_vm4, %v3321_v14, %v3257_v5  ;;  %7078 = vmatmul.msk.f32.vlgmr.msra.gmra.mxu1 %vm666_vm5, %v9944_v15  ;;  %v10283_v63 = vpop.f32.mrf.mxu0  ;;  %v10295_v5 = vpop.f32.mrf.mxu1 }
 0x3cb   :  { %7095 = vmatpush.msk.msrb.mxu3 %vm671_vm3, %v3337_v23  ;;  %12322 = vst [vmem:[#allocation87_spill] sm:$0xff] %v10283_v63  ;;  %v3418_v31 = vpop.f32.mrf.mxu2  ;;  %v3444_v20 = vpop.f32.mrf.mxu3  ;;  %v1165_v63 = vadd.f32 %v9557_v53, %v9314_v6 }
 0x3cc   :  { %7076 = vmatmul.msk.f32.gmra.mxu0 %vm666_vm5, %v9954_v24  ;;  %7096 = vmatmul.msk.f32.vlgmr.msrb.gmra.mxu3 %vm666_vm5, %v9944_v15  ;;  %12325 = vst [vmem:[#allocation89_spill] sm:$0xff] %v10295_v5  ;;  %v2244_v5 = vadd.f32 %v9901_v33, %v1191_v12  ;;  %v1116_v12 = vadd.f32 %v9675_v46, %v9398_v11 }
 0x3ce   :  { %v3006_v60 = vadd.f32 %v10119_v3, %v2244_v5 }
 0x3cf   :  { %v3109_v39 = vpop.permute.xlu0 %3108 }
 0x3d1   :  { %v3155_v49 = vpop.permute.xlu1 %3154  ;;  %v10288_v7 = vpop.permute.xlu2 %4265 }
 0x3d2   :  { %12324 = vst [vmem:[#allocation88_spill] sm:$0xff] %v10288_v7  ;;  %7079 = vmatmul.msk.f32.gmra.mxu1 %vm666_vm5, %v9954_v24  ;;  %v3302_v14 = vsel %vm303_vm1, %v3286_v35, %v3155_v49  ;;  %v1168_v7 = vadd.f32 %v9598_v36, %v9344_v34  ;;  %v1194_v49 = vadd.f32 %v9600_v48, %v9346_v8  ;;  %v10309_v43 = vpop.f32.mrf.mxu0  ;;  %v12326_v34 = vrot.slane %v9624_v10, 5 }
 0x3d3   :  { %v2242_v35 = vadd.f32 %v9899_v16, %v1165_v63  ;;  %v3421_v48 = vpop.f32.mrf.mxu2  ;;  %v3447_v16 = vpop.f32.mrf.mxu3 }
 0x3d4   :  { %7097 = vmatmul.msk.f32.gmra.mxu3 %vm666_vm5, %v9954_v24  ;;  %v2243_v56 = vadd.f32 %v9932_v25, %v1168_v7  ;;  %v3287_v53 = vsel %vm286_vm0, %v12326_v34, %v3109_v39  ;;  %v2245_v8 = vadd.f32 %v9934_v19, %v1194_v49  ;;  %v10329_v39 = vpop.f32.mrf.mxu1  ;;  %vm5503_vm0 = vcmask 1045509  }
 0x3d5   :  { %v3004_v33 = vadd.f32 %v10117_v52, %v2242_v35 }
 0x3d6   :  { %v3005_v36 = vadd.f32 %v10132_v44, %v2243_v56  ;;  %v3007_v10 = vadd.f32 %v10137_v37, %v2245_v8 }
 0x3d7   :  { %v3203_v23 = vpop.permute.xlu0 %3202  ;;  %v3766_v25 = vadd.f32 %v3418_v31, %v3004_v33 }
 0x3d8   :  { %v3318_v42 = vsel %vm320_vm2, %v3302_v14, %v3203_v23  ;;  %v3767_v7 = vadd.f32 %v3421_v48, %v3005_v36  ;;  %v3769_v52 = vadd.f32 %v3447_v16, %v3007_v10  ;;  %v1139_v16 = vadd.f32 %v9698_v13, %v9408_v38  ;;  %v12327_v38 = vld [vmem:[#allocation5_spill] sm:$0xff] }
 0x3d9   :  { %v3334_v27 = vsel %vm337_vm4, %v3318_v42, %v3251_v26  ;;  %v3205_v29 = vpop.permute.xlu1 %3204  ;;  %v10311_v6 = vpop.permute.xlu2 %4668  ;;  %v3768_v26 = vadd.f32 %v3444_v20, %v3006_v60  ;;  %v3810_v37 = vadd.f32 %v10268_v2, %v3766_v25  ;;  %v1113_v20 = vadd.f32 %v9615_v30, %v9365_v9  ;;  %v10354_v9 = vld [vmem:[%s11865_s3] sm:$0xff] }
 0x3da   :  { %7086 = vmatpush.msk.msrb.mxu0 %vm671_vm3, %v3334_v27  ;;  %4802 = vrot.lane.b32.xlu1 %v10311_v6, %s7358_s30  ;;  %v3303_v27 = vsel %vm303_vm1, %v3287_v53, %v10225_v41  ;;  %v2239_v30 = vadd.f32 %v9981_v32, %v1116_v12  ;;  %v10376_v53 = vld [vmem:[%s11865_s3 + $0x8] sm:$0xff]  ;;  %v2240_v25 = vadd.f32 %v9995_v54, %v1139_v16  ;;  %v12337_v12 = vld [vmem:[#allocation70_spill] sm:$0xff]  ;;  %vm5506_vm1 = vcmask 1046534  }
 0x3db   :  { %7087 = vmatmul.msk.f32.vlgmr.msrb.gmra.mxu0 %vm666_vm5, %v9944_v15  ;;  %v3319_v63 = vsel %vm320_vm2, %v3303_v27, %v3205_v29  ;;  %v3812_v44 = vadd.f32 %v10268_v2, %v3768_v26  ;;  %v3842_v42 = vmax.f32 %v3810_v37, 0.0  ;;  %v1269_v13 = vadd.f32 %v9649_v45, %v12327_v38  ;;  %v12328_v27 = vld [vmem:[#allocation66_spill] sm:$0xff] }
 0x3dc   :  { %v3001_v11 = vadd.f32 %v10183_v21, %v2239_v30  ;;  %v10361_v46 = vpop.f32.mrf.mxu1  ;;  %v12338_v30 = vld [vmem:[#allocation77_spill] sm:$0xff]  ;;  %vm5509_vm2 = vcmask 1047559  }
 0x3dd   :  { %v3844_v49 = vmax.f32 %v3812_v44, 0.0  ;;  %v12334_v44 = vld [vmem:[#allocation85_spill] sm:$0xff] }
 0x3df   :  { %v3253_v19 = vpop.permute.xlu0 %3252 }
 0x3e0   :  { %v3335_v3 = vsel %vm337_vm4, %v3319_v63, %v3253_v19  ;;  %v12329_v19 = vld [vmem:[#allocation53_spill] sm:$0xff]  ;;  %vm5491_vm4 = vcmask 1041409  }
 0x3e1   :  { %v10333_v14 = vpop.permute.xlu1 %3803  ;;  %7089 = vmatpush.msk.msrb.mxu1 %vm671_vm3, %v3335_v3  ;;  %v12332_v3 = vld [vmem:[#allocation31_spill] sm:$0xff]  ;;  %vm5568_vm3 = vcmask 130050  }
 0x3e2   :  { %v3366_v31 = vpop.f32.mrf.mxu0  ;;  %7090 = vmatmul.msk.f32.vlgmr.msrb.gmra.mxu1 %vm666_vm5, %v9944_v15  ;;  %v3811_v41 = vadd.f32 %v10333_v14, %v3767_v7  ;;  %v3813_v29 = vadd.f32 %v10333_v14, %v3769_v52  ;;  %4808 = vrot.lane.b32.xlu1 %v10092_v17, %s7358_s30  ;;  %v2238_v15 = vadd.f32 %v9958_v50, %v1113_v20  ;;  %v12330_v52 = vld [vmem:[#allocation80_spill] sm:$0xff] }
 0x3e3   :  { %7088 = vmatmul.msk.f32.gmra.mxu0 %vm666_vm5, %v9954_v24 }
 0x3e4   :  { %v3843_v5 = vmax.f32 %v3811_v41, 0.0  ;;  %v3845_v23 = vmax.f32 %v3813_v29, 0.0  ;;  %v3000_v35 = vadd.f32 %v10155_v61, %v2238_v15  ;;  %v12335_v41 = vld [vmem:[#allocation79_spill] sm:$0xff] }
 0x3e6   :  { %3951 = vmatpush.msra.mxu2 %v3843_v5  ;;  %3974 = vmatpush.msra.mxu3 %v3845_v23  ;;  %v3762_v50 = vadd.f32 %v3366_v31, %v3000_v35 }
 0x3e7   :  { %v10358_v56 = vpop.permute.xlu0 %3876 }
 0x3e8   :  { %3952 = vmatpush.msra.mxu2 %v3842_v42  ;;  %3975 = vmatpush.msra.mxu3 %v3844_v49  ;;  %v3806_v61 = vadd.f32 %v10268_v2, %v3762_v50 }
 0x3e9   :  { %7102 = vmatmul.msk.f32.vlgmr.msra.gmra.mxu2 %vm3884_vm6, %v10354_v9  ;;  %7104 = vmatmul.msk.f32.vlgmr.msra.gmra.mxu3 %vm3884_vm6, %v10354_v9 }
 0x3ea   :  { %v3369_v34 = vpop.f32.mrf.mxu0  ;;  %7091 = vmatmul.msk.f32.gmra.mxu1 %vm666_vm5, %v9954_v24  ;;  %4822 = vrot.lane.b32.xlu1 %v10101_v59, %s7358_s30  ;;  %v1295_v24 = vadd.f32 %v9651_v57, %v9393_v28  ;;  %v3838_v48 = vmax.f32 %v3806_v61, 0.0  ;;  %v1142_v28 = vadd.f32 %v9745_v40, %v9424_v51  ;;  %v1298_v57 = vadd.f32 %v9708_v58, %v9412_v55  ;;  %v12331_v40 = vld [vmem:[#allocation12_spill] sm:$0xff]  ;;  %v12333_v58 = vld [vmem:[#allocation42_spill] sm:$0xff] }
 0x3eb   :  { %v3763_v32 = vadd.f32 %v3369_v34, %v3001_v11  ;;  %v3002_v51 = vadd.f32 %v12330_v52, %v2240_v25  ;;  %v1272_v55 = vadd.f32 %v12332_v3, %v12331_v40  ;;  %v2250_v54 = vadd.f32 %v12333_v58, %v1269_v13  ;;  %v12339_v13 = vld [vmem:[#allocation26_spill] sm:$0xff]  ;;  %v12345_v58 = vld [vmem:[#allocation29_spill] sm:$0xff] }
 0x3ec   :  { %v2252_v10 = vadd.f32 %v9966_v0, %v1295_v24  ;;  %v2241_v63 = vadd.f32 %v12328_v27, %v1142_v28  ;;  %v2253_v7 = vadd.f32 %v12329_v19, %v1298_v57  ;;  %v12341_v27 = vld [vmem:[#allocation43_spill] sm:$0xff]  ;;  %vm5494_vm5 = vcmask 1042434  }
 0x3ed   :  { %v3807_v21 = vadd.f32 %v10333_v14, %v3763_v32  ;;  %v3012_v15 = vadd.f32 %v12337_v12, %v2250_v54  ;;  %v12346_v54 = vld [vmem:[#allocation32_spill] sm:$0xff]  ;;  %v12350_v12 = vld [vmem:[#allocation78_spill] sm:$0xff] }
 0x3ee   :  { %v3014_v0 = vadd.f32 %v10168_v47, %v2252_v10  ;;  %v3003_v31 = vadd.f32 %v12334_v44, %v2241_v63  ;;  %v3015_v29 = vadd.f32 %v12335_v41, %v2253_v7  ;;  %v12336_v47 = vld [vmem:[#allocation52_spill] sm:$0xff]  ;;  %v12342_v63 = vld [vmem:[#allocation65_spill] sm:$0xff]  ;;  %v12343_v7 = vld [vmem:[#allocation23_spill] sm:$0xff] }
 0x3ef   :  { %v3839_v8 = vmax.f32 %v3807_v21, 0.0  ;;  %v10378_v33 = vpop.permute.xlu0 %4670  ;;  %v2251_v20 = vadd.f32 %v12336_v47, %v1272_v55  ;;  %v1246_v19 = vadd.f32 %v12342_v63, %v12341_v27  ;;  %v12347_v41 = vld [vmem:[#allocation18_spill] sm:$0xff]  ;;  %v12349_v47 = vld [vmem:[#allocation57_spill] sm:$0xff] }
 0x3f0   :  { %4820 = vrot.lane.b32.xlu0 %v10378_v33, %s7358_s30  ;;  %4804 = vrot.lane.b32.xlu2 %v10378_v33, %s7358_s30 }
 0x3f1   :  { %v3548_v60 = vpop.f32.mrf.mxu3  ;;  %v3392_v36 = vpop.f32.mrf.mxu1  ;;  %3905 = vmatpush.msra.mxu0 %v3839_v8  ;;  %7103 = vmatmul.msk.f32.gmra.mxu2 %vm3884_vm6, %v10376_v53  ;;  %v3013_v35 = vadd.f32 %v12338_v30, %v2251_v20 }
 0x3f2   :  { %7105 = vmatmul.msk.f32.gmra.mxu3 %vm3884_vm6, %v10376_v53  ;;  %4836 = vrot.lane.b32.xlu1 %v10378_v33, %s7358_s30  ;;  %v3776_v37 = vadd.f32 %v3548_v60, %v3014_v0  ;;  %v3764_v45 = vadd.f32 %v3392_v36, %v3002_v51  ;;  %v12340_v0 = vld [vmem:[#allocation49_spill] sm:$0xff]  ;;  %v12344_v51 = vld [vmem:[#allocation30_spill] sm:$0xff] }
 0x3f3   :  { %3906 = vmatpush.msra.mxu0 %v3838_v48  ;;  %v2249_v40 = vadd.f32 %v12344_v51, %v1246_v19  ;;  %v12360_v19 = vld [vmem:[#allocation13_spill] sm:$0xff] }
 0x3f4   :  { %7098 = vmatmul.msk.f32.vlgmr.msra.gmra.mxu0 %vm3884_vm6, %v10354_v9  ;;  %v3820_v11 = vadd.f32 %v10268_v2, %v3776_v37  ;;  %v3808_v50 = vadd.f32 %v10268_v2, %v3764_v45  ;;  %v1217_v37 = vadd.f32 %v12346_v54, %v12345_v58  ;;  %v12362_v51 = vld [vmem:[#allocation81_spill] sm:$0xff] }
 0x3f5   :  { %v3522_v26 = vpop.f32.mrf.mxu2  ;;  %v3011_v44 = vadd.f32 %v10255_v62, %v2249_v40  ;;  %v12363_v54 = vld [vmem:[#allocation33_spill] sm:$0xff] }
 0x3f6   :  { %v3774_v34 = vadd.f32 %v3522_v26, %v3012_v15  ;;  %v3852_v16 = vmax.f32 %v3820_v11, 0.0  ;;  %v3840_v10 = vmax.f32 %v3808_v50, 0.0  ;;  %v1243_v26 = vadd.f32 %v12340_v0, %v12339_v13  ;;  %v12359_v0 = vld [vmem:[#allocation84_spill] sm:$0xff] }
 0x3f7   :  { %v4807_v25 = vpop.permute.xlu0 %4806  ;;  %v2246_v20 = vadd.f32 %v12349_v47, %v1217_v37  ;;  %v12364_v37 = vld [vmem:[#allocation62_spill] sm:$0xff] }
 0x3f8   :  { %4818 = vrot.lane.b32.xlu2 %v10311_v6, %s7358_s30  ;;  %4834 = vrot.lane.b32.xlu0 %v10311_v6, %s7358_s30  ;;  %v3818_v36 = vadd.f32 %v10268_v2, %v3774_v34  ;;  %v2248_v52 = vadd.f32 %v12343_v7, %v1243_v26  ;;  %v12361_v7 = vld [vmem:[#allocation46_spill] sm:$0xff] }
 0x3f9   :  { %v3551_v5 = vpop.f32.mrf.mxu3  ;;  %v3395_v23 = vpop.f32.mrf.mxu1 }
 0x3fa   :  { %v3777_v42 = vadd.f32 %v3551_v5, %v3015_v29  ;;  %v3765_v49 = vadd.f32 %v3395_v23, %v3003_v31  ;;  %4850 = vrot.lane.b32.xlu1 %v10311_v6, %s7358_s30  ;;  %v3850_v57 = vmax.f32 %v3818_v36, 0.0  ;;  %v3010_v3 = vadd.f32 %v10227_v1, %v2248_v52  ;;  %v12348_v29 = vld [vmem:[#allocation47_spill] sm:$0xff]  ;;  %v12355_v36 = vld [vmem:[#allocation28_spill] sm:$0xff] }
 0x3fb   :  { %v1220_v45 = vadd.f32 %v12348_v29, %v12347_v41  ;;  %v1399_v52 = vadd.f32 %v12361_v7, %v12360_v19  ;;  %v12378_v19 = vld [vmem:[#allocation25_spill] sm:$0xff] }
 0x3fc   :  { %v3821_v32 = vadd.f32 %v10333_v14, %v3777_v42  ;;  %v3809_v61 = vadd.f32 %v10333_v14, %v3765_v49  ;;  %7099 = vmatmul.msk.f32.gmra.mxu0 %vm3884_vm6, %v10376_v53  ;;  %v12351_v42 = vld [vmem:[#allocation71_spill] sm:$0xff] }
 0x3fd   :  { %v3525_v21 = vpop.f32.mrf.mxu2  ;;  %v2247_v15 = vadd.f32 %v12350_v12, %v1220_v45  ;;  %v3008_v49 = vadd.f32 %v12351_v42, %v2246_v20  ;;  %v12366_v45 = vld [vmem:[#allocation14_spill] sm:$0xff]  ;;  %v12367_v20 = vld [vmem:[#allocation83_spill] sm:$0xff] }
 0x3fe   :  { %v3853_v8 = vmax.f32 %v3821_v32, 0.0  ;;  %v3841_v24 = vmax.f32 %v3809_v61, 0.0  ;;  %v3775_v60 = vadd.f32 %v3525_v21, %v3013_v35  ;;  %v12352_v35 = vld [vmem:[#allocation15_spill] sm:$0xff]  ;;  %v12353_v61 = vld [vmem:[#allocation10_spill] sm:$0xff] }
 0x3ff   :  { %v3009_v11 = vadd.f32 %v12352_v35, %v2247_v15  ;;  %v12354_v21 = vld [vmem:[#allocation39_spill] sm:$0xff]  ;;  %v12368_v15 = vld [vmem:[#allocation72_spill] sm:$0xff] }
 0x400   :  { %v3819_v48 = vadd.f32 %v10333_v14, %v3775_v60  ;;  %4066 = vmatpush.msrb.mxu3 %v3853_v8  ;;  %3928 = vmatpush.msra.mxu1 %v3841_v24  ;;  %v1373_v8 = vadd.f32 %v12354_v21, %v12353_v61 }
 0x401   :  { %4824 = vrot.lane.b32.xlu2 %v10092_v17, %s7358_s30  ;;  %4840 = vrot.lane.b32.xlu0 %v10092_v17, %s7358_s30 }
 0x402   :  { %v3851_v28 = vmax.f32 %v3819_v48, 0.0  ;;  %4067 = vmatpush.msrb.mxu3 %v3852_v16  ;;  %3929 = vmatpush.msra.mxu1 %v3840_v10  ;;  %v12356_v48 = vld [vmem:[#allocation54_spill] sm:$0xff]  ;;  %v12357_v10 = vld [vmem:[#allocation60_spill] sm:$0xff] }
 0x403   :  { %7112 = vmatmul.msk.f32.vlgmr.msrb.gmra.mxu3 %vm3884_vm6, %v10354_v9  ;;  %4856 = vrot.lane.b32.xlu1 %v10092_v17, %s7358_s30  ;;  %v1376_v16 = vadd.f32 %v12356_v48, %v12355_v36  ;;  %v12371_v48 = vld [vmem:[#allocation36_spill] sm:$0xff] }
 0x404   :  { %7100 = vmatmul.msk.f32.vlgmr.msra.gmra.mxu1 %vm3884_vm6, %v10354_v9  ;;  %4043 = vmatpush.msrb.mxu2 %v3851_v28  ;;  %v2258_v28 = vadd.f32 %v12357_v10, %v1373_v8  ;;  %v12369_v8 = vld [vmem:[#allocation44_spill] sm:$0xff] }
 0x406   :  { %4044 = vmatpush.msrb.mxu2 %v3850_v57  ;;  %v3020_v26 = vadd.f32 %v12359_v0, %v2258_v28  ;;  %v10511_v61 = vpop.permute.xlu1 %3881  ;;  %v12373_v28 = vld [vmem:[#allocation61_spill] sm:$0xff] }
 0x407   :  { %7110 = vmatmul.msk.f32.vlgmr.msrb.gmra.mxu2 %vm3884_vm6, %v10354_v9 }
 0x409   :  { %4838 = vrot.lane.b32.xlu2 %v10101_v59, %s7358_s30  ;;  %4854 = vrot.lane.b32.xlu0 %v10101_v59, %s7358_s30 }
 0x40b   :  { %7113 = vmatmul.msk.f32.gmra.mxu3 %vm3884_vm6, %v10376_v53  ;;  %5030 = vrot.lane.b32.xlu1 %v4807_v25, %s7360_s15 }
 0x40c   :  { %7101 = vmatmul.msk.f32.gmra.mxu1 %vm3884_vm6, %v10376_v53 }
 0x40f   :  { %7111 = vmatmul.msk.f32.gmra.mxu2 %vm3884_vm6, %v10376_v53 }
 0x411   :  { %4852 = vrot.lane.b32.xlu2 %v10378_v33, %s7358_s30 }
 0x412   :  { %v3496_v38 = vpop.f32.mrf.mxu1 }
 0x413   :  { %5036 = vrot.lane.b32.xlu1 %v10378_v33, %s7360_s15  ;;  %v3772_v31 = vadd.f32 %v3496_v38, %v3010_v3  ;;  %v12358_v38 = vld [vmem:[#allocation22_spill] sm:$0xff] }
 0x414   :  { %v2259_v13 = vadd.f32 %v12358_v38, %v1376_v16  ;;  %v12372_v16 = vld [vmem:[#allocation64_spill] sm:$0xff]  ;;  %v12375_v38 = vld [vmem:[#allocation38_spill] sm:$0xff] }
 0x415   :  { %v3816_v1 = vadd.f32 %v10268_v2, %v3772_v31  ;;  %v12365_v31 = vld [vmem:[#allocation67_spill] sm:$0xff]  ;;  %v1321_v10 = vadd.f32 %v12372_v16, %v12371_v48  ;;  %v10522_v0 = vpop.permute.xlu1 %4270 }
 0x416   :  { %v3021_v40 = vadd.f32 %v12362_v51, %v2259_v13  ;;  %v2260_v41 = vadd.f32 %v12365_v31, %v1399_v52  ;;  %v12379_v52 = vld [vmem:[#allocation48_spill] sm:$0xff] }
 0x417   :  { %v3470_v55 = vpop.f32.mrf.mxu0  ;;  %v3848_v60 = vmax.f32 %v3816_v1, 0.0  ;;  %v2254_v7 = vadd.f32 %v12378_v19, %v1321_v10  ;;  %v12393_v19 = vld [vmem:[#allocation27_spill] sm:$0xff] }
 0x418   :  { %v3770_v50 = vadd.f32 %v3470_v55, %v3008_v49 }
 0x41a   :  { %v3499_v5 = vpop.f32.mrf.mxu1  ;;  %v3814_v57 = vadd.f32 %v10268_v2, %v3770_v50 }
 0x41b   :  { %v3773_v23 = vadd.f32 %v3499_v5, %v3011_v44  ;;  %v1402_v44 = vadd.f32 %v12364_v37, %v12363_v54  ;;  %v3022_v5 = vadd.f32 %v12367_v20, %v2260_v41  ;;  %v12382_v41 = vld [vmem:[#allocation51_spill] sm:$0xff] }
 0x41c   :  { %v3846_v55 = vmax.f32 %v3814_v57, 0.0  ;;  %v12374_v57 = vld [vmem:[#allocation19_spill] sm:$0xff] }
 0x41d   :  { %v3817_v30 = vadd.f32 %v10333_v14, %v3773_v23  ;;  %v2261_v47 = vadd.f32 %v12366_v45, %v1402_v44 }
 0x41f   :  { %v3849_v62 = vmax.f32 %v3817_v30, 0.0  ;;  %v3473_v34 = vpop.f32.mrf.mxu0  ;;  %v3626_v32 = vpop.f32.mrf.mxu2  ;;  %v3023_v42 = vadd.f32 %v12368_v15, %v2261_v47  ;;  %v12384_v15 = vld [vmem:[#allocation8_spill] sm:$0xff] }
 0x420   :  { %v3771_v24 = vadd.f32 %v3473_v34, %v3009_v11  ;;  %v3782_v3 = vadd.f32 %v3626_v32, %v3020_v26  ;;  %v12376_v26 = vld [vmem:[#allocation59_spill] sm:$0xff] }
 0x421   :  { %4020 = vmatpush.msrb.mxu1 %v3849_v62 }
 0x422   :  { %v3815_v25 = vadd.f32 %v10333_v14, %v3771_v24  ;;  %v3826_v23 = vadd.f32 %v10268_v2, %v3782_v3  ;;  %v12370_v24 = vld [vmem:[#allocation20_spill] sm:$0xff]  ;;  %v12380_v3 = vld [vmem:[#allocation41_spill] sm:$0xff] }
 0x423   :  { %4021 = vmatpush.msrb.mxu1 %v3848_v60  ;;  %v1477_v60 = vadd.f32 %v12370_v24, %v12369_v8 }
 0x424   :  { %v3847_v27 = vmax.f32 %v3815_v25, 0.0  ;;  %7108 = vmatmul.msk.f32.vlgmr.msrb.gmra.mxu1 %vm3884_vm6, %v10354_v9  ;;  %v3858_v35 = vmax.f32 %v3826_v23, 0.0  ;;  %v1480_v25 = vadd.f32 %v12374_v57, %v12373_v28 }
 0x425   :  { %v3652_v63 = vpop.f32.mrf.mxu3  ;;  %v2266_v13 = vadd.f32 %v12375_v38, %v1477_v60  ;;  %v12389_v60 = vld [vmem:[#allocation89_spill] sm:$0xff]  ;;  %v12391_v38 = vld [vmem:[#allocation6_spill] sm:$0xff] }
 0x426   :  { %3997 = vmatpush.msrb.mxu0 %v3847_v27  ;;  %v3784_v49 = vadd.f32 %v3652_v63, %v3022_v5  ;;  %v12377_v27 = vld [vmem:[#allocation9_spill] sm:$0xff]  ;;  %v2267_v51 = vadd.f32 %v12379_v52, %v1480_v25  ;;  %v12390_v25 = vld [vmem:[#allocation58_spill] sm:$0xff]  ;;  %v12394_v52 = vld [vmem:[#allocation40_spill] sm:$0xff] }
 0x427   :  { %v3629_v58 = vpop.f32.mrf.mxu2  ;;  %v1324_v63 = vadd.f32 %v12377_v27, %v12376_v26 }
 0x428   :  { %v3783_v29 = vadd.f32 %v3629_v58, %v3021_v40  ;;  %3998 = vmatpush.msrb.mxu0 %v3846_v55  ;;  %v3828_v50 = vadd.f32 %v10268_v2, %v3784_v49  ;;  %v3028_v40 = vadd.f32 %v10239_v22, %v2266_v13  ;;  %v12381_v58 = vld [vmem:[#allocation82_spill] sm:$0xff]  ;;  %v3029_v37 = vadd.f32 %v10272_v4, %v2267_v51  ;;  %v12386_v49 = vld [vmem:[#allocation45_spill] sm:$0xff] }
 0x429   :  { %7106 = vmatmul.msk.f32.vlgmr.msrb.gmra.mxu0 %vm3884_vm6, %v10354_v9  ;;  %v2255_v55 = vadd.f32 %v12380_v3, %v1324_v63  ;;  %v3016_v54 = vadd.f32 %v12381_v58, %v2254_v7  ;;  %v1503_v13 = vadd.f32 %v12391_v38, %v12390_v25  ;;  %v12392_v63 = vld [vmem:[#allocation17_spill] sm:$0xff]  ;;  %v12395_v58 = vld [vmem:[#allocation55_spill] sm:$0xff] }
 0x42a   :  { %v3827_v12 = vadd.f32 %v10333_v14, %v3783_v29  ;;  %v3860_v32 = vmax.f32 %v3828_v50, 0.0  ;;  %v12383_v29 = vld [vmem:[#allocation11_spill] sm:$0xff]  ;;  %v12387_v50 = vld [vmem:[#allocation68_spill] sm:$0xff]  ;;  %v1506_v7 = vadd.f32 %v12393_v19, %v12392_v63 }
 0x42b   :  { %v1347_v45 = vadd.f32 %v12383_v29, %v12382_v41  ;;  %v3017_v47 = vadd.f32 %v10262_v18, %v2255_v55  ;;  %v12388_v18 = vld [vmem:[#allocation86_spill] sm:$0xff]  ;;  %v2268_v51 = vadd.f32 %v12394_v52, %v1503_v13  ;;  %v12407_v13 = vld [vmem:[#allocation24_spill] sm:$0xff] }
 0x42c   :  { %v3859_v1 = vmax.f32 %v3827_v12, 0.0  ;;  %7109 = vmatmul.msk.f32.gmra.mxu1 %vm3884_vm6, %v10376_v53  ;;  %v12397_v29 = vld [vmem:[#allocation74_spill] sm:$0xff] }
 0x42d   :  { %v3655_v30 = vpop.f32.mrf.mxu3 }
 0x42e   :  { %v3785_v11 = vadd.f32 %v3655_v30, %v3023_v42  ;;  %4135 = vmatpush.msra.mxu2 %v3859_v1  ;;  %v12385_v42 = vld [vmem:[#allocation35_spill] sm:$0xff]  ;;  %v2256_v1 = vadd.f32 %v12386_v49, %v1347_v45 }
 0x42f   :  { %v1350_v22 = vadd.f32 %v12385_v42, %v12384_v15  ;;  %v12398_v15 = vld [vmem:[#allocation7_spill] sm:$0xff]  ;;  %v12399_v42 = vld [vmem:[#allocation34_spill] sm:$0xff] }
 0x430   :  { %v3829_v62 = vadd.f32 %v10333_v14, %v3785_v11  ;;  %4136 = vmatpush.msra.mxu2 %v3858_v35 }
 0x431   :  { %7107 = vmatmul.msk.f32.gmra.mxu0 %vm3884_vm6, %v10376_v53  ;;  %7118 = vmatmul.msk.f32.vlgmr.msra.gmra.mxu2 %vm3884_vm6, %v10354_v9 }
 0x432   :  { %v3861_v34 = vmax.f32 %v3829_v62, 0.0  ;;  %v2257_v62 = vadd.f32 %v12387_v50, %v1350_v22  ;;  %v1425_v22 = vadd.f32 %v12399_v42, %v12398_v15  ;;  %v11969_v42 = vmov 0.0  }
 0x434   :  { %4158 = vmatpush.msra.mxu3 %v3861_v34  ;;  %v3018_v34 = vadd.f32 %v12388_v18, %v2256_v1 }
 0x436   :  { %4159 = vmatpush.msra.mxu3 %v3860_v32 }
 0x437   :  { %7120 = vmatmul.msk.f32.vlgmr.msra.gmra.mxu3 %vm3884_vm6, %v10354_v9 }
 0x439   :  { %7119 = vmatmul.msk.f32.gmra.mxu2 %vm3884_vm6, %v10376_v53 }
 0x43f   :  { %7121 = vmatmul.msk.f32.gmra.mxu3 %vm3884_vm6, %v10376_v53 }
 0x440   :  { %v3730_v21 = vpop.f32.mrf.mxu2 }
 0x441   :  { %v3574_v36 = vpop.f32.mrf.mxu0  ;;  %v3790_v44 = vadd.f32 %v3730_v21, %v3028_v40 }
 0x442   :  { %v3778_v20 = vadd.f32 %v3574_v36, %v3016_v54  ;;  %v3019_v36 = vadd.f32 %v12389_v60, %v2257_v62  ;;  %v2269_v54 = vadd.f32 %v12395_v58, %v1506_v7 }
 0x443   :  { %v3834_v4 = vadd.f32 %v10268_v2, %v3790_v44 }
 0x444   :  { %v3822_v32 = vadd.f32 %v10268_v2, %v3778_v20  ;;  %v3031_v45 = vadd.f32 %v12397_v29, %v2269_v54 }
 0x445   :  { %v3866_v10 = vmax.f32 %v3834_v4, 0.0 }
 0x446   :  { %v3854_v26 = vmax.f32 %v3822_v32, 0.0 }
 0x447   :  { %v3600_v31 = vpop.f32.mrf.mxu1 }
 0x448   :  { %v3733_v5 = vpop.f32.mrf.mxu2  ;;  %v3780_v48 = vadd.f32 %v3600_v31, %v3018_v34  ;;  %v12403_v34 = vld [vmem:[#allocation69_spill] sm:$0xff] }
 0x449   :  { %v3791_v23 = vadd.f32 %v3733_v5, %v3029_v37  ;;  %v3577_v12 = vpop.f32.mrf.mxu0  ;;  %v12396_v37 = vld [vmem:[#allocation73_spill] sm:$0xff] }
 0x44a   :  { %v3779_v30 = vadd.f32 %v3577_v12, %v3017_v47  ;;  %v4805_v35 = vpop.permute.xlu2 %4804  ;;  %v3824_v40 = vadd.f32 %v10268_v2, %v3780_v48  ;;  %v3030_v44 = vadd.f32 %v12396_v37, %v2268_v51  ;;  %v12410_v51 = vld [vmem:[#allocation76_spill] sm:$0xff] }
 0x44b   :  { %v3835_v11 = vadd.f32 %v10333_v14, %v3791_v23  ;;  %5028 = vrot.lane.b32.xlu0 %v4805_v35, %s7360_s15  ;;  %v12401_v35 = vld [vmem:[#allocation37_spill] sm:$0xff] }
 0x44c   :  { %v3823_v21 = vadd.f32 %v10333_v14, %v3779_v30  ;;  %v4803_v24 = vpop.permute.xlu1 %4802  ;;  %v3856_v47 = vmax.f32 %v3824_v40, 0.0  ;;  %v12400_v30 = vld [vmem:[#allocation16_spill] sm:$0xff] }
 0x44d   :  { %v3867_v8 = vmax.f32 %v3835_v11, 0.0  ;;  %5026 = vrot.lane.b32.xlu2 %v4803_v24, %s7360_s15  ;;  %v1428_v4 = vadd.f32 %v12401_v35, %v12400_v30  ;;  %v12402_v11 = vld [vmem:[#allocation56_spill] sm:$0xff] }
 0x44e   :  { %v3855_v16 = vmax.f32 %v3823_v21, 0.0  ;;  %v2262_v50 = vadd.f32 %v12402_v11, %v1425_v22  ;;  %v12404_v21 = vld [vmem:[#allocation87_spill] sm:$0xff] }
 0x44f   :  { %v3603_v28 = vpop.f32.mrf.mxu1  ;;  %v3756_v57 = vpop.f32.mrf.mxu3  ;;  %4227 = vmatpush.msrb.mxu2 %v3867_v8  ;;  %v2263_v32 = vadd.f32 %v12403_v34, %v1428_v4 }
 0x450   :  { %v3781_v27 = vadd.f32 %v3603_v28, %v3019_v36  ;;  %4089 = vmatpush.msra.mxu0 %v3855_v16  ;;  %v3792_v20 = vadd.f32 %v3756_v57, %v3030_v44  ;;  %v3024_v8 = vadd.f32 %v12404_v21, %v2262_v50  ;;  %v12406_v28 = vld [vmem:[#allocation75_spill] sm:$0xff] }
 0x451   :  { %4228 = vmatpush.msrb.mxu2 %v3866_v10  ;;  %v3025_v36 = vadd.f32 %v10309_v43, %v2263_v32  ;;  %v12405_v10 = vld [vmem:[#allocation21_spill] sm:$0xff] }
 0x452   :  { %v3825_v3 = vadd.f32 %v10333_v14, %v3781_v27  ;;  %4090 = vmatpush.msra.mxu0 %v3854_v26  ;;  %7126 = vmatmul.msk.f32.vlgmr.msrb.gmra.mxu2 %vm3884_vm6, %v10354_v9  ;;  %v10556_v55 = vpop.permute.xlu2 %4818  ;;  %v3836_v49 = vadd.f32 %v10268_v2, %v3792_v20  ;;  %v1451_v57 = vadd.f32 %v12406_v28, %v12405_v10  ;;  %v12408_v26 = vld [vmem:[#allocation50_spill] sm:$0xff]  ;;  %v12409_v27 = vld [vmem:[#allocation63_spill] sm:$0xff] }
 0x453   :  { %7114 = vmatmul.msk.f32.vlgmr.msra.gmra.mxu0 %vm3884_vm6, %v10354_v9  ;;  %5034 = vrot.lane.b32.xlu0 %v10311_v6, %s7360_s15 }
 0x454   :  { %v3857_v31 = vmax.f32 %v3825_v3, 0.0  ;;  %v4809_v41 = vpop.permute.xlu1 %4808  ;;  %v3868_v60 = vmax.f32 %v3836_v49, 0.0  ;;  %v2264_v63 = vadd.f32 %v12409_v27, %v1451_v57  ;;  %v7328_v27 = vld [vmem:[%s11869_s7] sm:$0xff] }
 0x455   :  { %5032 = vrot.lane.b32.xlu2 %v4809_v41, %s7360_s15 }
 0x456   :  { %4112 = vmatpush.msra.mxu1 %v3857_v31  ;;  %v3026_v3 = vadd.f32 %v10329_v39, %v2264_v63 }
 0x457   :  { %v3759_v5 = vpop.f32.mrf.mxu3 }
 0x458   :  { %v3793_v23 = vadd.f32 %v3759_v5, %v3031_v45  ;;  %v3678_v12 = vpop.f32.mrf.mxu0  ;;  %4113 = vmatpush.msra.mxu1 %v3856_v47  ;;  %v5573_v45 = vlaneseq }
 0x459   :  { %7116 = vmatmul.msk.f32.vlgmr.msra.gmra.mxu1 %vm3884_vm6, %v10354_v9  ;;  %v3786_v48 = vadd.f32 %v3678_v12, %v3024_v8 }
 0x45a   :  { %v3837_v1 = vadd.f32 %v10333_v14, %v3793_v23  ;;  %7127 = vmatmul.msk.f32.gmra.mxu2 %vm3884_vm6, %v10376_v53  ;;  %v10618_v23 = vand.u32 127, %v5573_v45 }
 0x45b   :  { %v10577_v62 = vpop.permute.xlu2 %4824  ;;  %7115 = vmatmul.msk.f32.gmra.mxu0 %vm3884_vm6, %v10376_v53  ;;  %5040 = vrot.lane.b32.xlu0 %v10092_v17, %s7360_s15  ;;  %v3830_v19 = vadd.f32 %v10268_v2, %v3786_v48 }
 0x45c   :  { %v3869_v18 = vmax.f32 %v3837_v1, 0.0  ;;  %v10585_v24 = vpop.permute.xlu1 %4822  ;;  %vm5591_vm7 = vcmp.eq.s32.totalorder %v10618_v23, 1  ;;  %vm5592_vm8 = vcmp.eq.s32.totalorder %v10618_v23, 2  ;;  %vm5593_vm9 = vcmp.eq.s32.totalorder %v10618_v23, 3 }
 0x45d   :  { %5038 = vrot.lane.b32.xlu2 %v10101_v59, %s7360_s15  ;;  %v1454_v59 = vadd.f32 %v12408_v26, %v12407_v13  ;;  %v3862_v31 = vmax.f32 %v3830_v19, 0.0  ;;  %v10626_v22 = vsel %vm5591_vm7, 1.0, %v11969_v42  ;;  %vm5595_vm10 = vcmp.eq.s32.totalorder %v10618_v23, 5 }
 0x45e   :  { %4250 = vmatpush.msrb.mxu3 %v3869_v18  ;;  %v10653_v18 = vld [vmem:[%s11867_s5] sm:$0xff]  ;;  %vm5596_vm11 = vcmp.eq.s32.totalorder %v10618_v23, 6  ;;  %vm5594_vm12 = vcmp.eq.s32.totalorder %v10618_v23, 4  ;;  %vm5597_vm13 = vcmp.eq.s32.totalorder %v10618_v23, 7  ;;  %vm5546_vm7 = vcmask 130049  }
 0x45f   :  { %v3704_v16 = vpop.f32.mrf.mxu1  ;;  %v2265_v40 = vadd.f32 %v12410_v51, %v1454_v59 }
 0x460   :  { %v3681_v25 = vpop.f32.mrf.mxu0  ;;  %4251 = vmatpush.msrb.mxu3 %v3868_v60  ;;  %v3788_v44 = vadd.f32 %v3704_v16, %v3026_v3 }
 0x461   :  { %v3787_v38 = vadd.f32 %v3681_v25, %v3025_v36  ;;  %7117 = vmatmul.msk.f32.gmra.mxu1 %vm3884_vm6, %v10376_v53  ;;  %7128 = vmatmul.msk.f32.vlgmr.msrb.gmra.mxu3 %vm3884_vm6, %v10354_v9  ;;  %v3027_v37 = vadd.f32 %v10361_v46, %v2265_v40 }
 0x462   :  { %v10599_v43 = vpop.permute.xlu0 %4820  ;;  %v3832_v39 = vadd.f32 %v10268_v2, %v3788_v44 }
 0x463   :  { %v3831_v7 = vadd.f32 %v10333_v14, %v3787_v38  ;;  %v4839_v52 = vpop.permute.xlu2 %4838 }
 0x464   :  { %5062 = vrot.lane.b32.xlu0 %v4839_v52, %s7360_s15  ;;  %v4837_v54 = vpop.permute.xlu1 %4836  ;;  %v3864_v2 = vmax.f32 %v3832_v39, 0.0 }
 0x465   :  { %v3863_v58 = vmax.f32 %v3831_v7, 0.0  ;;  %5060 = vrot.lane.b32.xlu2 %v4837_v54, %s7360_s15 }
 0x467   :  { %v3707_v41 = vpop.f32.mrf.mxu1  ;;  %4181 = vmatpush.msrb.mxu0 %v3863_v58 }
 0x468   :  { %v3789_v29 = vadd.f32 %v3707_v41, %v3027_v37 }
 0x469   :  { %4182 = vmatpush.msrb.mxu0 %v3862_v31  ;;  %7129 = vmatmul.msk.f32.gmra.mxu3 %vm3884_vm6, %v10376_v53 }
 0x46a   :  { %v3833_v47 = vadd.f32 %v10333_v14, %v3789_v29  ;;  %7122 = vmatmul.msk.f32.vlgmr.msrb.gmra.mxu0 %vm3884_vm6, %v10354_v9  ;;  %v4835_v46 = vpop.permute.xlu0 %4834 }
 0x46b   :  { %5058 = vrot.lane.b32.xlu1 %v4835_v46, %s7360_s15  ;;  %v10730_v63 = vpop.permute.xlu2 %4852 }
 0x46c   :  { %v3865_v20 = vmax.f32 %v3833_v47, 0.0  ;;  %5068 = vrot.lane.b32.xlu0 %v10378_v33, %s7360_s15  ;;  %v3954_v5 = vpop.f32.mrf.mxu2  ;;  %v3977_v12 = vpop.f32.mrf.mxu3 }
 0x46d   :  { %v10620_v15 = vpop.permute.xlu1 %4850  ;;  %5066 = vrot.lane.b32.xlu2 %v10311_v6, %s7360_s15  ;;  %v10656_v34 = vadd.f32 %v3977_v12, %v10358_v56 }
 0x46e   :  { %4204 = vmatpush.msrb.mxu1 %v3865_v20 }
 0x470   :  { %4205 = vmatpush.msrb.mxu1 %v3864_v2 }
 0x471   :  { %v3908_v14 = vpop.f32.mrf.mxu0  ;;  %7124 = vmatmul.msk.f32.vlgmr.msrb.gmra.mxu1 %vm3884_vm6, %v10354_v9  ;;  %v10647_v9 = vadd.f32 %v3954_v5, %v10358_v56 }
 0x472   :  { %v3909_v49 = vadd.f32 %v3908_v14, %v10358_v56  ;;  %7123 = vmatmul.msk.f32.gmra.mxu0 %vm3884_vm6, %v10376_v53 }
 0x473   :  { %v4841_v57 = vpop.permute.xlu0 %4840 }
 0x474   :  { %v10634_v1 = vmul.f32 %v10626_v22, %v3909_v49  ;;  %v3957_v30 = vpop.f32.mrf.mxu2  ;;  %5064 = vrot.lane.b32.xlu1 %v4841_v57, %s7360_s15  ;;  %v10821_v57 = vsel %vm5595_vm10, 1.0, %v11969_v42 }
 0x475   :  { %v10637_v35 = vadd.f32 %v3957_v30, %v10511_v61  ;;  %v3980_v4 = vpop.f32.mrf.mxu3  ;;  %v10639_v11 = vpop.permute.xlu1 %4856  ;;  %5072 = vrot.lane.b32.xlu2 %v10092_v17, %s7360_s15 }
 0x476   :  { %v10642_v50 = vadd.f32 %v3980_v4, %v10511_v61 }
 0x477   :  { %4339 = vmatpush.msra.mxu2 %v10637_v35 }
 0x478   :  { %4362 = vmatpush.msra.mxu3 %v10642_v50 }
 0x479   :  { %v3911_v32 = vpop.f32.mrf.mxu0  ;;  %7125 = vmatmul.msk.f32.gmra.mxu1 %vm3884_vm6, %v10376_v53  ;;  %4340 = vmatpush.msra.mxu2 %v10647_v9  ;;  %v10677_v53 = vld [vmem:[%s11867_s5 + $0x8] sm:$0x7]  ;;  %s7372_s5 = smov 4  }
 0x47a   :  { %v10663_v17 = vadd.f32 %v3911_v32, %v10511_v61  ;;  %4363 = vmatpush.msra.mxu3 %v10656_v34  ;;  %7134 = vmatmul.msk.f32.vlgmr.msra.gmra.mxu2 %vm3884_vm6, %v10653_v18 }
 0x47b   :  { %7136 = vmatmul.msk.f32.vlgmr.msra.gmra.mxu3 %vm3884_vm6, %v10653_v18  ;;  %v10751_v44 = vpop.permute.xlu0 %4854 }
 0x47c   :  { %4293 = vmatpush.msra.mxu0 %v10663_v17  ;;  %5070 = vrot.lane.b32.xlu1 %v7328_v27, %s7360_s15  ;;  %v5640_v5 = vmul.f32 %v10626_v22, %v10663_v17  ;;  %v10789_v22 = vsel %vm5592_vm8, 1.0, %v11969_v42 }
 0x47d   :  { %v5031_v21 = vpop.permute.xlu1 %5030 }
 0x47e   :  { %5254 = vrot.lane.b32.xlu2 %v5031_v21, %s7367_s14  ;;  %4294 = vmatpush.msra.mxu0 %v3909_v49  ;;  %v10803_v21 = vsel %vm5593_vm9, 1.0, %v11969_v42  ;;  %vm5802_vm9 = vcmask 130112  }
 0x47f   :  { %7130 = vmatmul.msk.f32.vlgmr.msra.gmra.mxu0 %vm3884_vm6, %v10653_v18 }
 0x481   :  { %v3931_v8 = vpop.f32.mrf.mxu1 }
 0x482   :  { %7135 = vmatmul.msk.f32.gmra.mxu2 %vm3884_vm6, %v10677_v53  ;;  %v10690_v28 = vadd.f32 %v3931_v8, %v10358_v56  ;;  %v10808_v8 = vld [vmem:[%s11869_s7 + $0x8] sm:$0x7] }
 0x483   :  { %7137 = vmatmul.msk.f32.gmra.mxu3 %vm3884_vm6, %v10677_v53 }
 0x485   :  { %v5037_v60 = vpop.permute.xlu1 %5036 }
 0x486   :  { %v4069_v36 = vpop.f32.mrf.mxu3  ;;  %5260 = vrot.lane.b32.xlu2 %v5037_v60, %s7367_s14  ;;  %v5644_v60 = vmul.f32 %v10803_v21, %v10637_v35 }
 0x487   :  { %7131 = vmatmul.msk.f32.gmra.mxu0 %vm3884_vm6, %v10677_v53  ;;  %v10703_v13 = vadd.f32 %v4069_v36, %v10358_v56 }
 0x489   :  { %v3934_v48 = vpop.f32.mrf.mxu1 }
 0x48a   :  { %v10687_v16 = vadd.f32 %v3934_v48, %v10511_v61  ;;  %v4046_v10 = vpop.f32.mrf.mxu2 }
 0x48c   :  { %4316 = vmatpush.msra.mxu1 %v10687_v16  ;;  %v5642_v30 = vmul.f32 %v10789_v22, %v10687_v16 }
 0x48e   :  { %v4072_v25 = vpop.f32.mrf.mxu3  ;;  %4317 = vmatpush.msra.mxu1 %v10690_v28  ;;  %5266 = vrot.lane.b32.xlu2 %v10556_v55, %s7367_s14  ;;  %v10713_v55 = vadd.f32 %v4046_v10, %v10358_v56  ;;  %v5680_v32 = vsel %vm3884_vm6, %v5642_v30, 0.0  ;;  %v5686_v10 = vsel %vm3884_vm6, %v5644_v60, 0.0  ;;  %v5641_v60 = vmul.f32 %v10789_v22, %v10690_v28 }
 0x48f   :  { %v10698_v38 = vadd.f32 %v4072_v25, %v10511_v61  ;;  %7132 = vmatmul.msk.f32.vlgmr.msra.gmra.mxu1 %vm3884_vm6, %v10653_v18 }
 0x490   :  { %v5677_v28 = vsel %vm3884_vm6, %v5641_v60, 0.0 }
 0x491   :  { %4454 = vmatpush.msrb.mxu3 %v10698_v38 }
 0x492   :  { %v4049_v26 = vpop.f32.mrf.mxu2 }
 0x493   :  { %v10707_v59 = vadd.f32 %v4049_v26, %v10511_v61  ;;  %4455 = vmatpush.msrb.mxu3 %v10703_v13 }
 0x494   :  { %7144 = vmatmul.msk.f32.vlgmr.msrb.gmra.mxu3 %vm3884_vm6, %v10653_v18 }
 0x495   :  { %4431 = vmatpush.msrb.mxu2 %v10707_v59 }
 0x496   :  { %5272 = vrot.lane.b32.xlu2 %v10577_v62, %s7367_s14 }
 0x497   :  { %7133 = vmatmul.msk.f32.gmra.mxu1 %vm3884_vm6, %v10677_v53  ;;  %4432 = vmatpush.msrb.mxu2 %v10713_v55 }
 0x498   :  { %7142 = vmatmul.msk.f32.vlgmr.msrb.gmra.mxu2 %vm3884_vm6, %v10653_v18 }
 0x49c   :  { %7145 = vmatmul.msk.f32.gmra.mxu3 %vm3884_vm6, %v10677_v53 }
 0x49e   :  { %5278 = vrot.lane.b32.xlu2 %v7328_v27, %s7367_s14 }
 0x4a0   :  { %7143 = vmatmul.msk.f32.gmra.mxu2 %vm3884_vm6, %v10677_v53 }
 0x4a1   :  { %v4023_v19 = vpop.f32.mrf.mxu1 }
 0x4a2   :  { %v10739_v40 = vadd.f32 %v4023_v19, %v10358_v56 }
 0x4a6   :  { %v4000_v62 = vpop.f32.mrf.mxu0 }
 0x4a7   :  { %v5027_v7 = vpop.permute.xlu2 %5026  ;;  %v4001_v37 = vadd.f32 %v4000_v62, %v10358_v56 }
 0x4a8   :  { %5250 = vrot.lane.b32.xlu0 %v5027_v7, %s7367_s14 }
 0x4a9   :  { %v4026_v52 = vpop.f32.mrf.mxu1  ;;  %v5647_v35 = vmul.f32 %v10821_v57, %v4001_v37 }
 0x4aa   :  { %v10736_v51 = vadd.f32 %v4026_v52, %v10511_v61 }
 0x4ab   :  { %v5695_v52 = vsel %vm3884_vm6, %v5647_v35, 0.0 }
 0x4ac   :  { %4408 = vmatpush.msrb.mxu1 %v10736_v51 }
 0x4ae   :  { %v4003_v3 = vpop.f32.mrf.mxu0  ;;  %4409 = vmatpush.msrb.mxu1 %v10739_v40 }
 0x4af   :  { %v10744_v58 = vadd.f32 %v4003_v3, %v10511_v61  ;;  %7140 = vmatmul.msk.f32.vlgmr.msrb.gmra.mxu1 %vm3884_vm6, %v10653_v18  ;;  %v5033_v54 = vpop.permute.xlu2 %5032 }
 0x4b0   :  { %5256 = vrot.lane.b32.xlu0 %v5033_v54, %s7367_s14  ;;  %v5871_v54 = vshrl.u32 %v5573_v45, 7 }
 0x4b1   :  { %4385 = vmatpush.msrb.mxu0 %v10744_v58 }
 0x4b2   :  { %7221 = vset.pattern.permute.xlu2 %v5871_v54  ;;  %7222 = vset.pattern.permute.xlu0 %v5871_v54 }
 0x4b3   :  { %4386 = vmatpush.msrb.mxu0 %v4001_v37  ;;  %7223 = vset.pattern.permute.xlu1 %v5871_v54 }
 0x4b4   :  { %v4138_v31 = vpop.f32.mrf.mxu2  ;;  %7138 = vmatmul.msk.f32.vlgmr.msrb.gmra.mxu0 %vm3884_vm6, %v10653_v18 }
 0x4b5   :  { %v10765_v20 = vadd.f32 %v4138_v31, %v10358_v56  ;;  %v10852_v31 = vsel %vm5596_vm11, 1.0, %v11969_v42  ;;  %vm5549_vm11 = vcmask 122880  }
 0x4b7   :  { %7141 = vmatmul.msk.f32.gmra.mxu1 %vm3884_vm6, %v10677_v53  ;;  %v5039_v41 = vpop.permute.xlu2 %5038  ;;  %12412 = vst [vmem:[#allocation66_spill] sm:$0xff] %v10765_v20 }
 0x4b8   :  { %5262 = vrot.lane.b32.xlu0 %v5039_v41, %s7367_s14 }
 0x4ba   :  { %v4161_v29 = vpop.f32.mrf.mxu3 }
 0x4bb   :  { %v10779_v14 = vadd.f32 %v4161_v29, %v10358_v56  ;;  %v5650_v29 = vmul.f32 %v10852_v31, %v10736_v51 }
 0x4bc   :  { %v4141_v39 = vpop.f32.mrf.mxu2  ;;  %7139 = vmatmul.msk.f32.gmra.mxu0 %vm3884_vm6, %v10677_v53 }
 0x4bd   :  { %v10761_v47 = vadd.f32 %v4141_v39, %v10511_v61  ;;  %v5029_v46 = vpop.permute.xlu0 %5028  ;;  %12414 = vst [vmem:[#allocation80_spill] sm:$0xff] %v10779_v14  ;;  %v5704_v39 = vsel %vm3884_vm6, %v5650_v29, 0.0  ;;  %v5671_v29 = vsel %vm3884_vm6, %v10634_v1, 0.0 }
 0x4be   :  { %5252 = vrot.lane.b32.xlu1 %v5029_v46, %s7367_s14 }
 0x4bf   :  { %12411 = vst [vmem:[#allocation5_spill] sm:$0xff] %v10761_v47  ;;  %4523 = vmatpush.msra.mxu2 %v10761_v47  ;;  %v10814_v36 = vpop.permute.xlu2 %5060 }
 0x4c0   :  { %5268 = vrot.lane.b32.xlu0 %v10599_v43, %s7367_s14  ;;  %v5674_v43 = vsel %vm3884_vm6, %v5640_v5, 0.0 }
 0x4c1   :  { %4524 = vmatpush.msra.mxu2 %v10765_v20 }
 0x4c2   :  { %v4164_v12 = vpop.f32.mrf.mxu3  ;;  %7150 = vmatmul.msk.f32.vlgmr.msra.gmra.mxu2 %vm3884_vm6, %v10653_v18 }
 0x4c3   :  { %v10776_v2 = vadd.f32 %v4164_v12, %v10511_v61 }
 0x4c5   :  { %12413 = vst [vmem:[#allocation53_spill] sm:$0xff] %v10776_v2  ;;  %4546 = vmatpush.msra.mxu3 %v10776_v2  ;;  %v5035_v49 = vpop.permute.xlu0 %5034 }
 0x4c6   :  { %5258 = vrot.lane.b32.xlu1 %v5035_v49, %s7367_s14 }
 0x4c7   :  { %5675 = vadd.xlane.f32.xlu2 %v5674_v43  ;;  %4547 = vmatpush.msra.mxu3 %v10779_v14  ;;  %v10831_v19 = vpop.permute.xlu2 %5066 }
 0x4c8   :  { %7152 = vmatmul.msk.f32.vlgmr.msra.gmra.mxu3 %vm3884_vm6, %v10653_v18  ;;  %5274 = vrot.lane.b32.xlu0 %v10311_v6, %s7367_s14 }
 0x4ca   :  { %7151 = vmatmul.msk.f32.gmra.mxu2 %vm3884_vm6, %v10677_v53 }
 0x4cd   :  { %v5041_v4 = vpop.permute.xlu0 %5040 }
 0x4ce   :  { %5264 = vrot.lane.b32.xlu1 %v5041_v4, %s7367_s14 }
 0x4cf   :  { %5681 = vadd.xlane.f32.xlu2 %v5680_v32  ;;  %v10869_v46 = vpop.permute.xlu2 %5072 }
 0x4d0   :  { %v4092_v17 = vpop.f32.mrf.mxu0  ;;  %7153 = vmatmul.msk.f32.gmra.mxu3 %vm3884_vm6, %v10677_v53  ;;  %5280 = vrot.lane.b32.xlu0 %v10808_v8, %s7367_s14 }
 0x4d1   :  { %v10828_v27 = vadd.f32 %v4092_v17, %v10358_v56 }
 0x4d5   :  { %v4230_v48 = vpop.f32.mrf.mxu2 }
 0x4d6   :  { %v4115_v16 = vpop.f32.mrf.mxu1  ;;  %5270 = vrot.lane.b32.xlu1 %v10585_v24, %s7367_s14  ;;  %v10848_v37 = vadd.f32 %v4230_v48, %v10358_v56 }
 0x4d7   :  { %5687 = vadd.xlane.f32.xlu2 %v5686_v10  ;;  %v10855_v41 = vadd.f32 %v4115_v16, %v10358_v56  ;;  %v10904_v10 = vld [vmem:[%s11871_s9] sm:$0xff] }
 0x4d8   :  { %v4095_v25 = vpop.f32.mrf.mxu0  ;;  %12417 = vst [vmem:[#allocation42_spill] sm:$0xff] %v10848_v37  ;;  %v5255_v32 = vpop.permute.xlu2 %5254  ;;  %v5869_v35 = vperm.slane %v10904_v10, 0 }
 0x4d9   :  { %v10824_v26 = vadd.f32 %v4095_v25, %v10511_v61 }
 0x4db   :  { %4477 = vmatpush.msra.mxu0 %v10824_v26 }
 0x4dd   :  { %v4233_v24 = vpop.f32.mrf.mxu2  ;;  %4478 = vmatpush.msra.mxu0 %v10828_v27 }
 0x4de   :  { %v10836_v62 = vadd.f32 %v4233_v24, %v10511_v61  ;;  %v4118_v7 = vpop.f32.mrf.mxu1  ;;  %7146 = vmatmul.msk.f32.vlgmr.msra.gmra.mxu0 %vm3884_vm6, %v10653_v18  ;;  %5276 = vrot.lane.b32.xlu1 %v10378_v33, %s7367_s14 }
 0x4df   :  { %v10844_v3 = vadd.f32 %v4118_v7, %v10511_v61  ;;  %5696 = vadd.xlane.f32.xlu2 %v5695_v52  ;;  %v5890_v7 = vperm.slane %v10904_v10, 3 }
 0x4e0   :  { %12415 = vst [vmem:[#allocation12_spill] sm:$0xff] %v10836_v62  ;;  %4615 = vmatpush.msrb.mxu2 %v10836_v62  ;;  %v10914_v22 = vpop.permute.xlu2 %5260 }
 0x4e1   :  { %12416 = vst [vmem:[#allocation31_spill] sm:$0xff] %v10844_v3  ;;  %4500 = vmatpush.msra.mxu1 %v10844_v3 }
 0x4e2   :  { %4616 = vmatpush.msrb.mxu2 %v10848_v37 }
 0x4e3   :  { %4501 = vmatpush.msra.mxu1 %v10855_v41  ;;  %7158 = vmatmul.msk.f32.vlgmr.msrb.gmra.mxu2 %vm3884_vm6, %v10653_v18 }
 0x4e4   :  { %v4253_v45 = vpop.f32.mrf.mxu3  ;;  %7148 = vmatmul.msk.f32.vlgmr.msra.gmra.mxu1 %vm3884_vm6, %v10653_v18 }
 0x4e5   :  { %v10879_v43 = vadd.f32 %v4253_v45, %v10358_v56 }
 0x4e6   :  { %7147 = vmatmul.msk.f32.gmra.mxu0 %vm3884_vm6, %v10677_v53 }
 0x4e7   :  { %5705 = vadd.xlane.f32.xlu2 %v5704_v39  ;;  %v4184_v51 = vpop.f32.mrf.mxu0  ;;  %12419 = vst [vmem:[#allocation79_spill] sm:$0xff] %v10879_v43  ;;  %v7168_v39 = vsel %vm5597_vm13, 1.0, %v11969_v42 }
 0x4e8   :  { %v10887_v17 = vadd.f32 %v4184_v51, %v10358_v56  ;;  %v10927_v52 = vpop.permute.xlu2 %5266  ;;  %v5904_v51 = vperm.slane %v10904_v10, 5 }
 0x4ea   :  { %12421 = vst [vmem:[#allocation70_spill] sm:$0xff] %v10887_v17 }
 0x4eb   :  { %7159 = vmatmul.msk.f32.gmra.mxu2 %vm3884_vm6, %v10677_v53 }
 0x4ec   :  { %v4256_v5 = vpop.f32.mrf.mxu3  ;;  %7149 = vmatmul.msk.f32.gmra.mxu1 %vm3884_vm6, %v10677_v53 }
 0x4ed   :  { %v10876_v12 = vadd.f32 %v4256_v5, %v10511_v61 }
 0x4ee   :  { %v4207_v49 = vpop.f32.mrf.mxu1 }
 0x4ef   :  { %12418 = vst [vmem:[#allocation85_spill] sm:$0xff] %v10876_v12  ;;  %v4187_v30 = vpop.f32.mrf.mxu0  ;;  %4638 = vmatpush.msrb.mxu3 %v10876_v12  ;;  %v10907_v25 = vadd.f32 %v4207_v49, %v10358_v56  ;;  %v5651_v49 = vmul.f32 %v7168_v39, %v10713_v55 }
 0x4f0   :  { %v10883_v4 = vadd.f32 %v4187_v30, %v10511_v61  ;;  %v10944_v1 = vpop.permute.xlu2 %5272 }
 0x4f1   :  { %4639 = vmatpush.msrb.mxu3 %v10879_v43  ;;  %12423 = vst [vmem:[#allocation26_spill] sm:$0xff] %v10907_v25 }
 0x4f2   :  { %12420 = vst [vmem:[#allocation52_spill] sm:$0xff] %v10883_v4  ;;  %4569 = vmatpush.msrb.mxu0 %v10883_v4  ;;  %7160 = vmatmul.msk.f32.vlgmr.msrb.gmra.mxu3 %vm3884_vm6, %v10653_v18 }
 0x4f4   :  { %4570 = vmatpush.msrb.mxu0 %v10887_v17 }
 0x4f5   :  { %7154 = vmatmul.msk.f32.vlgmr.msrb.gmra.mxu0 %vm3884_vm6, %v10653_v18 }
 0x4f6   :  { %v4210_v48 = vpop.f32.mrf.mxu1 }
 0x4f7   :  { %v10898_v16 = vadd.f32 %v4210_v48, %v10511_v61  ;;  %v7165_v61 = vsel %vm5594_vm12, 1.0, %v11969_v42  ;;  %vm5571_vm12 = vcmask 123904  }
 0x4f8   :  { %v5645_v56 = vmul.f32 %v7165_v61, %v10656_v34  ;;  %v10936_v34 = vpop.permute.xlu0 %5062 }
 0x4f9   :  { %12422 = vst [vmem:[#allocation77_spill] sm:$0xff] %v10898_v16  ;;  %4592 = vmatpush.msrb.mxu1 %v10898_v16 }
 0x4fa   :  { %7161 = vmatmul.msk.f32.gmra.mxu3 %vm3884_vm6, %v10677_v53  ;;  %5678 = vadd.xlane.f32.xlu0 %v5677_v28  ;;  %v5689_v24 = vsel %vm3884_vm6, %v5645_v56, 0.0  ;;  %v10957_v56 = vpop.permute.xlu1 %5058 }
 0x4fb   :  { %4593 = vmatpush.msrb.mxu1 %v10907_v25 }
 0x4fc   :  { %7156 = vmatmul.msk.f32.vlgmr.msrb.gmra.mxu1 %vm3884_vm6, %v10653_v18  ;;  %v5648_v18 = vmul.f32 %v10821_v57, %v10744_v58  ;;  %v12424_v57 = vld [vmem:[#allocation88_spill] sm:$0xff] }
 0x4fd   :  { %7155 = vmatmul.msk.f32.gmra.mxu0 %vm3884_vm6, %v10677_v53 }
 0x4fe   :  { %v10929_v54 = vpop.f32.mrf.mxu3  ;;  %v5698_v45 = vsel %vm3884_vm6, %v5648_v18, 0.0 }
 0x4ff   :  { %5874 = vperm.xlu2 %7221, %v5869_v35   ;;  %v5918_v35 = vperm.slane %v10904_v10, 7 }
 0x500   :  { %v10954_v28 = vpop.permute.xlu0 %5068 }
 0x502   :  { %5690 = vadd.xlane.f32.xlu0 %v5689_v24 }
 0x504   :  { %7157 = vmatmul.msk.f32.gmra.mxu1 %vm3884_vm6, %v10677_v53  ;;  %v5643_v53 = vmul.f32 %v10803_v21, %v10647_v9  ;;  %v5707_v9 = vsel %vm3884_vm6, %v5651_v49, 0.0  ;;  %v5646_v21 = vmul.f32 %v7165_v61, %v10642_v50  ;;  %v5649_v61 = vmul.f32 %v10852_v31, %v10739_v40  ;;  %v4342_v40 = vpop.f32.mrf.mxu2 }
 0x506   :  { %v10947_v30 = vpop.f32.mrf.mxu3  ;;  %v5683_v60 = vsel %vm3884_vm6, %v5643_v53, 0.0  ;;  %v5692_v24 = vsel %vm3884_vm6, %v5646_v21, 0.0  ;;  %v10973_v53 = vpop.permute.xlu1 %5064 }
 0x507   :  { %5895 = vperm.xlu2 %7221, %v5890_v7   ;;  %v5279_v7 = vpop.permute.xlu2 %5278 }
 0x508   :  { %5672 = vadd.xlane.f32.xlu1 %v5671_v29 }
 0x50a   :  { %5699 = vadd.xlane.f32.xlu0 %v5698_v45 }
 0x50c   :  { %v4319_v58 = vpop.f32.mrf.mxu1 }
 0x50d   :  { %v4320_v5 = vadd.f32 %v4319_v58, %v12424_v57  ;;  %v5701_v58 = vsel %vm3884_vm6, %v5649_v61, 0.0 }
 0x50e   :  { %v10981_v31 = vpop.permute.xlu1 %5070 }
 0x50f   :  { %5909 = vperm.xlu2 %7221, %v5904_v51   ;;  %v10950_v48 = vadd.f32 %v5255_v32, %v4320_v5  ;;  %v10964_v32 = vld [vmem:[%s11871_s9 + $0x8] sm:$0xff]  ;;  %v10975_v51 = vpop.f32.mrf.mxu0  ;;  %v5652_v5 = vmul.f32 %v7168_v39, %v10707_v59  ;;  %v4345_v59 = vpop.f32.mrf.mxu2  ;;  %s7378_s9 = smov [#allocation2]  }
 0x510   :  { %5684 = vadd.xlane.f32.xlu1 %v5683_v60  ;;  %v5939_v45 = vperm.slane %v10964_v32, 2  ;;  %v5876_v60 = vperm.slane %v10904_v10, 1  ;;  %v4346_v4 = vadd.f32 %v4345_v59, %v10522_v0  ;;  %v5883_v59 = vperm.slane %v10904_v10, 2  ;;  %s6824_s18 = sshll.u32 %s7378_s9, 4  ;;  %s6825_s18 = int_to_ptr.vmem [resolvable:$true] %s6824_s18 }
 0x511   :  { %v5710_v21 = vsel %vm3884_vm6, %v5652_v5, 0.0 }
 0x512   :  { %5708 = vadd.xlane.f32.xlu0 %v5707_v9  ;;  %v5960_v9 = vperm.slane %v10964_v32, 5 }
 0x517   :  { %v4457_v55 = vpop.f32.mrf.mxu3  ;;  %5923 = vperm.xlu2 %7221, %v5918_v35   ;;  %v4322_v35 = vpop.f32.mrf.mxu1 }
 0x518   :  { %v4458_v18 = vadd.f32 %v4457_v55, %v12424_v57  ;;  %5693 = vadd.xlane.f32.xlu1 %v5692_v24  ;;  %v4299_v55 = vpop.f32.mrf.mxu0 }
 0x519   :  { %v4300_v17 = vadd.f32 %v4299_v55, %v10522_v0 }
 0x51a   :  { %v10966_v50 = vadd.f32 %v5279_v7, %v4458_v18  ;;  %v10970_v29 = vpop.permute.xlu0 %5250  ;;  %v5925_v7 = vperm.slane %v10964_v32, 0 }
 0x51b   :  { %v4434_v5 = vpop.f32.mrf.mxu2 }
 0x51f   :  { %5944 = vperm.xlu2 %7221, %v5939_v45  }
 0x520   :  { %5702 = vadd.xlane.f32.xlu1 %v5701_v58  ;;  %v5946_v58 = vperm.slane %v10964_v32, 3 }
 0x522   :  { %v5257_v49 = vpop.permute.xlu0 %5256 }
 0x526   :  { %5881 = vperm.xlu0 %7222, %v5876_v60   ;;  %v4343_v60 = vadd.f32 %v4342_v40, %v12424_v57  ;;  %v5967_v40 = vperm.slane %v10964_v32, 6 }
 0x527   :  { %5965 = vperm.xlu2 %7221, %v5960_v9  }
 0x528   :  { %5711 = vadd.xlane.f32.xlu1 %v5710_v21  ;;  %v4323_v21 = vadd.f32 %v4322_v35, %v10522_v0 }
 0x52a   :  { %v10984_v24 = vpop.permute.xlu0 %5262  ;;  %v5445_v43 = vadd.f32 %v5257_v49, %v4323_v21 }
 0x52c   :  { %v4411_v39 = vpop.f32.mrf.mxu1  ;;  %v5490_v55 = vrot.slane %v5445_v43, 7 }
 0x52e   :  { %5930 = vperm.xlu0 %7222, %v5925_v7   ;;  %v4435_v7 = vadd.f32 %v4434_v5, %v12424_v57  ;;  %v5447_v5 = vadd.f32 %v10914_v22, %v4346_v4  ;;  %v4460_v4 = vpop.f32.mrf.mxu3 }
 0x530   :  { %v5253_v18 = vpop.permute.xlu1 %5252 }
 0x531   :  { %v10987_v61 = vpop.f32.mrf.mxu0  ;;  %v5443_v35 = vadd.f32 %v5253_v18, %v4300_v17 }
 0x532   :  { %v5269_v45 = vpop.permute.xlu0 %5268 }
 0x534   :  { %v4414_v25 = vpop.f32.mrf.mxu1 }
 0x536   :  { %5951 = vperm.xlu0 %7222, %v5946_v58  }
 0x538   :  { %v5259_v9 = vpop.permute.xlu1 %5258 }
 0x539   :  { %v10992_v42 = vadd.f32 %v5259_v9, %v4343_v60  ;;  %v4391_v16 = vpop.f32.mrf.mxu0  ;;  %v4415_v60 = vadd.f32 %v4414_v25, %v10522_v0  ;;  %v4369_v9 = vadd.f32 %v10947_v30, %v10522_v0  ;;  %v5493_v25 = vrot.slane %v5447_v5, 6 }
 0x53a   :  { %v10996_v12 = vpop.xlane.xlu2 %5675  ;;  %v5275_v62 = vpop.permute.xlu0 %5274  ;;  %v4392_v58 = vadd.f32 %v4391_v16, %v10522_v0  ;;  %v5551_v16 = vsel %vm5497_vm14, %v5490_v55, %v5443_v35 }
 0x53b   :  { %v11001_v37 = vadd.f32 %v5275_v62, %v4435_v7  ;;  %v5453_v62 = vadd.f32 %v10944_v1, %v4415_v60  ;;  %v5552_v30 = vsel %vm5500_vm15, %v5493_v25, %v5551_v16 }
 0x53c   :  { %v5451_v49 = vadd.f32 %v5269_v45, %v4392_v58  ;;  %v4412_v58 = vadd.f32 %v4411_v39, %v12424_v57 }
 0x53d   :  { %v5502_v45 = vrot.slane %v5453_v62, 3  ;;  %v4437_v62 = vpop.f32.mrf.mxu2 }
 0x53e   :  { %5972 = vperm.xlu0 %7222, %v5967_v40   ;;  %v5499_v43 = vrot.slane %v5451_v49, 4  ;;  %v5897_v40 = vperm.slane %v10904_v10, 4  ;;  %v5529_v49 = vsel %vm5494_vm5, %v5490_v55, %v5443_v35 }
 0x540   :  { %v5265_v21 = vpop.permute.xlu1 %5264 }
 0x541   :  { %v5449_v17 = vadd.f32 %v5265_v21, %v4369_v9  ;;  %5888 = vperm.xlu1 %7223, %v5883_v59   ;;  %v5492_v9 = vsel %vm5491_vm4, %v5490_v55, %v5443_v35  ;;  %v4438_v55 = vadd.f32 %v4437_v62, %v10522_v0 }
 0x542   :  { %v11010_v18 = vpop.xlane.xlu2 %5681  ;;  %v5495_v39 = vsel %vm5494_vm5, %v5493_v25, %v5492_v9 }
 0x543   :  { %v5496_v22 = vrot.slane %v5449_v17, 5 }
 0x545   :  { %v5553_v7 = vsel %vm5503_vm0, %v5496_v22, %v5552_v30  ;;  %v5530_v30 = vsel %vm5497_vm14, %v5493_v25, %v5529_v49 }
 0x546   :  { %v5554_v1 = vsel %vm5506_vm1, %v5499_v43, %v5553_v7  ;;  %v5281_v7 = vpop.permute.xlu0 %5280 }
 0x547   :  { %v5555_v60 = vsel %vm5509_vm2, %v5502_v45, %v5554_v1  ;;  %v5911_v1 = vperm.slane %v10904_v10, 6 }
 0x548   :  { %5569 = vst.msk [vmem:[#allocation2 + $0x1e] sm:$0xfc] %vm5568_vm3, %v5555_v60  ;;  %v5271_v59 = vpop.permute.xlu1 %5270  ;;  %v5531_v60 = vsel %vm5500_vm15, %v5496_v22, %v5530_v30 }
 0x549   :  { %v11018_v5 = vadd.f32 %v5271_v59, %v4412_v58  ;;  %5902 = vperm.xlu1 %7223, %v5897_v40   ;;  %v4461_v58 = vadd.f32 %v4460_v4, %v10522_v0  ;;  %v5498_v40 = vsel %vm5497_vm14, %v5496_v22, %v5495_v39  ;;  %v5532_v25 = vsel %vm5503_vm0, %v5499_v43, %v5531_v60 }
 0x54a   :  { %v11022_v21 = vpop.xlane.xlu2 %5687  ;;  %v5501_v9 = vsel %vm5500_vm15, %v5499_v43, %v5498_v40  ;;  %v5533_v22 = vsel %vm5506_vm1, %v5502_v45, %v5532_v25  ;;  %v5932_v43 = vperm.slane %v10964_v32, 1 }
 0x54b   :  { %v4549_v16 = vpop.f32.mrf.mxu3  ;;  %v5457_v59 = vadd.f32 %v5281_v7, %v4461_v58  ;;  %v4297_v58 = vadd.f32 %v10975_v51, %v12424_v57  ;;  %v4366_v51 = vadd.f32 %v10929_v54, %v12424_v57 }
 0x54c   :  { %v4550_v17 = vadd.f32 %v4549_v16, %v12424_v57 }
 0x54d   :  { %v11041_v39 = vrot.slane %v5457_v59, 1  ;;  %v5442_v60 = vadd.f32 %v10970_v29, %v4297_v58  ;;  %v5448_v29 = vadd.f32 %v10984_v24, %v4366_v51 }
 0x54e   :  { %v11032_v35 = vadd.f32 %v10981_v31, %v4550_v17  ;;  %v5504_v31 = vsel %vm5503_vm0, %v5502_v45, %v5501_v9  ;;  %v5953_v45 = vperm.slane %v10964_v32, 4 }
 0x550   :  { %v5277_v16 = vpop.permute.xlu1 %5276 }
 0x551   :  { %v5455_v49 = vadd.f32 %v5277_v16, %v4438_v55  ;;  %5916 = vperm.xlu1 %7223, %v5911_v1   ;;  %v11055_v1 = vpop.f32.mrf.mxu2  ;;  %v11066_v55 = vld [vmem:[%s11872_s10] sm:$0xff]  ;;  %s7379_s10 = smov 128  }
 0x552   :  { %v11037_v10 = vpop.xlane.xlu2 %5696 }
 0x553   :  { %v11039_v4 = vrot.slane %v5455_v49, 2  ;;  %v5974_v49 = vperm.slane %v10964_v32, 7  ;;  %v11080_v32 = vadd.s32 4294967288, %v10618_v23  ;;  %v4552_v58 = vpop.f32.mrf.mxu3 }
 0x555   :  { %v5507_v62 = vsel %vm5506_vm1, %v11039_v4, %v5504_v31  ;;  %v5534_v17 = vsel %vm5509_vm2, %v11039_v4, %v5533_v22  ;;  %v5801_v47 = vperm.slane %v10996_v12, %v11080_v32 }
 0x556   :  { %v5510_v30 = vsel %vm5509_vm2, %v11041_v39, %v5507_v62  ;;  %5547 = vst.msk [vmem:[#allocation2 + $0xf] sm:$0xfe] %vm5546_vm7, %v5534_v17 }
 0x557   :  { %5527 = vst.msk [vmem:[#allocation2] sm:$0xff] %vm3884_vm6, %v5510_v30 }
 0x559   :  { %5937 = vperm.xlu1 %7223, %v5932_v43   ;;  %v4529_v9 = vpop.f32.mrf.mxu2 }
 0x55a   :  { %v11053_v7 = vpop.xlane.xlu2 %5705 }
 0x55b   :  { %v11060_v40 = vpop.f32.mrf.mxu0 }
 0x561   :  { %5958 = vperm.xlu1 %7223, %v5953_v45   ;;  %v11070_v31 = vpop.f32.mrf.mxu1 }
 0x562   :  { %v5875_v59 = vpop.permute.xlu2 %5874 }
 0x563   :  { %v5981_v16 = vadd.f32 %v5875_v59, %v5442_v60  ;;  %v4483_v17 = vpop.f32.mrf.mxu0  ;;  %v5805_v59 = vperm.slane %v11010_v18, %v11080_v32 }
 0x565   :  { %v5998_v25 = vadd.f32 %v11066_v55, %v5981_v16 }
 0x566   :  { %v11082_v60 = vpop.f32.mrf.mxu2 }
 0x567   :  { %v6030_v22 = vmul.f32 0.2, %v5998_v25  ;;  %vm6014_vm8 = vcmp.gt.f32.partialorder %v5998_v25, 0.0 }
 0x569   :  { %5979 = vperm.xlu1 %7223, %v5974_v49   ;;  %v11075_v62 = vsel %vm6014_vm8, %v5998_v25, %v6030_v22  ;;  %v4506_v49 = vpop.f32.mrf.mxu1 }
 0x56a   :  { %v5896_v43 = vpop.permute.xlu2 %5895  ;;  %v6062_v30 = vsel %vm3884_vm6, %v11075_v62, -inf }
 0x56b   :  { %v5984_v45 = vadd.f32 %v5896_v43, %v5448_v29  ;;  %6063 = vmax.xlane.f32.xlu2 %v6062_v30  ;;  %v4507_v43 = vadd.f32 %v4506_v49, %v10522_v0 }
 0x56d   :  { %v6001_v54 = vadd.f32 %v11066_v55, %v5984_v45  ;;  %v5679_v24 = vpop.xlane.xlu0 %5678  ;;  %v4484_v45 = vadd.f32 %v4483_v17, %v10522_v0 }
 0x56e   :  { %v5804_v25 = vperm.slane %v5679_v24, %v10618_v23  ;;  %v5461_v24 = vadd.f32 %v10973_v53, %v4507_v43  ;;  %v4621_v14 = vpop.f32.mrf.mxu2 }
 0x56f   :  { %v6033_v16 = vmul.f32 0.2, %v6001_v54  ;;  %vm6017_vm10 = vcmp.gt.f32.partialorder %v6001_v54, 0.0  ;;  %v4622_v49 = vadd.f32 %v4621_v14, %v10522_v0 }
 0x570   :  { %v5806_v51 = vsel %vm5802_vm9, %v5805_v59, %v5804_v25  ;;  %v4530_v59 = vadd.f32 %v4529_v9, %v10522_v0  ;;  %v5511_v20 = vrot.slane %v5461_v24, 7 }
 0x571   :  { %v11091_v29 = vsel %vm6017_vm10, %v6001_v54, %v6033_v16  ;;  %v4553_v54 = vadd.f32 %v4552_v58, %v10522_v0  ;;  %v5459_v16 = vadd.f32 %v10814_v36, %v4484_v45  ;;  %v5556_v36 = vsel %vm5491_vm4, %v11041_v39, %v11039_v4 }
 0x572   :  { %v11089_v22 = vpop.f32.mrf.mxu0  ;;  %v6071_v30 = vsel %vm3884_vm6, %v11091_v29, -inf  ;;  %v5463_v53 = vadd.f32 %v10954_v28, %v4530_v59  ;;  %v5813_v58 = vperm.slane %v11037_v10, %v10618_v23  ;;  %v5471_v12 = vadd.f32 %v10378_v33, %v4622_v49 }
 0x573   :  { %6072 = vmax.xlane.f32.xlu2 %v6071_v30  ;;  %v5465_v14 = vadd.f32 %v10869_v46, %v4553_v54  ;;  %v5535_v43 = vsel %vm5491_vm4, %v5459_v16, %v11041_v39  ;;  %v5557_v24 = vsel %vm5494_vm5, %v5459_v16, %v5556_v36  ;;  %v5512_v4 = vsel %vm5491_vm4, %v5511_v20, %v5459_v16 }
 0x574   :  { %v5513_v54 = vrot.slane %v5463_v53, 6  ;;  %v5536_v39 = vsel %vm5494_vm5, %v5511_v20, %v5535_v43  ;;  %v5558_v36 = vsel %vm5497_vm14, %v5511_v20, %v5557_v24 }
 0x575   :  { %v11097_v18 = vpop.f32.mrf.mxu3  ;;  %v11099_v2 = vpop.xlane.xlu0 %5690 }
 0x576   :  { %v5514_v16 = vsel %vm5494_vm5, %v5513_v54, %v5512_v4  ;;  %v5537_v53 = vsel %vm5497_vm14, %v5513_v54, %v5536_v39  ;;  %v5559_v43 = vsel %vm5500_vm15, %v5513_v54, %v5558_v36 }
 0x579   :  { %v11105_v25 = vpop.f32.mrf.mxu1 }
 0x57a   :  { %v4575_v30 = vpop.f32.mrf.mxu0 }
 0x57b   :  { %v4576_v17 = vadd.f32 %v4575_v30, %v10522_v0  ;;  %v5673_v3 = vpop.xlane.xlu1 %5672 }
 0x57c   :  { %v5799_v9 = vperm.slane %v5673_v3, %v10618_v23 }
 0x57d   :  { %v4644_v45 = vpop.f32.mrf.mxu3  ;;  %v5700_v59 = vpop.xlane.xlu0 %5699  ;;  %v5467_v30 = vadd.f32 %v10730_v63, %v4576_v17  ;;  %v5515_v17 = vrot.slane %v5465_v14, 5 }
 0x57e   :  { %v5803_v28 = vsel %vm5802_vm9, %v5801_v47, %v5799_v9  ;;  %v4645_v3 = vadd.f32 %v4644_v45, %v10522_v0  ;;  %v5814_v46 = vperm.slane %v5700_v59, %v11080_v32  ;;  %v5521_v9 = vrot.slane %v5471_v12, 2 }
 0x57f   :  { %v5849_v10 = vsel %vm5491_vm4, %v5806_v51, %v5803_v28  ;;  %v5517_v45 = vrot.slane %v5467_v30, 4  ;;  %v5516_v28 = vsel %vm5497_vm14, %v5515_v17, %v5514_v16  ;;  %v5560_v14 = vsel %vm5503_vm0, %v5515_v17, %v5559_v43 }
 0x580   :  { %v5473_v33 = vadd.f32 %v10808_v8, %v4645_v3  ;;  %v5815_v47 = vsel %vm5802_vm9, %v5814_v46, %v5813_v58  ;;  %v5808_v8 = vperm.slane %v11022_v21, %v11080_v32 }
 0x581   :  { %v4598_v49 = vpop.f32.mrf.mxu1  ;;  %v5518_v21 = vsel %vm5500_vm15, %v5517_v45, %v5516_v28  ;;  %v5561_v30 = vsel %vm5506_vm1, %v5517_v45, %v5560_v14 }
 0x582   :  { %v5523_v63 = vrot.slane %v5473_v33, 1  ;;  %v4599_v51 = vadd.f32 %v4598_v49, %v10522_v0  ;;  %v5538_v0 = vsel %vm5500_vm15, %v5515_v17, %v5537_v53 }
 0x583   :  { %v5685_v20 = vpop.xlane.xlu1 %5684  ;;  %v5539_v4 = vsel %vm5503_vm0, %v5517_v45, %v5538_v0 }
 0x584   :  { %5550 = vst.msk [vmem:[#allocation2 + $0x1f] sm:$0x1] %vm5549_vm11, %v5523_v63  ;;  %v5563_v58 = vsel %vm5491_vm4, %v5523_v63, %v5521_v9  ;;  %v5469_v24 = vadd.f32 %v10639_v11, %v4599_v51  ;;  %v5807_v12 = vperm.slane %v5685_v20, %v10618_v23 }
 0x585   :  { %5572 = vst.msk [vmem:[#allocation2 + $0x2e] sm:$0x3] %vm5571_vm12, %v5563_v58  ;;  %v5709_v43 = vpop.xlane.xlu0 %5708 }
 0x586   :  { %v5519_v3 = vrot.slane %v5469_v24, 3  ;;  %v5809_v59 = vsel %vm5802_vm9, %v5808_v8, %v5807_v12  ;;  %v5819_v28 = vperm.slane %v5709_v43, %v10618_v23  ;;  %v4527_v43 = vadd.f32 %v11055_v1, %v12424_v57 }
 0x587   :  { %v5850_v11 = vsel %vm5494_vm5, %v5809_v59, %v5849_v10  ;;  %v5810_v10 = vperm.slane %v11099_v2, %v10618_v23 }
 0x588   :  { %v5520_v46 = vsel %vm5503_vm0, %v5519_v3, %v5518_v21  ;;  %v5540_v54 = vsel %vm5506_vm1, %v5519_v3, %v5539_v4  ;;  %v5562_v39 = vsel %vm5509_vm2, %v5519_v3, %v5561_v30 }
 0x589   :  { %v5522_v36 = vsel %vm5506_vm1, %v5521_v9, %v5520_v46  ;;  %v5541_v33 = vsel %vm5509_vm2, %v5521_v9, %v5540_v54  ;;  %5570 = vst.msk [vmem:[#allocation2 + $0x26] sm:$0xff] %vm3884_vm6, %v5562_v39  ;;  %v4389_v39 = vadd.f32 %v10987_v61, %v12424_v57 }
 0x58a   :  { %v5524_v49 = vsel %vm5509_vm2, %v5523_v63, %v5522_v36  ;;  %5548 = vst.msk [vmem:[#allocation2 + $0x17] sm:$0xff] %vm3884_vm6, %v5541_v33  ;;  %v5817_v63 = vperm.slane %v11053_v7, %v11080_v32  ;;  %v4481_v36 = vadd.f32 %v11060_v40, %v12424_v57 }
 0x58b   :  { %5528 = vst.msk [vmem:[#allocation2 + $0x8] sm:$0xff] %vm3884_vm6, %v5524_v49  ;;  %v5694_v16 = vpop.xlane.xlu1 %5693 }
 0x58c   :  { %v5811_v51 = vperm.slane %v5694_v16, %v11080_v32  ;;  %6832 = dma.vmem_to_hbm [thread:$0]  %s6825_s18, 768, %s6827_s17, [#allocation3], %s7379_s10, %s7379_s10, %s7373_s2  }
 0x58e   :  { %v5812_v17 = vsel %vm5802_vm9, %v5811_v51, %v5810_v10  ;;  %v5458_v10 = vadd.f32 %v10957_v56, %v4481_v36 }
 0x58f   :  { %v5851_v53 = vsel %vm5497_vm14, %v5812_v17, %v5850_v11 }
 0x590   :  { %v5852_v9 = vsel %vm5500_vm15, %v5815_v47, %v5851_v53 }
 0x593   :  { %v5703_v45 = vpop.xlane.xlu1 %5702 }
 0x594   :  { %v5816_v20 = vperm.slane %v5703_v45, %v10618_v23 }
 0x596   :  { %v5818_v8 = vsel %vm5802_vm9, %v5817_v63, %v5816_v20 }
 0x597   :  { %v5853_v58 = vsel %vm5503_vm0, %v5818_v8, %v5852_v9 }
 0x598   :  { %v5882_v2 = vpop.permute.xlu0 %5881 }
 0x599   :  { %v5982_v24 = vadd.f32 %v5882_v2, %v10950_v48  ;;  %v5910_v48 = vpop.permute.xlu2 %5909 }
 0x59a   :  { %v5986_v30 = vadd.f32 %v5910_v48, %v11018_v5  ;;  %v5450_v5 = vadd.f32 %v10927_v52, %v4389_v39  ;;  %v4619_v48 = vadd.f32 %v11082_v60, %v12424_v57 }
 0x59b   :  { %v5712_v12 = vpop.xlane.xlu1 %5711  ;;  %v5999_v0 = vadd.f32 %v11066_v55, %v5982_v24 }
 0x59c   :  { %v5820_v47 = vperm.slane %v5712_v12, %v11080_v32  ;;  %v6003_v49 = vadd.f32 %v11066_v55, %v5986_v30 }
 0x59d   :  { %v6031_v14 = vmul.f32 0.2, %v5999_v0  ;;  %vm6015_vm13 = vcmp.gt.f32.partialorder %v5999_v0, 0.0 }
 0x59e   :  { %v5821_v3 = vsel %vm5802_vm9, %v5820_v47, %v5819_v28  ;;  %v6035_v53 = vmul.f32 0.2, %v6003_v49  ;;  %vm6019_vm7 = vcmp.gt.f32.partialorder %v6003_v49, 0.0 }
 0x59f   :  { %v11177_v7 = vsel %vm5506_vm1, %v5821_v3, %v5853_v58  ;;  %v11179_v59 = vsel %vm6015_vm13, %v5999_v0, %v6031_v14  ;;  %v5462_v58 = vadd.f32 %v10831_v19, %v4527_v43  ;;  %v4596_v19 = vadd.f32 %v11105_v25, %v12424_v57 }
 0x5a0   :  { %v6065_v21 = vsel %vm3884_vm6, %v11179_v59, -inf  ;;  %v5931_v54 = vpop.permute.xlu0 %5930  ;;  %v11203_v8 = vsel %vm6019_vm7, %v6003_v49, %v6035_v53 }
 0x5a1   :  { %6066 = vmax.xlane.f32.xlu0 %v6065_v21  ;;  %v5924_v11 = vpop.permute.xlu2 %5923  ;;  %v5989_v40 = vadd.f32 %v5931_v54, %v5458_v10  ;;  %v6077_v28 = vsel %vm3884_vm6, %v11203_v8, -inf  ;;  %v4504_v21 = vadd.f32 %v11070_v31, %v12424_v57  ;;  %v5468_v25 = vadd.f32 %v10751_v44, %v4596_v19 }
 0x5a2   :  { %v5470_v31 = vadd.f32 %v10311_v6, %v4619_v48  ;;  %v4573_v6 = vadd.f32 %v11089_v22, %v12424_v57 }
 0x5a3   :  { %v5460_v60 = vadd.f32 %v10936_v34, %v4504_v21 }
 0x5a8   :  { %v5952_v63 = vpop.permute.xlu0 %5951 }
 0x5a9   :  { %v5945_v45 = vpop.permute.xlu2 %5944  ;;  %v5992_v14 = vadd.f32 %v5952_v63, %v11032_v35 }
 0x5aa   :  { %v5991_v12 = vadd.f32 %v5945_v45, %v5462_v58 }
 0x5ac   :  { %v6008_v30 = vadd.f32 %v11066_v55, %v5991_v12 }
 0x5ae   :  { %v6040_v49 = vmul.f32 0.2, %v6008_v30  ;;  %vm6024_vm13 = vcmp.gt.f32.partialorder %v6008_v30, 0.0 }
 0x5b0   :  { %v5973_v39 = vpop.permute.xlu0 %5972 }
 0x5b3   :  { %v5889_v4 = vpop.permute.xlu1 %5888 }
 0x5b4   :  { %v5983_v46 = vadd.f32 %v5889_v4, %v10992_v42  ;;  %v5988_v42 = vadd.f32 %v5924_v11, %v10966_v50  ;;  %v6006_v50 = vadd.f32 %v11066_v55, %v5989_v40  ;;  %v6009_v11 = vadd.f32 %v11066_v55, %v5992_v14  ;;  %v7330_v14 = vld [vmem:[%s11869_s7] sm:$0xff] }
 0x5b5   :  { %v11242_v40 = vsel %vm6024_vm13, %v6008_v30, %v6040_v49  ;;  %vm5598_vm13 = vcmp.eq.s32.totalorder %v10618_v23, 8 }
 0x5b6   :  { %v6000_v33 = vadd.f32 %v11066_v55, %v5983_v46  ;;  %v6005_v52 = vadd.f32 %v11066_v55, %v5988_v42  ;;  %v6038_v47 = vmul.f32 0.2, %v6006_v50  ;;  %vm6022_vm11 = vcmp.gt.f32.partialorder %v6006_v50, 0.0 }
 0x5b7   :  { %v6041_v44 = vmul.f32 0.2, %v6009_v11 }
 0x5b8   :  { %v6032_v16 = vmul.f32 0.2, %v6000_v33  ;;  %vm6016_vm3 = vcmp.gt.f32.partialorder %v6000_v33, 0.0  ;;  %v6037_v24 = vmul.f32 0.2, %v6005_v52  ;;  %vm6021_vm10 = vcmp.gt.f32.partialorder %v6005_v52, 0.0 }
 0x5b9   :  { %v11225_v54 = vsel %vm6022_vm11, %v6006_v50, %v6038_v47  ;;  %v6092_v50 = vsel %vm3884_vm6, %v11242_v40, -inf }
 0x5ba   :  { %v11193_v51 = vsel %vm6016_vm3, %v6000_v33, %v6032_v16  ;;  %v11222_v35 = vsel %vm6021_vm10, %v6005_v52, %v6037_v24  ;;  %vm6025_vm3 = vcmp.gt.f32.partialorder %v6009_v11, 0.0 }
 0x5bb   :  { %v5903_v17 = vpop.permute.xlu1 %5902  ;;  %v6068_v61 = vsel %vm3884_vm6, %v11193_v51, -inf  ;;  %v6083_v36 = vsel %vm3884_vm6, %v11222_v35, -inf  ;;  %v11245_v45 = vsel %vm6025_vm3, %v6009_v11, %v6041_v44  ;;  %vm5599_vm3 = vcmp.eq.s32.totalorder %v10618_v23, 9 }
 0x5bc   :  { %v5985_v9 = vadd.f32 %v5903_v17, %v5450_v5  ;;  %6069 = vmax.xlane.f32.xlu1 %v6068_v61  ;;  %v6086_v5 = vsel %vm3884_vm6, %v11225_v54, -inf  ;;  %v5995_v17 = vadd.f32 %v5973_v39, %v5470_v31  ;;  %v6095_v22 = vsel %vm3884_vm6, %v11245_v45, -inf }
 0x5be   :  { %v6002_v56 = vadd.f32 %v11066_v55, %v5985_v9  ;;  %v6012_v9 = vadd.f32 %v11066_v55, %v5995_v17 }
 0x5c0   :  { %v6034_v20 = vmul.f32 0.2, %v6002_v56  ;;  %vm6018_vm8 = vcmp.gt.f32.partialorder %v6002_v56, 0.0  ;;  %v6044_v24 = vmul.f32 0.2, %v6012_v9 }
 0x5c2   :  { %v11206_v2 = vsel %vm6018_vm8, %v6002_v56, %v6034_v20  ;;  %v5466_v56 = vadd.f32 %v10620_v15, %v4573_v6  ;;  %vm6028_vm8 = vcmp.gt.f32.partialorder %v6012_v9, 0.0  ;;  %v4642_v15 = vadd.f32 %v11097_v18, %v12424_v57 }
 0x5c3   :  { %v5917_v1 = vpop.permute.xlu1 %5916  ;;  %v6074_v0 = vsel %vm3884_vm6, %v11206_v2, -inf }
 0x5c4   :  { %v5987_v3 = vadd.f32 %v5917_v1, %v11001_v37  ;;  %6078 = vmax.xlane.f32.xlu1 %v6077_v28  ;;  %6075 = vmax.xlane.f32.xlu0 %v6074_v0  ;;  %v5966_v37 = vpop.permute.xlu2 %5965  ;;  %v11259_v0 = vsel %vm6028_vm8, %v6012_v9, %v6044_v24  ;;  %vm5601_vm8 = vcmp.eq.s32.totalorder %v10618_v23, 11 }
 0x5c5   :  { %v5994_v16 = vadd.f32 %v5966_v37, %v5468_v25  ;;  %v6104_v48 = vsel %vm3884_vm6, %v11259_v0, -inf }
 0x5c6   :  { %v6004_v4 = vadd.f32 %v11066_v55, %v5987_v3  ;;  %v5472_v3 = vadd.f32 %v7330_v14, %v4642_v15 }
 0x5c7   :  { %v6011_v53 = vadd.f32 %v11066_v55, %v5994_v16 }
 0x5c8   :  { %v6036_v46 = vmul.f32 0.2, %v6004_v4  ;;  %vm6020_vm12 = vcmp.gt.f32.partialorder %v6004_v4, 0.0 }
 0x5c9   :  { %v6043_v58 = vmul.f32 0.2, %v6011_v53  ;;  %vm6027_vm10 = vcmp.gt.f32.partialorder %v6011_v53, 0.0 }
 0x5ca   :  { %v11232_v33 = vsel %vm6020_vm12, %v6004_v4, %v6036_v46 }
 0x5cb   :  { %v5938_v10 = vpop.permute.xlu1 %5937  ;;  %v6080_v42 = vsel %vm3884_vm6, %v11232_v33, -inf  ;;  %v11261_v47 = vsel %vm6027_vm10, %v6011_v53, %v6043_v58  ;;  %vm5602_vm10 = vcmp.eq.s32.totalorder %v10618_v23, 12 }
 0x5cc   :  { %v5990_v61 = vadd.f32 %v5938_v10, %v5460_v60  ;;  %6087 = vmax.xlane.f32.xlu1 %v6086_v5  ;;  %6084 = vmax.xlane.f32.xlu0 %v6083_v36  ;;  %v6101_v57 = vsel %vm3884_vm6, %v11261_v47, -inf }
 0x5cd   :  { %6081 = vmax.xlane.f32.xlu2 %v6080_v42 }
 0x5ce   :  { %v6007_v34 = vadd.f32 %v11066_v55, %v5990_v61 }
 0x5d0   :  { %v6039_v43 = vmul.f32 0.2, %v6007_v34  ;;  %vm6023_vm7 = vcmp.gt.f32.partialorder %v6007_v34, 0.0 }
 0x5d2   :  { %v11248_v52 = vsel %vm6023_vm7, %v6007_v34, %v6039_v43  ;;  %vm5600_vm7 = vcmp.eq.s32.totalorder %v10618_v23, 10 }
 0x5d3   :  { %v5959_v63 = vpop.permute.xlu1 %5958  ;;  %v6089_v20 = vsel %vm3884_vm6, %v11248_v52, -inf }
 0x5d4   :  { %v5993_v12 = vadd.f32 %v5959_v63, %v5466_v56  ;;  %6096 = vmax.xlane.f32.xlu1 %v6095_v22  ;;  %6093 = vmax.xlane.f32.xlu0 %v6092_v50 }
 0x5d5   :  { %6090 = vmax.xlane.f32.xlu2 %v6089_v20 }
 0x5d6   :  { %v6010_v1 = vadd.f32 %v11066_v55, %v5993_v12 }
 0x5d8   :  { %v6042_v28 = vmul.f32 0.2, %v6010_v1  ;;  %vm6026_vm11 = vcmp.gt.f32.partialorder %v6010_v1, 0.0 }
 0x5da   :  { %v11266_v19 = vsel %vm6026_vm11, %v6010_v1, %v6042_v28  ;;  %vm5605_vm11 = vcmp.eq.s32.totalorder %v10618_v23, 15 }
 0x5db   :  { %v5980_v21 = vpop.permute.xlu1 %5979  ;;  %v6098_v18 = vsel %vm3884_vm6, %v11266_v19, -inf }
 0x5dc   :  { %v5996_v4 = vadd.f32 %v5980_v21, %v5472_v3  ;;  %6105 = vmax.xlane.f32.xlu1 %v6104_v48  ;;  %6102 = vmax.xlane.f32.xlu0 %v6101_v57 }
 0x5dd   :  { %6099 = vmax.xlane.f32.xlu2 %v6098_v18 }
 0x5de   :  { %v6013_v30 = vadd.f32 %v11066_v55, %v5996_v4  ;;  %v6064_v37 = vpop.xlane.xlu2 %6063 }
 0x5df   :  { %v6110_v11 = vsub.f32 %v11075_v62, %v6064_v37 }
 0x5e0   :  { %v6045_v46 = vmul.f32 0.2, %v6013_v30  ;;  %vm6029_vm12 = vcmp.gt.f32.partialorder %v6013_v30, 0.0 }
 0x5e1   :  { %v6126_v25 = vmul.f32 1.442695, %v6110_v11 }
 0x5e2   :  { %v11276_v39 = vsel %vm6029_vm12, %v6013_v30, %v6045_v46  ;;  %vm5606_vm12 = vcmp.eq.s32.totalorder %v10618_v23, 16 }
 0x5e3   :  { %7259 = vpow2.f32 %v6126_v25  ;;  %v6107_v31 = vsel %vm3884_vm6, %v11276_v39, -inf }
 0x5e5   :  { %6108 = vmax.xlane.f32.xlu2 %v6107_v31 }
 0x5e6   :  { %v6073_v60 = vpop.xlane.xlu2 %6072 }
 0x5e7   :  { %v6113_v36 = vsub.f32 %v11091_v29, %v6073_v60 }
 0x5e9   :  { %v11281_v49 = vpop.eup %7259  ;;  %v6132_v16 = vmul.f32 1.442695, %v6113_v36  ;;  %v6239_v36 = vld [vmem:[%s11870_s8 + $0x8] sm:$0xff] }
 0x5ea   :  { %v6158_v55 = vsel %vm3884_vm6, %v11281_v49, 0.0  ;;  %6302 = vmatpush.msra.mxu0 %v6239_v36 }
 0x5eb   :  { %6159 = vadd.xlane.f32.xlu0 %v6158_v55  ;;  %7261 = vpow2.f32 %v6132_v16 }
 0x5f1   :  { %v11285_v62 = vpop.eup %7261 }
 0x5f2   :  { %v6167_v10 = vsel %vm3884_vm6, %v11285_v62, 0.0 }
 0x5f3   :  { %6168 = vadd.xlane.f32.xlu0 %v6167_v10 }
 0x614   :  { %v6067_v5 = vpop.xlane.xlu0 %6066 }
 0x615   :  { %v6111_v42 = vsub.f32 %v11179_v59, %v6067_v5 }
 0x617   :  { %v6128_v44 = vmul.f32 1.442695, %v6111_v42  ;;  %v6238_v42 = vld [vmem:[%s11870_s8] sm:$0xff]  ;;  %s7368_s8 = smov 116  }
 0x618   :  { %6303 = vmatpush.msra.mxu0 %v6238_v42 }
 0x619   :  { %7263 = vpow2.f32 %v6128_v44 }
 0x61f   :  { %v11290_v29 = vpop.eup %7263 }
 0x620   :  { %v6161_v17 = vsel %vm3884_vm6, %v11290_v29, 0.0 }
 0x621   :  { %6162 = vadd.xlane.f32.xlu1 %v6161_v17 }
 0x62f   :  { %v6070_v61 = vpop.xlane.xlu1 %6069 }
 0x630   :  { %v6112_v6 = vsub.f32 %v11193_v51, %v6070_v61 }
 0x632   :  { %v6130_v34 = vmul.f32 1.442695, %v6112_v6 }
 0x634   :  { %7265 = vpow2.f32 %v6130_v34 }
 0x637   :  { %v6076_v53 = vpop.xlane.xlu0 %6075  ;;  %v6079_v9 = vpop.xlane.xlu1 %6078 }
 0x638   :  { %v6114_v43 = vsub.f32 %v11206_v2, %v6076_v53  ;;  %v6115_v56 = vsub.f32 %v11203_v8, %v6079_v9 }
 0x63a   :  { %v11297_v59 = vpop.eup %7265  ;;  %v6134_v63 = vmul.f32 1.442695, %v6114_v43  ;;  %v6136_v22 = vmul.f32 1.442695, %v6115_v56 }
 0x63b   :  { %v6164_v50 = vsel %vm3884_vm6, %v11297_v59, 0.0 }
 0x63c   :  { %7267 = vpow2.f32 %v6134_v63  ;;  %6165 = vadd.xlane.f32.xlu2 %v6164_v50 }
 0x63d   :  { %7269 = vpow2.f32 %v6136_v22 }
 0x63f   :  { %v6085_v20 = vpop.xlane.xlu0 %6084  ;;  %v6088_v51 = vpop.xlane.xlu1 %6087 }
 0x640   :  { %v6117_v58 = vsub.f32 %v11222_v35, %v6085_v20  ;;  %v6082_v24 = vpop.xlane.xlu2 %6081  ;;  %v6118_v12 = vsub.f32 %v11225_v54, %v6088_v51 }
 0x641   :  { %v6116_v2 = vsub.f32 %v11232_v33, %v6082_v24 }
 0x642   :  { %v11304_v8 = vpop.eup %7267  ;;  %v6140_v15 = vmul.f32 1.442695, %v6117_v58  ;;  %v6142_v1 = vmul.f32 1.442695, %v6118_v12  ;;  %v7224_v12 = vpack.i.bf16 %v6238_v42, %v6239_v36 }
 0x643   :  { %v11306_v28 = vpop.eup %7269  ;;  %v6138_v14 = vmul.f32 1.442695, %v6116_v2  ;;  %v6170_v3 = vsel %vm3884_vm6, %v11304_v8, 0.0  ;;  %v12425_v2 = vmov 0.0  }
 0x644   :  { %7271 = vpow2.f32 %v6140_v15  ;;  %6171 = vadd.xlane.f32.xlu1 %v6170_v3  ;;  %v6173_v35 = vsel %vm3884_vm6, %v11306_v28, 0.0  ;;  %v7169_v15 = vsel %vm5598_vm13, 1.0, %v12425_v2  ;;  %vm5603_vm13 = vcmp.eq.s32.totalorder %v10618_v23, 13 }
 0x645   :  { %7273 = vpow2.f32 %v6138_v14  ;;  %6174 = vadd.xlane.f32.xlu2 %v6173_v35  ;;  %v5653_v14 = vmul.f32 %v7169_v15, %v10703_v13  ;;  %v7170_v35 = vsel %vm5599_vm3, 1.0, %v12425_v2  ;;  %v7173_v36 = vsel %vm5602_vm10, 1.0, %v12425_v2 }
 0x646   :  { %7275 = vpow2.f32 %v6142_v1  ;;  %v5654_v1 = vmul.f32 %v7169_v15, %v10698_v38  ;;  %vm5604_vm3 = vcmp.eq.s32.totalorder %v10618_v23, 14  ;;  %v7174_v42 = vsel %vm5603_vm13, 1.0, %v12425_v2 }
 0x647   :  { %v6094_v54 = vpop.xlane.xlu0 %6093  ;;  %v6097_v33 = vpop.xlane.xlu1 %6096  ;;  %v5713_v38 = vsel %vm3884_vm6, %v5653_v14, 0.0 }
 0x648   :  { %v6120_v21 = vsub.f32 %v11242_v40, %v6094_v54  ;;  %v6091_v48 = vpop.xlane.xlu2 %6090  ;;  %v6121_v57 = vsub.f32 %v11245_v45, %v6097_v33  ;;  %v5716_v3 = vsel %vm3884_vm6, %v5654_v1, 0.0  ;;  %v7171_v54 = vsel %vm5600_vm7, 1.0, %v12425_v2  ;;  %v12433_v1 = vld [vmem:[#allocation79_spill] sm:$0xff] }
 0x649   :  { %v6119_v18 = vsub.f32 %v11248_v52, %v6091_v48  ;;  %v5657_v48 = vmul.f32 %v7171_v54, %v10855_v41  ;;  %vm6311_vm7 = vcmask 31744  }
 0x64a   :  { %v11315_v4 = vpop.eup %7271  ;;  %v6146_v30 = vmul.f32 1.442695, %v6120_v21  ;;  %v6148_v37 = vmul.f32 1.442695, %v6121_v57  ;;  %v5655_v21 = vmul.f32 %v7170_v35, %v10828_v27  ;;  %v5656_v57 = vmul.f32 %v7170_v35, %v10824_v26  ;;  %v12426_v27 = vld [vmem:[#allocation5_spill] sm:$0xff] }
 0x64b   :  { %v11317_v11 = vpop.eup %7273  ;;  %v6144_v46 = vmul.f32 1.442695, %v6119_v18  ;;  %v6179_v25 = vsel %vm3884_vm6, %v11315_v4, 0.0  ;;  %v5725_v13 = vsel %vm3884_vm6, %v5657_v48, 0.0  ;;  %v12437_v48 = vld [vmem:[#allocation52_spill] sm:$0xff] }
 0x64c   :  { %v11321_v31 = vpop.eup %7275  ;;  %7277 = vpow2.f32 %v6146_v30  ;;  %6180 = vadd.xlane.f32.xlu1 %v6179_v25  ;;  %v6176_v40 = vsel %vm3884_vm6, %v11317_v11, 0.0  ;;  %v5719_v18 = vsel %vm3884_vm6, %v5655_v21, 0.0  ;;  %v12427_v25 = vld [vmem:[#allocation31_spill] sm:$0xff] }
 0x64d   :  { %7279 = vpow2.f32 %v6144_v46  ;;  %6177 = vadd.xlane.f32.xlu0 %v6176_v40  ;;  %v6182_v45 = vsel %vm3884_vm6, %v11321_v31, 0.0  ;;  %v7172_v46 = vsel %vm5601_vm8, 1.0, %v12425_v2  ;;  %v5658_v40 = vmul.f32 %v7171_v54, %v12427_v25  ;;  %v12435_v54 = vld [vmem:[#allocation85_spill] sm:$0xff] }
 0x64e   :  { %7281 = vpow2.f32 %v6148_v37  ;;  %6183 = vadd.xlane.f32.xlu2 %v6182_v45  ;;  %v5660_v41 = vmul.f32 %v7172_v46, %v12426_v27  ;;  %v5722_v45 = vsel %vm3884_vm6, %v5656_v57, 0.0 }
 0x64f   :  { %v6103_v52 = vpop.xlane.xlu0 %6102  ;;  %v6106_v60 = vpop.xlane.xlu1 %6105 }
 0x650   :  { %v6123_v16 = vsub.f32 %v11261_v47, %v6103_v52  ;;  %v6100_v55 = vpop.xlane.xlu2 %6099  ;;  %v6124_v10 = vsub.f32 %v11259_v0, %v6106_v60  ;;  %v12428_v52 = vld [vmem:[#allocation66_spill] sm:$0xff] }
 0x651   :  { %v6122_v5 = vsub.f32 %v11266_v19, %v6100_v55  ;;  %v5659_v60 = vmul.f32 %v7172_v46, %v12428_v52  ;;  %v5734_v55 = vsel %vm3884_vm6, %v5660_v41, 0.0 }
 0x652   :  { %v11336_v44 = vpop.eup %7277  ;;  %v6152_v17 = vmul.f32 1.442695, %v6123_v16  ;;  %v6154_v61 = vmul.f32 1.442695, %v6124_v10  ;;  %v7176_v16 = vsel %vm5605_vm11, 1.0, %v12425_v2  ;;  %v5728_v10 = vsel %vm3884_vm6, %v5658_v40, 0.0 }
 0x653   :  { %v11338_v6 = vpop.eup %7279  ;;  %v6150_v34 = vmul.f32 1.442695, %v6122_v5  ;;  %v6188_v47 = vsel %vm3884_vm6, %v11336_v44, 0.0  ;;  %v7177_v5 = vsel %vm5606_vm12, 1.0, %v12425_v2 }
 0x654   :  { %v11342_v53 = vpop.eup %7281  ;;  %7283 = vpow2.f32 %v6152_v17  ;;  %6189 = vadd.xlane.f32.xlu1 %v6188_v47  ;;  %v6185_v0 = vsel %vm3884_vm6, %v11338_v6, 0.0  ;;  %v5669_v14 = vmul.f32 %v7177_v5, %v12433_v1 }
 0x655   :  { %7285 = vpow2.f32 %v6150_v34  ;;  %6186 = vadd.xlane.f32.xlu0 %v6185_v0  ;;  %v6191_v19 = vsel %vm3884_vm6, %v11342_v53, 0.0  ;;  %v7175_v34 = vsel %vm5604_vm3, 1.0, %v12425_v2  ;;  %v5731_v0 = vsel %vm3884_vm6, %v5659_v60, 0.0 }
 0x656   :  { %7287 = vpow2.f32 %v6154_v61  ;;  %6192 = vadd.xlane.f32.xlu2 %v6191_v19  ;;  %v5670_v2 = vmul.f32 %v7177_v5, %v12435_v54 }
 0x658   :  { %v6109_v9 = vpop.xlane.xlu2 %6108 }
 0x659   :  { %v6125_v43 = vsub.f32 %v11276_v39, %v6109_v9  ;;  %v12429_v9 = vld [vmem:[#allocation80_spill] sm:$0xff] }
 0x65a   :  { %v11349_v56 = vpop.eup %7283 }
 0x65b   :  { %v11351_v63 = vpop.eup %7285  ;;  %v6156_v22 = vmul.f32 1.442695, %v6125_v43  ;;  %v6197_v50 = vsel %vm3884_vm6, %v11349_v56, 0.0  ;;  %v5661_v43 = vmul.f32 %v7173_v36, %v12429_v9 }
 0x65c   :  { %v11355_v20 = vpop.eup %7287  ;;  %6198 = vadd.xlane.f32.xlu1 %v6197_v50  ;;  %v6194_v51 = vsel %vm3884_vm6, %v11351_v63, 0.0 }
 0x65d   :  { %7289 = vpow2.f32 %v6156_v22  ;;  %6195 = vadd.xlane.f32.xlu0 %v6194_v51  ;;  %v6200_v58 = vsel %vm3884_vm6, %v11355_v20, 0.0  ;;  %v12430_v22 = vld [vmem:[#allocation53_spill] sm:$0xff]  ;;  %v12431_v51 = vld [vmem:[#allocation42_spill] sm:$0xff]  ;;  %v5737_v27 = vsel %vm3884_vm6, %v5661_v43, 0.0 }
 0x65e   :  { %6201 = vadd.xlane.f32.xlu2 %v6200_v58  ;;  %v6160_v33 = vpop.xlane.xlu0 %6159  ;;  %v5662_v50 = vmul.f32 %v7173_v36, %v12430_v22  ;;  %v5667_v58 = vmul.f32 %v7176_v16, %v12431_v51 }
 0x660   :  { %v5740_v41 = vsel %vm3884_vm6, %v5662_v50, 0.0  ;;  %v11424_v25 = vsel %vm3884_vm6, %v5667_v58, 0.0 }
 0x663   :  { %v11361_v39 = vpop.eup %7289 }
 0x664   :  { %v6203_v24 = vsel %vm3884_vm6, %v11361_v39, 0.0 }
 0x665   :  { %6204 = vadd.xlane.f32.xlu0 %v6203_v24  ;;  %v12432_v24 = vld [vmem:[#allocation12_spill] sm:$0xff] }
 0x666   :  { %v6169_v26 = vpop.xlane.xlu0 %6168 }
 0x675   :  { %7225 = vrot.lane.b32.xlu1 %v7224_v12, %s7367_s14 }
 0x676   :  { %7230 = vrot.lane.b32.xlu2 %v7224_v12, %s7368_s8 }
 0x679   :  { %7235 = vrot.lane.b32.xlu0 %v7224_v12, %s7360_s15 }
 0x67d   :  { %7240 = vrot.lane.b32.xlu1 %v7224_v12, %s7369_s4 }
 0x67e   :  { %7250 = vrot.lane.b32.xlu2 %v7224_v12, %s7370_s6 }
 0x681   :  { %7245 = vrot.lane.b32.xlu0 %v7224_v12, %s7371_s22 }
 0x685   :  { %7255 = vrot.lane.b32.xlu1 %v7224_v12, %s7364_s20  ;;  %v5668_v12 = vmul.f32 %v7176_v16, %v12432_v24 }
 0x694   :  { %v6163_v30 = vpop.xlane.xlu1 %6162 }
 0x695   :  { %7291 = vrcp.f32 %v6163_v30 }
 0x69b   :  { %v7292_v61 = vpop.eup %7291 }
 0x69c   :  { %v11412_v57 = vmul.f32 %v7292_v61, %v11290_v29 }
 0x69e   :  { %v6256_v16 = vrot.slane %v11412_v57, 7  ;;  %v6461_v1 = vrot.slane %v11412_v57, 2 }
 0x6a7   :  { %5717 = vadd.xlane.f32.xlu2 %v5716_v3  ;;  %v12434_v3 = vld [vmem:[#allocation70_spill] sm:$0xff] }
 0x6a8   :  { %v5663_v35 = vmul.f32 %v7174_v42, %v12434_v3 }
 0x6aa   :  { %v5743_v29 = vsel %vm3884_vm6, %v5663_v35, 0.0 }
 0x6ab   :  { %5714 = vadd.xlane.f32.xlu0 %v5713_v38  ;;  %v5664_v38 = vmul.f32 %v7174_v42, %v12437_v48 }
 0x6ad   :  { %v5746_v60 = vsel %vm3884_vm6, %v5664_v38, 0.0 }
 0x6af   :  { %5726 = vadd.xlane.f32.xlu2 %v5725_v13  ;;  %5720 = vadd.xlane.f32.xlu1 %v5719_v18  ;;  %v6166_v37 = vpop.xlane.xlu2 %6165  ;;  %v12438_v18 = vld [vmem:[#allocation77_spill] sm:$0xff] }
 0x6b0   :  { %7293 = vrcp.f32 %v6166_v37  ;;  %v5666_v30 = vmul.f32 %v7175_v34, %v12438_v18 }
 0x6b1   :  { %7295 = vrcp.f32 %v6160_v33  ;;  %v12436_v33 = vld [vmem:[#allocation26_spill] sm:$0xff] }
 0x6b2   :  { %7297 = vrcp.f32 %v6169_v26  ;;  %v5665_v21 = vmul.f32 %v7175_v34, %v12436_v33  ;;  %v11431_v26 = vsel %vm3884_vm6, %v5669_v14, 0.0  ;;  %v5752_v42 = vsel %vm3884_vm6, %v5666_v30, 0.0 }
 0x6b3   :  { %5723 = vadd.xlane.f32.xlu0 %v5722_v45  ;;  %v11428_v45 = vsel %vm3884_vm6, %v5668_v12, 0.0  ;;  %v6389_v33 = vrot.slane %v11412_v57, 1 }
 0x6b4   :  { %v5749_v36 = vsel %vm3884_vm6, %v5665_v21, 0.0  ;;  %v6749_v21 = vrot.slane %v11412_v57, 6 }
 0x6b6   :  { %v7294_v19 = vpop.eup %7293 }
 0x6b7   :  { %5735 = vadd.xlane.f32.xlu2 %v5734_v55  ;;  %5729 = vadd.xlane.f32.xlu1 %v5728_v10  ;;  %v6172_v17 = vpop.xlane.xlu1 %6171  ;;  %v7296_v15 = vpop.eup %7295  ;;  %v11416_v37 = vmul.f32 %v7294_v19, %v11297_v59  ;;  %v11434_v59 = vsel %vm3884_vm6, %v5670_v2, 0.0  ;;  %v6533_v2 = vrot.slane %v11412_v57, 3 }
 0x6b8   :  { %v6175_v47 = vpop.xlane.xlu2 %6174  ;;  %7299 = vrcp.f32 %v6172_v17  ;;  %v7298_v13 = vpop.eup %7297  ;;  %v11419_v46 = vmul.f32 %v7296_v15, %v11281_v49 }
 0x6b9   :  { %7301 = vrcp.f32 %v6175_v47  ;;  %v11437_v49 = vmul.f32 %v7298_v13, %v11285_v62  ;;  %v6258_v62 = vrot.slane %v11416_v37, 6  ;;  %v6463_v54 = vrot.slane %v11416_v37, 1 }
 0x6ba   :  { %v6460_v61 = vrot.slane %v11419_v46, 3  ;;  %v6532_v34 = vrot.slane %v11419_v46, 4  ;;  %v6388_v47 = vrot.slane %v11419_v46, 2  ;;  %v6748_v19 = vrot.slane %v11419_v46, 7 }
 0x6bb   :  { %5732 = vadd.xlane.f32.xlu0 %v5731_v0  ;;  %v6314_v0 = vrot.slane %v11419_v46, 1  ;;  %v6604_v9 = vrot.slane %v11419_v46, 5  ;;  %v6257_v22 = vsel %vm5491_vm4, %v6256_v16, %v11419_v46  ;;  %v6260_v50 = vrot.slane %v11437_v49, 5 }
 0x6bc   :  { %v6537_v51 = vrot.slane %v11437_v49, 1  ;;  %v6259_v58 = vsel %vm5494_vm5, %v6258_v62, %v6257_v22  ;;  %v6392_v12 = vrot.slane %v11437_v49, 7  ;;  %v6318_v15 = vrot.slane %v11437_v49, 6 }
 0x6bd   :  { %v6681_v14 = vrot.slane %v11437_v49, 3  ;;  %v6609_v3 = vrot.slane %v11437_v49, 2  ;;  %v6261_v18 = vsel %vm5497_vm14, %v6260_v50, %v6259_v58  ;;  %v6534_v62 = vsel %vm5491_vm4, %v6533_v2, %v6532_v34 }
 0x6be   :  { %v7300_v40 = vpop.eup %7299  ;;  %v6751_v22 = vrot.slane %v11416_v37, 5  ;;  %v6750_v34 = vsel %vm5491_vm4, %v6749_v21, %v6748_v19 }
 0x6bf   :  { %5744 = vadd.xlane.f32.xlu2 %v5743_v29  ;;  %5738 = vadd.xlane.f32.xlu1 %v5737_v27  ;;  %v6181_v52 = vpop.xlane.xlu1 %6180  ;;  %v7302_v55 = vpop.eup %7301  ;;  %v11443_v10 = vmul.f32 %v7300_v40, %v11304_v8  ;;  %v6676_v8 = vrot.slane %v11419_v46, 6  ;;  %v6535_v40 = vrot.slane %v11416_v37, 2 }
 0x6c0   :  { %v6178_v5 = vpop.xlane.xlu0 %6177  ;;  %7303 = vrcp.f32 %v6181_v52  ;;  %v11455_v43 = vmul.f32 %v7302_v55, %v11306_v28  ;;  %v6753_v28 = vrot.slane %v11437_v49, 4  ;;  %v6677_v52 = vrot.slane %v11412_v57, 5 }
 0x6c1   :  { %7305 = vrcp.f32 %v6178_v5  ;;  %v6184_v17 = vpop.xlane.xlu2 %6183  ;;  %v6262_v24 = vrot.slane %v11443_v10, 4  ;;  %v6462_v55 = vsel %vm5491_vm4, %v6461_v1, %v6460_v61  ;;  %v6316_v5 = vrot.slane %v11416_v37, 7 }
 0x6c2   :  { %7307 = vrcp.f32 %v6184_v17  ;;  %v6264_v30 = vrot.slane %v11455_v43, 3  ;;  %v6464_v58 = vsel %vm5494_vm5, %v6463_v54, %v6462_v55  ;;  %v6536_v61 = vsel %vm5494_vm5, %v6535_v40, %v6534_v62 }
 0x6c3   :  { %5741 = vadd.xlane.f32.xlu0 %v5740_v41  ;;  %v6263_v41 = vsel %vm5500_vm15, %v6262_v24, %v6261_v18  ;;  %v6679_v1 = vrot.slane %v11416_v37, 4  ;;  %v6538_v19 = vsel %vm5497_vm14, %v6537_v51, %v6536_v61 }
 0x6c6   :  { %v7304_v35 = vpop.eup %7303 }
 0x6c7   :  { %v7306_v48 = vpop.eup %7305  ;;  %v11474_v38 = vmul.f32 %v7304_v35, %v11315_v4  ;;  %5753 = vadd.xlane.f32.xlu2 %v5752_v42  ;;  %5747 = vadd.xlane.f32.xlu1 %v5746_v60  ;;  %v6190_v13 = vpop.xlane.xlu1 %6189  ;;  %v6605_v60 = vrot.slane %v11412_v57, 4  ;;  %v6265_v42 = vsel %vm5503_vm0, %v6264_v30, %v6263_v41  ;;  %v6468_v41 = vrot.slane %v11455_v43, 6 }
 0x6c8   :  { %v11479_v46 = vmul.f32 %v7306_v48, %v11317_v11  ;;  %v6187_v27 = vpop.xlane.xlu0 %6186  ;;  %7309 = vrcp.f32 %v6190_v13  ;;  %v6390_v11 = vsel %vm5491_vm4, %v6389_v33, %v6388_v47  ;;  %v7308_v47 = vpop.eup %7307  ;;  %v6678_v33 = vsel %vm5491_vm4, %v6677_v52, %v6676_v8 }
 0x6c9   :  { %7311 = vrcp.f32 %v6187_v27  ;;  %v6193_v29 = vpop.xlane.xlu2 %6192  ;;  %v6268_v4 = vrot.slane %v11474_v38, 1  ;;  %v6391_v17 = vsel %vm5494_vm5, %v11416_v37, %v6390_v11  ;;  %v6606_v54 = vsel %vm5491_vm4, %v6605_v60, %v6604_v9 }
 0x6ca   :  { %v6266_v16 = vrot.slane %v11479_v46, 2  ;;  %7313 = vrcp.f32 %v6193_v29  ;;  %v6607_v48 = vrot.slane %v11416_v37, 3  ;;  %v6393_v21 = vsel %vm5497_vm14, %v6392_v12, %v6391_v17 }
 0x6cb   :  { %5750 = vadd.xlane.f32.xlu0 %v5749_v36  ;;  %v6315_v36 = vsel %vm5491_vm4, %v11412_v57, %v6314_v0  ;;  %v6465_v57 = vsel %vm5497_vm14, %v11437_v49, %v6464_v58  ;;  %v6466_v0 = vrot.slane %v11443_v10, 7  ;;  %v11515_v30 = vmul.f32 %v7308_v47, %v11321_v31 }
 0x6cc   :  { %v6267_v50 = vsel %vm5506_vm1, %v6266_v16, %v6265_v42  ;;  %v6317_v2 = vsel %vm5494_vm5, %v6316_v5, %v6315_v36  ;;  %v6680_v12 = vsel %vm5494_vm5, %v6679_v1, %v6678_v33  ;;  %v6608_v29 = vsel %vm5494_vm5, %v6607_v48, %v6606_v54 }
 0x6cd   :  { %v6269_v24 = vsel %vm5509_vm2, %v6268_v4, %v6267_v50  ;;  %v6319_v51 = vsel %vm5497_vm14, %v6318_v15, %v6317_v2  ;;  %v6540_v4 = vrot.slane %v11455_v43, 7  ;;  %v6394_v52 = vrot.slane %v11443_v10, 6 }
 0x6ce   :  { %v7310_v35 = vpop.eup %7309  ;;  %7178 = vmatmul.msk.f32.vlgmr.msra.gmra.mxu0 %vm3884_vm6, %v6269_v24  ;;  %v6474_v60 = vrot.slane %v11515_v30, 3  ;;  %v6539_v16 = vsel %vm5500_vm15, %v11443_v10, %v6538_v19  ;;  %v6470_v50 = vrot.slane %v11479_v46, 5  ;;  %v6472_v36 = vrot.slane %v11474_v38, 4 }
 0x6cf   :  { %v7312_v13 = vpop.eup %7311  ;;  %5756 = vadd.xlane.f32.xlu1 %v11424_v25  ;;  %v6199_v18 = vpop.xlane.xlu1 %6198  ;;  %v6752_v25 = vsel %vm5494_vm5, %v6751_v22, %v6750_v34  ;;  %v11522_v9 = vmul.f32 %v7310_v35, %v11336_v44  ;;  %v6467_v44 = vsel %vm5500_vm15, %v6466_v0, %v6465_v57  ;;  %v11566_v58 = vsel %vm5503_vm0, %v6540_v4, %v6539_v16 }
 0x6d0   :  { %v11518_v8 = vmul.f32 %v7312_v13, %v11338_v6  ;;  %v6196_v37 = vpop.xlane.xlu0 %6195  ;;  %7315 = vrcp.f32 %v6199_v18  ;;  %v7314_v31 = vpop.eup %7313  ;;  %v11539_v15 = vsel %vm5497_vm14, %v6753_v28, %v6752_v25  ;;  %v11557_v28 = vsel %vm5497_vm14, %v6609_v3, %v6608_v29 }
 0x6d1   :  { %7317 = vrcp.f32 %v6196_v37  ;;  %v6202_v27 = vpop.xlane.xlu2 %6201  ;;  %v11550_v55 = vmul.f32 %v7314_v31, %v11342_v53  ;;  %v6272_v11 = vrot.slane %v11522_v9, 6  ;;  %v6477_v5 = vrot.slane %v11522_v9, 1 }
 0x6d2   :  { %v6270_v6 = vrot.slane %v11518_v8, 7  ;;  %v6475_v40 = vrot.slane %v11518_v8, 2  ;;  %7319 = vrcp.f32 %v6202_v27  ;;  %v6469_v62 = vsel %vm5503_vm0, %v6468_v41, %v6467_v44 }
 0x6d3   :  { %5759 = vadd.xlane.f32.xlu0 %v11428_v45  ;;  %v11547_v45 = vsel %vm5497_vm14, %v6681_v14, %v6680_v12  ;;  %v6396_v53 = vrot.slane %v11455_v43, 5  ;;  %v6395_v49 = vsel %vm5500_vm15, %v6394_v52, %v6393_v21  ;;  %v6320_v3 = vrot.slane %v11443_v10, 5 }
 0x6d4   :  { %v6271_v17 = vsel %vm5491_vm4, %v6270_v6, %v11515_v30  ;;  %v6476_v14 = vsel %vm5491_vm4, %v6475_v40, %v6474_v60  ;;  %v6322_v34 = vrot.slane %v11455_v43, 4  ;;  %v6274_v2 = vrot.slane %v11550_v55, 5 }
 0x6d5   :  { %v6273_v35 = vsel %vm5494_vm5, %v6272_v11, %v6271_v17  ;;  %v6478_v33 = vsel %vm5494_vm5, %v6477_v5, %v6476_v14  ;;  %v6471_v18 = vsel %vm5506_vm1, %v6470_v50, %v6469_v62  ;;  %v6321_v57 = vsel %vm5500_vm15, %v6320_v3, %v6319_v51 }
 0x6d6   :  { %v7316_v42 = vpop.eup %7315  ;;  %v6755_v0 = vrot.slane %v11443_v10, 3  ;;  %v6757_v19 = vrot.slane %v11455_v43, 2  ;;  %v6275_v21 = vsel %vm5497_vm14, %v6274_v2, %v6273_v35  ;;  %v6479_v25 = vsel %vm5497_vm14, %v11550_v55, %v6478_v33 }
 0x6d7   :  { %v7318_v22 = vpop.eup %7317  ;;  %v11574_v47 = vmul.f32 %v7316_v42, %v11349_v56  ;;  %v6397_v31 = vsel %vm5503_vm0, %v6396_v53, %v6395_v49  ;;  %v6473_v41 = vsel %vm5509_vm2, %v6472_v36, %v6471_v18  ;;  %v6323_v6 = vsel %vm5503_vm0, %v6322_v34, %v6321_v57 }
 0x6d8   :  { %v11571_v61 = vmul.f32 %v7318_v22, %v11351_v63  ;;  %v6205_v24 = vpop.xlane.xlu0 %6204  ;;  %v7320_v54 = vpop.eup %7319  ;;  %v6683_v40 = vrot.slane %v11443_v10, 2  ;;  %v6685_v29 = vrot.slane %v11455_v43, 1  ;;  %v6398_v4 = vrot.slane %v11479_v46, 4 }
 0x6d9   :  { %7321 = vrcp.f32 %v6205_v24  ;;  %v7231_v1 = vpop.permute.xlu2 %7230  ;;  %v6278_v37 = vrot.slane %v11574_v47, 3  ;;  %v6482_v27 = vrot.slane %v11574_v47, 6  ;;  %v6546_v52 = vrot.slane %v11515_v30, 4 }
 0x6da   :  { %v7233_v48 = vunpack.i.h.bf16 %v7231_v1  ;;  %v7232_v63 = vunpack.i.l.bf16 %v7231_v1  ;;  %v6276_v13 = vrot.slane %v11571_v61, 4  ;;  %v6480_v56 = vrot.slane %v11571_v61, 7 }
 0x6db   :  { %5762 = vadd.xlane.f32.xlu0 %v11431_v26  ;;  %v11594_v26 = vmul.f32 %v7320_v54, %v11355_v20  ;;  %v6542_v20 = vrot.slane %v11479_v46, 6  ;;  %v6547_v60 = vrot.slane %v11518_v8, 3  ;;  %v6403_v42 = vrot.slane %v11518_v8, 1 }
 0x6dc   :  { %6512 = vmatpush.msra.mxu3 %v7232_v63  ;;  %v6277_v12 = vsel %vm5500_vm15, %v6276_v13, %v6275_v21  ;;  %v6481_v51 = vsel %vm5500_vm15, %v6480_v56, %v6479_v25  ;;  %v6549_v53 = vrot.slane %v11522_v9, 2  ;;  %v6402_v22 = vrot.slane %v11515_v30, 2 }
 0x6dd   :  { %v6279_v11 = vsel %vm5503_vm0, %v6278_v37, %v6277_v12  ;;  %v6483_v5 = vsel %vm5503_vm0, %v6482_v27, %v6481_v51  ;;  %v6280_v62 = vrot.slane %v11594_v26, 2  ;;  %v6484_v17 = vrot.slane %v11594_v26, 5 }
 0x6de   :  { %6513 = vmatpush.msra.mxu3 %v7233_v48  ;;  %v6548_v34 = vsel %vm5491_vm4, %v6547_v60, %v6546_v52  ;;  %v6756_v1 = vsel %vm5500_vm15, %v6755_v0, %v11539_v15  ;;  %v6404_v33 = vsel %vm5491_vm4, %v6403_v42, %v6402_v22  ;;  %v6684_v54 = vsel %vm5500_vm15, %v6683_v40, %v11547_v45 }
 0x6df   :  { %v7322_v44 = vpop.eup %7321  ;;  %7184 = vmatmul.msk.f32.vlgmr.msra.gmra.mxu3 %vm3884_vm6, %v6473_v41  ;;  %v6281_v24 = vsel %vm5506_vm1, %v6280_v62, %v6279_v11  ;;  %v6485_v36 = vsel %vm5506_vm1, %v6484_v17, %v6483_v5  ;;  %v6544_v48 = vrot.slane %v11474_v38, 5  ;;  %v6400_v63 = vrot.slane %v11474_v38, 3 }
 0x6e0   :  { %v11609_v16 = vmul.f32 %v7322_v44, %v11361_v39  ;;  %v6324_v15 = vrot.slane %v11479_v46, 3  ;;  %v6399_v13 = vsel %vm5506_vm1, %v6398_v4, %v6397_v31  ;;  %v6326_v56 = vrot.slane %v11474_v38, 2 }
 0x6e1   :  { %v7251_v14 = vpop.permute.xlu2 %7250  ;;  %v6550_v18 = vsel %vm5494_vm5, %v6549_v53, %v6548_v34  ;;  %v6328_v45 = vrot.slane %v11515_v30, 1  ;;  %v6405_v0 = vsel %vm5494_vm5, %v11522_v9, %v6404_v33  ;;  %v6408_v21 = vrot.slane %v11571_v61, 6 }
 0x6e2   :  { %v6282_v50 = vrot.slane %v11609_v16, 1  ;;  %v6486_v39 = vrot.slane %v11609_v16, 4  ;;  %v7253_v49 = vunpack.i.h.bf16 %v7251_v14  ;;  %v7252_v3 = vunpack.i.l.bf16 %v7251_v14 }
 0x6e3   :  { %5765 = vadd.xlane.f32.xlu0 %v11434_v59  ;;  %v6543_v59 = vsel %vm5506_vm1, %v6542_v20, %v11566_v58  ;;  %v6551_v58 = vrot.slane %v11550_v55, 1  ;;  %v6330_v37 = vrot.slane %v11522_v9, 7  ;;  %v6406_v12 = vrot.slane %v11550_v55, 7 }
 0x6e4   :  { %v6283_v35 = vsel %vm5509_vm2, %v6282_v50, %v6281_v24  ;;  %v6487_v2 = vsel %vm5509_vm2, %v6486_v39, %v6485_v36  ;;  %6584 = vmatpush.msrb.mxu0 %v7252_v3  ;;  %v6329_v51 = vsel %vm5491_vm4, %v11518_v8, %v6328_v45  ;;  %v6325_v31 = vsel %vm5506_vm1, %v6324_v15, %v6323_v6 }
 0x6e5   :  { %7179 = vmatmul.msk.f32.gmra.mxu0 %vm3884_vm6, %v6283_v35  ;;  %v6552_v41 = vsel %vm5497_vm14, %v6551_v58, %v6550_v18  ;;  %v6554_v40 = vrot.slane %v11574_v47, 7  ;;  %v6759_v44 = vrot.slane %v11479_v46, 1  ;;  %v6407_v4 = vsel %vm5497_vm14, %v6406_v12, %v6405_v0 }
 0x6e6   :  { %6585 = vmatpush.msrb.mxu0 %v7253_v49  ;;  %v6553_v20 = vsel %vm5500_vm15, %v11571_v61, %v6552_v41  ;;  %v6410_v52 = vrot.slane %v11574_v47, 5  ;;  %v6332_v60 = vrot.slane %v11550_v55, 6  ;;  %v6409_v5 = vsel %vm5500_vm15, %v6408_v21, %v6407_v4 }
 0x6e7   :  { %7185 = vmatmul.msk.f32.gmra.mxu3 %vm3884_vm6, %v6487_v2  ;;  %v7226_v57 = vpop.permute.xlu1 %7225  ;;  %v6331_v6 = vsel %vm5494_vm5, %v6330_v37, %v6329_v51  ;;  %v6334_v42 = vrot.slane %v11571_v61, 5  ;;  %v6758_v62 = vsel %vm5503_vm0, %v6757_v19, %v6756_v1  ;;  %v6545_v14 = vsel %vm5509_vm2, %v6544_v48, %v6543_v59 }
 0x6e8   :  { %v7228_v25 = vunpack.i.h.bf16 %v7226_v57  ;;  %v7227_v27 = vunpack.i.l.bf16 %v7226_v57  ;;  %v6401_v53 = vsel %vm5509_vm2, %v6400_v63, %v6399_v13  ;;  %v6327_v22 = vsel %vm5509_vm2, %v6326_v56, %v6325_v31 }
 0x6e9   :  { %v6555_v50 = vsel %vm5503_vm0, %v6554_v40, %v6553_v20  ;;  %v6556_v39 = vrot.slane %v11594_v26, 6  ;;  %v6760_v49 = vsel %vm5506_vm1, %v6759_v44, %v6758_v62  ;;  %v6686_v19 = vsel %vm5503_vm0, %v6685_v29, %v6684_v54 }
 0x6ea   :  { %6440 = vmatpush.msra.mxu2 %v7227_v27  ;;  %v6411_v24 = vsel %vm5503_vm0, %v6410_v52, %v6409_v5  ;;  %v6333_v36 = vsel %vm5497_vm14, %v6332_v60, %v6331_v6  ;;  %v6763_v34 = vrot.slane %v11518_v8, 6  ;;  %v6558_v35 = vrot.slane %v11609_v16, 5 }
 0x6eb   :  { %v7236_v11 = vpop.permute.xlu0 %7235  ;;  %v6412_v2 = vrot.slane %v11594_v26, 4  ;;  %v6335_v33 = vsel %vm5500_vm15, %v6334_v42, %v6333_v36  ;;  %v6336_v59 = vrot.slane %v11574_v47, 4  ;;  %v6414_v54 = vrot.slane %v11609_v16, 3 }
 0x6ec   :  { %v7237_v17 = vunpack.i.l.bf16 %v7236_v11  ;;  %6441 = vmatpush.msra.mxu2 %v7228_v25  ;;  %v7238_v3 = vunpack.i.h.bf16 %v7236_v11  ;;  %v6762_v63 = vrot.slane %v11515_v30, 7  ;;  %v6557_v15 = vsel %vm5506_vm1, %v6556_v39, %v6555_v50 }
 0x6ed   :  { %7186 = vmatmul.msk.f32.vlgmr.msrb.gmra.mxu0 %vm3884_vm6, %v6545_v14  ;;  %7182 = vmatmul.msk.f32.vlgmr.msra.gmra.mxu2 %vm3884_vm6, %v6401_v53  ;;  %v6687_v13 = vsel %vm5506_vm1, %v11479_v46, %v6686_v19  ;;  %v6611_v56 = vrot.slane %v11443_v10, 1  ;;  %v6765_v18 = vrot.slane %v11522_v9, 5  ;;  %v6413_v45 = vsel %vm5506_vm1, %v6412_v2, %v6411_v24 }
 0x6ee   :  { %6368 = vmatpush.msra.mxu1 %v7237_v17  ;;  %v6338_v57 = vrot.slane %v11594_v26, 3  ;;  %v6764_v58 = vsel %vm5491_vm4, %v6763_v34, %v6762_v63  ;;  %v6691_v0 = vrot.slane %v11518_v8, 5  ;;  %v6559_v37 = vsel %vm5509_vm2, %v6558_v35, %v6557_v15 }
 0x6ef   :  { %v7241_v1 = vpop.permute.xlu1 %7240  ;;  %v6337_v25 = vsel %vm5503_vm0, %v6336_v59, %v6335_v33  ;;  %v6340_v27 = vrot.slane %v11609_v16, 2  ;;  %v6761_v10 = vsel %vm5509_vm2, %v11474_v38, %v6760_v49  ;;  %v6415_v31 = vsel %vm5509_vm2, %v6414_v54, %v6413_v45 }
 0x6f0   :  { %6369 = vmatpush.msra.mxu1 %v7238_v3  ;;  %v7243_v48 = vunpack.i.h.bf16 %v7241_v1  ;;  %v7242_v29 = vunpack.i.l.bf16 %v7241_v1  ;;  %v6690_v41 = vrot.slane %v11515_v30, 6  ;;  %v6688_v40 = vrot.slane %v11474_v38, 7 }
 0x6f1   :  { %7180 = vmatmul.msk.f32.vlgmr.msra.gmra.mxu1 %vm3884_vm6, %v6327_v22  ;;  %v6766_v44 = vsel %vm5494_vm5, %v6765_v18, %v6764_v58  ;;  %v6769_v20 = vrot.slane %v11571_v61, 3  ;;  %v6693_v4 = vrot.slane %v11522_v9, 4  ;;  %v6339_v52 = vsel %vm5506_vm1, %v6338_v57, %v6337_v25 }
 0x6f2   :  { %6728 = vmatpush.msrb.mxu2 %v7242_v29  ;;  %v6767_v60 = vrot.slane %v11550_v55, 4  ;;  %v6692_v11 = vsel %vm5491_vm4, %v6691_v0, %v6690_v41  ;;  %v6619_v5 = vrot.slane %v11518_v8, 4  ;;  %v6341_v6 = vsel %vm5509_vm2, %v6340_v27, %v6339_v52 }
 0x6f3   :  { %v7246_v21 = vpop.permute.xlu0 %7245  ;;  %v6612_v62 = vsel %vm5500_vm15, %v6611_v56, %v11557_v28  ;;  %v6614_v17 = vrot.slane %v11479_v46, 7  ;;  %v6771_v14 = vrot.slane %v11574_v47, 2  ;;  %v6618_v39 = vrot.slane %v11515_v30, 5 }
 0x6f4   :  { %v7248_v12 = vunpack.i.h.bf16 %v7246_v21  ;;  %v7247_v51 = vunpack.i.l.bf16 %v7246_v21  ;;  %6729 = vmatpush.msrb.mxu2 %v7243_v48  ;;  %v6768_v50 = vsel %vm5497_vm14, %v6767_v60, %v6766_v44  ;;  %v6694_v49 = vsel %vm5494_vm5, %v6693_v4, %v6692_v11 }
 0x6f5   :  { %7187 = vmatmul.msk.f32.gmra.mxu0 %vm3884_vm6, %v6559_v37  ;;  %7183 = vmatmul.msk.f32.gmra.mxu2 %vm3884_vm6, %v6415_v31  ;;  %v6770_v8 = vsel %vm5500_vm15, %v6769_v20, %v6768_v50  ;;  %v6697_v28 = vrot.slane %v11571_v61, 2  ;;  %v6621_v46 = vrot.slane %v11522_v9, 3  ;;  %v6695_v19 = vrot.slane %v11550_v55, 3 }
 0x6f6   :  { %6800 = vmatpush.msrb.mxu3 %v7247_v51  ;;  %v6620_v3 = vsel %vm5491_vm4, %v6619_v5, %v6618_v39  ;;  %v6689_v24 = vsel %vm5509_vm2, %v6688_v40, %v6687_v13  ;;  %v6613_v30 = vsel %vm5503_vm0, %v11455_v43, %v6612_v62  ;;  %v6616_v36 = vrot.slane %v11474_v38, 6 }
 0x6f7   :  { %v7256_v42 = vpop.permute.xlu1 %7255  ;;  %v6615_v34 = vsel %vm5506_vm1, %v6614_v17, %v6613_v30  ;;  %v6772_v1 = vsel %vm5503_vm0, %v6771_v14, %v6770_v8  ;;  %v6696_v35 = vsel %vm5497_vm14, %v6695_v19, %v6694_v49  ;;  %v6699_v9 = vrot.slane %v11574_v47, 1 }
 0x6f8   :  { %6801 = vmatpush.msrb.mxu3 %v7248_v12  ;;  %v7258_v53 = vunpack.i.h.bf16 %v7256_v42  ;;  %v7257_v22 = vunpack.i.l.bf16 %v7256_v42  ;;  %v6773_v2 = vrot.slane %v11594_v26, 1  ;;  %v6698_v33 = vsel %vm5500_vm15, %v6697_v28, %v6696_v35 }
 0x6f9   :  { %7181 = vmatmul.msk.f32.gmra.mxu1 %vm3884_vm6, %v6341_v6  ;;  %7192 = vmatmul.msk.f32.vlgmr.msrb.gmra.mxu3 %vm3884_vm6, %v6761_v10  ;;  %v6622_v59 = vsel %vm5494_vm5, %v6621_v46, %v6620_v3  ;;  %v6625_v43 = vrot.slane %v11571_v61, 1  ;;  %v6623_v38 = vrot.slane %v11550_v55, 2  ;;  %v6617_v48 = vsel %vm5509_vm2, %v6616_v36, %v6615_v34 }
 0x6fa   :  { %6656 = vmatpush.msrb.mxu1 %v7257_v22  ;;  %v6774_v29 = vsel %vm5506_vm1, %v6773_v2, %v6772_v1  ;;  %v6700_v63 = vsel %vm5503_vm0, %v6699_v9, %v6698_v33  ;;  %v6702_v15 = vrot.slane %v11609_v16, 7  ;;  %v6630_v45 = vrot.slane %v11609_v16, 6 }
 0x6fb   :  { %v6775_v54 = vsel %vm5509_vm2, %v11609_v16, %v6774_v29  ;;  %v6624_v13 = vsel %vm5497_vm14, %v6623_v38, %v6622_v59  ;;  %v6701_v55 = vsel %vm5506_vm1, %v11594_v26, %v6700_v63  ;;  %v6628_v57 = vrot.slane %v11594_v26, 7 }
 0x6fc   :  { %6657 = vmatpush.msrb.mxu1 %v7258_v53  ;;  %v6626_v61 = vsel %vm5500_vm15, %v6625_v43, %v6624_v13  ;;  %v6703_v56 = vsel %vm5509_vm2, %v6702_v15, %v6701_v55 }
 0x6fd   :  { %7190 = vmatmul.msk.f32.vlgmr.msrb.gmra.mxu2 %vm3884_vm6, %v6689_v24  ;;  %v6627_v18 = vsel %vm5503_vm0, %v11574_v47, %v6626_v61 }
 0x6fe   :  { %v6629_v58 = vsel %vm5506_vm1, %v6628_v57, %v6627_v18 }
 0x6ff   :  { %v6631_v0 = vsel %vm5509_vm2, %v6630_v45, %v6629_v58 }
 0x701   :  { %7188 = vmatmul.msk.f32.vlgmr.msrb.gmra.mxu1 %vm3884_vm6, %v6617_v48  ;;  %7193 = vmatmul.msk.f32.gmra.mxu3 %vm3884_vm6, %v6775_v54 }
 0x705   :  { %7191 = vmatmul.msk.f32.gmra.mxu2 %vm3884_vm6, %v6703_v56 }
 0x709   :  { %7189 = vmatmul.msk.f32.gmra.mxu1 %vm3884_vm6, %v6631_v0 }
 0x71a   :  { %v5718_v21 = vpop.xlane.xlu2 %5717 }
 0x71b   :  { %v5823_v25 = vperm.slane %v5718_v21, %v11080_v32 }
 0x71e   :  { %v5715_v37 = vpop.xlane.xlu0 %5714 }
 0x71f   :  { %v5822_v27 = vperm.slane %v5715_v37, %v10618_v23 }
 0x721   :  { %v5824_v47 = vsel %vm5802_vm9, %v5823_v25, %v5822_v27 }
 0x722   :  { %v5855_v16 = vsel %vm5509_vm2, %v5824_v47, %v11177_v7  ;;  %v5721_v10 = vpop.xlane.xlu1 %5720  ;;  %v5727_v51 = vpop.xlane.xlu2 %5726 }
 0x723   :  { %5865 = vst.msk [vmem:[%s11874_s12] sm:$0xff] %vm3884_vm6, %v5855_v16  ;;  %v5828_v42 = vperm.slane %v5727_v51, %v10618_v23  ;;  %v5825_v50 = vperm.slane %v5721_v10, %v10618_v23 }
 0x726   :  { %v5724_v26 = vpop.xlane.xlu0 %5723 }
 0x727   :  { %v5826_v62 = vperm.slane %v5724_v26, %v11080_v32 }
 0x729   :  { %v5827_v24 = vsel %vm5802_vm9, %v5826_v62, %v5825_v50 }
 0x72a   :  { %v5730_v31 = vpop.xlane.xlu1 %5729  ;;  %v5736_v40 = vpop.xlane.xlu2 %5735 }
 0x72b   :  { %v5829_v7 = vperm.slane %v5730_v31, %v11080_v32  ;;  %v5832_v14 = vperm.slane %v5736_v40, %v11080_v32 }
 0x72d   :  { %v5830_v39 = vsel %vm5802_vm9, %v5829_v7, %v5828_v42 }
 0x72e   :  { %v5733_v12 = vpop.xlane.xlu0 %5732  ;;  %v5856_v34 = vsel %vm5491_vm4, %v5830_v39, %v5827_v24  ;;  %vm6817_vm4 = vcmask 261344  }
 0x72f   :  { %v5831_v5 = vperm.slane %v5733_v12, %v10618_v23 }
 0x731   :  { %v5833_v46 = vsel %vm5802_vm9, %v5832_v14, %v5831_v5 }
 0x732   :  { %v5739_v44 = vpop.xlane.xlu1 %5738  ;;  %v5745_v4 = vpop.xlane.xlu2 %5744  ;;  %v5857_v9 = vsel %vm5494_vm5, %v5833_v46, %v5856_v34 }
 0x733   :  { %v5834_v8 = vperm.slane %v5739_v44, %v10618_v23  ;;  %v5837_v19 = vperm.slane %v5745_v4, %v10618_v23 }
 0x736   :  { %v5742_v41 = vpop.xlane.xlu0 %5741 }
 0x737   :  { %v5835_v17 = vperm.slane %v5742_v41, %v11080_v32 }
 0x739   :  { %v5836_v30 = vsel %vm5802_vm9, %v5835_v17, %v5834_v8 }
 0x73a   :  { %v5748_v60 = vpop.xlane.xlu1 %5747  ;;  %v5754_v53 = vpop.xlane.xlu2 %5753  ;;  %v5858_v33 = vsel %vm5497_vm14, %v5836_v30, %v5857_v9  ;;  %vm6457_vm14 = vcmask 97344  }
 0x73b   :  { %v5838_v22 = vperm.slane %v5748_v60, %v11080_v32  ;;  %v5841_v36 = vperm.slane %v5754_v53, %v11080_v32 }
 0x73d   :  { %v5839_v1 = vsel %vm5802_vm9, %v5838_v22, %v5837_v19 }
 0x73e   :  { %v5751_v20 = vpop.xlane.xlu0 %5750  ;;  %v5859_v38 = vsel %vm5500_vm15, %v5839_v1, %v5858_v33  ;;  %vm6529_vm15 = vcmask 130144  }
 0x73f   :  { %v5840_v49 = vperm.slane %v5751_v20, %v10618_v23 }
 0x741   :  { %v5842_v2 = vsel %vm5802_vm9, %v5841_v36, %v5840_v49 }
 0x742   :  { %v5757_v28 = vpop.xlane.xlu1 %5756  ;;  %v5860_v54 = vsel %vm5503_vm0, %v5842_v2, %v5859_v38  ;;  %vm6601_vm0 = vcmask 162944  }
 0x743   :  { %v5843_v35 = vperm.slane %v5757_v28, %v10618_v23 }
 0x746   :  { %v5760_v52 = vpop.xlane.xlu0 %5759 }
 0x747   :  { %v5844_v3 = vperm.slane %v5760_v52, %v11080_v32 }
 0x749   :  { %v5845_v59 = vsel %vm5802_vm9, %v5844_v3, %v5843_v35 }
 0x74a   :  { %v5861_v63 = vsel %vm5506_vm1, %v5845_v59, %v5860_v54  ;;  %vm6673_vm1 = vcmask 195744  }
 0x74b   :  { %v6305_v11 = vpop.f32.mrf.mxu0 }
 0x74c   :  { %6312 = vst.msk [vmem:[%s11875_s13] sm:$0xff] %vm6311_vm7, %v6305_v11 }
 0x74e   :  { %v5763_v6 = vpop.xlane.xlu0 %5762 }
 0x74f   :  { %v5846_v48 = vperm.slane %v5763_v6, %v10618_v23 }
 0x756   :  { %v5766_v43 = vpop.xlane.xlu0 %5765 }
 0x757   :  { %v5847_v29 = vperm.slane %v5766_v43, %v11080_v32 }
 0x759   :  { %v5848_v15 = vsel %vm5802_vm9, %v5847_v29, %v5846_v48 }
 0x75a   :  { %v5862_v13 = vsel %vm5509_vm2, %v5848_v15, %v5861_v63  ;;  %vm6745_vm2 = vcmask 228544  }
 0x75b   :  { %5866 = vst.msk [vmem:[%s11874_s12 + $0x8] sm:$0xff] %vm3884_vm6, %v5862_v13  ;;  %s7374_s12 = smov 12   ;;  %vm6385_vm6 = vcmask 64544  }
 0x762   :  { %v6308_v61 = vpop.f32.mrf.mxu0  ;;  %v6515_v55 = vpop.f32.mrf.mxu3 }
 0x763   :  { %6313 = vst.msk [vmem:[%s11875_s13 + $0x8] sm:$0xff] %vm6311_vm7, %v6308_v61 }
 0x76a   :  { %v6587_v45 = vpop.f32.mrf.mxu0  ;;  %v6518_v58 = vpop.f32.mrf.mxu3 }
 0x76e   :  { %v6371_v23 = vpop.f32.mrf.mxu1 }
 0x76f   :  { %6379 = vrot.lane.b32.xlu2 %v6371_v23, %s7372_s5 }
 0x770   :  { %v6443_v32 = vpop.f32.mrf.mxu2 }
 0x771   :  { %6451 = vrot.lane.b32.xlu0 %v6443_v32, %s7373_s2 }
 0x772   :  { %v6590_v21 = vpop.f32.mrf.mxu0 }
 0x776   :  { %v6374_v56 = vpop.f32.mrf.mxu1 }
 0x777   :  { %6381 = vrot.lane.b32.xlu1 %v6374_v56, %s7372_s5 }
 0x778   :  { %v6446_v18 = vpop.f32.mrf.mxu2 }
 0x779   :  { %6453 = vrot.lane.b32.xlu2 %v6446_v18, %s7373_s2 }
 0x77c   :  { %v6803_v25 = vpop.f32.mrf.mxu3 }
 0x77e   :  { %v6659_v57 = vpop.f32.mrf.mxu1 }
 0x77f   :  { %6523 = vrot.lane.b32.xlu1 %v6515_v55, %s7374_s12  ;;  %6667 = vrot.lane.b32.xlu0 %v6659_v57, %s7375_s25 }
 0x780   :  { %v6731_v0 = vpop.f32.mrf.mxu2 }
 0x781   :  { %6525 = vrot.lane.b32.xlu2 %v6518_v58, %s7374_s12 }
 0x784   :  { %v6806_v47 = vpop.f32.mrf.mxu3 }
 0x786   :  { %v6662_v27 = vpop.f32.mrf.mxu1 }
 0x787   :  { %6595 = vrot.lane.b32.xlu1 %v6587_v45, %s7376_s26 }
 0x788   :  { %v6734_v37 = vpop.f32.mrf.mxu2 }
 0x789   :  { %6597 = vrot.lane.b32.xlu2 %v6590_v21, %s7376_s26  ;;  %6741 = vrot.lane.b32.xlu0 %v6734_v37, %s7377_s28 }
 0x78f   :  { %6669 = vrot.lane.b32.xlu1 %v6662_v27, %s7375_s25 }
 0x791   :  { %6739 = vrot.lane.b32.xlu2 %v6731_v0, %s7377_s28 }
 0x797   :  { %6811 = vrot.lane.b32.xlu1 %v6803_v25, %s7380_s27 }
 0x799   :  { %6813 = vrot.lane.b32.xlu2 %v6806_v47, %s7380_s27 }
 0x7c9   :  { %v6380_v16 = vpop.permute.xlu2 %6379 }
 0x7ca   :  { %6386 = vst.msk [vmem:[%s11875_s13] sm:$0xff] %vm6385_vm6, %v6380_v16 }
 0x7d3   :  { %v6454_v26 = vpop.permute.xlu2 %6453 }
 0x7db   :  { %v6526_v10 = vpop.permute.xlu2 %6525 }
 0x7e3   :  { %v6452_v12 = vpop.permute.xlu0 %6451  ;;  %v6598_v31 = vpop.permute.xlu2 %6597 }
 0x7e4   :  { %6458 = vst.msk [vmem:[%s11875_s13] sm:$0xff] %vm6457_vm14, %v6452_v12 }
 0x7e9   :  { %v6382_v51 = vpop.permute.xlu1 %6381 }
 0x7ea   :  { %6387 = vst.msk [vmem:[%s11875_s13 + $0x8] sm:$0xff] %vm6385_vm6, %v6382_v51 }
 0x7eb   :  { %6459 = vst.msk [vmem:[%s11875_s13 + $0x8] sm:$0xff] %vm6457_vm14, %v6454_v26  ;;  %v6740_v40 = vpop.permute.xlu2 %6739 }
 0x7ec   :  { %6531 = vst.msk [vmem:[%s11875_s13 + $0x8] sm:$0xff] %vm6529_vm15, %v6526_v10 }
 0x7ed   :  { %6603 = vst.msk [vmem:[%s11875_s13 + $0x8] sm:$0xff] %vm6601_vm0, %v6598_v31 }
 0x7f1   :  { %v6524_v41 = vpop.permute.xlu1 %6523  ;;  %v6668_v20 = vpop.permute.xlu0 %6667 }
 0x7f2   :  { %6530 = vst.msk [vmem:[%s11875_s13] sm:$0xff] %vm6529_vm15, %v6524_v41 }
 0x7f3   :  { %v6814_v60 = vpop.permute.xlu2 %6813 }
 0x7f9   :  { %v6596_v44 = vpop.permute.xlu1 %6595 }
 0x7fa   :  { %6602 = vst.msk [vmem:[%s11875_s13] sm:$0xff] %vm6601_vm0, %v6596_v44 }
 0x7fb   :  { %6674 = vst.msk [vmem:[%s11875_s13] sm:$0xff] %vm6673_vm1, %v6668_v20  ;;  %v6742_v52 = vpop.permute.xlu0 %6741 }
 0x7fc   :  { %6746 = vst.msk [vmem:[%s11875_s13] sm:$0xff] %vm6745_vm2, %v6740_v40 }
 0x801   :  { %v6670_v4 = vpop.permute.xlu1 %6669 }
 0x802   :  { %6675 = vst.msk [vmem:[%s11875_s13 + $0x8] sm:$0xff] %vm6673_vm1, %v6670_v4 }
 0x803   :  { %6747 = vst.msk [vmem:[%s11875_s13 + $0x8] sm:$0xff] %vm6745_vm2, %v6742_v52 }
 0x804   :  { %6819 = vst.msk [vmem:[%s11875_s13 + $0x8] sm:$0xff] %vm6817_vm4, %v6814_v60 }
 0x809   :  { %v6812_v11 = vpop.permute.xlu1 %6811 }
 0x80a   :  { %6818 = vst.msk [vmem:[%s11875_s13] sm:$0xff] %vm6817_vm4, %v6812_v11 }
 0x80b   :  { %7355 = dma.done.wait [#allocation3], 768  }
 0x80c   :  { %7356 = vsyncadd [#allocation3], 4294966528 }
 0x80d   :  { %6845 = vsyncpa [#allocation3], 1 }

</bundles_post_ra>
